<compile_context>
chip_gen: v7x
topology: tpu7x:2x2x1
jax: 0.10.0
libtpu: 0.0.40
codegen_flags: <defaults>
</compile_context>

<pallas_src>
import functools

import jax
import jax.numpy as jnp
from jax.experimental import pallas as pl
from jax.experimental.pallas import tpu as pltpu

# ----------------------------- scaled-down config -----------------------------
EMBED = 128       # stands in for 768 (shared embedding dim; lane-dense)
IMG_FEAT = 256    # stands in for 2048 (ResNet pooled feature dim)
TXT_PROJ = 128    # stands in for 1024 (CLIP text projection dim)
WIDTH = 128       # text transformer width (stands in for 512; lane-dense)
HEADS = 4
HEAD_DIM = WIDTH // HEADS
LAYERS = 2        # stands in for 12
VOCAB = 64
CTX = 8           # context length (stands in for 77)
EPS_LN = 1e-5
EPS_BN = 1e-5

STEM_OUT = 128    # stands in for 64, padded to a 128-lane multiple
STAGE_SPECS = [(STEM_OUT, 128, 256), (256, 128, 256),
               (256, 128, 256), (256, 128, IMG_FEAT)]


def _vmem_limit_bytes():
    # ~96 MiB on 128-MiB parts (v5e/v6e), 48 MiB on v7x (64 MiB physical VMEM).
    try:
        cap = pltpu.get_tpu_info().vmem_capacity_bytes
        return int(min(cap * 3 // 4, 96 * 1024 * 1024))
    except Exception:
        return 32 * 1024 * 1024


_VMEM_LIMIT = _vmem_limit_bytes()


# --------------------------------- helpers ------------------------------------
def _layernorm(x, g, b, eps):
    mu = jnp.mean(x, axis=-1, keepdims=True)
    xc = x - mu
    var = jnp.mean(xc * xc, axis=-1, keepdims=True)
    return xc * jax.lax.rsqrt(var + eps) * g + b


def _pick_tile(dim, candidates):
    # '>=': a dim of exactly 512 runs as one 512-row block (review fix).
    for c in candidates:
        if dim >= c and dim % c == 0:
            return c
    return dim


# ------------------------- tiled linear (trunk matmuls) -------------------------
def _linear_kernel(x_ref, w_ref, b_ref, o_ref, acc_ref, *, activation):
    @pl.when(pl.program_id(2) == 0)
    def _init():
        acc_ref[...] = jnp.zeros_like(acc_ref)

    acc_ref[...] += jnp.dot(x_ref[...], w_ref[...],
                            preferred_element_type=jnp.float32)

    @pl.when(pl.program_id(2) == pl.num_programs(2) - 1)
    def _epilogue():
        y = acc_ref[...] + b_ref[...]
        if activation == "relu":
            y = jnp.maximum(y, 0.0)
        elif activation == "quick_gelu":         # CLIP QuickGELU: x * sigmoid(1.702 x)
            y = y * jax.nn.sigmoid(1.702 * y)
        o_ref[...] = y.astype(o_ref.dtype)


def pallas_linear(x, w, b, activation=None, out_dtype=jnp.float32):
    """(M,N,K)-tiled matmul + bias (+ activation); bf16 operands, f32 VMEM accumulator."""
    M, K = x.shape
    N = w.shape[1]
    tm = _pick_tile(M, (512, 256, 128))
    tn = _pick_tile(N, (512, 256, 128))
    tk = _pick_tile(K, (1024, 512, 256))
    grid = (M // tm, N // tn, K // tk)
    # TODO(synk): at full scale add pipeline_mode=pl.Buffered(1) on grid-invariant
    #             weight/bias specs to avoid double-buffering large weights.
    return pl.pallas_call(
        functools.partial(_linear_kernel, activation=activation),
        out_shape=jax.ShapeDtypeStruct((M, N), out_dtype),
        grid=grid,
        in_specs=[
            pl.BlockSpec((tm, tk), lambda i, j, k: (i, k)),
            pl.BlockSpec((tk, tn), lambda i, j, k: (k, j)),
            pl.BlockSpec((1, tn), lambda i, j, k: (0, j)),
        ],
        out_specs=pl.BlockSpec((tm, tn), lambda i, j, k: (i, j)),
        scratch_shapes=[pltpu.VMEM((tm, tn), jnp.float32)],
        compiler_params=pltpu.CompilerParams(
            dimension_semantics=("parallel", "parallel", "arbitrary"),
            vmem_limit_bytes=_VMEM_LIMIT),
    )(x, w, b)


# --------------------- fused transformer residual block ------------------------
def _transformer_layer_kernel(x_ref, mask_ref, ln1g_ref, ln1b_ref, wqkv_ref, bqkv_ref,
                              wo_ref, bo_ref, ln2g_ref, ln2b_ref, wfc_ref, bfc_ref,
                              wpj_ref, bpj_ref, o_ref, *, heads, head_dim, width, eps):
    x = x_ref[...]                                            # [M, W] f32 residual stream
    mask = mask_ref[...]                                      # [M, M] block-diag causal (f32)
    # ---- LN1 + QKV (one MXU pass) ----
    h = _layernorm(x, ln1g_ref[...], ln1b_ref[...], eps)
    qkv = jnp.dot(h.astype(wqkv_ref.dtype), wqkv_ref[...],
                  preferred_element_type=jnp.float32) + bqkv_ref[...]       # [M, 3W]
    # ---- multi-head attention; heads split in-kernel by static lane slices ----
    # TODO(synk): [q|k|v] head-major column layout matches the synthetic weights,
    #             not a real PyTorch nn.MultiheadAttention checkpoint.
    scale = 1.0 / (head_dim ** 0.5)                           # folded into q (cheaper than S*S)
    head_outs = []
    for hh in range(heads):
        lo = hh * head_dim
        q = (qkv[:, lo:lo + head_dim] * scale).astype(jnp.bfloat16)
        k = qkv[:, width + lo:width + lo + head_dim].astype(jnp.bfloat16)
        v = qkv[:, 2 * width + lo:2 * width + lo + head_dim].astype(jnp.bfloat16)
        s = jax.lax.dot_general(q, k, (((1,), (1,)), ((), ())),
                                preferred_element_type=jnp.float32) + mask   # f32 scores
        s = s - jnp.max(s, axis=-1, keepdims=True)
        p = jnp.exp(s)
        # approx reciprocal (EUP): rows sum to ~1, not bit-exact vs torch softmax.
        p = p * pl.reciprocal(jnp.sum(p, axis=-1, keepdims=True), approx=True)
        head_outs.append(jnp.dot(p.astype(jnp.bfloat16), v,
                                 preferred_element_type=jnp.float32))
    attn = jnp.concatenate(head_outs, axis=-1)                # [M, W] head merge (in-kernel)
    # ---- out_proj + residual add ----
    x = x + jnp.dot(attn.astype(wo_ref.dtype), wo_ref[...],
                    preferred_element_type=jnp.float32) + bo_ref[...]
    # ---- LN2 + MLP (fc -> QuickGELU -> proj) + residual add ----
    h2 = _layernorm(x, ln2g_ref[...], ln2b_ref[...], eps)
    y = jnp.dot(h2.astype(wfc_ref.dtype), wfc_ref[...],
                preferred_element_type=jnp.float32) + bfc_ref[...]
    y = y * jax.nn.sigmoid(1.702 * y)
    x = x + jnp.dot(y.astype(wpj_ref.dtype), wpj_ref[...],
                    preferred_element_type=jnp.float32) + bpj_ref[...]
    o_ref[...] = x.astype(o_ref.dtype)


def pallas_transformer_layer(x2d, mask, p):
    M = x2d.shape[0]
    return pl.pallas_call(
        functools.partial(_transformer_layer_kernel, heads=HEADS, head_dim=HEAD_DIM,
                          width=WIDTH, eps=EPS_LN),
        out_shape=jax.ShapeDtypeStruct((M, WIDTH), jnp.float32),
    )(x2d, mask,
      p["ln1_g"], p["ln1_b"], p["in_proj_w"], p["in_proj_b"],
      p["out_proj_w"], p["out_proj_b"], p["ln2_g"], p["ln2_b"],
      p["fc_w"], p["fc_b"], p["proj_w"], p["proj_b"])


def _block_causal_mask(attn_mask, batch):
    """Block-diagonal causal additive mask over the flattened [B*S, B*S] scores.
    -1e9 (not -inf) is safe because scores stay f32 in-kernel."""
    S = attn_mask.shape[0]
    bid = jnp.repeat(jnp.arange(batch), S)
    same = bid[:, None] == bid[None, :]
    return jnp.where(same, jnp.tile(attn_mask, (batch, batch)), -1e9).astype(jnp.float32)


# ------------------------------ fused head kernels ------------------------------
def _text_head_kernel(x_ref, g_ref, b_ref, tp_ref, fw_ref, fb_ref, o_ref, *, eps):
    h = _layernorm(x_ref[...], g_ref[...], b_ref[...], eps)                 # ln_final
    t = jnp.dot(h.astype(tp_ref.dtype), tp_ref[...],
                preferred_element_type=jnp.float32)                         # @ text_projection
    t = jnp.dot(t.astype(fw_ref.dtype), fw_ref[...],
                preferred_element_type=jnp.float32) + fb_ref[...]           # text_fc
    o_ref[...] = t.astype(o_ref.dtype)


def _clip_head_kernel(img_ref, txt_ref, scale_ref, o_ref):
    img = img_ref[...]
    txt = txt_ref[...]
    # No epsilon: matches PyTorch `x / x.norm(dim=1)` semantics (inf/NaN on zero vectors).
    img_n = img * jax.lax.rsqrt(jnp.sum(img * img, axis=1, keepdims=True))
    txt_n = txt * jax.lax.rsqrt(jnp.sum(txt * txt, axis=1, keepdims=True))
    logits = jax.lax.dot_general(img_n, txt_n, (((1,), (1,)), ((), ())),
                                 preferred_element_type=jnp.float32)
    o_ref[...] = (scale_ref[0, 0] * logits).astype(o_ref.dtype)             # scalar from SMEM


def pallas_clip_head(img_feat, txt_feat, logit_scale):
    Bi, Bt = img_feat.shape[0], txt_feat.shape[0]
    # logit_scale.exp() is a true scalar op -> hoisted; value fed via SMEM (no VMEM tile pad).
    scale = jnp.exp(logit_scale).reshape(1, 1).astype(jnp.float32)
    return pl.pallas_call(
        _clip_head_kernel,
        out_shape=jax.ShapeDtypeStruct((Bi, Bt), jnp.float32),
        in_specs=[pl.BlockSpec(memory_space=pltpu.MemorySpace.VMEM),
                  pl.BlockSpec(memory_space=pltpu.MemorySpace.VMEM),
                  pl.BlockSpec(memory_space=pltpu.MemorySpace.SMEM)],
        out_specs=pl.BlockSpec(memory_space=pltpu.MemorySpace.VMEM),
    )(img_feat, txt_feat, scale)


# ---------------------------- bottleneck tail kernels ----------------------------
def _bneck_tail_kernel(x_ref, w3_ref, b3_ref, s_ref, wd_ref, bd_ref, o_ref):
    # final 1x1 conv (+folded BN) fused with 1x1 downsample-shortcut conv,
    # residual add and ReLU.
    y = jnp.dot(x_ref[...], w3_ref[...], preferred_element_type=jnp.float32) + b3_ref[...]
    y = y + jnp.dot(s_ref[...], wd_ref[...], preferred_element_type=jnp.float32) + bd_ref[...]
    o_ref[...] = jnp.maximum(y, 0.0).astype(o_ref.dtype)


def _bneck_tail_pool_fc_kernel(x_ref, w3_ref, b3_ref, s_ref, wd_ref, bd_ref,
                               fcw_ref, fcb_ref, o_ref, *, batch, hw):
    # last-stage variant: additionally fuses global average pool (in-kernel mean,
    # no dense pooling matmul) + visual.fc.
    y = jnp.dot(x_ref[...], w3_ref[...], preferred_element_type=jnp.float32) + b3_ref[...]
    y = y + jnp.dot(s_ref[...], wd_ref[...], preferred_element_type=jnp.float32) + bd_ref[...]
    y = jnp.maximum(y, 0.0)
    if hw == 1:
        pooled = y
    else:
        pooled = jnp.mean(y.reshape(batch, hw, y.shape[-1]), axis=1)
    o = jnp.dot(pooled.astype(fcw_ref.dtype), fcw_ref[...],
                preferred_element_type=jnp.float32) + fcb_ref[...]          # Linear(2048->768)
    o_ref[...] = o.astype(o_ref.dtype)


# ------------------------------- image trunk glue -------------------------------
def im2col(x, kh, kw, stride, pad):
    # TODO(synk): at full scale form patches in-kernel from NHWC halo tiles
    #             (this XLA materialization is kh*kw x the input volume).
    B, H, W, C = x.shape
    xp = jnp.pad(x, ((0, 0), (pad, pad), (pad, pad), (0, 0)))
    Ho = (H + 2 * pad - kh) // stride + 1
    Wo = (W + 2 * pad - kw) // stride + 1
    cols = []
    for i in range(kh):
        for j in range(kw):
            cols.append(xp[:, i:i + stride * (Ho - 1) + 1:stride,
                              j:j + stride * (Wo - 1) + 1:stride, :])
    patches = jnp.concatenate(cols, axis=-1)            # [B, Ho, Wo, kh*kw*C]
    return patches.reshape(B * Ho * Wo, kh * kw * C), Ho, Wo


def conv1x1(x, wf, bf, activation=None):
    B, H, W, C = x.shape                                # 1x1 conv = plain matmul
    y = pallas_linear(x.reshape(B * H * W, C), wf, bf, activation=activation,
                      out_dtype=jnp.bfloat16)
    return y.reshape(B, H, W, -1)


def conv3x3(x, wf, bf, stride, activation=None):
    patches, Ho, Wo = im2col(x, 3, 3, stride, 1)
    y = pallas_linear(patches, wf, bf, activation=activation, out_dtype=jnp.bfloat16)
    return y.reshape(x.shape[0], Ho, Wo, -1)


def maxpool3x3s2p1(x):
    # TODO(synk): fuse into the stem-conv epilogue at full scale.
    B, H, W, C = x.shape
    xp = jnp.pad(x, ((0, 0), (1, 1), (1, 1), (0, 0)), constant_values=-jnp.inf)
    Ho = (H + 2 - 3) // 2 + 1
    Wo = (W + 2 - 3) // 2 + 1
    out = None
    for i in range(3):
        for j in range(3):
            s = xp[:, i:i + 2 * (Ho - 1) + 1:2, j:j + 2 * (Wo - 1) + 1:2, :]
            out = s if out is None else jnp.maximum(out, s)
    return out


def bottleneck(x, p, stride, pool_fc=None):
    """conv1x1-conv3x3-conv1x1 (+folded BN) with fused downsample shortcut."""
    B = x.shape[0]
    out = conv1x1(x, p["w1"], p["b1"], activation="relu")                   # 1x1
    out = conv3x3(out, p["w2"], p["b2"], stride=stride, activation="relu")  # 3x3 (stride)
    _, Ho, Wo, C = out.shape
    main = out.reshape(B * Ho * Wo, C)
    xs = x[:, ::stride, ::stride, :] if stride > 1 else x                   # shortcut input
    sc = xs.reshape(B * Ho * Wo, xs.shape[-1])
    cout = p["w3"].shape[1]
    # TODO(synk): at full scale grid these tail kernels over rows with
    #             dimension_semantics=("parallel",) so both v7x TCs are used.
    if pool_fc is None:
        y = pl.pallas_call(
            _bneck_tail_kernel,
            out_shape=jax.ShapeDtypeStruct((B * Ho * Wo, cout), jnp.bfloat16),
        )(main, p["w3"], p["b3"], sc, p["wd"], p["bd"])
        return y.reshape(B, Ho, Wo, cout)
    fc_w, fc_b = pool_fc
    return pl.pallas_call(
        functools.partial(_bneck_tail_pool_fc_kernel, batch=B, hw=Ho * Wo),
        out_shape=jax.ShapeDtypeStruct((B, fc_w.shape[1]), jnp.float32),
    )(main, p["w3"], p["b3"], sc, p["wd"], p["bd"], fc_w, fc_b)


def encode_image(fp, image_nchw):
    B = image_nchw.shape[0]
    x = jnp.transpose(image_nchw, (0, 2, 3, 1)).astype(jnp.bfloat16)        # NCHW -> NHWC
    patches, Ho, Wo = im2col(x, 7, 7, 2, 3)                                 # stem 7x7/s2/p3
    y = pallas_linear(patches, fp["stem_w"], fp["stem_b"], activation="relu",
                      out_dtype=jnp.bfloat16)
    x = y.reshape(B, Ho, Wo, -1)
    x = maxpool3x3s2p1(x)
    strides = (1, 2, 2, 2)
    feats = None
    for i, blk in enumerate(fp["stages"]):
        last = i == len(fp["stages"]) - 1
        res = bottleneck(x, blk, strides[i],
                         pool_fc=(fp["fc_w"], fp["fc_b"]) if last else None)
        if last:
            feats = res                                                     # [B, EMBED] f32
        else:
            x = res
    return feats


# ------------------------------- text encoder glue -------------------------------
def encode_text(fp, text):
    B, S = text.shape
    # TODO(synk): token-embedding / EOT gathers kept in plain JAX (irregular gather).
    x = jnp.take(fp["tok_emb"], text, axis=0) + fp["pos_emb"][None]
    x2d = x.reshape(B * S, WIDTH).astype(jnp.float32)
    mask = _block_causal_mask(fp["attn_mask"], B)                           # [B*S, B*S]
    for blk in fp["blocks"]:
        x2d = pallas_transformer_layer(x2d, mask, blk)                      # ONE call / layer
    x = x2d.reshape(B, S, WIDTH)
    # LN is per-token, so gathering the EOT token first then ln_final is
    # equivalent to ln_final over the full sequence followed by the gather.
    eot = jnp.argmax(text, axis=-1)                                         # text.argmax(dim=-1)
    x_eot = x[jnp.arange(B), eot]                                           # [B, WIDTH]
    return pl.pallas_call(                       # ln_final + text_projection + text_fc fused
        functools.partial(_text_head_kernel, eps=EPS_LN),
        out_shape=jax.ShapeDtypeStruct((B, EMBED), jnp.float32),
    )(x_eot, fp["lnf_g"], fp["lnf_b"], fp["text_projection"],
      fp["text_fc_w"], fp["text_fc_b"])


# ----------------------------------- forward -----------------------------------
def forward(fp, image, text, return_fea=False):
    image_features = encode_image(fp, image)                                # [B, EMBED]
    text_features = encode_text(fp, text)                                   # [B, EMBED] (incl. text_fc)
    logits_per_image = pallas_clip_head(image_features, text_features,
                                        fp["logit_scale"])
    logits_per_text = logits_per_image.T
    if return_fea:
        img_n = image_features * jax.lax.rsqrt(
            jnp.sum(image_features * image_features, axis=1, keepdims=True))
        return logits_per_image, logits_per_text, img_n
    return logits_per_image, logits_per_text


# -------------------------------- parameter init --------------------------------
def init_params(key):
    keys = iter(jax.random.split(key, 256))

    def nrm(shape, scale=0.05):
        return (scale * jax.random.normal(next(keys), shape)).astype(jnp.float32)

    def bn(c):
        return {"g": 1.0 + nrm((c,), 0.1), "b": nrm((c,), 0.05),
                "m": nrm((c,), 0.05), "v": 1.0 + jnp.abs(nrm((c,), 0.1))}

    p = {}
    p["stem_w"] = nrm((7, 7, 3, STEM_OUT), 0.1)
    p["stem_bn"] = bn(STEM_OUT)
    p["stages"] = [{"w1": nrm((1, 1, cin, mid), 0.1), "bn1": bn(mid),
                    "w2": nrm((3, 3, mid, mid), 0.05), "bn2": bn(mid),
                    "w3": nrm((1, 1, mid, cout), 0.1), "bn3": bn(cout),
                    "wd": nrm((1, 1, cin, cout), 0.1), "bnd": bn(cout)}
                   for cin, mid, cout in STAGE_SPECS]
    p["fc_w"] = nrm((IMG_FEAT, EMBED))
    p["fc_b"] = nrm((EMBED,), 0.02)

    p["tok_emb"] = nrm((VOCAB, WIDTH), 0.02)
    p["pos_emb"] = nrm((CTX, WIDTH), 0.01)
    p["blocks"] = [{"ln1_g": 1.0 + nrm((WIDTH,), 0.02), "ln1_b": nrm((WIDTH,), 0.02),
                    "in_proj_w": nrm((WIDTH, 3 * WIDTH)), "in_proj_b": nrm((3 * WIDTH,), 0.02),
                    "out_proj_w": nrm((WIDTH, WIDTH)), "out_proj_b": nrm((WIDTH,), 0.02),
                    "ln2_g": 1.0 + nrm((WIDTH,), 0.02), "ln2_b": nrm((WIDTH,), 0.02),
                    "fc_w": nrm((WIDTH, 4 * WIDTH)), "fc_b": nrm((4 * WIDTH,), 0.02),
                    "proj_w": nrm((4 * WIDTH, WIDTH)), "proj_b": nrm((WIDTH,), 0.02)}
                   for _ in range(LAYERS)]
    p["lnf_g"] = 1.0 + nrm((WIDTH,), 0.02)
    p["lnf_b"] = nrm((WIDTH,), 0.02)
    p["text_projection"] = nrm((WIDTH, TXT_PROJ))
    p["text_fc_w"] = nrm((TXT_PROJ, EMBED))
    p["text_fc_b"] = nrm((EMBED,), 0.02)
    p["logit_scale"] = jnp.array(jnp.log(1.0 / 0.07), jnp.float32)          # CLIP init

    row = jnp.arange(CTX)[:, None]
    col = jnp.arange(CTX)[None, :]
    p["attn_mask"] = jnp.where(col > row, -1e9, 0.0).astype(jnp.float32)    # causal mask
    return p


def prepare_params(p):
    """One-time preprocessing outside the forward path: fold eval-mode BN into
    conv weights, cast matmul weights to bf16 (MXU-native) and pre-shape all
    bias / LN vectors to (1, N); biases stay f32."""
    def fold(w, bn):
        scale = bn["g"] / jnp.sqrt(bn["v"] + EPS_BN)
        wf = (w * scale).reshape(-1, w.shape[-1]).astype(jnp.bfloat16)
        bf = (bn["b"] - bn["m"] * scale).astype(jnp.float32).reshape(1, -1)
        return wf, bf

    fp = {}
    fp["stem_w"], fp["stem_b"] = fold(p["stem_w"], p["stem_bn"])
    fp["stages"] = []
    for blk in p["stages"]:
        w1, b1 = fold(blk["w1"], blk["bn1"])
        w2, b2 = fold(blk["w2"], blk["bn2"])
        w3, b3 = fold(blk["w3"], blk["bn3"])
        wd, bd = fold(blk["wd"], blk["bnd"])
        fp["stages"].append({"w1": w1, "b1": b1, "w2": w2, "b2": b2,
                             "w3": w3, "b3": b3, "wd": wd, "bd": bd})
    fp["fc_w"] = p["fc_w"].astype(jnp.bfloat16)
    fp["fc_b"] = p["fc_b"].reshape(1, EMBED)

    fp["tok_emb"] = p["tok_emb"]
    fp["pos_emb"] = p["pos_emb"]
    fp["blocks"] = []
    for blk in p["blocks"]:
        fp["blocks"].append({
            "ln1_g": blk["ln1_g"].reshape(1, WIDTH), "ln1_b": blk["ln1_b"].reshape(1, WIDTH),
            "in_proj_w": blk["in_proj_w"].astype(jnp.bfloat16),
            "in_proj_b": blk["in_proj_b"].reshape(1, 3 * WIDTH),
            "out_proj_w": blk["out_proj_w"].astype(jnp.bfloat16),
            "out_proj_b": blk["out_proj_b"].reshape(1, WIDTH),
            "ln2_g": blk["ln2_g"].reshape(1, WIDTH), "ln2_b": blk["ln2_b"].reshape(1, WIDTH),
            "fc_w": blk["fc_w"].astype(jnp.bfloat16),
            "fc_b": blk["fc_b"].reshape(1, 4 * WIDTH),
            "proj_w": blk["proj_w"].astype(jnp.bfloat16),
            "proj_b": blk["proj_b"].reshape(1, WIDTH),
        })
    fp["lnf_g"] = p["lnf_g"].reshape(1, WIDTH)
    fp["lnf_b"] = p["lnf_b"].reshape(1, WIDTH)
    fp["text_projection"] = p["text_projection"].astype(jnp.bfloat16)
    fp["text_fc_w"] = p["text_fc_w"].astype(jnp.bfloat16)
    fp["text_fc_b"] = p["text_fc_b"].reshape(1, EMBED)
    fp["logit_scale"] = p["logit_scale"]
    fp["attn_mask"] = p["attn_mask"]
    return fp


# ------------------------------------- main -------------------------------------
if __name__ == "__main__":
    key = jax.random.PRNGKey(0)
    k_params, k_img, k_txt = jax.random.split(key, 3)

    raw_params = init_params(k_params)
    params = prepare_params(raw_params)        # BN fold + bf16 cast: once, outside forward

    image = jax.random.normal(k_img, (2, 3, 32, 32), jnp.float32)           # NCHW
    text = jax.random.randint(k_txt, (2, CTX), 0, VOCAB, jnp.int32)

    fwd = jax.jit(forward)
    logits_per_image, logits_per_text = fwd(params, image, text)
    jax.block_until_ready((logits_per_image, logits_per_text))

    assert logits_per_image.shape == (2, 2) and logits_per_text.shape == (2, 2)
    assert bool(jnp.all(jnp.isfinite(logits_per_image)))
    assert bool(jnp.allclose(logits_per_text, logits_per_image.T))
    print("KERNEL_OK")
</pallas_src>

<mosaic_0001>
module attributes {stable_mosaic.version = 11 : i64} {
  func.func @_linear_kernel(%arg0: i32, %arg1: i32, %arg2: i32, %arg3: memref<512x147xbf16, #tpu.memory_space<vmem>>, %arg4: memref<147x128xbf16, #tpu.memory_space<vmem>>, %arg5: memref<1x128xf32, #tpu.memory_space<vmem>>, %arg6: memref<512x128xbf16, #tpu.memory_space<vmem>>, %arg7: memref<512x128xf32, #tpu.memory_space<vmem>>) attributes {dimension_semantics = [#tpu.dimension_semantics<parallel>, #tpu.dimension_semantics<parallel>, #tpu.dimension_semantics<arbitrary>], iteration_bounds = array<i64: 1, 1, 1>, scalar_prefetch = 0 : i64, scratch_operands = 1 : i64, tpu.core_type = #tpu.core_type<tc>, window_params = [{transform_indices = @transform_0, window_bounds = array<i64: 512, 147>}, {transform_indices = @transform_1, window_bounds = array<i64: 147, 128>}, {transform_indices = @transform_2, window_bounds = array<i64: 1, 128>}, {transform_indices = @transform_3, window_bounds = array<i64: 512, 128>}]} {
    %c0_i32 = arith.constant 0 : i32
    %0 = arith.cmpi eq, %arg2, %c0_i32 : i32
    %1 = arith.extui %0 : i1 to i32
    %c0_i32_0 = arith.constant 0 : i32
    %2 = arith.cmpi ne, %1, %c0_i32_0 : i32
    scf.if %2 {
      %cst_10 = arith.constant 0.000000e+00 : f32
      %12 = vector.broadcast %cst_10 : f32 to vector<512x128xf32>
      %c0_11 = arith.constant 0 : index
      %c0_12 = arith.constant 0 : index
      %13 = vector.load %arg7[%c0_11, %c0_12] : memref<512x128xf32, #tpu.memory_space<vmem>>, vector<512x128xf32>
      tpu.vector_store %arg7[%c0_11, %c0_12], %12 {strides = array<i32>} : memref<512x128xf32, #tpu.memory_space<vmem>>, vector<512x128xf32>,
    } else {
    }
    %c0 = arith.constant 0 : index
    %c0_1 = arith.constant 0 : index
    %3 = vector.load %arg7[%c0, %c0_1] : memref<512x128xf32, #tpu.memory_space<vmem>>, vector<512x128xf32>
    %c0_2 = arith.constant 0 : index
    %c0_3 = arith.constant 0 : index
    %4 = vector.load %arg3[%c0_2, %c0_3] : memref<512x147xbf16, #tpu.memory_space<vmem>>, vector<512x147xbf16>
    %c0_4 = arith.constant 0 : index
    %c0_5 = arith.constant 0 : index
    %5 = vector.load %arg4[%c0_4, %c0_5] : memref<147x128xbf16, #tpu.memory_space<vmem>>, vector<147x128xbf16>
    %cst = arith.constant dense<0.000000e+00> : vector<512x128xf32>
    %6 = tpu.matmul %4, %5, %cst {dimension_numbers = #tpu.dot_dimension_numbers<[1], [0], [0], [1], [0, 0, 1, 1], [], []>} : vector<512x147xbf16>, vector<147x128xbf16>, vector<512x128xf32> -> vector<512x128xf32>
    %7 = arith.addf %3, %6 : vector<512x128xf32>
    %c0_6 = arith.constant 0 : index
    %c0_7 = arith.constant 0 : index
    %8 = vector.load %arg7[%c0_6, %c0_7] : memref<512x128xf32, #tpu.memory_space<vmem>>, vector<512x128xf32>
    tpu.vector_store %arg7[%c0_6, %c0_7], %7 {strides = array<i32>} : memref<512x128xf32, #tpu.memory_space<vmem>>, vector<512x128xf32>,
    %c0_i32_8 = arith.constant 0 : i32
    %9 = arith.cmpi eq, %arg2, %c0_i32_8 : i32
    %10 = arith.extui %9 : i1 to i32
    %c0_i32_9 = arith.constant 0 : i32
    %11 = arith.cmpi ne, %10, %c0_i32_9 : i32
    scf.if %11 {
      %c0_10 = arith.constant 0 : index
      %c0_11 = arith.constant 0 : index
      %12 = vector.load %arg7[%c0_10, %c0_11] : memref<512x128xf32, #tpu.memory_space<vmem>>, vector<512x128xf32>
      %c0_12 = arith.constant 0 : index
      %c0_13 = arith.constant 0 : index
      %13 = vector.load %arg5[%c0_12, %c0_13] : memref<1x128xf32, #tpu.memory_space<vmem>>, vector<1x128xf32>
      %14 = vector.broadcast %13 : vector<1x128xf32> to vector<512x128xf32>
      %15 = arith.addf %12, %14 : vector<512x128xf32>
      %cst_14 = arith.constant 0.000000e+00 : f32
      %16 = vector.broadcast %cst_14 : f32 to vector<512x128xf32>
      %17 = arith.maximumf %15, %16 : vector<512x128xf32>
      %18 = arith.truncf %17 : vector<512x128xf32> to vector<512x128xbf16>
      %c0_15 = arith.constant 0 : index
      %c0_16 = arith.constant 0 : index
      %19 = vector.load %arg6[%c0_15, %c0_16] : memref<512x128xbf16, #tpu.memory_space<vmem>>, vector<512x128xbf16>
      tpu.vector_store %arg6[%c0_15, %c0_16], %18 {strides = array<i32>} : memref<512x128xbf16, #tpu.memory_space<vmem>>, vector<512x128xbf16>,
    } else {
    }
    return
  }
  func.func @transform_0(%arg0: i32, %arg1: i32, %arg2: i32) -> (i32, i32) {
    %c0_i32 = arith.constant 0 : i32
    return %arg0, %arg2 : i32, i32
  }
  func.func @transform_1(%arg0: i32, %arg1: i32, %arg2: i32) -> (i32, i32) {
    %c0_i32 = arith.constant 0 : i32
    return %arg2, %arg1 : i32, i32
  }
  func.func @transform_2(%arg0: i32, %arg1: i32, %arg2: i32) -> (i32, i32) {
    %c0_i32 = arith.constant 0 : i32
    %c0_i32_0 = arith.constant 0 : i32
    return %c0_i32, %arg1 : i32, i32
  }
  func.func @transform_3(%arg0: i32, %arg1: i32, %arg2: i32) -> (i32, i32) {
    %c0_i32 = arith.constant 0 : i32
    return %arg0, %arg1 : i32, i32
  }
}

module attributes {stable_mosaic.version = 11 : i64} {
  func.func @_linear_kernel(%arg0: i32, %arg1: i32, %arg2: i32, %arg3: memref<128x128xbf16, #tpu.memory_space<vmem>>, %arg4: memref<128x128xbf16, #tpu.memory_space<vmem>>, %arg5: memref<1x128xf32, #tpu.memory_space<vmem>>, %arg6: memref<128x128xbf16, #tpu.memory_space<vmem>>, %arg7: memref<128x128xf32, #tpu.memory_space<vmem>>) attributes {dimension_semantics = [#tpu.dimension_semantics<parallel>, #tpu.dimension_semantics<parallel>, #tpu.dimension_semantics<arbitrary>], iteration_bounds = array<i64: 1, 1, 1>, scalar_prefetch = 0 : i64, scratch_operands = 1 : i64, tpu.core_type = #tpu.core_type<tc>, window_params = [{transform_indices = @transform_0, window_bounds = array<i64: 128, 128>}, {transform_indices = @transform_1, window_bounds = array<i64: 128, 128>}, {transform_indices = @transform_2, window_bounds = array<i64: 1, 128>}, {transform_indices = @transform_3, window_bounds = array<i64: 128, 128>}]} {
    %c0_i32 = arith.constant 0 : i32
    %0 = arith.cmpi eq, %arg2, %c0_i32 : i32
    %1 = arith.extui %0 : i1 to i32
    %c0_i32_0 = arith.constant 0 : i32
    %2 = arith.cmpi ne, %1, %c0_i32_0 : i32
    scf.if %2 {
      %cst_10 = arith.constant 0.000000e+00 : f32
      %12 = vector.broadcast %cst_10 : f32 to vector<128x128xf32>
      %c0_11 = arith.constant 0 : index
      %c0_12 = arith.constant 0 : index
      %13 = vector.load %arg7[%c0_11, %c0_12] : memref<128x128xf32, #tpu.memory_space<vmem>>, vector<128x128xf32>
      tpu.vector_store %arg7[%c0_11, %c0_12], %12 {strides = array<i32>} : memref<128x128xf32, #tpu.memory_space<vmem>>, vector<128x128xf32>,
    } else {
    }
    %c0 = arith.constant 0 : index
    %c0_1 = arith.constant 0 : index
    %3 = vector.load %arg7[%c0, %c0_1] : memref<128x128xf32, #tpu.memory_space<vmem>>, vector<128x128xf32>
    %c0_2 = arith.constant 0 : index
    %c0_3 = arith.constant 0 : index
    %4 = vector.load %arg3[%c0_2, %c0_3] : memref<128x128xbf16, #tpu.memory_space<vmem>>, vector<128x128xbf16>
    %c0_4 = arith.constant 0 : index
    %c0_5 = arith.constant 0 : index
    %5 = vector.load %arg4[%c0_4, %c0_5] : memref<128x128xbf16, #tpu.memory_space<vmem>>, vector<128x128xbf16>
    %cst = arith.constant dense<0.000000e+00> : vector<128x128xf32>
    %6 = tpu.matmul %4, %5, %cst {dimension_numbers = #tpu.dot_dimension_numbers<[1], [0], [0], [1], [0, 0, 1, 1], [], []>} : vector<128x128xbf16>, vector<128x128xbf16>, vector<128x128xf32> -> vector<128x128xf32>
    %7 = arith.addf %3, %6 : vector<128x128xf32>
    %c0_6 = arith.constant 0 : index
    %c0_7 = arith.constant 0 : index
    %8 = vector.load %arg7[%c0_6, %c0_7] : memref<128x128xf32, #tpu.memory_space<vmem>>, vector<128x128xf32>
    tpu.vector_store %arg7[%c0_6, %c0_7], %7 {strides = array<i32>} : memref<128x128xf32, #tpu.memory_space<vmem>>, vector<128x128xf32>,
    %c0_i32_8 = arith.constant 0 : i32
    %9 = arith.cmpi eq, %arg2, %c0_i32_8 : i32
    %10 = arith.extui %9 : i1 to i32
    %c0_i32_9 = arith.constant 0 : i32
    %11 = arith.cmpi ne, %10, %c0_i32_9 : i32
    scf.if %11 {
      %c0_10 = arith.constant 0 : index
      %c0_11 = arith.constant 0 : index
      %12 = vector.load %arg7[%c0_10, %c0_11] : memref<128x128xf32, #tpu.memory_space<vmem>>, vector<128x128xf32>
      %c0_12 = arith.constant 0 : index
      %c0_13 = arith.constant 0 : index
      %13 = vector.load %arg5[%c0_12, %c0_13] : memref<1x128xf32, #tpu.memory_space<vmem>>, vector<1x128xf32>
      %14 = vector.broadcast %13 : vector<1x128xf32> to vector<128x128xf32>
      %15 = arith.addf %12, %14 : vector<128x128xf32>
      %cst_14 = arith.constant 0.000000e+00 : f32
      %16 = vector.broadcast %cst_14 : f32 to vector<128x128xf32>
      %17 = arith.maximumf %15, %16 : vector<128x128xf32>
      %18 = arith.truncf %17 : vector<128x128xf32> to vector<128x128xbf16>
      %c0_15 = arith.constant 0 : index
      %c0_16 = arith.constant 0 : index
      %19 = vector.load %arg6[%c0_15, %c0_16] : memref<128x128xbf16, #tpu.memory_space<vmem>>, vector<128x128xbf16>
      tpu.vector_store %arg6[%c0_15, %c0_16], %18 {strides = array<i32>} : memref<128x128xbf16, #tpu.memory_space<vmem>>, vector<128x128xbf16>,
    } else {
    }
    return
  }
  func.func @transform_0(%arg0: i32, %arg1: i32, %arg2: i32) -> (i32, i32) {
    %c0_i32 = arith.constant 0 : i32
    return %arg0, %arg2 : i32, i32
  }
  func.func @transform_1(%arg0: i32, %arg1: i32, %arg2: i32) -> (i32, i32) {
    %c0_i32 = arith.constant 0 : i32
    return %arg2, %arg1 : i32, i32
  }
  func.func @transform_2(%arg0: i32, %arg1: i32, %arg2: i32) -> (i32, i32) {
    %c0_i32 = arith.constant 0 : i32
    %c0_i32_0 = arith.constant 0 : i32
    return %c0_i32, %arg1 : i32, i32
  }
  func.func @transform_3(%arg0: i32, %arg1: i32, %arg2: i32) -> (i32, i32) {
    %c0_i32 = arith.constant 0 : i32
    return %arg0, %arg1 : i32, i32
  }
}

module attributes {stable_mosaic.version = 11 : i64} {
  func.func @_bneck_tail_kernel(%arg0: memref<128x128xbf16, #tpu.memory_space<vmem>>, %arg1: memref<128x256xbf16, #tpu.memory_space<vmem>>, %arg2: memref<1x256xf32, #tpu.memory_space<vmem>>, %arg3: memref<128x128xbf16, #tpu.memory_space<vmem>>, %arg4: memref<128x256xbf16, #tpu.memory_space<vmem>>, %arg5: memref<1x256xf32, #tpu.memory_space<vmem>>, %arg6: memref<128x256xbf16, #tpu.memory_space<vmem>>) attributes {dimension_semantics = [], scalar_prefetch = 0 : i64, scratch_operands = 0 : i64, tpu.core_type = #tpu.core_type<tc>} {
    %c0 = arith.constant 0 : index
    %c0_0 = arith.constant 0 : index
    %0 = vector.load %arg0[%c0, %c0_0] : memref<128x128xbf16, #tpu.memory_space<vmem>>, vector<128x128xbf16>
    %c0_1 = arith.constant 0 : index
    %c0_2 = arith.constant 0 : index
    %1 = vector.load %arg1[%c0_1, %c0_2] : memref<128x256xbf16, #tpu.memory_space<vmem>>, vector<128x256xbf16>
    %cst = arith.constant dense<0.000000e+00> : vector<128x256xf32>
    %2 = tpu.matmul %0, %1, %cst {dimension_numbers = #tpu.dot_dimension_numbers<[1], [0], [0], [1], [0, 0, 1, 1], [], []>} : vector<128x128xbf16>, vector<128x256xbf16>, vector<128x256xf32> -> vector<128x256xf32>
    %c0_3 = arith.constant 0 : index
    %c0_4 = arith.constant 0 : index
    %3 = vector.load %arg2[%c0_3, %c0_4] : memref<1x256xf32, #tpu.memory_space<vmem>>, vector<1x256xf32>
    %4 = vector.broadcast %3 : vector<1x256xf32> to vector<128x256xf32>
    %5 = arith.addf %2, %4 : vector<128x256xf32>
    %c0_5 = arith.constant 0 : index
    %c0_6 = arith.constant 0 : index
    %6 = vector.load %arg3[%c0_5, %c0_6] : memref<128x128xbf16, #tpu.memory_space<vmem>>, vector<128x128xbf16>
    %c0_7 = arith.constant 0 : index
    %c0_8 = arith.constant 0 : index
    %7 = vector.load %arg4[%c0_7, %c0_8] : memref<128x256xbf16, #tpu.memory_space<vmem>>, vector<128x256xbf16>
    %cst_9 = arith.constant dense<0.000000e+00> : vector<128x256xf32>
    %8 = tpu.matmul %6, %7, %cst_9 {dimension_numbers = #tpu.dot_dimension_numbers<[1], [0], [0], [1], [0, 0, 1, 1], [], []>} : vector<128x128xbf16>, vector<128x256xbf16>, vector<128x256xf32> -> vector<128x256xf32>
    %9 = arith.addf %5, %8 : vector<128x256xf32>
    %c0_10 = arith.constant 0 : index
    %c0_11 = arith.constant 0 : index
    %10 = vector.load %arg5[%c0_10, %c0_11] : memref<1x256xf32, #tpu.memory_space<vmem>>, vector<1x256xf32>
    %11 = vector.broadcast %10 : vector<1x256xf32> to vector<128x256xf32>
    %12 = arith.addf %9, %11 : vector<128x256xf32>
    %cst_12 = arith.constant 0.000000e+00 : f32
    %13 = vector.broadcast %cst_12 : f32 to vector<128x256xf32>
    %14 = arith.maximumf %12, %13 : vector<128x256xf32>
    %15 = arith.truncf %14 : vector<128x256xf32> to vector<128x256xbf16>
    %c0_13 = arith.constant 0 : index
    %c0_14 = arith.constant 0 : index
    %16 = vector.load %arg6[%c0_13, %c0_14] : memref<128x256xbf16, #tpu.memory_space<vmem>>, vector<128x256xbf16>
    tpu.vector_store %arg6[%c0_13, %c0_14], %15 {strides = array<i32>} : memref<128x256xbf16, #tpu.memory_space<vmem>>, vector<128x256xbf16>,
    return
  }
}

module attributes {stable_mosaic.version = 11 : i64} {
  func.func @_linear_kernel(%arg0: i32, %arg1: i32, %arg2: i32, %arg3: memref<128x1152xbf16, #tpu.memory_space<vmem>>, %arg4: memref<1152x128xbf16, #tpu.memory_space<vmem>>, %arg5: memref<1x128xf32, #tpu.memory_space<vmem>>, %arg6: memref<128x128xbf16, #tpu.memory_space<vmem>>, %arg7: memref<128x128xf32, #tpu.memory_space<vmem>>) attributes {dimension_semantics = [#tpu.dimension_semantics<parallel>, #tpu.dimension_semantics<parallel>, #tpu.dimension_semantics<arbitrary>], iteration_bounds = array<i64: 1, 1, 1>, scalar_prefetch = 0 : i64, scratch_operands = 1 : i64, tpu.core_type = #tpu.core_type<tc>, window_params = [{transform_indices = @transform_0, window_bounds = array<i64: 128, 1152>}, {transform_indices = @transform_1, window_bounds = array<i64: 1152, 128>}, {transform_indices = @transform_2, window_bounds = array<i64: 1, 128>}, {transform_indices = @transform_3, window_bounds = array<i64: 128, 128>}]} {
    %c0_i32 = arith.constant 0 : i32
    %0 = arith.cmpi eq, %arg2, %c0_i32 : i32
    %1 = arith.extui %0 : i1 to i32
    %c0_i32_0 = arith.constant 0 : i32
    %2 = arith.cmpi ne, %1, %c0_i32_0 : i32
    scf.if %2 {
      %cst_10 = arith.constant 0.000000e+00 : f32
      %12 = vector.broadcast %cst_10 : f32 to vector<128x128xf32>
      %c0_11 = arith.constant 0 : index
      %c0_12 = arith.constant 0 : index
      %13 = vector.load %arg7[%c0_11, %c0_12] : memref<128x128xf32, #tpu.memory_space<vmem>>, vector<128x128xf32>
      tpu.vector_store %arg7[%c0_11, %c0_12], %12 {strides = array<i32>} : memref<128x128xf32, #tpu.memory_space<vmem>>, vector<128x128xf32>,
    } else {
    }
    %c0 = arith.constant 0 : index
    %c0_1 = arith.constant 0 : index
    %3 = vector.load %arg7[%c0, %c0_1] : memref<128x128xf32, #tpu.memory_space<vmem>>, vector<128x128xf32>
    %c0_2 = arith.constant 0 : index
    %c0_3 = arith.constant 0 : index
    %4 = vector.load %arg3[%c0_2, %c0_3] : memref<128x1152xbf16, #tpu.memory_space<vmem>>, vector<128x1152xbf16>
    %c0_4 = arith.constant 0 : index
    %c0_5 = arith.constant 0 : index
    %5 = vector.load %arg4[%c0_4, %c0_5] : memref<1152x128xbf16, #tpu.memory_space<vmem>>, vector<1152x128xbf16>
    %cst = arith.constant dense<0.000000e+00> : vector<128x128xf32>
    %6 = tpu.matmul %4, %5, %cst {dimension_numbers = #tpu.dot_dimension_numbers<[1], [0], [0], [1], [0, 0, 1, 1], [], []>} : vector<128x1152xbf16>, vector<1152x128xbf16>, vector<128x128xf32> -> vector<128x128xf32>
    %7 = arith.addf %3, %6 : vector<128x128xf32>
    %c0_6 = arith.constant 0 : index
    %c0_7 = arith.constant 0 : index
    %8 = vector.load %arg7[%c0_6, %c0_7] : memref<128x128xf32, #tpu.memory_space<vmem>>, vector<128x128xf32>
    tpu.vector_store %arg7[%c0_6, %c0_7], %7 {strides = array<i32>} : memref<128x128xf32, #tpu.memory_space<vmem>>, vector<128x128xf32>,
    %c0_i32_8 = arith.constant 0 : i32
    %9 = arith.cmpi eq, %arg2, %c0_i32_8 : i32
    %10 = arith.extui %9 : i1 to i32
    %c0_i32_9 = arith.constant 0 : i32
    %11 = arith.cmpi ne, %10, %c0_i32_9 : i32
    scf.if %11 {
      %c0_10 = arith.constant 0 : index
      %c0_11 = arith.constant 0 : index
      %12 = vector.load %arg7[%c0_10, %c0_11] : memref<128x128xf32, #tpu.memory_space<vmem>>, vector<128x128xf32>
      %c0_12 = arith.constant 0 : index
      %c0_13 = arith.constant 0 : index
      %13 = vector.load %arg5[%c0_12, %c0_13] : memref<1x128xf32, #tpu.memory_space<vmem>>, vector<1x128xf32>
      %14 = vector.broadcast %13 : vector<1x128xf32> to vector<128x128xf32>
      %15 = arith.addf %12, %14 : vector<128x128xf32>
      %cst_14 = arith.constant 0.000000e+00 : f32
      %16 = vector.broadcast %cst_14 : f32 to vector<128x128xf32>
      %17 = arith.maximumf %15, %16 : vector<128x128xf32>
      %18 = arith.truncf %17 : vector<128x128xf32> to vector<128x128xbf16>
      %c0_15 = arith.constant 0 : index
      %c0_16 = arith.constant 0 : index
      %19 = vector.load %arg6[%c0_15, %c0_16] : memref<128x128xbf16, #tpu.memory_space<vmem>>, vector<128x128xbf16>
      tpu.vector_store %arg6[%c0_15, %c0_16], %18 {strides = array<i32>} : memref<128x128xbf16, #tpu.memory_space<vmem>>, vector<128x128xbf16>,
    } else {
    }
    return
  }
  func.func @transform_0(%arg0: i32, %arg1: i32, %arg2: i32) -> (i32, i32) {
    %c0_i32 = arith.constant 0 : i32
    return %arg0, %arg2 : i32, i32
  }
  func.func @transform_1(%arg0: i32, %arg1: i32, %arg2: i32) -> (i32, i32) {
    %c0_i32 = arith.constant 0 : i32
    return %arg2, %arg1 : i32, i32
  }
  func.func @transform_2(%arg0: i32, %arg1: i32, %arg2: i32) -> (i32, i32) {
    %c0_i32 = arith.constant 0 : i32
    %c0_i32_0 = arith.constant 0 : i32
    return %c0_i32, %arg1 : i32, i32
  }
  func.func @transform_3(%arg0: i32, %arg1: i32, %arg2: i32) -> (i32, i32) {
    %c0_i32 = arith.constant 0 : i32
    return %arg0, %arg1 : i32, i32
  }
}

module attributes {stable_mosaic.version = 11 : i64} {
  func.func @_linear_kernel(%arg0: i32, %arg1: i32, %arg2: i32, %arg3: memref<128x256xbf16, #tpu.memory_space<vmem>>, %arg4: memref<256x128xbf16, #tpu.memory_space<vmem>>, %arg5: memref<1x128xf32, #tpu.memory_space<vmem>>, %arg6: memref<128x128xbf16, #tpu.memory_space<vmem>>, %arg7: memref<128x128xf32, #tpu.memory_space<vmem>>) attributes {dimension_semantics = [#tpu.dimension_semantics<parallel>, #tpu.dimension_semantics<parallel>, #tpu.dimension_semantics<arbitrary>], iteration_bounds = array<i64: 1, 1, 1>, scalar_prefetch = 0 : i64, scratch_operands = 1 : i64, tpu.core_type = #tpu.core_type<tc>, window_params = [{transform_indices = @transform_0, window_bounds = array<i64: 128, 256>}, {transform_indices = @transform_1, window_bounds = array<i64: 256, 128>}, {transform_indices = @transform_2, window_bounds = array<i64: 1, 128>}, {transform_indices = @transform_3, window_bounds = array<i64: 128, 128>}]} {
    %c0_i32 = arith.constant 0 : i32
    %0 = arith.cmpi eq, %arg2, %c0_i32 : i32
    %1 = arith.extui %0 : i1 to i32
    %c0_i32_0 = arith.constant 0 : i32
    %2 = arith.cmpi ne, %1, %c0_i32_0 : i32
    scf.if %2 {
      %cst_10 = arith.constant 0.000000e+00 : f32
      %12 = vector.broadcast %cst_10 : f32 to vector<128x128xf32>
      %c0_11 = arith.constant 0 : index
      %c0_12 = arith.constant 0 : index
      %13 = vector.load %arg7[%c0_11, %c0_12] : memref<128x128xf32, #tpu.memory_space<vmem>>, vector<128x128xf32>
      tpu.vector_store %arg7[%c0_11, %c0_12], %12 {strides = array<i32>} : memref<128x128xf32, #tpu.memory_space<vmem>>, vector<128x128xf32>,
    } else {
    }
    %c0 = arith.constant 0 : index
    %c0_1 = arith.constant 0 : index
    %3 = vector.load %arg7[%c0, %c0_1] : memref<128x128xf32, #tpu.memory_space<vmem>>, vector<128x128xf32>
    %c0_2 = arith.constant 0 : index
    %c0_3 = arith.constant 0 : index
    %4 = vector.load %arg3[%c0_2, %c0_3] : memref<128x256xbf16, #tpu.memory_space<vmem>>, vector<128x256xbf16>
    %c0_4 = arith.constant 0 : index
    %c0_5 = arith.constant 0 : index
    %5 = vector.load %arg4[%c0_4, %c0_5] : memref<256x128xbf16, #tpu.memory_space<vmem>>, vector<256x128xbf16>
    %cst = arith.constant dense<0.000000e+00> : vector<128x128xf32>
    %6 = tpu.matmul %4, %5, %cst {dimension_numbers = #tpu.dot_dimension_numbers<[1], [0], [0], [1], [0, 0, 1, 1], [], []>} : vector<128x256xbf16>, vector<256x128xbf16>, vector<128x128xf32> -> vector<128x128xf32>
    %7 = arith.addf %3, %6 : vector<128x128xf32>
    %c0_6 = arith.constant 0 : index
    %c0_7 = arith.constant 0 : index
    %8 = vector.load %arg7[%c0_6, %c0_7] : memref<128x128xf32, #tpu.memory_space<vmem>>, vector<128x128xf32>
    tpu.vector_store %arg7[%c0_6, %c0_7], %7 {strides = array<i32>} : memref<128x128xf32, #tpu.memory_space<vmem>>, vector<128x128xf32>,
    %c0_i32_8 = arith.constant 0 : i32
    %9 = arith.cmpi eq, %arg2, %c0_i32_8 : i32
    %10 = arith.extui %9 : i1 to i32
    %c0_i32_9 = arith.constant 0 : i32
    %11 = arith.cmpi ne, %10, %c0_i32_9 : i32
    scf.if %11 {
      %c0_10 = arith.constant 0 : index
      %c0_11 = arith.constant 0 : index
      %12 = vector.load %arg7[%c0_10, %c0_11] : memref<128x128xf32, #tpu.memory_space<vmem>>, vector<128x128xf32>
      %c0_12 = arith.constant 0 : index
      %c0_13 = arith.constant 0 : index
      %13 = vector.load %arg5[%c0_12, %c0_13] : memref<1x128xf32, #tpu.memory_space<vmem>>, vector<1x128xf32>
      %14 = vector.broadcast %13 : vector<1x128xf32> to vector<128x128xf32>
      %15 = arith.addf %12, %14 : vector<128x128xf32>
      %cst_14 = arith.constant 0.000000e+00 : f32
      %16 = vector.broadcast %cst_14 : f32 to vector<128x128xf32>
      %17 = arith.maximumf %15, %16 : vector<128x128xf32>
      %18 = arith.truncf %17 : vector<128x128xf32> to vector<128x128xbf16>
      %c0_15 = arith.constant 0 : index
      %c0_16 = arith.constant 0 : index
      %19 = vector.load %arg6[%c0_15, %c0_16] : memref<128x128xbf16, #tpu.memory_space<vmem>>, vector<128x128xbf16>
      tpu.vector_store %arg6[%c0_15, %c0_16], %18 {strides = array<i32>} : memref<128x128xbf16, #tpu.memory_space<vmem>>, vector<128x128xbf16>,
    } else {
    }
    return
  }
  func.func @transform_0(%arg0: i32, %arg1: i32, %arg2: i32) -> (i32, i32) {
    %c0_i32 = arith.constant 0 : i32
    return %arg0, %arg2 : i32, i32
  }
  func.func @transform_1(%arg0: i32, %arg1: i32, %arg2: i32) -> (i32, i32) {
    %c0_i32 = arith.constant 0 : i32
    return %arg2, %arg1 : i32, i32
  }
  func.func @transform_2(%arg0: i32, %arg1: i32, %arg2: i32) -> (i32, i32) {
    %c0_i32 = arith.constant 0 : i32
    %c0_i32_0 = arith.constant 0 : i32
    return %c0_i32, %arg1 : i32, i32
  }
  func.func @transform_3(%arg0: i32, %arg1: i32, %arg2: i32) -> (i32, i32) {
    %c0_i32 = arith.constant 0 : i32
    return %arg0, %arg1 : i32, i32
  }
}

module attributes {stable_mosaic.version = 11 : i64} {
  func.func @_linear_kernel(%arg0: i32, %arg1: i32, %arg2: i32, %arg3: memref<32x1152xbf16, #tpu.memory_space<vmem>>, %arg4: memref<1152x128xbf16, #tpu.memory_space<vmem>>, %arg5: memref<1x128xf32, #tpu.memory_space<vmem>>, %arg6: memref<32x128xbf16, #tpu.memory_space<vmem>>, %arg7: memref<32x128xf32, #tpu.memory_space<vmem>>) attributes {dimension_semantics = [#tpu.dimension_semantics<parallel>, #tpu.dimension_semantics<parallel>, #tpu.dimension_semantics<arbitrary>], iteration_bounds = array<i64: 1, 1, 1>, scalar_prefetch = 0 : i64, scratch_operands = 1 : i64, tpu.core_type = #tpu.core_type<tc>, window_params = [{transform_indices = @transform_0, window_bounds = array<i64: 32, 1152>}, {transform_indices = @transform_1, window_bounds = array<i64: 1152, 128>}, {transform_indices = @transform_2, window_bounds = array<i64: 1, 128>}, {transform_indices = @transform_3, window_bounds = array<i64: 32, 128>}]} {
    %c0_i32 = arith.constant 0 : i32
    %0 = arith.cmpi eq, %arg2, %c0_i32 : i32
    %1 = arith.extui %0 : i1 to i32
    %c0_i32_0 = arith.constant 0 : i32
    %2 = arith.cmpi ne, %1, %c0_i32_0 : i32
    scf.if %2 {
      %cst_10 = arith.constant 0.000000e+00 : f32
      %12 = vector.broadcast %cst_10 : f32 to vector<32x128xf32>
      %c0_11 = arith.constant 0 : index
      %c0_12 = arith.constant 0 : index
      %13 = vector.load %arg7[%c0_11, %c0_12] : memref<32x128xf32, #tpu.memory_space<vmem>>, vector<32x128xf32>
      tpu.vector_store %arg7[%c0_11, %c0_12], %12 {strides = array<i32>} : memref<32x128xf32, #tpu.memory_space<vmem>>, vector<32x128xf32>,
    } else {
    }
    %c0 = arith.constant 0 : index
    %c0_1 = arith.constant 0 : index
    %3 = vector.load %arg7[%c0, %c0_1] : memref<32x128xf32, #tpu.memory_space<vmem>>, vector<32x128xf32>
    %c0_2 = arith.constant 0 : index
    %c0_3 = arith.constant 0 : index
    %4 = vector.load %arg3[%c0_2, %c0_3] : memref<32x1152xbf16, #tpu.memory_space<vmem>>, vector<32x1152xbf16>
    %c0_4 = arith.constant 0 : index
    %c0_5 = arith.constant 0 : index
    %5 = vector.load %arg4[%c0_4, %c0_5] : memref<1152x128xbf16, #tpu.memory_space<vmem>>, vector<1152x128xbf16>
    %cst = arith.constant dense<0.000000e+00> : vector<32x128xf32>
    %6 = tpu.matmul %4, %5, %cst {dimension_numbers = #tpu.dot_dimension_numbers<[1], [0], [0], [1], [0, 0, 1, 1], [], []>} : vector<32x1152xbf16>, vector<1152x128xbf16>, vector<32x128xf32> -> vector<32x128xf32>
    %7 = arith.addf %3, %6 : vector<32x128xf32>
    %c0_6 = arith.constant 0 : index
    %c0_7 = arith.constant 0 : index
    %8 = vector.load %arg7[%c0_6, %c0_7] : memref<32x128xf32, #tpu.memory_space<vmem>>, vector<32x128xf32>
    tpu.vector_store %arg7[%c0_6, %c0_7], %7 {strides = array<i32>} : memref<32x128xf32, #tpu.memory_space<vmem>>, vector<32x128xf32>,
    %c0_i32_8 = arith.constant 0 : i32
    %9 = arith.cmpi eq, %arg2, %c0_i32_8 : i32
    %10 = arith.extui %9 : i1 to i32
    %c0_i32_9 = arith.constant 0 : i32
    %11 = arith.cmpi ne, %10, %c0_i32_9 : i32
    scf.if %11 {
      %c0_10 = arith.constant 0 : index
      %c0_11 = arith.constant 0 : index
      %12 = vector.load %arg7[%c0_10, %c0_11] : memref<32x128xf32, #tpu.memory_space<vmem>>, vector<32x128xf32>
      %c0_12 = arith.constant 0 : index
      %c0_13 = arith.constant 0 : index
      %13 = vector.load %arg5[%c0_12, %c0_13] : memref<1x128xf32, #tpu.memory_space<vmem>>, vector<1x128xf32>
      %14 = vector.broadcast %13 : vector<1x128xf32> to vector<32x128xf32>
      %15 = arith.addf %12, %14 : vector<32x128xf32>
      %cst_14 = arith.constant 0.000000e+00 : f32
      %16 = vector.broadcast %cst_14 : f32 to vector<32x128xf32>
      %17 = arith.maximumf %15, %16 : vector<32x128xf32>
      %18 = arith.truncf %17 : vector<32x128xf32> to vector<32x128xbf16>
      %c0_15 = arith.constant 0 : index
      %c0_16 = arith.constant 0 : index
      %19 = vector.load %arg6[%c0_15, %c0_16] : memref<32x128xbf16, #tpu.memory_space<vmem>>, vector<32x128xbf16>
      tpu.vector_store %arg6[%c0_15, %c0_16], %18 {strides = array<i32>} : memref<32x128xbf16, #tpu.memory_space<vmem>>, vector<32x128xbf16>,
    } else {
    }
    return
  }
  func.func @transform_0(%arg0: i32, %arg1: i32, %arg2: i32) -> (i32, i32) {
    %c0_i32 = arith.constant 0 : i32
    return %arg0, %arg2 : i32, i32
  }
  func.func @transform_1(%arg0: i32, %arg1: i32, %arg2: i32) -> (i32, i32) {
    %c0_i32 = arith.constant 0 : i32
    return %arg2, %arg1 : i32, i32
  }
  func.func @transform_2(%arg0: i32, %arg1: i32, %arg2: i32) -> (i32, i32) {
    %c0_i32 = arith.constant 0 : i32
    %c0_i32_0 = arith.constant 0 : i32
    return %c0_i32, %arg1 : i32, i32
  }
  func.func @transform_3(%arg0: i32, %arg1: i32, %arg2: i32) -> (i32, i32) {
    %c0_i32 = arith.constant 0 : i32
    return %arg0, %arg1 : i32, i32
  }
}

module attributes {stable_mosaic.version = 11 : i64} {
  func.func @_linear_kernel(%arg0: i32, %arg1: i32, %arg2: i32, %arg3: memref<32x256xbf16, #tpu.memory_space<vmem>>, %arg4: memref<256x128xbf16, #tpu.memory_space<vmem>>, %arg5: memref<1x128xf32, #tpu.memory_space<vmem>>, %arg6: memref<32x128xbf16, #tpu.memory_space<vmem>>, %arg7: memref<32x128xf32, #tpu.memory_space<vmem>>) attributes {dimension_semantics = [#tpu.dimension_semantics<parallel>, #tpu.dimension_semantics<parallel>, #tpu.dimension_semantics<arbitrary>], iteration_bounds = array<i64: 1, 1, 1>, scalar_prefetch = 0 : i64, scratch_operands = 1 : i64, tpu.core_type = #tpu.core_type<tc>, window_params = [{transform_indices = @transform_0, window_bounds = array<i64: 32, 256>}, {transform_indices = @transform_1, window_bounds = array<i64: 256, 128>}, {transform_indices = @transform_2, window_bounds = array<i64: 1, 128>}, {transform_indices = @transform_3, window_bounds = array<i64: 32, 128>}]} {
    %c0_i32 = arith.constant 0 : i32
    %0 = arith.cmpi eq, %arg2, %c0_i32 : i32
    %1 = arith.extui %0 : i1 to i32
    %c0_i32_0 = arith.constant 0 : i32
    %2 = arith.cmpi ne, %1, %c0_i32_0 : i32
    scf.if %2 {
      %cst_10 = arith.constant 0.000000e+00 : f32
      %12 = vector.broadcast %cst_10 : f32 to vector<32x128xf32>
      %c0_11 = arith.constant 0 : index
      %c0_12 = arith.constant 0 : index
      %13 = vector.load %arg7[%c0_11, %c0_12] : memref<32x128xf32, #tpu.memory_space<vmem>>, vector<32x128xf32>
      tpu.vector_store %arg7[%c0_11, %c0_12], %12 {strides = array<i32>} : memref<32x128xf32, #tpu.memory_space<vmem>>, vector<32x128xf32>,
    } else {
    }
    %c0 = arith.constant 0 : index
    %c0_1 = arith.constant 0 : index
    %3 = vector.load %arg7[%c0, %c0_1] : memref<32x128xf32, #tpu.memory_space<vmem>>, vector<32x128xf32>
    %c0_2 = arith.constant 0 : index
    %c0_3 = arith.constant 0 : index
    %4 = vector.load %arg3[%c0_2, %c0_3] : memref<32x256xbf16, #tpu.memory_space<vmem>>, vector<32x256xbf16>
    %c0_4 = arith.constant 0 : index
    %c0_5 = arith.constant 0 : index
    %5 = vector.load %arg4[%c0_4, %c0_5] : memref<256x128xbf16, #tpu.memory_space<vmem>>, vector<256x128xbf16>
    %cst = arith.constant dense<0.000000e+00> : vector<32x128xf32>
    %6 = tpu.matmul %4, %5, %cst {dimension_numbers = #tpu.dot_dimension_numbers<[1], [0], [0], [1], [0, 0, 1, 1], [], []>} : vector<32x256xbf16>, vector<256x128xbf16>, vector<32x128xf32> -> vector<32x128xf32>
    %7 = arith.addf %3, %6 : vector<32x128xf32>
    %c0_6 = arith.constant 0 : index
    %c0_7 = arith.constant 0 : index
    %8 = vector.load %arg7[%c0_6, %c0_7] : memref<32x128xf32, #tpu.memory_space<vmem>>, vector<32x128xf32>
    tpu.vector_store %arg7[%c0_6, %c0_7], %7 {strides = array<i32>} : memref<32x128xf32, #tpu.memory_space<vmem>>, vector<32x128xf32>,
    %c0_i32_8 = arith.constant 0 : i32
    %9 = arith.cmpi eq, %arg2, %c0_i32_8 : i32
    %10 = arith.extui %9 : i1 to i32
    %c0_i32_9 = arith.constant 0 : i32
    %11 = arith.cmpi ne, %10, %c0_i32_9 : i32
    scf.if %11 {
      %c0_10 = arith.constant 0 : index
      %c0_11 = arith.constant 0 : index
      %12 = vector.load %arg7[%c0_10, %c0_11] : memref<32x128xf32, #tpu.memory_space<vmem>>, vector<32x128xf32>
      %c0_12 = arith.constant 0 : index
      %c0_13 = arith.constant 0 : index
      %13 = vector.load %arg5[%c0_12, %c0_13] : memref<1x128xf32, #tpu.memory_space<vmem>>, vector<1x128xf32>
      %14 = vector.broadcast %13 : vector<1x128xf32> to vector<32x128xf32>
      %15 = arith.addf %12, %14 : vector<32x128xf32>
      %cst_14 = arith.constant 0.000000e+00 : f32
      %16 = vector.broadcast %cst_14 : f32 to vector<32x128xf32>
      %17 = arith.maximumf %15, %16 : vector<32x128xf32>
      %18 = arith.truncf %17 : vector<32x128xf32> to vector<32x128xbf16>
      %c0_15 = arith.constant 0 : index
      %c0_16 = arith.constant 0 : index
      %19 = vector.load %arg6[%c0_15, %c0_16] : memref<32x128xbf16, #tpu.memory_space<vmem>>, vector<32x128xbf16>
      tpu.vector_store %arg6[%c0_15, %c0_16], %18 {strides = array<i32>} : memref<32x128xbf16, #tpu.memory_space<vmem>>, vector<32x128xbf16>,
    } else {
    }
    return
  }
  func.func @transform_0(%arg0: i32, %arg1: i32, %arg2: i32) -> (i32, i32) {
    %c0_i32 = arith.constant 0 : i32
    return %arg0, %arg2 : i32, i32
  }
  func.func @transform_1(%arg0: i32, %arg1: i32, %arg2: i32) -> (i32, i32) {
    %c0_i32 = arith.constant 0 : i32
    return %arg2, %arg1 : i32, i32
  }
  func.func @transform_2(%arg0: i32, %arg1: i32, %arg2: i32) -> (i32, i32) {
    %c0_i32 = arith.constant 0 : i32
    %c0_i32_0 = arith.constant 0 : i32
    return %c0_i32, %arg1 : i32, i32
  }
  func.func @transform_3(%arg0: i32, %arg1: i32, %arg2: i32) -> (i32, i32) {
    %c0_i32 = arith.constant 0 : i32
    return %arg0, %arg1 : i32, i32
  }
}

module attributes {stable_mosaic.version = 11 : i64} {
  func.func @_bneck_tail_kernel(%arg0: memref<32x128xbf16, #tpu.memory_space<vmem>>, %arg1: memref<128x256xbf16, #tpu.memory_space<vmem>>, %arg2: memref<1x256xf32, #tpu.memory_space<vmem>>, %arg3: memref<32x256xbf16, #tpu.memory_space<vmem>>, %arg4: memref<256x256xbf16, #tpu.memory_space<vmem>>, %arg5: memref<1x256xf32, #tpu.memory_space<vmem>>, %arg6: memref<32x256xbf16, #tpu.memory_space<vmem>>) attributes {dimension_semantics = [], scalar_prefetch = 0 : i64, scratch_operands = 0 : i64, tpu.core_type = #tpu.core_type<tc>} {
    %c0 = arith.constant 0 : index
    %c0_0 = arith.constant 0 : index
    %0 = vector.load %arg0[%c0, %c0_0] : memref<32x128xbf16, #tpu.memory_space<vmem>>, vector<32x128xbf16>
    %c0_1 = arith.constant 0 : index
    %c0_2 = arith.constant 0 : index
    %1 = vector.load %arg1[%c0_1, %c0_2] : memref<128x256xbf16, #tpu.memory_space<vmem>>, vector<128x256xbf16>
    %cst = arith.constant dense<0.000000e+00> : vector<32x256xf32>
    %2 = tpu.matmul %0, %1, %cst {dimension_numbers = #tpu.dot_dimension_numbers<[1], [0], [0], [1], [0, 0, 1, 1], [], []>} : vector<32x128xbf16>, vector<128x256xbf16>, vector<32x256xf32> -> vector<32x256xf32>
    %c0_3 = arith.constant 0 : index
    %c0_4 = arith.constant 0 : index
    %3 = vector.load %arg2[%c0_3, %c0_4] : memref<1x256xf32, #tpu.memory_space<vmem>>, vector<1x256xf32>
    %4 = vector.broadcast %3 : vector<1x256xf32> to vector<32x256xf32>
    %5 = arith.addf %2, %4 : vector<32x256xf32>
    %c0_5 = arith.constant 0 : index
    %c0_6 = arith.constant 0 : index
    %6 = vector.load %arg3[%c0_5, %c0_6] : memref<32x256xbf16, #tpu.memory_space<vmem>>, vector<32x256xbf16>
    %c0_7 = arith.constant 0 : index
    %c0_8 = arith.constant 0 : index
    %7 = vector.load %arg4[%c0_7, %c0_8] : memref<256x256xbf16, #tpu.memory_space<vmem>>, vector<256x256xbf16>
    %cst_9 = arith.constant dense<0.000000e+00> : vector<32x256xf32>
    %8 = tpu.matmul %6, %7, %cst_9 {dimension_numbers = #tpu.dot_dimension_numbers<[1], [0], [0], [1], [0, 0, 1, 1], [], []>} : vector<32x256xbf16>, vector<256x256xbf16>, vector<32x256xf32> -> vector<32x256xf32>
    %9 = arith.addf %5, %8 : vector<32x256xf32>
    %c0_10 = arith.constant 0 : index
    %c0_11 = arith.constant 0 : index
    %10 = vector.load %arg5[%c0_10, %c0_11] : memref<1x256xf32, #tpu.memory_space<vmem>>, vector<1x256xf32>
    %11 = vector.broadcast %10 : vector<1x256xf32> to vector<32x256xf32>
    %12 = arith.addf %9, %11 : vector<32x256xf32>
    %cst_12 = arith.constant 0.000000e+00 : f32
    %13 = vector.broadcast %cst_12 : f32 to vector<32x256xf32>
    %14 = arith.maximumf %12, %13 : vector<32x256xf32>
    %15 = arith.truncf %14 : vector<32x256xf32> to vector<32x256xbf16>
    %c0_13 = arith.constant 0 : index
    %c0_14 = arith.constant 0 : index
    %16 = vector.load %arg6[%c0_13, %c0_14] : memref<32x256xbf16, #tpu.memory_space<vmem>>, vector<32x256xbf16>
    tpu.vector_store %arg6[%c0_13, %c0_14], %15 {strides = array<i32>} : memref<32x256xbf16, #tpu.memory_space<vmem>>, vector<32x256xbf16>,
    return
  }
}

module attributes {stable_mosaic.version = 11 : i64} {
  func.func @_linear_kernel(%arg0: i32, %arg1: i32, %arg2: i32, %arg3: memref<8x1152xbf16, #tpu.memory_space<vmem>>, %arg4: memref<1152x128xbf16, #tpu.memory_space<vmem>>, %arg5: memref<1x128xf32, #tpu.memory_space<vmem>>, %arg6: memref<8x128xbf16, #tpu.memory_space<vmem>>, %arg7: memref<8x128xf32, #tpu.memory_space<vmem>>) attributes {dimension_semantics = [#tpu.dimension_semantics<parallel>, #tpu.dimension_semantics<parallel>, #tpu.dimension_semantics<arbitrary>], iteration_bounds = array<i64: 1, 1, 1>, scalar_prefetch = 0 : i64, scratch_operands = 1 : i64, tpu.core_type = #tpu.core_type<tc>, window_params = [{transform_indices = @transform_0, window_bounds = array<i64: 8, 1152>}, {transform_indices = @transform_1, window_bounds = array<i64: 1152, 128>}, {transform_indices = @transform_2, window_bounds = array<i64: 1, 128>}, {transform_indices = @transform_3, window_bounds = array<i64: 8, 128>}]} {
    %c0_i32 = arith.constant 0 : i32
    %0 = arith.cmpi eq, %arg2, %c0_i32 : i32
    %1 = arith.extui %0 : i1 to i32
    %c0_i32_0 = arith.constant 0 : i32
    %2 = arith.cmpi ne, %1, %c0_i32_0 : i32
    scf.if %2 {
      %cst_10 = arith.constant 0.000000e+00 : f32
      %12 = vector.broadcast %cst_10 : f32 to vector<8x128xf32>
      %c0_11 = arith.constant 0 : index
      %c0_12 = arith.constant 0 : index
      %13 = vector.load %arg7[%c0_11, %c0_12] : memref<8x128xf32, #tpu.memory_space<vmem>>, vector<8x128xf32>
      tpu.vector_store %arg7[%c0_11, %c0_12], %12 {strides = array<i32>} : memref<8x128xf32, #tpu.memory_space<vmem>>, vector<8x128xf32>,
    } else {
    }
    %c0 = arith.constant 0 : index
    %c0_1 = arith.constant 0 : index
    %3 = vector.load %arg7[%c0, %c0_1] : memref<8x128xf32, #tpu.memory_space<vmem>>, vector<8x128xf32>
    %c0_2 = arith.constant 0 : index
    %c0_3 = arith.constant 0 : index
    %4 = vector.load %arg3[%c0_2, %c0_3] : memref<8x1152xbf16, #tpu.memory_space<vmem>>, vector<8x1152xbf16>
    %c0_4 = arith.constant 0 : index
    %c0_5 = arith.constant 0 : index
    %5 = vector.load %arg4[%c0_4, %c0_5] : memref<1152x128xbf16, #tpu.memory_space<vmem>>, vector<1152x128xbf16>
    %cst = arith.constant dense<0.000000e+00> : vector<8x128xf32>
    %6 = tpu.matmul %4, %5, %cst {dimension_numbers = #tpu.dot_dimension_numbers<[1], [0], [0], [1], [0, 0, 1, 1], [], []>} : vector<8x1152xbf16>, vector<1152x128xbf16>, vector<8x128xf32> -> vector<8x128xf32>
    %7 = arith.addf %3, %6 : vector<8x128xf32>
    %c0_6 = arith.constant 0 : index
    %c0_7 = arith.constant 0 : index
    %8 = vector.load %arg7[%c0_6, %c0_7] : memref<8x128xf32, #tpu.memory_space<vmem>>, vector<8x128xf32>
    tpu.vector_store %arg7[%c0_6, %c0_7], %7 {strides = array<i32>} : memref<8x128xf32, #tpu.memory_space<vmem>>, vector<8x128xf32>,
    %c0_i32_8 = arith.constant 0 : i32
    %9 = arith.cmpi eq, %arg2, %c0_i32_8 : i32
    %10 = arith.extui %9 : i1 to i32
    %c0_i32_9 = arith.constant 0 : i32
    %11 = arith.cmpi ne, %10, %c0_i32_9 : i32
    scf.if %11 {
      %c0_10 = arith.constant 0 : index
      %c0_11 = arith.constant 0 : index
      %12 = vector.load %arg7[%c0_10, %c0_11] : memref<8x128xf32, #tpu.memory_space<vmem>>, vector<8x128xf32>
      %c0_12 = arith.constant 0 : index
      %c0_13 = arith.constant 0 : index
      %13 = vector.load %arg5[%c0_12, %c0_13] : memref<1x128xf32, #tpu.memory_space<vmem>>, vector<1x128xf32>
      %14 = vector.broadcast %13 : vector<1x128xf32> to vector<8x128xf32>
      %15 = arith.addf %12, %14 : vector<8x128xf32>
      %cst_14 = arith.constant 0.000000e+00 : f32
      %16 = vector.broadcast %cst_14 : f32 to vector<8x128xf32>
      %17 = arith.maximumf %15, %16 : vector<8x128xf32>
      %18 = arith.truncf %17 : vector<8x128xf32> to vector<8x128xbf16>
      %c0_15 = arith.constant 0 : index
      %c0_16 = arith.constant 0 : index
      %19 = vector.load %arg6[%c0_15, %c0_16] : memref<8x128xbf16, #tpu.memory_space<vmem>>, vector<8x128xbf16>
      tpu.vector_store %arg6[%c0_15, %c0_16], %18 {strides = array<i32>} : memref<8x128xbf16, #tpu.memory_space<vmem>>, vector<8x128xbf16>,
    } else {
    }
    return
  }
  func.func @transform_0(%arg0: i32, %arg1: i32, %arg2: i32) -> (i32, i32) {
    %c0_i32 = arith.constant 0 : i32
    return %arg0, %arg2 : i32, i32
  }
  func.func @transform_1(%arg0: i32, %arg1: i32, %arg2: i32) -> (i32, i32) {
    %c0_i32 = arith.constant 0 : i32
    return %arg2, %arg1 : i32, i32
  }
  func.func @transform_2(%arg0: i32, %arg1: i32, %arg2: i32) -> (i32, i32) {
    %c0_i32 = arith.constant 0 : i32
    %c0_i32_0 = arith.constant 0 : i32
    return %c0_i32, %arg1 : i32, i32
  }
  func.func @transform_3(%arg0: i32, %arg1: i32, %arg2: i32) -> (i32, i32) {
    %c0_i32 = arith.constant 0 : i32
    return %arg0, %arg1 : i32, i32
  }
}

module attributes {stable_mosaic.version = 11 : i64} {
  func.func @_bneck_tail_kernel(%arg0: memref<8x128xbf16, #tpu.memory_space<vmem>>, %arg1: memref<128x256xbf16, #tpu.memory_space<vmem>>, %arg2: memref<1x256xf32, #tpu.memory_space<vmem>>, %arg3: memref<8x256xbf16, #tpu.memory_space<vmem>>, %arg4: memref<256x256xbf16, #tpu.memory_space<vmem>>, %arg5: memref<1x256xf32, #tpu.memory_space<vmem>>, %arg6: memref<8x256xbf16, #tpu.memory_space<vmem>>) attributes {dimension_semantics = [], scalar_prefetch = 0 : i64, scratch_operands = 0 : i64, tpu.core_type = #tpu.core_type<tc>} {
    %c0 = arith.constant 0 : index
    %c0_0 = arith.constant 0 : index
    %0 = vector.load %arg0[%c0, %c0_0] : memref<8x128xbf16, #tpu.memory_space<vmem>>, vector<8x128xbf16>
    %c0_1 = arith.constant 0 : index
    %c0_2 = arith.constant 0 : index
    %1 = vector.load %arg1[%c0_1, %c0_2] : memref<128x256xbf16, #tpu.memory_space<vmem>>, vector<128x256xbf16>
    %cst = arith.constant dense<0.000000e+00> : vector<8x256xf32>
    %2 = tpu.matmul %0, %1, %cst {dimension_numbers = #tpu.dot_dimension_numbers<[1], [0], [0], [1], [0, 0, 1, 1], [], []>} : vector<8x128xbf16>, vector<128x256xbf16>, vector<8x256xf32> -> vector<8x256xf32>
    %c0_3 = arith.constant 0 : index
    %c0_4 = arith.constant 0 : index
    %3 = vector.load %arg2[%c0_3, %c0_4] : memref<1x256xf32, #tpu.memory_space<vmem>>, vector<1x256xf32>
    %4 = vector.broadcast %3 : vector<1x256xf32> to vector<8x256xf32>
    %5 = arith.addf %2, %4 : vector<8x256xf32>
    %c0_5 = arith.constant 0 : index
    %c0_6 = arith.constant 0 : index
    %6 = vector.load %arg3[%c0_5, %c0_6] : memref<8x256xbf16, #tpu.memory_space<vmem>>, vector<8x256xbf16>
    %c0_7 = arith.constant 0 : index
    %c0_8 = arith.constant 0 : index
    %7 = vector.load %arg4[%c0_7, %c0_8] : memref<256x256xbf16, #tpu.memory_space<vmem>>, vector<256x256xbf16>
    %cst_9 = arith.constant dense<0.000000e+00> : vector<8x256xf32>
    %8 = tpu.matmul %6, %7, %cst_9 {dimension_numbers = #tpu.dot_dimension_numbers<[1], [0], [0], [1], [0, 0, 1, 1], [], []>} : vector<8x256xbf16>, vector<256x256xbf16>, vector<8x256xf32> -> vector<8x256xf32>
    %9 = arith.addf %5, %8 : vector<8x256xf32>
    %c0_10 = arith.constant 0 : index
    %c0_11 = arith.constant 0 : index
    %10 = vector.load %arg5[%c0_10, %c0_11] : memref<1x256xf32, #tpu.memory_space<vmem>>, vector<1x256xf32>
    %11 = vector.broadcast %10 : vector<1x256xf32> to vector<8x256xf32>
    %12 = arith.addf %9, %11 : vector<8x256xf32>
    %cst_12 = arith.constant 0.000000e+00 : f32
    %13 = vector.broadcast %cst_12 : f32 to vector<8x256xf32>
    %14 = arith.maximumf %12, %13 : vector<8x256xf32>
    %15 = arith.truncf %14 : vector<8x256xf32> to vector<8x256xbf16>
    %c0_13 = arith.constant 0 : index
    %c0_14 = arith.constant 0 : index
    %16 = vector.load %arg6[%c0_13, %c0_14] : memref<8x256xbf16, #tpu.memory_space<vmem>>, vector<8x256xbf16>
    tpu.vector_store %arg6[%c0_13, %c0_14], %15 {strides = array<i32>} : memref<8x256xbf16, #tpu.memory_space<vmem>>, vector<8x256xbf16>,
    return
  }
}

module attributes {stable_mosaic.version = 11 : i64} {
  func.func @_linear_kernel(%arg0: i32, %arg1: i32, %arg2: i32, %arg3: memref<8x256xbf16, #tpu.memory_space<vmem>>, %arg4: memref<256x128xbf16, #tpu.memory_space<vmem>>, %arg5: memref<1x128xf32, #tpu.memory_space<vmem>>, %arg6: memref<8x128xbf16, #tpu.memory_space<vmem>>, %arg7: memref<8x128xf32, #tpu.memory_space<vmem>>) attributes {dimension_semantics = [#tpu.dimension_semantics<parallel>, #tpu.dimension_semantics<parallel>, #tpu.dimension_semantics<arbitrary>], iteration_bounds = array<i64: 1, 1, 1>, scalar_prefetch = 0 : i64, scratch_operands = 1 : i64, tpu.core_type = #tpu.core_type<tc>, window_params = [{transform_indices = @transform_0, window_bounds = array<i64: 8, 256>}, {transform_indices = @transform_1, window_bounds = array<i64: 256, 128>}, {transform_indices = @transform_2, window_bounds = array<i64: 1, 128>}, {transform_indices = @transform_3, window_bounds = array<i64: 8, 128>}]} {
    %c0_i32 = arith.constant 0 : i32
    %0 = arith.cmpi eq, %arg2, %c0_i32 : i32
    %1 = arith.extui %0 : i1 to i32
    %c0_i32_0 = arith.constant 0 : i32
    %2 = arith.cmpi ne, %1, %c0_i32_0 : i32
    scf.if %2 {
      %cst_10 = arith.constant 0.000000e+00 : f32
      %12 = vector.broadcast %cst_10 : f32 to vector<8x128xf32>
      %c0_11 = arith.constant 0 : index
      %c0_12 = arith.constant 0 : index
      %13 = vector.load %arg7[%c0_11, %c0_12] : memref<8x128xf32, #tpu.memory_space<vmem>>, vector<8x128xf32>
      tpu.vector_store %arg7[%c0_11, %c0_12], %12 {strides = array<i32>} : memref<8x128xf32, #tpu.memory_space<vmem>>, vector<8x128xf32>,
    } else {
    }
    %c0 = arith.constant 0 : index
    %c0_1 = arith.constant 0 : index
    %3 = vector.load %arg7[%c0, %c0_1] : memref<8x128xf32, #tpu.memory_space<vmem>>, vector<8x128xf32>
    %c0_2 = arith.constant 0 : index
    %c0_3 = arith.constant 0 : index
    %4 = vector.load %arg3[%c0_2, %c0_3] : memref<8x256xbf16, #tpu.memory_space<vmem>>, vector<8x256xbf16>
    %c0_4 = arith.constant 0 : index
    %c0_5 = arith.constant 0 : index
    %5 = vector.load %arg4[%c0_4, %c0_5] : memref<256x128xbf16, #tpu.memory_space<vmem>>, vector<256x128xbf16>
    %cst = arith.constant dense<0.000000e+00> : vector<8x128xf32>
    %6 = tpu.matmul %4, %5, %cst {dimension_numbers = #tpu.dot_dimension_numbers<[1], [0], [0], [1], [0, 0, 1, 1], [], []>} : vector<8x256xbf16>, vector<256x128xbf16>, vector<8x128xf32> -> vector<8x128xf32>
    %7 = arith.addf %3, %6 : vector<8x128xf32>
    %c0_6 = arith.constant 0 : index
    %c0_7 = arith.constant 0 : index
    %8 = vector.load %arg7[%c0_6, %c0_7] : memref<8x128xf32, #tpu.memory_space<vmem>>, vector<8x128xf32>
    tpu.vector_store %arg7[%c0_6, %c0_7], %7 {strides = array<i32>} : memref<8x128xf32, #tpu.memory_space<vmem>>, vector<8x128xf32>,
    %c0_i32_8 = arith.constant 0 : i32
    %9 = arith.cmpi eq, %arg2, %c0_i32_8 : i32
    %10 = arith.extui %9 : i1 to i32
    %c0_i32_9 = arith.constant 0 : i32
    %11 = arith.cmpi ne, %10, %c0_i32_9 : i32
    scf.if %11 {
      %c0_10 = arith.constant 0 : index
      %c0_11 = arith.constant 0 : index
      %12 = vector.load %arg7[%c0_10, %c0_11] : memref<8x128xf32, #tpu.memory_space<vmem>>, vector<8x128xf32>
      %c0_12 = arith.constant 0 : index
      %c0_13 = arith.constant 0 : index
      %13 = vector.load %arg5[%c0_12, %c0_13] : memref<1x128xf32, #tpu.memory_space<vmem>>, vector<1x128xf32>
      %14 = vector.broadcast %13 : vector<1x128xf32> to vector<8x128xf32>
      %15 = arith.addf %12, %14 : vector<8x128xf32>
      %cst_14 = arith.constant 0.000000e+00 : f32
      %16 = vector.broadcast %cst_14 : f32 to vector<8x128xf32>
      %17 = arith.maximumf %15, %16 : vector<8x128xf32>
      %18 = arith.truncf %17 : vector<8x128xf32> to vector<8x128xbf16>
      %c0_15 = arith.constant 0 : index
      %c0_16 = arith.constant 0 : index
      %19 = vector.load %arg6[%c0_15, %c0_16] : memref<8x128xbf16, #tpu.memory_space<vmem>>, vector<8x128xbf16>
      tpu.vector_store %arg6[%c0_15, %c0_16], %18 {strides = array<i32>} : memref<8x128xbf16, #tpu.memory_space<vmem>>, vector<8x128xbf16>,
    } else {
    }
    return
  }
  func.func @transform_0(%arg0: i32, %arg1: i32, %arg2: i32) -> (i32, i32) {
    %c0_i32 = arith.constant 0 : i32
    return %arg0, %arg2 : i32, i32
  }
  func.func @transform_1(%arg0: i32, %arg1: i32, %arg2: i32) -> (i32, i32) {
    %c0_i32 = arith.constant 0 : i32
    return %arg2, %arg1 : i32, i32
  }
  func.func @transform_2(%arg0: i32, %arg1: i32, %arg2: i32) -> (i32, i32) {
    %c0_i32 = arith.constant 0 : i32
    %c0_i32_0 = arith.constant 0 : i32
    return %c0_i32, %arg1 : i32, i32
  }
  func.func @transform_3(%arg0: i32, %arg1: i32, %arg2: i32) -> (i32, i32) {
    %c0_i32 = arith.constant 0 : i32
    return %arg0, %arg1 : i32, i32
  }
}

module attributes {stable_mosaic.version = 11 : i64} {
  func.func @_linear_kernel(%arg0: i32, %arg1: i32, %arg2: i32, %arg3: memref<2x1152xbf16, #tpu.memory_space<vmem>>, %arg4: memref<1152x128xbf16, #tpu.memory_space<vmem>>, %arg5: memref<1x128xf32, #tpu.memory_space<vmem>>, %arg6: memref<2x128xbf16, #tpu.memory_space<vmem>>, %arg7: memref<2x128xf32, #tpu.memory_space<vmem>>) attributes {dimension_semantics = [#tpu.dimension_semantics<parallel>, #tpu.dimension_semantics<parallel>, #tpu.dimension_semantics<arbitrary>], iteration_bounds = array<i64: 1, 1, 1>, scalar_prefetch = 0 : i64, scratch_operands = 1 : i64, tpu.core_type = #tpu.core_type<tc>, window_params = [{transform_indices = @transform_0, window_bounds = array<i64: 2, 1152>}, {transform_indices = @transform_1, window_bounds = array<i64: 1152, 128>}, {transform_indices = @transform_2, window_bounds = array<i64: 1, 128>}, {transform_indices = @transform_3, window_bounds = array<i64: 2, 128>}]} {
    %c0_i32 = arith.constant 0 : i32
    %0 = arith.cmpi eq, %arg2, %c0_i32 : i32
    %1 = arith.extui %0 : i1 to i32
    %c0_i32_0 = arith.constant 0 : i32
    %2 = arith.cmpi ne, %1, %c0_i32_0 : i32
    scf.if %2 {
      %cst_10 = arith.constant 0.000000e+00 : f32
      %12 = vector.broadcast %cst_10 : f32 to vector<2x128xf32>
      %c0_11 = arith.constant 0 : index
      %c0_12 = arith.constant 0 : index
      %13 = vector.load %arg7[%c0_11, %c0_12] : memref<2x128xf32, #tpu.memory_space<vmem>>, vector<2x128xf32>
      tpu.vector_store %arg7[%c0_11, %c0_12], %12 {strides = array<i32>} : memref<2x128xf32, #tpu.memory_space<vmem>>, vector<2x128xf32>,
    } else {
    }
    %c0 = arith.constant 0 : index
    %c0_1 = arith.constant 0 : index
    %3 = vector.load %arg7[%c0, %c0_1] : memref<2x128xf32, #tpu.memory_space<vmem>>, vector<2x128xf32>
    %c0_2 = arith.constant 0 : index
    %c0_3 = arith.constant 0 : index
    %4 = vector.load %arg3[%c0_2, %c0_3] : memref<2x1152xbf16, #tpu.memory_space<vmem>>, vector<2x1152xbf16>
    %c0_4 = arith.constant 0 : index
    %c0_5 = arith.constant 0 : index
    %5 = vector.load %arg4[%c0_4, %c0_5] : memref<1152x128xbf16, #tpu.memory_space<vmem>>, vector<1152x128xbf16>
    %cst = arith.constant dense<0.000000e+00> : vector<2x128xf32>
    %6 = tpu.matmul %4, %5, %cst {dimension_numbers = #tpu.dot_dimension_numbers<[1], [0], [0], [1], [0, 0, 1, 1], [], []>} : vector<2x1152xbf16>, vector<1152x128xbf16>, vector<2x128xf32> -> vector<2x128xf32>
    %7 = arith.addf %3, %6 : vector<2x128xf32>
    %c0_6 = arith.constant 0 : index
    %c0_7 = arith.constant 0 : index
    %8 = vector.load %arg7[%c0_6, %c0_7] : memref<2x128xf32, #tpu.memory_space<vmem>>, vector<2x128xf32>
    tpu.vector_store %arg7[%c0_6, %c0_7], %7 {strides = array<i32>} : memref<2x128xf32, #tpu.memory_space<vmem>>, vector<2x128xf32>,
    %c0_i32_8 = arith.constant 0 : i32
    %9 = arith.cmpi eq, %arg2, %c0_i32_8 : i32
    %10 = arith.extui %9 : i1 to i32
    %c0_i32_9 = arith.constant 0 : i32
    %11 = arith.cmpi ne, %10, %c0_i32_9 : i32
    scf.if %11 {
      %c0_10 = arith.constant 0 : index
      %c0_11 = arith.constant 0 : index
      %12 = vector.load %arg7[%c0_10, %c0_11] : memref<2x128xf32, #tpu.memory_space<vmem>>, vector<2x128xf32>
      %c0_12 = arith.constant 0 : index
      %c0_13 = arith.constant 0 : index
      %13 = vector.load %arg5[%c0_12, %c0_13] : memref<1x128xf32, #tpu.memory_space<vmem>>, vector<1x128xf32>
      %14 = vector.broadcast %13 : vector<1x128xf32> to vector<2x128xf32>
      %15 = arith.addf %12, %14 : vector<2x128xf32>
      %cst_14 = arith.constant 0.000000e+00 : f32
      %16 = vector.broadcast %cst_14 : f32 to vector<2x128xf32>
      %17 = arith.maximumf %15, %16 : vector<2x128xf32>
      %18 = arith.truncf %17 : vector<2x128xf32> to vector<2x128xbf16>
      %c0_15 = arith.constant 0 : index
      %c0_16 = arith.constant 0 : index
      %19 = vector.load %arg6[%c0_15, %c0_16] : memref<2x128xbf16, #tpu.memory_space<vmem>>, vector<2x128xbf16>
      tpu.vector_store %arg6[%c0_15, %c0_16], %18 {strides = array<i32>} : memref<2x128xbf16, #tpu.memory_space<vmem>>, vector<2x128xbf16>,
    } else {
    }
    return
  }
  func.func @transform_0(%arg0: i32, %arg1: i32, %arg2: i32) -> (i32, i32) {
    %c0_i32 = arith.constant 0 : i32
    return %arg0, %arg2 : i32, i32
  }
  func.func @transform_1(%arg0: i32, %arg1: i32, %arg2: i32) -> (i32, i32) {
    %c0_i32 = arith.constant 0 : i32
    return %arg2, %arg1 : i32, i32
  }
  func.func @transform_2(%arg0: i32, %arg1: i32, %arg2: i32) -> (i32, i32) {
    %c0_i32 = arith.constant 0 : i32
    %c0_i32_0 = arith.constant 0 : i32
    return %c0_i32, %arg1 : i32, i32
  }
  func.func @transform_3(%arg0: i32, %arg1: i32, %arg2: i32) -> (i32, i32) {
    %c0_i32 = arith.constant 0 : i32
    return %arg0, %arg1 : i32, i32
  }
}

module attributes {stable_mosaic.version = 11 : i64} {
  func.func @_bneck_tail_pool_fc_kernel(%arg0: memref<2x128xbf16, #tpu.memory_space<vmem>>, %arg1: memref<128x256xbf16, #tpu.memory_space<vmem>>, %arg2: memref<1x256xf32, #tpu.memory_space<vmem>>, %arg3: memref<2x256xbf16, #tpu.memory_space<vmem>>, %arg4: memref<256x256xbf16, #tpu.memory_space<vmem>>, %arg5: memref<1x256xf32, #tpu.memory_space<vmem>>, %arg6: memref<256x128xbf16, #tpu.memory_space<vmem>>, %arg7: memref<1x128xf32, #tpu.memory_space<vmem>>, %arg8: memref<2x128xf32, #tpu.memory_space<vmem>>) attributes {dimension_semantics = [], scalar_prefetch = 0 : i64, scratch_operands = 0 : i64, tpu.core_type = #tpu.core_type<tc>} {
    %c0 = arith.constant 0 : index
    %c0_0 = arith.constant 0 : index
    %0 = vector.load %arg0[%c0, %c0_0] : memref<2x128xbf16, #tpu.memory_space<vmem>>, vector<2x128xbf16>
    %c0_1 = arith.constant 0 : index
    %c0_2 = arith.constant 0 : index
    %1 = vector.load %arg1[%c0_1, %c0_2] : memref<128x256xbf16, #tpu.memory_space<vmem>>, vector<128x256xbf16>
    %cst = arith.constant dense<0.000000e+00> : vector<2x256xf32>
    %2 = tpu.matmul %0, %1, %cst {dimension_numbers = #tpu.dot_dimension_numbers<[1], [0], [0], [1], [0, 0, 1, 1], [], []>} : vector<2x128xbf16>, vector<128x256xbf16>, vector<2x256xf32> -> vector<2x256xf32>
    %c0_3 = arith.constant 0 : index
    %c0_4 = arith.constant 0 : index
    %3 = vector.load %arg2[%c0_3, %c0_4] : memref<1x256xf32, #tpu.memory_space<vmem>>, vector<1x256xf32>
    %4 = vector.broadcast %3 : vector<1x256xf32> to vector<2x256xf32>
    %5 = arith.addf %2, %4 : vector<2x256xf32>
    %c0_5 = arith.constant 0 : index
    %c0_6 = arith.constant 0 : index
    %6 = vector.load %arg3[%c0_5, %c0_6] : memref<2x256xbf16, #tpu.memory_space<vmem>>, vector<2x256xbf16>
    %c0_7 = arith.constant 0 : index
    %c0_8 = arith.constant 0 : index
    %7 = vector.load %arg4[%c0_7, %c0_8] : memref<256x256xbf16, #tpu.memory_space<vmem>>, vector<256x256xbf16>
    %cst_9 = arith.constant dense<0.000000e+00> : vector<2x256xf32>
    %8 = tpu.matmul %6, %7, %cst_9 {dimension_numbers = #tpu.dot_dimension_numbers<[1], [0], [0], [1], [0, 0, 1, 1], [], []>} : vector<2x256xbf16>, vector<256x256xbf16>, vector<2x256xf32> -> vector<2x256xf32>
    %9 = arith.addf %5, %8 : vector<2x256xf32>
    %c0_10 = arith.constant 0 : index
    %c0_11 = arith.constant 0 : index
    %10 = vector.load %arg5[%c0_10, %c0_11] : memref<1x256xf32, #tpu.memory_space<vmem>>, vector<1x256xf32>
    %11 = vector.broadcast %10 : vector<1x256xf32> to vector<2x256xf32>
    %12 = arith.addf %9, %11 : vector<2x256xf32>
    %cst_12 = arith.constant 0.000000e+00 : f32
    %13 = vector.broadcast %cst_12 : f32 to vector<2x256xf32>
    %14 = arith.maximumf %12, %13 : vector<2x256xf32>
    %15 = arith.truncf %14 : vector<2x256xf32> to vector<2x256xbf16>
    %c0_13 = arith.constant 0 : index
    %c0_14 = arith.constant 0 : index
    %16 = vector.load %arg6[%c0_13, %c0_14] : memref<256x128xbf16, #tpu.memory_space<vmem>>, vector<256x128xbf16>
    %cst_15 = arith.constant dense<0.000000e+00> : vector<2x128xf32>
    %17 = tpu.matmul %15, %16, %cst_15 {dimension_numbers = #tpu.dot_dimension_numbers<[1], [0], [0], [1], [0, 0, 1, 1], [], []>} : vector<2x256xbf16>, vector<256x128xbf16>, vector<2x128xf32> -> vector<2x128xf32>
    %c0_16 = arith.constant 0 : index
    %c0_17 = arith.constant 0 : index
    %18 = vector.load %arg7[%c0_16, %c0_17] : memref<1x128xf32, #tpu.memory_space<vmem>>, vector<1x128xf32>
    %19 = vector.broadcast %18 : vector<1x128xf32> to vector<2x128xf32>
    %20 = arith.addf %17, %19 : vector<2x128xf32>
    %c0_18 = arith.constant 0 : index
    %c0_19 = arith.constant 0 : index
    %21 = vector.load %arg8[%c0_18, %c0_19] : memref<2x128xf32, #tpu.memory_space<vmem>>, vector<2x128xf32>
    tpu.vector_store %arg8[%c0_18, %c0_19], %20 {strides = array<i32>} : memref<2x128xf32, #tpu.memory_space<vmem>>, vector<2x128xf32>,
    return
  }
}

module attributes {stable_mosaic.version = 11 : i64} {
  func.func @_transformer_layer_kernel(%arg0: memref<16x128xf32, #tpu.memory_space<vmem>>, %arg1: memref<16x16xf32, #tpu.memory_space<vmem>>, %arg2: memref<1x128xf32, #tpu.memory_space<vmem>>, %arg3: memref<1x128xf32, #tpu.memory_space<vmem>>, %arg4: memref<128x384xbf16, #tpu.memory_space<vmem>>, %arg5: memref<1x384xf32, #tpu.memory_space<vmem>>, %arg6: memref<128x128xbf16, #tpu.memory_space<vmem>>, %arg7: memref<1x128xf32, #tpu.memory_space<vmem>>, %arg8: memref<1x128xf32, #tpu.memory_space<vmem>>, %arg9: memref<1x128xf32, #tpu.memory_space<vmem>>, %arg10: memref<128x512xbf16, #tpu.memory_space<vmem>>, %arg11: memref<1x512xf32, #tpu.memory_space<vmem>>, %arg12: memref<512x128xbf16, #tpu.memory_space<vmem>>, %arg13: memref<1x128xf32, #tpu.memory_space<vmem>>, %arg14: memref<16x128xf32, #tpu.memory_space<vmem>>) attributes {dimension_semantics = [], scalar_prefetch = 0 : i64, scratch_operands = 0 : i64, tpu.core_type = #tpu.core_type<tc>} {
    %c0 = arith.constant 0 : index
    %c0_0 = arith.constant 0 : index
    %0 = vector.load %arg0[%c0, %c0_0] : memref<16x128xf32, #tpu.memory_space<vmem>>, vector<16x128xf32>
    %c0_1 = arith.constant 0 : index
    %c0_2 = arith.constant 0 : index
    %1 = vector.load %arg1[%c0_1, %c0_2] : memref<16x16xf32, #tpu.memory_space<vmem>>, vector<16x16xf32>
    %c0_3 = arith.constant 0 : index
    %c0_4 = arith.constant 0 : index
    %2 = vector.load %arg2[%c0_3, %c0_4] : memref<1x128xf32, #tpu.memory_space<vmem>>, vector<1x128xf32>
    %c0_5 = arith.constant 0 : index
    %c0_6 = arith.constant 0 : index
    %3 = vector.load %arg3[%c0_5, %c0_6] : memref<1x128xf32, #tpu.memory_space<vmem>>, vector<1x128xf32>
    %cst = arith.constant dense<0.000000e+00> : vector<16xf32>
    %4 = vector.multi_reduction <add>, %0, %cst [1] : vector<16x128xf32> to vector<16xf32>
    %5 = vector.shape_cast %4 : vector<16xf32> to vector<16x1xf32>
    %cst_7 = arith.constant 1.280000e+02 : f32
    %6 = vector.broadcast %cst_7 : f32 to vector<16x1xf32>
    %7 = arith.divf %5, %6 : vector<16x1xf32>
    %8 = vector.broadcast %7 : vector<16x1xf32> to vector<16x128xf32>
    %9 = arith.subf %0, %8 : vector<16x128xf32>
    %10 = arith.mulf %9, %9 : vector<16x128xf32>
    %cst_8 = arith.constant dense<0.000000e+00> : vector<16xf32>
    %11 = vector.multi_reduction <add>, %10, %cst_8 [1] : vector<16x128xf32> to vector<16xf32>
    %12 = vector.shape_cast %11 : vector<16xf32> to vector<16x1xf32>
    %cst_9 = arith.constant 1.280000e+02 : f32
    %13 = vector.broadcast %cst_9 : f32 to vector<16x1xf32>
    %14 = arith.divf %12, %13 : vector<16x1xf32>
    %cst_10 = arith.constant 9.99999974E-6 : f32
    %15 = vector.broadcast %cst_10 : f32 to vector<16x1xf32>
    %16 = arith.addf %14, %15 : vector<16x1xf32>
    %17 = math.rsqrt %16 : vector<16x1xf32>
    %18 = vector.broadcast %17 : vector<16x1xf32> to vector<16x128xf32>
    %19 = arith.mulf %9, %18 : vector<16x128xf32>
    %20 = vector.broadcast %2 : vector<1x128xf32> to vector<16x128xf32>
    %21 = arith.mulf %19, %20 : vector<16x128xf32>
    %22 = vector.broadcast %3 : vector<1x128xf32> to vector<16x128xf32>
    %23 = arith.addf %21, %22 : vector<16x128xf32>
    %24 = arith.truncf %23 : vector<16x128xf32> to vector<16x128xbf16>
    %c0_11 = arith.constant 0 : index
    %c0_12 = arith.constant 0 : index
    %25 = vector.load %arg4[%c0_11, %c0_12] : memref<128x384xbf16, #tpu.memory_space<vmem>>, vector<128x384xbf16>
    %cst_13 = arith.constant dense<0.000000e+00> : vector<16x384xf32>
    %26 = tpu.matmul %24, %25, %cst_13 {dimension_numbers = #tpu.dot_dimension_numbers<[1], [0], [0], [1], [0, 0, 1, 1], [], []>} : vector<16x128xbf16>, vector<128x384xbf16>, vector<16x384xf32> -> vector<16x384xf32>
    %c0_14 = arith.constant 0 : index
    %c0_15 = arith.constant 0 : index
    %27 = vector.load %arg5[%c0_14, %c0_15] : memref<1x384xf32, #tpu.memory_space<vmem>>, vector<1x384xf32>
    %28 = vector.broadcast %27 : vector<1x384xf32> to vector<16x384xf32>
    %29 = arith.addf %26, %28 : vector<16x384xf32>
    %30 = vector.extract_strided_slice %29 {offsets = [0, 0], sizes = [16, 32], strides = [1, 1]} : vector<16x384xf32> to vector<16x32xf32>
    %cst_16 = arith.constant 0.176776692 : f32
    %31 = vector.broadcast %cst_16 : f32 to vector<16x32xf32>
    %32 = arith.mulf %30, %31 : vector<16x32xf32>
    %33 = arith.truncf %32 : vector<16x32xf32> to vector<16x32xbf16>
    %34 = vector.extract_strided_slice %29 {offsets = [0, 128], sizes = [16, 32], strides = [1, 1]} : vector<16x384xf32> to vector<16x32xf32>
    %35 = arith.truncf %34 : vector<16x32xf32> to vector<16x32xbf16>
    %36 = vector.extract_strided_slice %29 {offsets = [0, 256], sizes = [16, 32], strides = [1, 1]} : vector<16x384xf32> to vector<16x32xf32>
    %37 = arith.truncf %36 : vector<16x32xf32> to vector<16x32xbf16>
    %cst_17 = arith.constant dense<0.000000e+00> : vector<16x16xf32>
    %38 = tpu.matmul %33, %35, %cst_17 {dimension_numbers = #tpu.dot_dimension_numbers<[1], [1], [0], [0], [0, 0, 1, 0], [], []>} : vector<16x32xbf16>, vector<16x32xbf16>, vector<16x16xf32> -> vector<16x16xf32>
    %39 = arith.addf %38, %1 : vector<16x16xf32>
    %cst_18 = arith.constant dense<0xFF800000> : vector<16xf32>
    %40 = vector.multi_reduction <maximumf>, %39, %cst_18 [1] : vector<16x16xf32> to vector<16xf32>
    %41 = vector.shape_cast %40 : vector<16xf32> to vector<16x1xf32>
    %42 = vector.broadcast %41 : vector<16x1xf32> to vector<16x16xf32>
    %43 = arith.subf %39, %42 : vector<16x16xf32>
    %44 = math.exp %43 : vector<16x16xf32>
    %cst_19 = arith.constant dense<0.000000e+00> : vector<16xf32>
    %45 = vector.multi_reduction <add>, %44, %cst_19 [1] : vector<16x16xf32> to vector<16xf32>
    %46 = vector.shape_cast %45 : vector<16xf32> to vector<16x1xf32>
    %47 = tpu.reciprocal %46 {approx = true} : vector<16x1xf32> -> vector<16x1xf32>
    %48 = vector.broadcast %47 : vector<16x1xf32> to vector<16x16xf32>
    %49 = arith.mulf %44, %48 : vector<16x16xf32>
    %50 = arith.truncf %49 : vector<16x16xf32> to vector<16x16xbf16>
    %cst_20 = arith.constant dense<0.000000e+00> : vector<16x32xf32>
    %51 = tpu.matmul %50, %37, %cst_20 {dimension_numbers = #tpu.dot_dimension_numbers<[1], [0], [0], [1], [0, 0, 1, 1], [], []>} : vector<16x16xbf16>, vector<16x32xbf16>, vector<16x32xf32> -> vector<16x32xf32>
    %52 = vector.extract_strided_slice %29 {offsets = [0, 32], sizes = [16, 32], strides = [1, 1]} : vector<16x384xf32> to vector<16x32xf32>
    %cst_21 = arith.constant 0.176776692 : f32
    %53 = vector.broadcast %cst_21 : f32 to vector<16x32xf32>
    %54 = arith.mulf %52, %53 : vector<16x32xf32>
    %55 = arith.truncf %54 : vector<16x32xf32> to vector<16x32xbf16>
    %56 = vector.extract_strided_slice %29 {offsets = [0, 160], sizes = [16, 32], strides = [1, 1]} : vector<16x384xf32> to vector<16x32xf32>
    %57 = arith.truncf %56 : vector<16x32xf32> to vector<16x32xbf16>
    %58 = vector.extract_strided_slice %29 {offsets = [0, 288], sizes = [16, 32], strides = [1, 1]} : vector<16x384xf32> to vector<16x32xf32>
    %59 = arith.truncf %58 : vector<16x32xf32> to vector<16x32xbf16>
    %cst_22 = arith.constant dense<0.000000e+00> : vector<16x16xf32>
    %60 = tpu.matmul %55, %57, %cst_22 {dimension_numbers = #tpu.dot_dimension_numbers<[1], [1], [0], [0], [0, 0, 1, 0], [], []>} : vector<16x32xbf16>, vector<16x32xbf16>, vector<16x16xf32> -> vector<16x16xf32>
    %61 = arith.addf %60, %1 : vector<16x16xf32>
    %cst_23 = arith.constant dense<0xFF800000> : vector<16xf32>
    %62 = vector.multi_reduction <maximumf>, %61, %cst_23 [1] : vector<16x16xf32> to vector<16xf32>
    %63 = vector.shape_cast %62 : vector<16xf32> to vector<16x1xf32>
    %64 = vector.broadcast %63 : vector<16x1xf32> to vector<16x16xf32>
    %65 = arith.subf %61, %64 : vector<16x16xf32>
    %66 = math.exp %65 : vector<16x16xf32>
    %cst_24 = arith.constant dense<0.000000e+00> : vector<16xf32>
    %67 = vector.multi_reduction <add>, %66, %cst_24 [1] : vector<16x16xf32> to vector<16xf32>
    %68 = vector.shape_cast %67 : vector<16xf32> to vector<16x1xf32>
    %69 = tpu.reciprocal %68 {approx = true} : vector<16x1xf32> -> vector<16x1xf32>
    %70 = vector.broadcast %69 : vector<16x1xf32> to vector<16x16xf32>
    %71 = arith.mulf %66, %70 : vector<16x16xf32>
    %72 = arith.truncf %71 : vector<16x16xf32> to vector<16x16xbf16>
    %cst_25 = arith.constant dense<0.000000e+00> : vector<16x32xf32>
    %73 = tpu.matmul %72, %59, %cst_25 {dimension_numbers = #tpu.dot_dimension_numbers<[1], [0], [0], [1], [0, 0, 1, 1], [], []>} : vector<16x16xbf16>, vector<16x32xbf16>, vector<16x32xf32> -> vector<16x32xf32>
    %74 = vector.extract_strided_slice %29 {offsets = [0, 64], sizes = [16, 32], strides = [1, 1]} : vector<16x384xf32> to vector<16x32xf32>
    %cst_26 = arith.constant 0.176776692 : f32
    %75 = vector.broadcast %cst_26 : f32 to vector<16x32xf32>
    %76 = arith.mulf %74, %75 : vector<16x32xf32>
    %77 = arith.truncf %76 : vector<16x32xf32> to vector<16x32xbf16>
    %78 = vector.extract_strided_slice %29 {offsets = [0, 192], sizes = [16, 32], strides = [1, 1]} : vector<16x384xf32> to vector<16x32xf32>
    %79 = arith.truncf %78 : vector<16x32xf32> to vector<16x32xbf16>
    %80 = vector.extract_strided_slice %29 {offsets = [0, 320], sizes = [16, 32], strides = [1, 1]} : vector<16x384xf32> to vector<16x32xf32>
    %81 = arith.truncf %80 : vector<16x32xf32> to vector<16x32xbf16>
    %cst_27 = arith.constant dense<0.000000e+00> : vector<16x16xf32>
    %82 = tpu.matmul %77, %79, %cst_27 {dimension_numbers = #tpu.dot_dimension_numbers<[1], [1], [0], [0], [0, 0, 1, 0], [], []>} : vector<16x32xbf16>, vector<16x32xbf16>, vector<16x16xf32> -> vector<16x16xf32>
    %83 = arith.addf %82, %1 : vector<16x16xf32>
    %cst_28 = arith.constant dense<0xFF800000> : vector<16xf32>
    %84 = vector.multi_reduction <maximumf>, %83, %cst_28 [1] : vector<16x16xf32> to vector<16xf32>
    %85 = vector.shape_cast %84 : vector<16xf32> to vector<16x1xf32>
    %86 = vector.broadcast %85 : vector<16x1xf32> to vector<16x16xf32>
    %87 = arith.subf %83, %86 : vector<16x16xf32>
    %88 = math.exp %87 : vector<16x16xf32>
    %cst_29 = arith.constant dense<0.000000e+00> : vector<16xf32>
    %89 = vector.multi_reduction <add>, %88, %cst_29 [1] : vector<16x16xf32> to vector<16xf32>
    %90 = vector.shape_cast %89 : vector<16xf32> to vector<16x1xf32>
    %91 = tpu.reciprocal %90 {approx = true} : vector<16x1xf32> -> vector<16x1xf32>
    %92 = vector.broadcast %91 : vector<16x1xf32> to vector<16x16xf32>
    %93 = arith.mulf %88, %92 : vector<16x16xf32>
    %94 = arith.truncf %93 : vector<16x16xf32> to vector<16x16xbf16>
    %cst_30 = arith.constant dense<0.000000e+00> : vector<16x32xf32>
    %95 = tpu.matmul %94, %81, %cst_30 {dimension_numbers = #tpu.dot_dimension_numbers<[1], [0], [0], [1], [0, 0, 1, 1], [], []>} : vector<16x16xbf16>, vector<16x32xbf16>, vector<16x32xf32> -> vector<16x32xf32>
    %96 = vector.extract_strided_slice %29 {offsets = [0, 96], sizes = [16, 32], strides = [1, 1]} : vector<16x384xf32> to vector<16x32xf32>
    %cst_31 = arith.constant 0.176776692 : f32
    %97 = vector.broadcast %cst_31 : f32 to vector<16x32xf32>
    %98 = arith.mulf %96, %97 : vector<16x32xf32>
    %99 = arith.truncf %98 : vector<16x32xf32> to vector<16x32xbf16>
    %100 = vector.extract_strided_slice %29 {offsets = [0, 224], sizes = [16, 32], strides = [1, 1]} : vector<16x384xf32> to vector<16x32xf32>
    %101 = arith.truncf %100 : vector<16x32xf32> to vector<16x32xbf16>
    %102 = vector.extract_strided_slice %29 {offsets = [0, 352], sizes = [16, 32], strides = [1, 1]} : vector<16x384xf32> to vector<16x32xf32>
    %103 = arith.truncf %102 : vector<16x32xf32> to vector<16x32xbf16>
    %cst_32 = arith.constant dense<0.000000e+00> : vector<16x16xf32>
    %104 = tpu.matmul %99, %101, %cst_32 {dimension_numbers = #tpu.dot_dimension_numbers<[1], [1], [0], [0], [0, 0, 1, 0], [], []>} : vector<16x32xbf16>, vector<16x32xbf16>, vector<16x16xf32> -> vector<16x16xf32>
    %105 = arith.addf %104, %1 : vector<16x16xf32>
    %cst_33 = arith.constant dense<0xFF800000> : vector<16xf32>
    %106 = vector.multi_reduction <maximumf>, %105, %cst_33 [1] : vector<16x16xf32> to vector<16xf32>
    %107 = vector.shape_cast %106 : vector<16xf32> to vector<16x1xf32>
    %108 = vector.broadcast %107 : vector<16x1xf32> to vector<16x16xf32>
    %109 = arith.subf %105, %108 : vector<16x16xf32>
    %110 = math.exp %109 : vector<16x16xf32>
    %cst_34 = arith.constant dense<0.000000e+00> : vector<16xf32>
    %111 = vector.multi_reduction <add>, %110, %cst_34 [1] : vector<16x16xf32> to vector<16xf32>
    %112 = vector.shape_cast %111 : vector<16xf32> to vector<16x1xf32>
    %113 = tpu.reciprocal %112 {approx = true} : vector<16x1xf32> -> vector<16x1xf32>
    %114 = vector.broadcast %113 : vector<16x1xf32> to vector<16x16xf32>
    %115 = arith.mulf %110, %114 : vector<16x16xf32>
    %116 = arith.truncf %115 : vector<16x16xf32> to vector<16x16xbf16>
    %cst_35 = arith.constant dense<0.000000e+00> : vector<16x32xf32>
    %117 = tpu.matmul %116, %103, %cst_35 {dimension_numbers = #tpu.dot_dimension_numbers<[1], [0], [0], [1], [0, 0, 1, 1], [], []>} : vector<16x16xbf16>, vector<16x32xbf16>, vector<16x32xf32> -> vector<16x32xf32>
    %118 = tpu.concatenate %51, %73, %95, %117 in 1 : vector<16x32xf32>, vector<16x32xf32>, vector<16x32xf32>, vector<16x32xf32> -> vector<16x128xf32>
    %119 = arith.truncf %118 : vector<16x128xf32> to vector<16x128xbf16>
    %c0_36 = arith.constant 0 : index
    %c0_37 = arith.constant 0 : index
    %120 = vector.load %arg6[%c0_36, %c0_37] : memref<128x128xbf16, #tpu.memory_space<vmem>>, vector<128x128xbf16>
    %cst_38 = arith.constant dense<0.000000e+00> : vector<16x128xf32>
    %121 = tpu.matmul %119, %120, %cst_38 {dimension_numbers = #tpu.dot_dimension_numbers<[1], [0], [0], [1], [0, 0, 1, 1], [], []>} : vector<16x128xbf16>, vector<128x128xbf16>, vector<16x128xf32> -> vector<16x128xf32>
    %122 = arith.addf %0, %121 : vector<16x128xf32>
    %c0_39 = arith.constant 0 : index
    %c0_40 = arith.constant 0 : index
    %123 = vector.load %arg7[%c0_39, %c0_40] : memref<1x128xf32, #tpu.memory_space<vmem>>, vector<1x128xf32>
    %124 = vector.broadcast %123 : vector<1x128xf32> to vector<16x128xf32>
    %125 = arith.addf %122, %124 : vector<16x128xf32>
    %c0_41 = arith.constant 0 : index
    %c0_42 = arith.constant 0 : index
    %126 = vector.load %arg8[%c0_41, %c0_42] : memref<1x128xf32, #tpu.memory_space<vmem>>, vector<1x128xf32>
    %c0_43 = arith.constant 0 : index
    %c0_44 = arith.constant 0 : index
    %127 = vector.load %arg9[%c0_43, %c0_44] : memref<1x128xf32, #tpu.memory_space<vmem>>, vector<1x128xf32>
    %cst_45 = arith.constant dense<0.000000e+00> : vector<16xf32>
    %128 = vector.multi_reduction <add>, %125, %cst_45 [1] : vector<16x128xf32> to vector<16xf32>
    %129 = vector.shape_cast %128 : vector<16xf32> to vector<16x1xf32>
    %cst_46 = arith.constant 1.280000e+02 : f32
    %130 = vector.broadcast %cst_46 : f32 to vector<16x1xf32>
    %131 = arith.divf %129, %130 : vector<16x1xf32>
    %132 = vector.broadcast %131 : vector<16x1xf32> to vector<16x128xf32>
    %133 = arith.subf %125, %132 : vector<16x128xf32>
    %134 = arith.mulf %133, %133 : vector<16x128xf32>
    %cst_47 = arith.constant dense<0.000000e+00> : vector<16xf32>
    %135 = vector.multi_reduction <add>, %134, %cst_47 [1] : vector<16x128xf32> to vector<16xf32>
    %136 = vector.shape_cast %135 : vector<16xf32> to vector<16x1xf32>
    %cst_48 = arith.constant 1.280000e+02 : f32
    %137 = vector.broadcast %cst_48 : f32 to vector<16x1xf32>
    %138 = arith.divf %136, %137 : vector<16x1xf32>
    %cst_49 = arith.constant 9.99999974E-6 : f32
    %139 = vector.broadcast %cst_49 : f32 to vector<16x1xf32>
    %140 = arith.addf %138, %139 : vector<16x1xf32>
    %141 = math.rsqrt %140 : vector<16x1xf32>
    %142 = vector.broadcast %141 : vector<16x1xf32> to vector<16x128xf32>
    %143 = arith.mulf %133, %142 : vector<16x128xf32>
    %144 = vector.broadcast %126 : vector<1x128xf32> to vector<16x128xf32>
    %145 = arith.mulf %143, %144 : vector<16x128xf32>
    %146 = vector.broadcast %127 : vector<1x128xf32> to vector<16x128xf32>
    %147 = arith.addf %145, %146 : vector<16x128xf32>
    %148 = arith.truncf %147 : vector<16x128xf32> to vector<16x128xbf16>
    %c0_50 = arith.constant 0 : index
    %c0_51 = arith.constant 0 : index
    %149 = vector.load %arg10[%c0_50, %c0_51] : memref<128x512xbf16, #tpu.memory_space<vmem>>, vector<128x512xbf16>
    %cst_52 = arith.constant dense<0.000000e+00> : vector<16x512xf32>
    %150 = tpu.matmul %148, %149, %cst_52 {dimension_numbers = #tpu.dot_dimension_numbers<[1], [0], [0], [1], [0, 0, 1, 1], [], []>} : vector<16x128xbf16>, vector<128x512xbf16>, vector<16x512xf32> -> vector<16x512xf32>
    %c0_53 = arith.constant 0 : index
    %c0_54 = arith.constant 0 : index
    %151 = vector.load %arg11[%c0_53, %c0_54] : memref<1x512xf32, #tpu.memory_space<vmem>>, vector<1x512xf32>
    %152 = vector.broadcast %151 : vector<1x512xf32> to vector<16x512xf32>
    %153 = arith.addf %150, %152 : vector<16x512xf32>
    %cst_55 = arith.constant 1.702000e+00 : f32
    %154 = vector.broadcast %cst_55 : f32 to vector<16x512xf32>
    %155 = arith.mulf %154, %153 : vector<16x512xf32>
    %156 = arith.negf %155 : vector<16x512xf32>
    %157 = math.exp %156 : vector<16x512xf32>
    %cst_56 = arith.constant 1.000000e+00 : f32
    %158 = vector.broadcast %cst_56 : f32 to vector<16x512xf32>
    %159 = arith.addf %158, %157 : vector<16x512xf32>
    %160 = arith.divf %158, %159 : vector<16x512xf32>
    %161 = arith.mulf %153, %160 : vector<16x512xf32>
    %162 = arith.truncf %161 : vector<16x512xf32> to vector<16x512xbf16>
    %c0_57 = arith.constant 0 : index
    %c0_58 = arith.constant 0 : index
    %163 = vector.load %arg12[%c0_57, %c0_58] : memref<512x128xbf16, #tpu.memory_space<vmem>>, vector<512x128xbf16>
    %cst_59 = arith.constant dense<0.000000e+00> : vector<16x128xf32>
    %164 = tpu.matmul %162, %163, %cst_59 {dimension_numbers = #tpu.dot_dimension_numbers<[1], [0], [0], [1], [0, 0, 1, 1], [], []>} : vector<16x512xbf16>, vector<512x128xbf16>, vector<16x128xf32> -> vector<16x128xf32>
    %165 = arith.addf %125, %164 : vector<16x128xf32>
    %c0_60 = arith.constant 0 : index
    %c0_61 = arith.constant 0 : index
    %166 = vector.load %arg13[%c0_60, %c0_61] : memref<1x128xf32, #tpu.memory_space<vmem>>, vector<1x128xf32>
    %167 = vector.broadcast %166 : vector<1x128xf32> to vector<16x128xf32>
    %168 = arith.addf %165, %167 : vector<16x128xf32>
    %c0_62 = arith.constant 0 : index
    %c0_63 = arith.constant 0 : index
    %169 = vector.load %arg14[%c0_62, %c0_63] : memref<16x128xf32, #tpu.memory_space<vmem>>, vector<16x128xf32>
    tpu.vector_store %arg14[%c0_62, %c0_63], %168 {strides = array<i32>} : memref<16x128xf32, #tpu.memory_space<vmem>>, vector<16x128xf32>,
    return
  }
}

module attributes {stable_mosaic.version = 11 : i64} {
  func.func @_clip_head_kernel(%arg0: memref<2x128xf32, #tpu.memory_space<vmem>>, %arg1: memref<2x128xf32, #tpu.memory_space<vmem>>, %arg2: memref<1x1xf32, #tpu.memory_space<smem>>, %arg3: memref<2x2xf32, #tpu.memory_space<vmem>>) attributes {dimension_semantics = [], scalar_prefetch = 0 : i64, scratch_operands = 0 : i64, tpu.core_type = #tpu.core_type<tc>} {
    %c0 = arith.constant 0 : index
    %c0_0 = arith.constant 0 : index
    %0 = vector.load %arg0[%c0, %c0_0] : memref<2x128xf32, #tpu.memory_space<vmem>>, vector<2x128xf32>
    %c0_1 = arith.constant 0 : index
    %c0_2 = arith.constant 0 : index
    %1 = vector.load %arg1[%c0_1, %c0_2] : memref<2x128xf32, #tpu.memory_space<vmem>>, vector<2x128xf32>
    %2 = arith.mulf %0, %0 : vector<2x128xf32>
    %cst = arith.constant dense<0.000000e+00> : vector<2xf32>
    %3 = vector.multi_reduction <add>, %2, %cst [1] : vector<2x128xf32> to vector<2xf32>
    %4 = vector.shape_cast %3 : vector<2xf32> to vector<2x1xf32>
    %5 = math.rsqrt %4 : vector<2x1xf32>
    %6 = vector.broadcast %5 : vector<2x1xf32> to vector<2x128xf32>
    %7 = arith.mulf %0, %6 : vector<2x128xf32>
    %8 = arith.mulf %1, %1 : vector<2x128xf32>
    %cst_3 = arith.constant dense<0.000000e+00> : vector<2xf32>
    %9 = vector.multi_reduction <add>, %8, %cst_3 [1] : vector<2x128xf32> to vector<2xf32>
    %10 = vector.shape_cast %9 : vector<2xf32> to vector<2x1xf32>
    %11 = math.rsqrt %10 : vector<2x1xf32>
    %12 = vector.broadcast %11 : vector<2x1xf32> to vector<2x128xf32>
    %13 = arith.mulf %1, %12 : vector<2x128xf32>
    %cst_4 = arith.constant dense<0.000000e+00> : vector<2x2xf32>
    %14 = tpu.matmul %7, %13, %cst_4 {dimension_numbers = #tpu.dot_dimension_numbers<[1], [1], [0], [0], [0, 0, 1, 0], [], []>} : vector<2x128xf32>, vector<2x128xf32>, vector<2x2xf32> -> vector<2x2xf32>
    %c0_5 = arith.constant 0 : index
    %c0_6 = arith.constant 0 : index
    %15 = memref.load %arg2[%c0_5, %c0_6] : memref<1x1xf32, #tpu.memory_space<smem>>
    %16 = vector.broadcast %15 : f32 to vector<2x2xf32>
    %17 = arith.mulf %16, %14 : vector<2x2xf32>
    %c0_7 = arith.constant 0 : index
    %c0_8 = arith.constant 0 : index
    %18 = vector.load %arg3[%c0_7, %c0_8] : memref<2x2xf32, #tpu.memory_space<vmem>>, vector<2x2xf32>
    tpu.vector_store %arg3[%c0_7, %c0_8], %17 {strides = array<i32>} : memref<2x2xf32, #tpu.memory_space<vmem>>, vector<2x2xf32>,
    return
  }
}

module attributes {stable_mosaic.version = 11 : i64} {
  func.func @_text_head_kernel(%arg0: memref<2x128xf32, #tpu.memory_space<vmem>>, %arg1: memref<1x128xf32, #tpu.memory_space<vmem>>, %arg2: memref<1x128xf32, #tpu.memory_space<vmem>>, %arg3: memref<128x128xbf16, #tpu.memory_space<vmem>>, %arg4: memref<128x128xbf16, #tpu.memory_space<vmem>>, %arg5: memref<1x128xf32, #tpu.memory_space<vmem>>, %arg6: memref<2x128xf32, #tpu.memory_space<vmem>>) attributes {dimension_semantics = [], scalar_prefetch = 0 : i64, scratch_operands = 0 : i64, tpu.core_type = #tpu.core_type<tc>} {
    %c0 = arith.constant 0 : index
    %c0_0 = arith.constant 0 : index
    %0 = vector.load %arg0[%c0, %c0_0] : memref<2x128xf32, #tpu.memory_space<vmem>>, vector<2x128xf32>
    %c0_1 = arith.constant 0 : index
    %c0_2 = arith.constant 0 : index
    %1 = vector.load %arg1[%c0_1, %c0_2] : memref<1x128xf32, #tpu.memory_space<vmem>>, vector<1x128xf32>
    %c0_3 = arith.constant 0 : index
    %c0_4 = arith.constant 0 : index
    %2 = vector.load %arg2[%c0_3, %c0_4] : memref<1x128xf32, #tpu.memory_space<vmem>>, vector<1x128xf32>
    %cst = arith.constant dense<0.000000e+00> : vector<2xf32>
    %3 = vector.multi_reduction <add>, %0, %cst [1] : vector<2x128xf32> to vector<2xf32>
    %4 = vector.shape_cast %3 : vector<2xf32> to vector<2x1xf32>
    %cst_5 = arith.constant 1.280000e+02 : f32
    %5 = vector.broadcast %cst_5 : f32 to vector<2x1xf32>
    %6 = arith.divf %4, %5 : vector<2x1xf32>
    %7 = vector.broadcast %6 : vector<2x1xf32> to vector<2x128xf32>
    %8 = arith.subf %0, %7 : vector<2x128xf32>
    %9 = arith.mulf %8, %8 : vector<2x128xf32>
    %cst_6 = arith.constant dense<0.000000e+00> : vector<2xf32>
    %10 = vector.multi_reduction <add>, %9, %cst_6 [1] : vector<2x128xf32> to vector<2xf32>
    %11 = vector.shape_cast %10 : vector<2xf32> to vector<2x1xf32>
    %cst_7 = arith.constant 1.280000e+02 : f32
    %12 = vector.broadcast %cst_7 : f32 to vector<2x1xf32>
    %13 = arith.divf %11, %12 : vector<2x1xf32>
    %cst_8 = arith.constant 9.99999974E-6 : f32
    %14 = vector.broadcast %cst_8 : f32 to vector<2x1xf32>
    %15 = arith.addf %13, %14 : vector<2x1xf32>
    %16 = math.rsqrt %15 : vector<2x1xf32>
    %17 = vector.broadcast %16 : vector<2x1xf32> to vector<2x128xf32>
    %18 = arith.mulf %8, %17 : vector<2x128xf32>
    %19 = vector.broadcast %1 : vector<1x128xf32> to vector<2x128xf32>
    %20 = arith.mulf %18, %19 : vector<2x128xf32>
    %21 = vector.broadcast %2 : vector<1x128xf32> to vector<2x128xf32>
    %22 = arith.addf %20, %21 : vector<2x128xf32>
    %23 = arith.truncf %22 : vector<2x128xf32> to vector<2x128xbf16>
    %c0_9 = arith.constant 0 : index
    %c0_10 = arith.constant 0 : index
    %24 = vector.load %arg3[%c0_9, %c0_10] : memref<128x128xbf16, #tpu.memory_space<vmem>>, vector<128x128xbf16>
    %cst_11 = arith.constant dense<0.000000e+00> : vector<2x128xf32>
    %25 = tpu.matmul %23, %24, %cst_11 {dimension_numbers = #tpu.dot_dimension_numbers<[1], [0], [0], [1], [0, 0, 1, 1], [], []>} : vector<2x128xbf16>, vector<128x128xbf16>, vector<2x128xf32> -> vector<2x128xf32>
    %26 = arith.truncf %25 : vector<2x128xf32> to vector<2x128xbf16>
    %c0_12 = arith.constant 0 : index
    %c0_13 = arith.constant 0 : index
    %27 = vector.load %arg4[%c0_12, %c0_13] : memref<128x128xbf16, #tpu.memory_space<vmem>>, vector<128x128xbf16>
    %cst_14 = arith.constant dense<0.000000e+00> : vector<2x128xf32>
    %28 = tpu.matmul %26, %27, %cst_14 {dimension_numbers = #tpu.dot_dimension_numbers<[1], [0], [0], [1], [0, 0, 1, 1], [], []>} : vector<2x128xbf16>, vector<128x128xbf16>, vector<2x128xf32> -> vector<2x128xf32>
    %c0_15 = arith.constant 0 : index
    %c0_16 = arith.constant 0 : index
    %29 = vector.load %arg5[%c0_15, %c0_16] : memref<1x128xf32, #tpu.memory_space<vmem>>, vector<1x128xf32>
    %30 = vector.broadcast %29 : vector<1x128xf32> to vector<2x128xf32>
    %31 = arith.addf %28, %30 : vector<2x128xf32>
    %c0_17 = arith.constant 0 : index
    %c0_18 = arith.constant 0 : index
    %32 = vector.load %arg6[%c0_17, %c0_18] : memref<2x128xf32, #tpu.memory_space<vmem>>, vector<2x128xf32>
    tpu.vector_store %arg6[%c0_17, %c0_18], %31 {strides = array<i32>} : memref<2x128xf32, #tpu.memory_space<vmem>>, vector<2x128xf32>,
    return
  }
}

</mosaic_0001>

<bundles_post_ra>
// kernel: forward.18
= control target key start
LH: loop header
LB: loop body
LE: loop exit
PB: predicated region body
PF: predicated region fallthrough
CT: control target
= control target key end

     0   :  { %s721_s1 = inlined_call_operand.vmem [shape: bf16[128,128], index: 1, kind: input, shape index: {}]   ;;  %s722_s0 = inlined_call_operand.vmem [shape: bf16[128,128], index: 0, kind: input, shape index: {}]   ;;  %s723_s2 = inlined_call_operand.vmem [shape: f32[1,128], index: 2, kind: input, shape index: {}]   ;;  %s724_s3 = inlined_call_operand.vmem [shape: bf16[128,128], index: 3, kind: output, shape index: {}]  }
   0x1   :  { %v610_v0 = vld [vmem:[%s721_s1] sm:$0xff]   ;;  %v611_v1 = vld [vmem:[%s721_s1 + $0x8] sm:$0xff]   ;;  %v612_v2 = vld [vmem:[%s721_s1 + $0x10] sm:$0xff]  }
   0x2   :  { %562 = vmatprep.subr.bf16.mxu0 %v610_v0  ;;  %594 = vmatprep.subr.bf16.mxu1 %v610_v0  ;;  %v613_v3 = vld [vmem:[%s721_s1 + $0x18] sm:$0xff]   ;;  %v618_v4 = vld [vmem:[%s722_s0] sm:$0xff]   ;;  %v615_v7 = vld [vmem:[%s721_s1 + $0x28] sm:$0xff]  }
   0x3   :  { %563 = vmatpush3.bf16.msra.mxu0 %v610_v0  ;;  %602 = vmatpush3.bf16.msra.mxu1 %v610_v0  ;;  %v619_v5 = vld [vmem:[%s722_s0 + $0x20] sm:$0xff]   ;;  %v616_v8 = vld [vmem:[%s721_s1 + $0x30] sm:$0xff]   ;;  %v617_v9 = vld [vmem:[%s721_s1 + $0x38] sm:$0xff]  }
   0x4   :  { %564 = vmatprep.subr.bf16.mxu0 %v611_v1  ;;  %595 = vmatprep.subr.bf16.mxu1 %v611_v1  ;;  %v614_v6 = vld [vmem:[%s721_s1 + $0x20] sm:$0xff]   ;;  %v620_v10 = vld [vmem:[%s722_s0 + $0x8] sm:$0xff]   ;;  %v622_v12 = vld [vmem:[%s722_s0 + $0x10] sm:$0xff]  }
   0x5   :  { %578 = vmatprep.mubr.bf16.mxu0 %v618_v4  ;;  %586 = vmatprep.mubr.bf16.mxu1 %v619_v5  ;;  %v621_v11 = vld [vmem:[%s722_s0 + $0x28] sm:$0xff]   ;;  %v623_v13 = vld [vmem:[%s722_s0 + $0x30] sm:$0xff]   ;;  %v624_v14 = vld [vmem:[%s722_s0 + $0x18] sm:$0xff]  }
   0x6   :  { %v625_v15 = vld [vmem:[%s722_s0 + $0x38] sm:$0xff]   ;;  %v466_v16 = vld [vmem:[%s723_s2] ss:$0 sm:$0xff] }
   0x7   :  { %565 = vmatpush3.bf16.msra.mxu0 %v611_v1  ;;  %603 = vmatpush3.bf16.msra.mxu1 %v611_v1 }
   0x8   :  { %566 = vmatprep.subr.bf16.mxu0 %v612_v2  ;;  %596 = vmatprep.subr.bf16.mxu1 %v612_v2 }
   0xb   :  { %567 = vmatpush3.bf16.msra.mxu0 %v612_v2  ;;  %604 = vmatpush3.bf16.msra.mxu1 %v612_v2 }
   0xc   :  { %568 = vmatprep.subr.bf16.mxu0 %v613_v3  ;;  %597 = vmatprep.subr.bf16.mxu1 %v613_v3 }
   0xf   :  { %569 = vmatpush3.bf16.msra.mxu0 %v613_v3  ;;  %605 = vmatpush3.bf16.msra.mxu1 %v613_v3 }
  0x10   :  { %570 = vmatprep.subr.bf16.mxu0 %v614_v6  ;;  %598 = vmatprep.subr.bf16.mxu1 %v614_v6 }
  0x13   :  { %571 = vmatpush3.bf16.msra.mxu0 %v614_v6  ;;  %606 = vmatpush3.bf16.msra.mxu1 %v614_v6 }
  0x14   :  { %572 = vmatprep.subr.bf16.mxu0 %v615_v7  ;;  %599 = vmatprep.subr.bf16.mxu1 %v615_v7 }
  0x17   :  { %573 = vmatpush3.bf16.msra.mxu0 %v615_v7  ;;  %607 = vmatpush3.bf16.msra.mxu1 %v615_v7 }
  0x18   :  { %574 = vmatprep.subr.bf16.mxu0 %v616_v8  ;;  %600 = vmatprep.subr.bf16.mxu1 %v616_v8 }
  0x1b   :  { %575 = vmatpush3.bf16.msra.mxu0 %v616_v8  ;;  %608 = vmatpush3.bf16.msra.mxu1 %v616_v8 }
  0x1c   :  { %576 = vmatprep.subr.bf16.mxu0 %v617_v9  ;;  %601 = vmatprep.subr.bf16.mxu1 %v617_v9 }
  0x1f   :  { %577 = vmatpush3.bf16.msra.mxu0 %v617_v9  ;;  %609 = vmatpush3.bf16.msra.mxu1 %v617_v9 }
  0x22   :  { %579 = vmatmul.mubr.bf16.vlgmr.msra.gmra.mrb[0].mxu0 %v620_v10  ;;  %587 = vmatmul.mubr.bf16.vlgmr.msra.gmra.mrb[0].mxu1 %v621_v11 }
  0x23   :  { %582 = vmatprep.mubr.bf16.mxu0 %v622_v12  ;;  %590 = vmatprep.mubr.bf16.mxu1 %v623_v13 }
  0x2a   :  { %583 = vmatmul.mubr.bf16.gmra.mrb[4].mxu0 %v624_v14  ;;  %591 = vmatmul.mubr.bf16.gmra.mrb[4].mxu1 %v625_v15 }
  0xf5   :  { %v580_v17 = vpop.f32.mrb[0].mxu0  ;;  %v588_v18 = vpop.f32.mrb[0].mxu1 }
  0xf6   :  { %v336_v19 = vadd.f32 %v580_v17, %v466_v16  ;;  %v344_v20 = vadd.f32 %v588_v18, %v466_v16  ;;  %v213_v21 = vpop.f32.mrb[1].mxu0  ;;  %v245_v22 = vpop.f32.mrb[1].mxu1 }
  0xf7   :  { %v334_v23 = vadd.f32 %v466_v16, %v213_v21  ;;  %v342_v24 = vadd.f32 %v466_v16, %v245_v22  ;;  %v581_v25 = vpop.f32.mrb[2].mxu0  ;;  %v589_v26 = vpop.f32.mrb[2].mxu1 }
  0xf8   :  { %v337_v27 = vadd.f32 %v581_v25, %v466_v16  ;;  %v345_v28 = vadd.f32 %v589_v26, %v466_v16  ;;  %v216_v29 = vpop.f32.mrb[3].mxu0  ;;  %v248_v30 = vpop.f32.mrb[3].mxu1  ;;  %v352_v33 = vmax.f32 %v336_v19, 0.0  ;;  %v360_v34 = vmax.f32 %v344_v20, 0.0 }
  0xf9   :  { %v335_v31 = vadd.f32 %v466_v16, %v216_v29  ;;  %v343_v32 = vadd.f32 %v466_v16, %v248_v30  ;;  %v350_v37 = vmax.f32 %v334_v23, 0.0  ;;  %v358_v38 = vmax.f32 %v342_v24, 0.0 }
  0xfa   :  { %v353_v35 = vmax.f32 %v337_v27, 0.0  ;;  %v361_v36 = vmax.f32 %v345_v28, 0.0 }
  0xfb   :  { %v351_v39 = vmax.f32 %v335_v31, 0.0  ;;  %v359_v40 = vmax.f32 %v343_v32, 0.0 }
  0xfc   :  { %v507_v41 = vpack.c.bf16 %v353_v35, %v352_v33  ;;  %v527_v42 = vpack.c.bf16 %v361_v36, %v360_v34 }
  0xfd   :  { %v502_v43 = vpack.c.bf16 %v351_v39, %v350_v37  ;;  %v522_v44 = vpack.c.bf16 %v359_v40, %v358_v38  ;;  %v584_v45 = vpop.f32.mrb[4].mxu0  ;;  %v592_v46 = vpop.f32.mrb[4].mxu1 }
  0xfe   :  { %539 = vst [vmem:[%s724_s3 + $0x8] sm:$0xff] %v507_v41   ;;  %543 = vst [vmem:[%s724_s3 + $0x28] sm:$0xff] %v527_v42   ;;  %v340_v47 = vadd.f32 %v584_v45, %v466_v16  ;;  %v348_v48 = vadd.f32 %v592_v46, %v466_v16  ;;  %v229_v49 = vpop.f32.mrb[5].mxu0  ;;  %v261_v50 = vpop.f32.mrb[5].mxu1 }
  0xff   :  { %503 = vst [vmem:[%s724_s3] sm:$0xff] %v502_v43   ;;  %542 = vst [vmem:[%s724_s3 + $0x20] sm:$0xff] %v522_v44   ;;  %v338_v51 = vadd.f32 %v466_v16, %v229_v49  ;;  %v346_v52 = vadd.f32 %v466_v16, %v261_v50  ;;  %v585_v53 = vpop.f32.mrb[6].mxu0  ;;  %v593_v54 = vpop.f32.mrb[6].mxu1 }
 0x100   :  { %v341_v55 = vadd.f32 %v585_v53, %v466_v16  ;;  %v349_v56 = vadd.f32 %v593_v54, %v466_v16  ;;  %v232_v57 = vpop.f32.mrb[7].mxu0  ;;  %v264_v58 = vpop.f32.mrb[7].mxu1  ;;  %v356_v61 = vmax.f32 %v340_v47, 0.0  ;;  %v364_v62 = vmax.f32 %v348_v48, 0.0 }
 0x101   :  { %v339_v59 = vadd.f32 %v466_v16, %v232_v57  ;;  %v347_v60 = vadd.f32 %v466_v16, %v264_v58  ;;  %v354_v1 = vmax.f32 %v338_v51, 0.0  ;;  %v362_v2 = vmax.f32 %v346_v52, 0.0 }
 0x102   :  { %v357_v63 = vmax.f32 %v341_v55, 0.0  ;;  %v365_v0 = vmax.f32 %v349_v56, 0.0 }
 0x103   :  { %v355_v3 = vmax.f32 %v339_v59, 0.0  ;;  %v363_v4 = vmax.f32 %v347_v60, 0.0 }
 0x104   :  { %v517_v5 = vpack.c.bf16 %v357_v63, %v356_v61  ;;  %v537_v6 = vpack.c.bf16 %v365_v0, %v364_v62 }
 0x105   :  { %v512_v7 = vpack.c.bf16 %v355_v3, %v354_v1  ;;  %v532_v8 = vpack.c.bf16 %v363_v4, %v362_v2 }
 0x106   :  { %541 = vst [vmem:[%s724_s3 + $0x18] sm:$0xff] %v517_v5   ;;  %545 = vst [vmem:[%s724_s3 + $0x38] sm:$0xff] %v537_v6  }
 0x107   :  { %540 = vst [vmem:[%s724_s3 + $0x10] sm:$0xff] %v512_v7   ;;  %544 = vst [vmem:[%s724_s3 + $0x30] sm:$0xff] %v532_v8  }

// kernel: forward.17
= control target key start
LH: loop header
LB: loop body
LE: loop exit
PB: predicated region body
PF: predicated region fallthrough
CT: control target
= control target key end

     0   :  { %v2176_v0 = vmov 0   ;;  %vm575_vm0 = vcmask 154624   ;;  %vm672_vm1 = vcmask 1040384   ;;  %vm673_vm2 = vcmask 1041408   ;;  %s2617_s1 = inlined_call_operand.vmem [shape: bf16[147,128], index: 1, kind: input, shape index: {}]   ;;  %s2618_s0 = inlined_call_operand.vmem [shape: bf16[512,147], index: 0, kind: input, shape index: {}]   ;;  %s2619_s2 = inlined_call_operand.vmem [shape: f32[1,128], index: 2, kind: input, shape index: {}]   ;;  %s2620_s3 = inlined_call_operand.vmem [shape: bf16[512,128], index: 3, kind: output, shape index: {}]  }
   0x1   :  { %679 = vmatprep.subr.bf16.mxu0 %v2176_v0  ;;  %2048 = vmatprep.subr.bf16.mxu1 %v2176_v0  ;;  %v2070_v1 = vld [vmem:[%s2617_s1] sm:$0xff]   ;;  %v2071_v2 = vld [vmem:[%s2617_s1 + $0x8] sm:$0xff]   ;;  %v2072_v3 = vld [vmem:[%s2617_s1 + $0x10] sm:$0xff]   ;;  %v2177_v11 = vmov 65535  }
   0x2   :  { %680 = vmatpush1.bf16.msra.mxu0 %v2070_v1  ;;  %2058 = vmatpush1.bf16.msra.mxu1 %v2070_v1  ;;  %v2073_v4 = vld [vmem:[%s2617_s1 + $0x18] sm:$0xff]   ;;  %v2082_v5 = vld [vmem:[%s2618_s0 + $0x4] ss:$8 sps:$4 sm:$0xff]   ;;  %v2076_v9 = vld [vmem:[%s2617_s1 + $0x30] sm:$0xff]   ;;  %v674_v12 = vsel %vm672_vm1, 4294967295, %v2177_v11 }
   0x3   :  { %681 = vmatprep.subr.bf16.mxu0 %v2176_v0  ;;  %2049 = vmatprep.subr.bf16.mxu1 %v2176_v0  ;;  %v2085_v6 = vld [vmem:[%s2618_s0 + $0x104] ss:$8 sps:$4 sm:$0xff]   ;;  %v2077_v10 = vld [vmem:[%s2617_s1 + $0x38] sm:$0xff]   ;;  %v2079_v14 = vld [vmem:[%s2617_s1 + $0x48] ss:$0 sps:$4 sm:$0x33]  }
   0x4   :  { %1696 = vmatprep.mubr.msk.bf16.mxu0 %vm575_vm0, %v2082_v5  ;;  %v2074_v7 = vld [vmem:[%s2617_s1 + $0x20] sm:$0xff]   ;;  %1712 = vmatprep.mubr.msk.bf16.mxu1 %vm575_vm0, %v2085_v6  ;;  %v2075_v8 = vld [vmem:[%s2617_s1 + $0x28] sm:$0xff]   ;;  %v675_v15 = vsel %vm673_vm2, %v674_v12, 0  ;;  %v2086_v19 = vld [vmem:[%s2618_s0 + $0x14] ss:$8 sps:$4 sm:$0xff]  }
   0x5   :  { %v2078_v13 = vld [vmem:[%s2617_s1 + $0x40] sm:$0xff]   ;;  %v677_v16 = vand.u32 %v2079_v14, %v675_v15  ;;  %v2088_v20 = vld [vmem:[%s2618_s0 + $0x114] ss:$8 sps:$4 sm:$0xff]   ;;  %v2090_v21 = vld [vmem:[%s2618_s0 + $0x10] ss:$8 sps:$4 sm:$0xff]  }
   0x6   :  { %682 = vmatpush1.bf16.msra.mxu0 %v2071_v2  ;;  %2059 = vmatpush1.bf16.msra.mxu1 %v2071_v2  ;;  %v2080_v17 = vld [vmem:[%s2618_s0] ss:$8 sps:$4 sm:$0xff]   ;;  %v2091_v22 = vld [vmem:[%s2618_s0 + $0x110] ss:$8 sps:$4 sm:$0xff]   ;;  %v2092_v23 = vld [vmem:[%s2618_s0 + $0x24] ss:$8 sps:$4 sm:$0xff]  }
   0x7   :  { %683 = vmatprep.subr.bf16.mxu0 %v2176_v0  ;;  %2050 = vmatprep.subr.bf16.mxu1 %v2176_v0  ;;  %v2083_v18 = vld [vmem:[%s2618_s0 + $0x100] ss:$8 sps:$4 sm:$0xff]   ;;  %v2094_v24 = vld [vmem:[%s2618_s0 + $0x124] ss:$8 sps:$4 sm:$0xff]   ;;  %v2098_v27 = vld [vmem:[%s2618_s0 + $0x34] ss:$8 sps:$4 sm:$0xff]  }
   0x8   :  { %v2096_v25 = vld [vmem:[%s2618_s0 + $0x20] ss:$8 sps:$4 sm:$0xff]   ;;  %v2100_v28 = vld [vmem:[%s2618_s0 + $0x134] ss:$8 sps:$4 sm:$0xff]   ;;  %v2102_v29 = vld [vmem:[%s2618_s0 + $0x30] ss:$8 sps:$4 sm:$0xff]  }
   0x9   :  { %v2097_v26 = vld [vmem:[%s2618_s0 + $0x120] ss:$8 sps:$4 sm:$0xff]   ;;  %v2103_v30 = vld [vmem:[%s2618_s0 + $0x130] ss:$8 sps:$4 sm:$0xff]   ;;  %v2104_v31 = vld [vmem:[%s2618_s0 + $0x44] ss:$8 sps:$4 sm:$0xff]  }
   0xa   :  { %684 = vmatpush1.bf16.msra.mxu0 %v2072_v3  ;;  %2060 = vmatpush1.bf16.msra.mxu1 %v2072_v3  ;;  %v2106_v32 = vld [vmem:[%s2618_s0 + $0x144] ss:$8 sps:$4 sm:$0xff]   ;;  %v2108_v33 = vld [vmem:[%s2618_s0 + $0x40] ss:$8 sps:$4 sm:$0xff]   ;;  %v2110_v35 = vld [vmem:[%s2618_s0 + $0x54] ss:$8 sps:$4 sm:$0xff]  }
   0xb   :  { %685 = vmatprep.subr.bf16.mxu0 %v2176_v0  ;;  %2051 = vmatprep.subr.bf16.mxu1 %v2176_v0  ;;  %v2109_v34 = vld [vmem:[%s2618_s0 + $0x140] ss:$8 sps:$4 sm:$0xff]   ;;  %v2112_v36 = vld [vmem:[%s2618_s0 + $0x154] ss:$8 sps:$4 sm:$0xff]   ;;  %v2114_v37 = vld [vmem:[%s2618_s0 + $0x50] ss:$8 sps:$4 sm:$0xff]  }
   0xc   :  { %v2115_v38 = vld [vmem:[%s2618_s0 + $0x150] ss:$8 sps:$4 sm:$0xff]   ;;  %v2116_v39 = vld [vmem:[%s2618_s0 + $0x64] ss:$8 sps:$4 sm:$0xff]   ;;  %v2120_v41 = vld [vmem:[%s2618_s0 + $0x60] ss:$8 sps:$4 sm:$0xff]  }
   0xd   :  { %v2118_v40 = vld [vmem:[%s2618_s0 + $0x164] ss:$8 sps:$4 sm:$0xff]   ;;  %v2121_v42 = vld [vmem:[%s2618_s0 + $0x160] ss:$8 sps:$4 sm:$0xff]   ;;  %v2122_v43 = vld [vmem:[%s2618_s0 + $0x74] ss:$8 sps:$4 sm:$0xff]  }
   0xe   :  { %686 = vmatpush1.bf16.msra.mxu0 %v2073_v4  ;;  %2061 = vmatpush1.bf16.msra.mxu1 %v2073_v4  ;;  %v2124_v44 = vld [vmem:[%s2618_s0 + $0x174] ss:$8 sps:$4 sm:$0xff]   ;;  %v2126_v45 = vld [vmem:[%s2618_s0 + $0x70] ss:$8 sps:$4 sm:$0xff]   ;;  %v2128_v47 = vld [vmem:[%s2618_s0 + $0x84] ss:$8 sps:$4 sm:$0xff]  }
   0xf   :  { %687 = vmatprep.subr.bf16.mxu0 %v2176_v0  ;;  %2052 = vmatprep.subr.bf16.mxu1 %v2176_v0  ;;  %v2127_v46 = vld [vmem:[%s2618_s0 + $0x170] ss:$8 sps:$4 sm:$0xff]   ;;  %v2130_v48 = vld [vmem:[%s2618_s0 + $0x184] ss:$8 sps:$4 sm:$0xff]   ;;  %v2132_v49 = vld [vmem:[%s2618_s0 + $0x80] ss:$8 sps:$4 sm:$0xff]  }
  0x10   :  { %v2133_v50 = vld [vmem:[%s2618_s0 + $0x180] ss:$8 sps:$4 sm:$0xff]   ;;  %v2134_v51 = vld [vmem:[%s2618_s0 + $0x94] ss:$8 sps:$4 sm:$0xff]   ;;  %v2138_v53 = vld [vmem:[%s2618_s0 + $0x90] ss:$8 sps:$4 sm:$0xff]  }
  0x11   :  { %v2136_v52 = vld [vmem:[%s2618_s0 + $0x194] ss:$8 sps:$4 sm:$0xff]   ;;  %v2139_v54 = vld [vmem:[%s2618_s0 + $0x190] ss:$8 sps:$4 sm:$0xff]   ;;  %v2140_v55 = vld [vmem:[%s2618_s0 + $0xa4] ss:$8 sps:$4 sm:$0xff]  }
  0x12   :  { %688 = vmatpush1.bf16.msra.mxu0 %v2074_v7  ;;  %2062 = vmatpush1.bf16.msra.mxu1 %v2074_v7  ;;  %v2142_v56 = vld [vmem:[%s2618_s0 + $0x1a4] ss:$8 sps:$4 sm:$0xff]   ;;  %v2144_v57 = vld [vmem:[%s2618_s0 + $0xa0] ss:$8 sps:$4 sm:$0xff]   ;;  %v2146_v59 = vld [vmem:[%s2618_s0 + $0xb4] ss:$8 sps:$4 sm:$0xff]  }
  0x13   :  { %689 = vmatprep.subr.bf16.mxu0 %v2176_v0  ;;  %2053 = vmatprep.subr.bf16.mxu1 %v2176_v0  ;;  %v2145_v58 = vld [vmem:[%s2618_s0 + $0x1a0] ss:$8 sps:$4 sm:$0xff]   ;;  %v2148_v60 = vld [vmem:[%s2618_s0 + $0x1b4] ss:$8 sps:$4 sm:$0xff]   ;;  %v2150_v61 = vld [vmem:[%s2618_s0 + $0xb0] ss:$8 sps:$4 sm:$0xff]  }
  0x14   :  { %v2151_v62 = vld [vmem:[%s2618_s0 + $0x1b0] ss:$8 sps:$4 sm:$0xff]   ;;  %v2152_v63 = vld [vmem:[%s2618_s0 + $0xc4] ss:$8 sps:$4 sm:$0xff]   ;;  %v2156_v1 = vld [vmem:[%s2618_s0 + $0xc0] ss:$8 sps:$4 sm:$0xff]  }
  0x15   :  { %v2157_v2 = vld [vmem:[%s2618_s0 + $0x1c0] ss:$8 sps:$4 sm:$0xff]   ;;  %v2158_v3 = vld [vmem:[%s2618_s0 + $0xd4] ss:$8 sps:$4 sm:$0xff]   ;;  %v2162_v5 = vld [vmem:[%s2618_s0 + $0xd0] ss:$8 sps:$4 sm:$0xff]  }
  0x16   :  { %690 = vmatpush1.bf16.msra.mxu0 %v2075_v8  ;;  %2063 = vmatpush1.bf16.msra.mxu1 %v2075_v8  ;;  %v2160_v4 = vld [vmem:[%s2618_s0 + $0x1d4] ss:$8 sps:$4 sm:$0xff]   ;;  %v2163_v6 = vld [vmem:[%s2618_s0 + $0x1d0] ss:$8 sps:$4 sm:$0xff]   ;;  %v2164_v7 = vld [vmem:[%s2618_s0 + $0xe4] ss:$8 sps:$4 sm:$0xff]  }
  0x17   :  { %691 = vmatprep.subr.bf16.mxu0 %v2176_v0  ;;  %2054 = vmatprep.subr.bf16.mxu1 %v2176_v0  ;;  %v2166_v8 = vld [vmem:[%s2618_s0 + $0x1e4] ss:$8 sps:$4 sm:$0xff]   ;;  %v2170_v11 = vld [vmem:[%s2618_s0 + $0xf4] ss:$8 sps:$4 sm:$0xff]   ;;  %v2175_v14 = vld [vmem:[%s2618_s0 + $0x1f0] ss:$8 sps:$4 sm:$0xff]  }
  0x18   :  { %v2172_v12 = vld [vmem:[%s2618_s0 + $0x1f4] ss:$8 sps:$4 sm:$0xff]   ;;  %v2455_v15 = vld [vmem:[%s2619_s2] ss:$0 sm:$0xff] }
  0x1a   :  { %692 = vmatpush1.bf16.msra.mxu0 %v2076_v9  ;;  %2064 = vmatpush1.bf16.msra.mxu1 %v2076_v9  ;;  %v2168_v9 = vld [vmem:[%s2618_s0 + $0xe0] ss:$8 sps:$4 sm:$0xff]  }
  0x1b   :  { %693 = vmatprep.subr.bf16.mxu0 %v2176_v0  ;;  %2055 = vmatprep.subr.bf16.mxu1 %v2176_v0 }
  0x1e   :  { %694 = vmatpush1.bf16.msra.mxu0 %v2077_v10  ;;  %2065 = vmatpush1.bf16.msra.mxu1 %v2077_v10  ;;  %v2169_v10 = vld [vmem:[%s2618_s0 + $0x1e0] ss:$8 sps:$4 sm:$0xff]  }
  0x1f   :  { %695 = vmatprep.subr.bf16.mxu0 %v2176_v0  ;;  %2056 = vmatprep.subr.bf16.mxu1 %v2176_v0 }
  0x22   :  { %696 = vmatpush1.bf16.msra.mxu0 %v2078_v13  ;;  %2066 = vmatpush1.bf16.msra.mxu1 %v2078_v13  ;;  %v2174_v13 = vld [vmem:[%s2618_s0 + $0xf0] ss:$8 sps:$4 sm:$0xff]  }
  0x23   :  { %697 = vmatprep.subr.bf16.mxu0 %v2176_v0  ;;  %2057 = vmatprep.subr.bf16.mxu1 %v2176_v0  ;;  %v2154_v0 = vld [vmem:[%s2618_s0 + $0x1c4] ss:$8 sps:$4 sm:$0xff]  }
  0x26   :  { %698 = vmatpush1.bf16.msra.mxu0 %v677_v16  ;;  %2067 = vmatpush1.bf16.msra.mxu1 %v677_v16 }
  0x29   :  { %712 = vmatmul.mubr.bf16.vlgmr.msra.gmra.mrb[0].mxu0 %v2080_v17  ;;  %840 = vmatmul.mubr.bf16.vlgmr.msra.gmra.mrb[0].mxu1 %v2083_v18 }
  0x2a   :  { %1697 = vmatprep.mubr.msk.bf16.mxu0 %vm575_vm0, %v2086_v19  ;;  %1713 = vmatprep.mubr.msk.bf16.mxu1 %vm575_vm0, %v2088_v20 }
  0x31   :  { %720 = vmatmul.mubr.bf16.gmra.mrb[4].mxu0 %v2090_v21  ;;  %848 = vmatmul.mubr.bf16.gmra.mrb[4].mxu1 %v2091_v22 }
  0x32   :  { %1698 = vmatprep.mubr.msk.bf16.mxu0 %vm575_vm0, %v2092_v23  ;;  %1714 = vmatprep.mubr.msk.bf16.mxu1 %vm575_vm0, %v2094_v24 }
  0x39   :  { %728 = vmatmul.mubr.bf16.gmra.mrb[8].mxu0 %v2096_v25  ;;  %856 = vmatmul.mubr.bf16.gmra.mrb[8].mxu1 %v2097_v26 }
  0x3a   :  { %1699 = vmatprep.mubr.msk.bf16.mxu0 %vm575_vm0, %v2098_v27  ;;  %1715 = vmatprep.mubr.msk.bf16.mxu1 %vm575_vm0, %v2100_v28 }
  0x41   :  { %736 = vmatmul.mubr.bf16.gmra.mrb[12].mxu0 %v2102_v29  ;;  %864 = vmatmul.mubr.bf16.gmra.mrb[12].mxu1 %v2103_v30 }
  0x42   :  { %1700 = vmatprep.mubr.msk.bf16.mxu0 %vm575_vm0, %v2104_v31  ;;  %1716 = vmatprep.mubr.msk.bf16.mxu1 %vm575_vm0, %v2106_v32 }
  0x49   :  { %744 = vmatmul.mubr.bf16.gmra.mrb[16].mxu0 %v2108_v33  ;;  %872 = vmatmul.mubr.bf16.gmra.mrb[16].mxu1 %v2109_v34 }
  0x4a   :  { %1701 = vmatprep.mubr.msk.bf16.mxu0 %vm575_vm0, %v2110_v35  ;;  %1717 = vmatprep.mubr.msk.bf16.mxu1 %vm575_vm0, %v2112_v36 }
  0x51   :  { %752 = vmatmul.mubr.bf16.gmra.mrb[20].mxu0 %v2114_v37  ;;  %880 = vmatmul.mubr.bf16.gmra.mrb[20].mxu1 %v2115_v38 }
  0x52   :  { %1702 = vmatprep.mubr.msk.bf16.mxu0 %vm575_vm0, %v2116_v39  ;;  %1718 = vmatprep.mubr.msk.bf16.mxu1 %vm575_vm0, %v2118_v40 }
  0x59   :  { %760 = vmatmul.mubr.bf16.gmra.mrb[24].mxu0 %v2120_v41  ;;  %888 = vmatmul.mubr.bf16.gmra.mrb[24].mxu1 %v2121_v42 }
  0x5a   :  { %1703 = vmatprep.mubr.msk.bf16.mxu0 %vm575_vm0, %v2122_v43  ;;  %1719 = vmatprep.mubr.msk.bf16.mxu1 %vm575_vm0, %v2124_v44 }
  0x61   :  { %768 = vmatmul.mubr.bf16.gmra.mrb[28].mxu0 %v2126_v45  ;;  %896 = vmatmul.mubr.bf16.gmra.mrb[28].mxu1 %v2127_v46 }
  0x62   :  { %1704 = vmatprep.mubr.msk.bf16.mxu0 %vm575_vm0, %v2128_v47  ;;  %1720 = vmatprep.mubr.msk.bf16.mxu1 %vm575_vm0, %v2130_v48 }
  0x69   :  { %776 = vmatmul.mubr.bf16.gmra.mrb[32].mxu0 %v2132_v49  ;;  %904 = vmatmul.mubr.bf16.gmra.mrb[32].mxu1 %v2133_v50 }
  0x6a   :  { %1705 = vmatprep.mubr.msk.bf16.mxu0 %vm575_vm0, %v2134_v51  ;;  %1721 = vmatprep.mubr.msk.bf16.mxu1 %vm575_vm0, %v2136_v52 }
  0x71   :  { %784 = vmatmul.mubr.bf16.gmra.mrb[36].mxu0 %v2138_v53  ;;  %912 = vmatmul.mubr.bf16.gmra.mrb[36].mxu1 %v2139_v54 }
  0x72   :  { %1706 = vmatprep.mubr.msk.bf16.mxu0 %vm575_vm0, %v2140_v55  ;;  %1722 = vmatprep.mubr.msk.bf16.mxu1 %vm575_vm0, %v2142_v56 }
  0x79   :  { %792 = vmatmul.mubr.bf16.gmra.mrb[40].mxu0 %v2144_v57  ;;  %920 = vmatmul.mubr.bf16.gmra.mrb[40].mxu1 %v2145_v58 }
  0x7a   :  { %1707 = vmatprep.mubr.msk.bf16.mxu0 %vm575_vm0, %v2146_v59  ;;  %1723 = vmatprep.mubr.msk.bf16.mxu1 %vm575_vm0, %v2148_v60 }
  0x81   :  { %800 = vmatmul.mubr.bf16.gmra.mrb[44].mxu0 %v2150_v61  ;;  %928 = vmatmul.mubr.bf16.gmra.mrb[44].mxu1 %v2151_v62 }
  0x82   :  { %1708 = vmatprep.mubr.msk.bf16.mxu0 %vm575_vm0, %v2152_v63  ;;  %1724 = vmatprep.mubr.msk.bf16.mxu1 %vm575_vm0, %v2154_v0 }
  0x89   :  { %808 = vmatmul.mubr.bf16.gmra.mrb[48].mxu0 %v2156_v1  ;;  %936 = vmatmul.mubr.bf16.gmra.mrb[48].mxu1 %v2157_v2 }
  0x8a   :  { %1709 = vmatprep.mubr.msk.bf16.mxu0 %vm575_vm0, %v2158_v3  ;;  %1725 = vmatprep.mubr.msk.bf16.mxu1 %vm575_vm0, %v2160_v4 }
  0x91   :  { %816 = vmatmul.mubr.bf16.gmra.mrb[52].mxu0 %v2162_v5  ;;  %944 = vmatmul.mubr.bf16.gmra.mrb[52].mxu1 %v2163_v6 }
  0x92   :  { %1710 = vmatprep.mubr.msk.bf16.mxu0 %vm575_vm0, %v2164_v7  ;;  %1726 = vmatprep.mubr.msk.bf16.mxu1 %vm575_vm0, %v2166_v8 }
  0x99   :  { %824 = vmatmul.mubr.bf16.gmra.mrb[56].mxu0 %v2168_v9  ;;  %952 = vmatmul.mubr.bf16.gmra.mrb[56].mxu1 %v2169_v10 }
  0x9a   :  { %1711 = vmatprep.mubr.msk.bf16.mxu0 %vm575_vm0, %v2170_v11  ;;  %1727 = vmatprep.mubr.msk.bf16.mxu1 %vm575_vm0, %v2172_v12 }
  0xa1   :  { %832 = vmatmul.mubr.bf16.gmra.mrb[60].mxu0 %v2174_v13  ;;  %960 = vmatmul.mubr.bf16.gmra.mrb[60].mxu1 %v2175_v14 }
  0xfc   :  { %v713_v16 = vpop.f32.mrb[0].mxu0  ;;  %v841_v17 = vpop.f32.mrb[0].mxu1 }
  0xfd   :  { %v1170_v18 = vadd.f32 %v2455_v15, %v713_v16  ;;  %v1202_v19 = vadd.f32 %v2455_v15, %v841_v17  ;;  %v715_v20 = vpop.f32.mrb[1].mxu0  ;;  %v843_v21 = vpop.f32.mrb[1].mxu1 }
  0xfe   :  { %v716_v22 = vpop.f32.mrb[2].mxu0  ;;  %v844_v23 = vpop.f32.mrb[2].mxu1 }
  0xff   :  { %v1171_v24 = vadd.f32 %v2455_v15, %v716_v22  ;;  %v1203_v25 = vadd.f32 %v2455_v15, %v844_v23  ;;  %v718_v26 = vpop.f32.mrb[3].mxu0  ;;  %v846_v27 = vpop.f32.mrb[3].mxu1  ;;  %v1234_v28 = vmax.f32 %v1170_v18, 0.0  ;;  %v1266_v29 = vmax.f32 %v1202_v19, 0.0 }
 0x101   :  { %v1235_v30 = vmax.f32 %v1171_v24, 0.0  ;;  %v1267_v31 = vmax.f32 %v1203_v25, 0.0 }
 0x103   :  { %v1860_v32 = vpack.c.bf16 %v1235_v30, %v1234_v28  ;;  %v1940_v33 = vpack.c.bf16 %v1267_v31, %v1266_v29 }
 0x104   :  { %v721_v34 = vpop.f32.mrb[4].mxu0  ;;  %v849_v35 = vpop.f32.mrb[4].mxu1 }
 0x105   :  { %1861 = vst [vmem:[%s2620_s3] sm:$0xff] %v1860_v32   ;;  %2032 = vst [vmem:[%s2620_s3 + $0x80] sm:$0xff] %v1940_v33   ;;  %v1172_v36 = vadd.f32 %v2455_v15, %v721_v34  ;;  %v1204_v37 = vadd.f32 %v2455_v15, %v849_v35  ;;  %v723_v38 = vpop.f32.mrb[5].mxu0  ;;  %v851_v39 = vpop.f32.mrb[5].mxu1 }
 0x106   :  { %v724_v40 = vpop.f32.mrb[6].mxu0  ;;  %v852_v41 = vpop.f32.mrb[6].mxu1 }
 0x107   :  { %v1173_v42 = vadd.f32 %v2455_v15, %v724_v40  ;;  %v1205_v43 = vadd.f32 %v2455_v15, %v852_v41  ;;  %v726_v44 = vpop.f32.mrb[7].mxu0  ;;  %v854_v45 = vpop.f32.mrb[7].mxu1  ;;  %v1236_v46 = vmax.f32 %v1172_v36, 0.0  ;;  %v1268_v47 = vmax.f32 %v1204_v37, 0.0 }
 0x109   :  { %v1237_v48 = vmax.f32 %v1173_v42, 0.0  ;;  %v1269_v49 = vmax.f32 %v1205_v43, 0.0 }
 0x10b   :  { %v1865_v50 = vpack.c.bf16 %v1237_v48, %v1236_v46  ;;  %v1945_v51 = vpack.c.bf16 %v1269_v49, %v1268_v47 }
 0x10c   :  { %v729_v52 = vpop.f32.mrb[8].mxu0  ;;  %v857_v53 = vpop.f32.mrb[8].mxu1 }
 0x10d   :  { %2017 = vst [vmem:[%s2620_s3 + $0x8] sm:$0xff] %v1865_v50   ;;  %2033 = vst [vmem:[%s2620_s3 + $0x88] sm:$0xff] %v1945_v51   ;;  %v1174_v54 = vadd.f32 %v2455_v15, %v729_v52  ;;  %v1206_v55 = vadd.f32 %v2455_v15, %v857_v53  ;;  %v731_v56 = vpop.f32.mrb[9].mxu0  ;;  %v859_v57 = vpop.f32.mrb[9].mxu1 }
 0x10e   :  { %v732_v58 = vpop.f32.mrb[10].mxu0  ;;  %v860_v59 = vpop.f32.mrb[10].mxu1 }
 0x10f   :  { %v1175_v60 = vadd.f32 %v2455_v15, %v732_v58  ;;  %v1207_v61 = vadd.f32 %v2455_v15, %v860_v59  ;;  %v734_v62 = vpop.f32.mrb[11].mxu0  ;;  %v862_v63 = vpop.f32.mrb[11].mxu1  ;;  %v1238_v0 = vmax.f32 %v1174_v54, 0.0  ;;  %v1270_v1 = vmax.f32 %v1206_v55, 0.0 }
 0x111   :  { %v1239_v2 = vmax.f32 %v1175_v60, 0.0  ;;  %v1271_v3 = vmax.f32 %v1207_v61, 0.0 }
 0x113   :  { %v1870_v4 = vpack.c.bf16 %v1239_v2, %v1238_v0  ;;  %v1950_v5 = vpack.c.bf16 %v1271_v3, %v1270_v1 }
 0x114   :  { %v737_v6 = vpop.f32.mrb[12].mxu0  ;;  %v865_v7 = vpop.f32.mrb[12].mxu1 }
 0x115   :  { %2018 = vst [vmem:[%s2620_s3 + $0x10] sm:$0xff] %v1870_v4   ;;  %2034 = vst [vmem:[%s2620_s3 + $0x90] sm:$0xff] %v1950_v5   ;;  %v1176_v8 = vadd.f32 %v2455_v15, %v737_v6  ;;  %v1208_v9 = vadd.f32 %v2455_v15, %v865_v7  ;;  %v739_v10 = vpop.f32.mrb[13].mxu0  ;;  %v867_v11 = vpop.f32.mrb[13].mxu1 }
 0x116   :  { %v740_v12 = vpop.f32.mrb[14].mxu0  ;;  %v868_v13 = vpop.f32.mrb[14].mxu1 }
 0x117   :  { %v1177_v14 = vadd.f32 %v2455_v15, %v740_v12  ;;  %v1209_v16 = vadd.f32 %v2455_v15, %v868_v13  ;;  %v742_v17 = vpop.f32.mrb[15].mxu0  ;;  %v870_v18 = vpop.f32.mrb[15].mxu1  ;;  %v1240_v19 = vmax.f32 %v1176_v8, 0.0  ;;  %v1272_v20 = vmax.f32 %v1208_v9, 0.0 }
 0x119   :  { %v1241_v21 = vmax.f32 %v1177_v14, 0.0  ;;  %v1273_v22 = vmax.f32 %v1209_v16, 0.0 }
 0x11b   :  { %v1875_v23 = vpack.c.bf16 %v1241_v21, %v1240_v19  ;;  %v1955_v24 = vpack.c.bf16 %v1273_v22, %v1272_v20 }
 0x11c   :  { %v745_v25 = vpop.f32.mrb[16].mxu0  ;;  %v873_v26 = vpop.f32.mrb[16].mxu1 }
 0x11d   :  { %2019 = vst [vmem:[%s2620_s3 + $0x18] sm:$0xff] %v1875_v23   ;;  %2035 = vst [vmem:[%s2620_s3 + $0x98] sm:$0xff] %v1955_v24   ;;  %v1178_v27 = vadd.f32 %v2455_v15, %v745_v25  ;;  %v1210_v28 = vadd.f32 %v2455_v15, %v873_v26  ;;  %v747_v29 = vpop.f32.mrb[17].mxu0  ;;  %v875_v30 = vpop.f32.mrb[17].mxu1 }
 0x11e   :  { %v748_v31 = vpop.f32.mrb[18].mxu0  ;;  %v876_v32 = vpop.f32.mrb[18].mxu1 }
 0x11f   :  { %v1179_v33 = vadd.f32 %v2455_v15, %v748_v31  ;;  %v1211_v34 = vadd.f32 %v2455_v15, %v876_v32  ;;  %v750_v35 = vpop.f32.mrb[19].mxu0  ;;  %v878_v36 = vpop.f32.mrb[19].mxu1  ;;  %v1242_v37 = vmax.f32 %v1178_v27, 0.0  ;;  %v1274_v38 = vmax.f32 %v1210_v28, 0.0 }
 0x121   :  { %v1243_v39 = vmax.f32 %v1179_v33, 0.0  ;;  %v1275_v40 = vmax.f32 %v1211_v34, 0.0 }
 0x123   :  { %v1880_v41 = vpack.c.bf16 %v1243_v39, %v1242_v37  ;;  %v1960_v42 = vpack.c.bf16 %v1275_v40, %v1274_v38 }
 0x124   :  { %v753_v43 = vpop.f32.mrb[20].mxu0  ;;  %v881_v44 = vpop.f32.mrb[20].mxu1 }
 0x125   :  { %2020 = vst [vmem:[%s2620_s3 + $0x20] sm:$0xff] %v1880_v41   ;;  %2036 = vst [vmem:[%s2620_s3 + $0xa0] sm:$0xff] %v1960_v42   ;;  %v1180_v45 = vadd.f32 %v2455_v15, %v753_v43  ;;  %v1212_v46 = vadd.f32 %v2455_v15, %v881_v44  ;;  %v755_v47 = vpop.f32.mrb[21].mxu0  ;;  %v883_v48 = vpop.f32.mrb[21].mxu1 }
 0x126   :  { %v756_v49 = vpop.f32.mrb[22].mxu0  ;;  %v884_v50 = vpop.f32.mrb[22].mxu1 }
 0x127   :  { %v1181_v51 = vadd.f32 %v2455_v15, %v756_v49  ;;  %v1213_v52 = vadd.f32 %v2455_v15, %v884_v50  ;;  %v758_v53 = vpop.f32.mrb[23].mxu0  ;;  %v886_v54 = vpop.f32.mrb[23].mxu1  ;;  %v1244_v55 = vmax.f32 %v1180_v45, 0.0  ;;  %v1276_v56 = vmax.f32 %v1212_v46, 0.0 }
 0x129   :  { %v1245_v57 = vmax.f32 %v1181_v51, 0.0  ;;  %v1277_v58 = vmax.f32 %v1213_v52, 0.0 }
 0x12b   :  { %v1885_v59 = vpack.c.bf16 %v1245_v57, %v1244_v55  ;;  %v1965_v60 = vpack.c.bf16 %v1277_v58, %v1276_v56 }
 0x12c   :  { %v761_v61 = vpop.f32.mrb[24].mxu0  ;;  %v889_v62 = vpop.f32.mrb[24].mxu1 }
 0x12d   :  { %2021 = vst [vmem:[%s2620_s3 + $0x28] sm:$0xff] %v1885_v59   ;;  %2037 = vst [vmem:[%s2620_s3 + $0xa8] sm:$0xff] %v1965_v60   ;;  %v1182_v63 = vadd.f32 %v2455_v15, %v761_v61  ;;  %v1214_v0 = vadd.f32 %v2455_v15, %v889_v62  ;;  %v763_v1 = vpop.f32.mrb[25].mxu0  ;;  %v891_v2 = vpop.f32.mrb[25].mxu1 }
 0x12e   :  { %v764_v3 = vpop.f32.mrb[26].mxu0  ;;  %v892_v4 = vpop.f32.mrb[26].mxu1 }
 0x12f   :  { %v1183_v5 = vadd.f32 %v2455_v15, %v764_v3  ;;  %v1215_v6 = vadd.f32 %v2455_v15, %v892_v4  ;;  %v766_v7 = vpop.f32.mrb[27].mxu0  ;;  %v894_v8 = vpop.f32.mrb[27].mxu1  ;;  %v1246_v9 = vmax.f32 %v1182_v63, 0.0  ;;  %v1278_v10 = vmax.f32 %v1214_v0, 0.0 }
 0x131   :  { %v1247_v11 = vmax.f32 %v1183_v5, 0.0  ;;  %v1279_v12 = vmax.f32 %v1215_v6, 0.0 }
 0x133   :  { %v1890_v13 = vpack.c.bf16 %v1247_v11, %v1246_v9  ;;  %v1970_v14 = vpack.c.bf16 %v1279_v12, %v1278_v10 }
 0x134   :  { %v769_v16 = vpop.f32.mrb[28].mxu0  ;;  %v897_v17 = vpop.f32.mrb[28].mxu1 }
 0x135   :  { %2022 = vst [vmem:[%s2620_s3 + $0x30] sm:$0xff] %v1890_v13   ;;  %2038 = vst [vmem:[%s2620_s3 + $0xb0] sm:$0xff] %v1970_v14   ;;  %v1184_v18 = vadd.f32 %v2455_v15, %v769_v16  ;;  %v1216_v19 = vadd.f32 %v2455_v15, %v897_v17  ;;  %v771_v20 = vpop.f32.mrb[29].mxu0  ;;  %v899_v21 = vpop.f32.mrb[29].mxu1 }
 0x136   :  { %v772_v22 = vpop.f32.mrb[30].mxu0  ;;  %v900_v23 = vpop.f32.mrb[30].mxu1 }
 0x137   :  { %v1185_v24 = vadd.f32 %v2455_v15, %v772_v22  ;;  %v1217_v25 = vadd.f32 %v2455_v15, %v900_v23  ;;  %v774_v26 = vpop.f32.mrb[31].mxu0  ;;  %v902_v27 = vpop.f32.mrb[31].mxu1  ;;  %v1248_v28 = vmax.f32 %v1184_v18, 0.0  ;;  %v1280_v29 = vmax.f32 %v1216_v19, 0.0 }
 0x139   :  { %v1249_v30 = vmax.f32 %v1185_v24, 0.0  ;;  %v1281_v31 = vmax.f32 %v1217_v25, 0.0 }
 0x13b   :  { %v1895_v32 = vpack.c.bf16 %v1249_v30, %v1248_v28  ;;  %v1975_v33 = vpack.c.bf16 %v1281_v31, %v1280_v29 }
 0x13c   :  { %v777_v34 = vpop.f32.mrb[32].mxu0  ;;  %v905_v35 = vpop.f32.mrb[32].mxu1 }
 0x13d   :  { %2023 = vst [vmem:[%s2620_s3 + $0x38] sm:$0xff] %v1895_v32   ;;  %2039 = vst [vmem:[%s2620_s3 + $0xb8] sm:$0xff] %v1975_v33   ;;  %v1186_v36 = vadd.f32 %v2455_v15, %v777_v34  ;;  %v1218_v37 = vadd.f32 %v2455_v15, %v905_v35  ;;  %v779_v38 = vpop.f32.mrb[33].mxu0  ;;  %v907_v39 = vpop.f32.mrb[33].mxu1 }
 0x13e   :  { %v780_v40 = vpop.f32.mrb[34].mxu0  ;;  %v908_v41 = vpop.f32.mrb[34].mxu1 }
 0x13f   :  { %v1187_v42 = vadd.f32 %v2455_v15, %v780_v40  ;;  %v1219_v43 = vadd.f32 %v2455_v15, %v908_v41  ;;  %v782_v44 = vpop.f32.mrb[35].mxu0  ;;  %v910_v45 = vpop.f32.mrb[35].mxu1  ;;  %v1250_v46 = vmax.f32 %v1186_v36, 0.0  ;;  %v1282_v47 = vmax.f32 %v1218_v37, 0.0 }
 0x141   :  { %v1251_v48 = vmax.f32 %v1187_v42, 0.0  ;;  %v1283_v49 = vmax.f32 %v1219_v43, 0.0 }
 0x143   :  { %v1900_v50 = vpack.c.bf16 %v1251_v48, %v1250_v46  ;;  %v1980_v51 = vpack.c.bf16 %v1283_v49, %v1282_v47 }
 0x144   :  { %v785_v52 = vpop.f32.mrb[36].mxu0  ;;  %v913_v53 = vpop.f32.mrb[36].mxu1 }
 0x145   :  { %2024 = vst [vmem:[%s2620_s3 + $0x40] sm:$0xff] %v1900_v50   ;;  %2040 = vst [vmem:[%s2620_s3 + $0xc0] sm:$0xff] %v1980_v51   ;;  %v1188_v54 = vadd.f32 %v2455_v15, %v785_v52  ;;  %v1220_v55 = vadd.f32 %v2455_v15, %v913_v53  ;;  %v787_v56 = vpop.f32.mrb[37].mxu0  ;;  %v915_v57 = vpop.f32.mrb[37].mxu1 }
 0x146   :  { %v788_v58 = vpop.f32.mrb[38].mxu0  ;;  %v916_v59 = vpop.f32.mrb[38].mxu1 }
 0x147   :  { %v1189_v60 = vadd.f32 %v2455_v15, %v788_v58  ;;  %v1221_v61 = vadd.f32 %v2455_v15, %v916_v59  ;;  %v790_v62 = vpop.f32.mrb[39].mxu0  ;;  %v918_v63 = vpop.f32.mrb[39].mxu1  ;;  %v1252_v0 = vmax.f32 %v1188_v54, 0.0  ;;  %v1284_v1 = vmax.f32 %v1220_v55, 0.0 }
 0x149   :  { %v1253_v2 = vmax.f32 %v1189_v60, 0.0  ;;  %v1285_v3 = vmax.f32 %v1221_v61, 0.0 }
 0x14b   :  { %v1905_v4 = vpack.c.bf16 %v1253_v2, %v1252_v0  ;;  %v1985_v5 = vpack.c.bf16 %v1285_v3, %v1284_v1 }
 0x14c   :  { %v793_v6 = vpop.f32.mrb[40].mxu0  ;;  %v921_v7 = vpop.f32.mrb[40].mxu1 }
 0x14d   :  { %2025 = vst [vmem:[%s2620_s3 + $0x48] sm:$0xff] %v1905_v4   ;;  %2041 = vst [vmem:[%s2620_s3 + $0xc8] sm:$0xff] %v1985_v5   ;;  %v1190_v8 = vadd.f32 %v2455_v15, %v793_v6  ;;  %v1222_v9 = vadd.f32 %v2455_v15, %v921_v7  ;;  %v795_v10 = vpop.f32.mrb[41].mxu0  ;;  %v923_v11 = vpop.f32.mrb[41].mxu1 }
 0x14e   :  { %v796_v12 = vpop.f32.mrb[42].mxu0  ;;  %v924_v13 = vpop.f32.mrb[42].mxu1 }
 0x14f   :  { %v1191_v14 = vadd.f32 %v2455_v15, %v796_v12  ;;  %v1223_v16 = vadd.f32 %v2455_v15, %v924_v13  ;;  %v798_v17 = vpop.f32.mrb[43].mxu0  ;;  %v926_v18 = vpop.f32.mrb[43].mxu1  ;;  %v1254_v19 = vmax.f32 %v1190_v8, 0.0  ;;  %v1286_v20 = vmax.f32 %v1222_v9, 0.0 }
 0x151   :  { %v1255_v21 = vmax.f32 %v1191_v14, 0.0  ;;  %v1287_v22 = vmax.f32 %v1223_v16, 0.0 }
 0x153   :  { %v1910_v23 = vpack.c.bf16 %v1255_v21, %v1254_v19  ;;  %v1990_v24 = vpack.c.bf16 %v1287_v22, %v1286_v20 }
 0x154   :  { %v801_v25 = vpop.f32.mrb[44].mxu0  ;;  %v929_v26 = vpop.f32.mrb[44].mxu1 }
 0x155   :  { %2026 = vst [vmem:[%s2620_s3 + $0x50] sm:$0xff] %v1910_v23   ;;  %2042 = vst [vmem:[%s2620_s3 + $0xd0] sm:$0xff] %v1990_v24   ;;  %v1192_v27 = vadd.f32 %v2455_v15, %v801_v25  ;;  %v1224_v28 = vadd.f32 %v2455_v15, %v929_v26  ;;  %v803_v29 = vpop.f32.mrb[45].mxu0  ;;  %v931_v30 = vpop.f32.mrb[45].mxu1 }
 0x156   :  { %v804_v31 = vpop.f32.mrb[46].mxu0  ;;  %v932_v32 = vpop.f32.mrb[46].mxu1 }
 0x157   :  { %v1193_v33 = vadd.f32 %v2455_v15, %v804_v31  ;;  %v1225_v34 = vadd.f32 %v2455_v15, %v932_v32  ;;  %v806_v35 = vpop.f32.mrb[47].mxu0  ;;  %v934_v36 = vpop.f32.mrb[47].mxu1  ;;  %v1256_v37 = vmax.f32 %v1192_v27, 0.0  ;;  %v1288_v38 = vmax.f32 %v1224_v28, 0.0 }
 0x159   :  { %v1257_v39 = vmax.f32 %v1193_v33, 0.0  ;;  %v1289_v40 = vmax.f32 %v1225_v34, 0.0 }
 0x15b   :  { %v1915_v41 = vpack.c.bf16 %v1257_v39, %v1256_v37  ;;  %v1995_v42 = vpack.c.bf16 %v1289_v40, %v1288_v38 }
 0x15c   :  { %v809_v43 = vpop.f32.mrb[48].mxu0  ;;  %v937_v44 = vpop.f32.mrb[48].mxu1 }
 0x15d   :  { %2027 = vst [vmem:[%s2620_s3 + $0x58] sm:$0xff] %v1915_v41   ;;  %2043 = vst [vmem:[%s2620_s3 + $0xd8] sm:$0xff] %v1995_v42   ;;  %v1194_v45 = vadd.f32 %v2455_v15, %v809_v43  ;;  %v1226_v46 = vadd.f32 %v2455_v15, %v937_v44  ;;  %v811_v47 = vpop.f32.mrb[49].mxu0  ;;  %v939_v48 = vpop.f32.mrb[49].mxu1 }
 0x15e   :  { %v812_v49 = vpop.f32.mrb[50].mxu0  ;;  %v940_v50 = vpop.f32.mrb[50].mxu1 }
 0x15f   :  { %v1195_v51 = vadd.f32 %v2455_v15, %v812_v49  ;;  %v1227_v52 = vadd.f32 %v2455_v15, %v940_v50  ;;  %v814_v53 = vpop.f32.mrb[51].mxu0  ;;  %v942_v54 = vpop.f32.mrb[51].mxu1  ;;  %v1258_v55 = vmax.f32 %v1194_v45, 0.0  ;;  %v1290_v56 = vmax.f32 %v1226_v46, 0.0 }
 0x161   :  { %v1259_v57 = vmax.f32 %v1195_v51, 0.0  ;;  %v1291_v58 = vmax.f32 %v1227_v52, 0.0 }
 0x163   :  { %v1920_v59 = vpack.c.bf16 %v1259_v57, %v1258_v55  ;;  %v2000_v60 = vpack.c.bf16 %v1291_v58, %v1290_v56 }
 0x164   :  { %v817_v61 = vpop.f32.mrb[52].mxu0  ;;  %v945_v62 = vpop.f32.mrb[52].mxu1 }
 0x165   :  { %2028 = vst [vmem:[%s2620_s3 + $0x60] sm:$0xff] %v1920_v59   ;;  %2044 = vst [vmem:[%s2620_s3 + $0xe0] sm:$0xff] %v2000_v60   ;;  %v1196_v63 = vadd.f32 %v2455_v15, %v817_v61  ;;  %v1228_v0 = vadd.f32 %v2455_v15, %v945_v62  ;;  %v819_v1 = vpop.f32.mrb[53].mxu0  ;;  %v947_v2 = vpop.f32.mrb[53].mxu1 }
 0x166   :  { %v820_v3 = vpop.f32.mrb[54].mxu0  ;;  %v948_v4 = vpop.f32.mrb[54].mxu1 }
 0x167   :  { %v1197_v5 = vadd.f32 %v2455_v15, %v820_v3  ;;  %v1229_v6 = vadd.f32 %v2455_v15, %v948_v4  ;;  %v822_v7 = vpop.f32.mrb[55].mxu0  ;;  %v950_v8 = vpop.f32.mrb[55].mxu1  ;;  %v1260_v9 = vmax.f32 %v1196_v63, 0.0  ;;  %v1292_v10 = vmax.f32 %v1228_v0, 0.0 }
 0x169   :  { %v1261_v11 = vmax.f32 %v1197_v5, 0.0  ;;  %v1293_v12 = vmax.f32 %v1229_v6, 0.0 }
 0x16b   :  { %v1925_v13 = vpack.c.bf16 %v1261_v11, %v1260_v9  ;;  %v2005_v14 = vpack.c.bf16 %v1293_v12, %v1292_v10 }
 0x16c   :  { %v825_v16 = vpop.f32.mrb[56].mxu0  ;;  %v953_v17 = vpop.f32.mrb[56].mxu1 }
 0x16d   :  { %2029 = vst [vmem:[%s2620_s3 + $0x68] sm:$0xff] %v1925_v13   ;;  %2045 = vst [vmem:[%s2620_s3 + $0xe8] sm:$0xff] %v2005_v14   ;;  %v1198_v18 = vadd.f32 %v2455_v15, %v825_v16  ;;  %v1230_v19 = vadd.f32 %v2455_v15, %v953_v17  ;;  %v827_v20 = vpop.f32.mrb[57].mxu0  ;;  %v955_v21 = vpop.f32.mrb[57].mxu1 }
 0x16e   :  { %v828_v22 = vpop.f32.mrb[58].mxu0  ;;  %v956_v23 = vpop.f32.mrb[58].mxu1 }
 0x16f   :  { %v1199_v24 = vadd.f32 %v2455_v15, %v828_v22  ;;  %v1231_v25 = vadd.f32 %v2455_v15, %v956_v23  ;;  %v830_v26 = vpop.f32.mrb[59].mxu0  ;;  %v958_v27 = vpop.f32.mrb[59].mxu1  ;;  %v1262_v28 = vmax.f32 %v1198_v18, 0.0  ;;  %v1294_v29 = vmax.f32 %v1230_v19, 0.0 }
 0x171   :  { %v1263_v30 = vmax.f32 %v1199_v24, 0.0  ;;  %v1295_v31 = vmax.f32 %v1231_v25, 0.0 }
 0x173   :  { %v1930_v32 = vpack.c.bf16 %v1263_v30, %v1262_v28  ;;  %v2010_v33 = vpack.c.bf16 %v1295_v31, %v1294_v29 }
 0x174   :  { %v833_v34 = vpop.f32.mrb[60].mxu0  ;;  %v961_v35 = vpop.f32.mrb[60].mxu1 }
 0x175   :  { %2030 = vst [vmem:[%s2620_s3 + $0x70] sm:$0xff] %v1930_v32   ;;  %2046 = vst [vmem:[%s2620_s3 + $0xf0] sm:$0xff] %v2010_v33   ;;  %v1200_v36 = vadd.f32 %v2455_v15, %v833_v34  ;;  %v1232_v37 = vadd.f32 %v2455_v15, %v961_v35  ;;  %v835_v38 = vpop.f32.mrb[61].mxu0  ;;  %v963_v39 = vpop.f32.mrb[61].mxu1 }
 0x176   :  { %v836_v40 = vpop.f32.mrb[62].mxu0  ;;  %v964_v41 = vpop.f32.mrb[62].mxu1 }
 0x177   :  { %v1201_v42 = vadd.f32 %v2455_v15, %v836_v40  ;;  %v1233_v43 = vadd.f32 %v2455_v15, %v964_v41  ;;  %v838_v44 = vpop.f32.mrb[63].mxu0  ;;  %v966_v45 = vpop.f32.mrb[63].mxu1  ;;  %v1264_v46 = vmax.f32 %v1200_v36, 0.0  ;;  %v1296_v47 = vmax.f32 %v1232_v37, 0.0 }
 0x179   :  { %v1265_v48 = vmax.f32 %v1201_v42, 0.0  ;;  %v1297_v49 = vmax.f32 %v1233_v43, 0.0 }
 0x17b   :  { %v1935_v50 = vpack.c.bf16 %v1265_v48, %v1264_v46  ;;  %v2015_v51 = vpack.c.bf16 %v1297_v49, %v1296_v47 }
 0x17d   :  { %2031 = vst [vmem:[%s2620_s3 + $0x78] sm:$0xff] %v1935_v50   ;;  %2047 = vst [vmem:[%s2620_s3 + $0xf8] sm:$0xff] %v2015_v51  }

// kernel: forward.20
= control target key start
LH: loop header
LB: loop body
LE: loop exit
PB: predicated region body
PF: predicated region fallthrough
CT: control target
= control target key end

     0   :  { %v1015_v1 = vmov 0   ;;  %v58_v49 = vlaneseq  ;;  %s1337_s1 = inlined_call_operand.vmem [shape: bf16[128,256], index: 1, kind: input, shape index: {}]   ;;  %s1338_s4 = inlined_call_operand.vmem [shape: bf16[128,256], index: 4, kind: input, shape index: {}]   ;;  %s1339_s0 = inlined_call_operand.vmem [shape: bf16[128,128], index: 0, kind: input, shape index: {}]   ;;  %s1340_s3 = inlined_call_operand.vmem [shape: bf16[128,128], index: 3, kind: input, shape index: {}]   ;;  %s1341_s2 = inlined_call_operand.vmem [shape: f32[1,256], index: 2, kind: input, shape index: {}]   ;;  %s1342_s5 = inlined_call_operand.vmem [shape: f32[1,256], index: 5, kind: input, shape index: {}]   ;;  %s1343_s6 = inlined_call_operand.vmem [shape: bf16[128,256], index: 6, kind: output, shape index: {}]  }
   0x1   :  { %v951_v0 = vld [vmem:[%s1337_s1 + $0x4] ss:$8 sps:$4 sm:$0xff]   ;;  %228 = vmatprep.mubr.bf16.mxu1 %v1015_v1  ;;  %501 = vmatprep.mubr.bf16.mxu0 %v1015_v1  ;;  %v955_v3 = vld [vmem:[%s1337_s1] ss:$8 sps:$4 sm:$0xff]   ;;  %v957_v5 = vld [vmem:[%s1337_s1 + $0x14] ss:$8 sps:$4 sm:$0xff]  }
   0x2   :  { %v953_v2 = vld [vmem:[%s1338_s4 + $0x4] ss:$8 sps:$4 sm:$0xff]   ;;  %196 = vmatprep.subr.bf16.mxu1 %v951_v0  ;;  %v956_v4 = vld [vmem:[%s1338_s4] ss:$8 sps:$4 sm:$0xff]   ;;  %v959_v6 = vld [vmem:[%s1338_s4 + $0x14] ss:$8 sps:$4 sm:$0xff]  }
   0x3   :  { %469 = vmatprep.subr.bf16.mxu0 %v953_v2  ;;  %197 = vmatpush1.bf16.msra.mxu1 %v955_v3  ;;  %v961_v7 = vld [vmem:[%s1337_s1 + $0x10] ss:$8 sps:$4 sm:$0xff]   ;;  %v963_v9 = vld [vmem:[%s1337_s1 + $0x24] ss:$8 sps:$4 sm:$0xff]   ;;  %v967_v11 = vld [vmem:[%s1337_s1 + $0x20] ss:$8 sps:$4 sm:$0xff]  }
   0x4   :  { %470 = vmatpush1.bf16.msra.mxu0 %v956_v4  ;;  %198 = vmatprep.subr.bf16.mxu1 %v957_v5  ;;  %v962_v8 = vld [vmem:[%s1338_s4 + $0x10] ss:$8 sps:$4 sm:$0xff]   ;;  %v965_v10 = vld [vmem:[%s1338_s4 + $0x24] ss:$8 sps:$4 sm:$0xff]   ;;  %v968_v12 = vld [vmem:[%s1338_s4 + $0x20] ss:$8 sps:$4 sm:$0xff]  }
   0x5   :  { %471 = vmatprep.subr.bf16.mxu0 %v959_v6  ;;  %v969_v13 = vld [vmem:[%s1337_s1 + $0x34] ss:$8 sps:$4 sm:$0xff]   ;;  %v973_v15 = vld [vmem:[%s1337_s1 + $0x30] ss:$8 sps:$4 sm:$0xff]   ;;  %v975_v17 = vld [vmem:[%s1337_s1 + $0x44] ss:$8 sps:$4 sm:$0xff]  }
   0x6   :  { %v971_v14 = vld [vmem:[%s1338_s4 + $0x34] ss:$8 sps:$4 sm:$0xff]   ;;  %v974_v16 = vld [vmem:[%s1338_s4 + $0x30] ss:$8 sps:$4 sm:$0xff]   ;;  %v977_v18 = vld [vmem:[%s1338_s4 + $0x44] ss:$8 sps:$4 sm:$0xff]  }
   0x7   :  { %199 = vmatpush1.bf16.msra.mxu1 %v961_v7  ;;  %v979_v19 = vld [vmem:[%s1337_s1 + $0x40] ss:$8 sps:$4 sm:$0xff]   ;;  %v981_v21 = vld [vmem:[%s1337_s1 + $0x54] ss:$8 sps:$4 sm:$0xff]   ;;  %v985_v23 = vld [vmem:[%s1337_s1 + $0x50] ss:$8 sps:$4 sm:$0xff]  }
   0x8   :  { %472 = vmatpush1.bf16.msra.mxu0 %v962_v8  ;;  %200 = vmatprep.subr.bf16.mxu1 %v963_v9  ;;  %v980_v20 = vld [vmem:[%s1338_s4 + $0x40] ss:$8 sps:$4 sm:$0xff]   ;;  %v983_v22 = vld [vmem:[%s1338_s4 + $0x54] ss:$8 sps:$4 sm:$0xff]   ;;  %v986_v24 = vld [vmem:[%s1338_s4 + $0x50] ss:$8 sps:$4 sm:$0xff]  }
   0x9   :  { %473 = vmatprep.subr.bf16.mxu0 %v965_v10  ;;  %v987_v25 = vld [vmem:[%s1337_s1 + $0x64] ss:$8 sps:$4 sm:$0xff]   ;;  %v991_v27 = vld [vmem:[%s1337_s1 + $0x60] ss:$8 sps:$4 sm:$0xff]   ;;  %v993_v29 = vld [vmem:[%s1337_s1 + $0x74] ss:$8 sps:$4 sm:$0xff]  }
   0xa   :  { %v989_v26 = vld [vmem:[%s1338_s4 + $0x64] ss:$8 sps:$4 sm:$0xff]   ;;  %v992_v28 = vld [vmem:[%s1338_s4 + $0x60] ss:$8 sps:$4 sm:$0xff]   ;;  %v995_v30 = vld [vmem:[%s1338_s4 + $0x74] ss:$8 sps:$4 sm:$0xff]  }
   0xb   :  { %201 = vmatpush1.bf16.msra.mxu1 %v967_v11  ;;  %v997_v31 = vld [vmem:[%s1337_s1 + $0x70] ss:$8 sps:$4 sm:$0xff]   ;;  %v999_v33 = vld [vmem:[%s1339_s0] sm:$0xff]   ;;  %v1001_v35 = vld [vmem:[%s1339_s0 + $0x8] sm:$0xff]   ;;  %v59_v50 = vshrl.u32 %v58_v49, 7 }
   0xc   :  { %474 = vmatpush1.bf16.msra.mxu0 %v968_v12  ;;  %202 = vmatprep.subr.bf16.mxu1 %v969_v13  ;;  %v998_v32 = vld [vmem:[%s1338_s4 + $0x70] ss:$8 sps:$4 sm:$0xff]   ;;  %v1000_v34 = vld [vmem:[%s1340_s3] sm:$0xff]   ;;  %v1002_v36 = vld [vmem:[%s1340_s3 + $0x8] sm:$0xff]  }
   0xd   :  { %475 = vmatprep.subr.bf16.mxu0 %v971_v14  ;;  %v1003_v37 = vld [vmem:[%s1339_s0 + $0x10] sm:$0xff]   ;;  %v1005_v39 = vld [vmem:[%s1339_s0 + $0x18] sm:$0xff]   ;;  %v1007_v41 = vld [vmem:[%s1339_s0 + $0x20] sm:$0xff]   ;;  %v60_v51 = vsub.s32 0, %v59_v50  ;;  %v64_v53 = vsub.s32 1, %v59_v50 }
   0xe   :  { %v1004_v38 = vld [vmem:[%s1340_s3 + $0x10] sm:$0xff]   ;;  %v1006_v40 = vld [vmem:[%s1340_s3 + $0x18] sm:$0xff]   ;;  %v1008_v42 = vld [vmem:[%s1340_s3 + $0x20] sm:$0xff]  }
   0xf   :  { %203 = vmatpush1.bf16.msra.mxu1 %v973_v15  ;;  %v1009_v43 = vld [vmem:[%s1339_s0 + $0x28] sm:$0xff]   ;;  %v1011_v45 = vld [vmem:[%s1339_s0 + $0x30] sm:$0xff]   ;;  %v1013_v47 = vld [vmem:[%s1339_s0 + $0x38] sm:$0xff]  }
  0x10   :  { %476 = vmatpush1.bf16.msra.mxu0 %v974_v16  ;;  %204 = vmatprep.subr.bf16.mxu1 %v975_v17  ;;  %v1010_v44 = vld [vmem:[%s1340_s3 + $0x28] sm:$0xff]   ;;  %v1012_v46 = vld [vmem:[%s1340_s3 + $0x30] sm:$0xff]   ;;  %v1014_v48 = vld [vmem:[%s1340_s3 + $0x38] sm:$0xff]  }
  0x11   :  { %477 = vmatprep.subr.bf16.mxu0 %v977_v18  ;;  %v56_v52 = vld [vmem:[%s1341_s2] sm:$0x3] }
  0x12   :  { %v1214_v54 = vrot.slane %v56_v52, %v60_v51  ;;  %v614_v55 = vld [vmem:[%s1342_s5] sm:$0x3]  ;;  %v1219_v56 = vrot.slane %v56_v52, %v64_v53 }
  0x13   :  { %205 = vmatpush1.bf16.msra.mxu1 %v979_v19  ;;  %v1222_v60 = vrot.slane %v614_v55, %v60_v51  ;;  %v1225_v0 = vrot.slane %v614_v55, %v64_v53 }
  0x14   :  { %478 = vmatpush1.bf16.msra.mxu0 %v980_v20  ;;  %206 = vmatprep.subr.bf16.mxu1 %v981_v21 }
  0x15   :  { %479 = vmatprep.subr.bf16.mxu0 %v983_v22 }
  0x17   :  { %207 = vmatpush1.bf16.msra.mxu1 %v985_v23 }
  0x18   :  { %480 = vmatpush1.bf16.msra.mxu0 %v986_v24  ;;  %208 = vmatprep.subr.bf16.mxu1 %v987_v25 }
  0x19   :  { %481 = vmatprep.subr.bf16.mxu0 %v989_v26 }
  0x1b   :  { %209 = vmatpush1.bf16.msra.mxu1 %v991_v27 }
  0x1c   :  { %482 = vmatpush1.bf16.msra.mxu0 %v992_v28  ;;  %210 = vmatprep.subr.bf16.mxu1 %v993_v29 }
  0x1d   :  { %483 = vmatprep.subr.bf16.mxu0 %v995_v30 }
  0x1f   :  { %211 = vmatpush1.bf16.msra.mxu1 %v997_v31 }
  0x20   :  { %484 = vmatpush1.bf16.msra.mxu0 %v998_v32 }
  0x22   :  { %229 = vmatmul.mubr.bf16.vlgmr.msra.gmra.mrb[0].mxu1 %v999_v33 }
  0x23   :  { %502 = vmatmul.mubr.bf16.vlgmr.msra.gmra.mrb[0].mxu0 %v1000_v34  ;;  %238 = vmatprep.mubr.bf16.mxu1 %v1015_v1 }
  0x24   :  { %511 = vmatprep.mubr.bf16.mxu0 %v1015_v1 }
  0x2a   :  { %239 = vmatmul.mubr.bf16.gmra.mrb[4].mxu1 %v1001_v35 }
  0x2b   :  { %512 = vmatmul.mubr.bf16.gmra.mrb[4].mxu0 %v1002_v36  ;;  %248 = vmatprep.mubr.bf16.mxu1 %v1015_v1 }
  0x2c   :  { %521 = vmatprep.mubr.bf16.mxu0 %v1015_v1 }
  0x32   :  { %249 = vmatmul.mubr.bf16.gmra.mrb[8].mxu1 %v1003_v37 }
  0x33   :  { %522 = vmatmul.mubr.bf16.gmra.mrb[8].mxu0 %v1004_v38  ;;  %258 = vmatprep.mubr.bf16.mxu1 %v1015_v1 }
  0x34   :  { %531 = vmatprep.mubr.bf16.mxu0 %v1015_v1 }
  0x3a   :  { %259 = vmatmul.mubr.bf16.gmra.mrb[12].mxu1 %v1005_v39 }
  0x3b   :  { %532 = vmatmul.mubr.bf16.gmra.mrb[12].mxu0 %v1006_v40  ;;  %268 = vmatprep.mubr.bf16.mxu1 %v1015_v1 }
  0x3c   :  { %541 = vmatprep.mubr.bf16.mxu0 %v1015_v1 }
  0x42   :  { %269 = vmatmul.mubr.bf16.gmra.mrb[16].mxu1 %v1007_v41 }
  0x43   :  { %542 = vmatmul.mubr.bf16.gmra.mrb[16].mxu0 %v1008_v42  ;;  %278 = vmatprep.mubr.bf16.mxu1 %v1015_v1 }
  0x44   :  { %551 = vmatprep.mubr.bf16.mxu0 %v1015_v1 }
  0x4a   :  { %279 = vmatmul.mubr.bf16.gmra.mrb[20].mxu1 %v1009_v43 }
  0x4b   :  { %552 = vmatmul.mubr.bf16.gmra.mrb[20].mxu0 %v1010_v44  ;;  %288 = vmatprep.mubr.bf16.mxu1 %v1015_v1 }
  0x4c   :  { %561 = vmatprep.mubr.bf16.mxu0 %v1015_v1 }
  0x52   :  { %289 = vmatmul.mubr.bf16.gmra.mrb[24].mxu1 %v1011_v45 }
  0x53   :  { %562 = vmatmul.mubr.bf16.gmra.mrb[24].mxu0 %v1012_v46  ;;  %298 = vmatprep.mubr.bf16.mxu1 %v1015_v1 }
  0x54   :  { %571 = vmatprep.mubr.bf16.mxu0 %v1015_v1 }
  0x5a   :  { %299 = vmatmul.mubr.bf16.gmra.mrb[28].mxu1 %v1013_v47 }
  0x5b   :  { %572 = vmatmul.mubr.bf16.gmra.mrb[28].mxu0 %v1014_v48 }
  0xf5   :  { %v230_v57 = vpop.f32.mrb[0].mxu1 }
  0xf6   :  { %v503_v58 = vpop.f32.mrb[0].mxu0  ;;  %v231_v59 = vadd.f32 %v230_v57, %v1214_v54  ;;  %v232_v61 = vpop.f32.mrb[1].mxu1 }
  0xf7   :  { %v505_v62 = vpop.f32.mrb[1].mxu0  ;;  %v233_v63 = vadd.f32 %v232_v61, %v1219_v56  ;;  %v234_v1 = vpop.f32.mrb[2].mxu1 }
  0xf8   :  { %v507_v2 = vpop.f32.mrb[2].mxu0  ;;  %v582_v3 = vadd.f32 %v503_v58, %v231_v59  ;;  %v235_v4 = vadd.f32 %v234_v1, %v1214_v54  ;;  %v236_v5 = vpop.f32.mrb[3].mxu1 }
  0xf9   :  { %v509_v6 = vpop.f32.mrb[3].mxu0  ;;  %v583_v7 = vadd.f32 %v505_v62, %v233_v63  ;;  %v237_v8 = vadd.f32 %v236_v5, %v1219_v56 }
  0xfa   :  { %v626_v9 = vadd.f32 %v1222_v60, %v582_v3  ;;  %v584_v10 = vadd.f32 %v507_v2, %v235_v4 }
  0xfb   :  { %v627_v11 = vadd.f32 %v1225_v0, %v583_v7  ;;  %v585_v12 = vadd.f32 %v509_v6, %v237_v8 }
  0xfc   :  { %v658_v13 = vmax.f32 %v626_v9, 0.0  ;;  %v628_v14 = vadd.f32 %v1222_v60, %v584_v10 }
  0xfd   :  { %v659_v15 = vmax.f32 %v627_v11, 0.0  ;;  %v629_v16 = vadd.f32 %v1225_v0, %v585_v12  ;;  %v240_v17 = vpop.f32.mrb[4].mxu1 }
  0xfe   :  { %v513_v18 = vpop.f32.mrb[4].mxu0  ;;  %v660_v19 = vmax.f32 %v628_v14, 0.0  ;;  %v241_v20 = vadd.f32 %v240_v17, %v1214_v54  ;;  %v242_v21 = vpop.f32.mrb[5].mxu1 }
  0xff   :  { %v515_v22 = vpop.f32.mrb[5].mxu0  ;;  %v870_v23 = vpack.c.bf16 %v659_v15, %v658_v13  ;;  %v661_v24 = vmax.f32 %v629_v16, 0.0  ;;  %v243_v25 = vadd.f32 %v242_v21, %v1219_v56  ;;  %v244_v26 = vpop.f32.mrb[6].mxu1 }
 0x100   :  { %v517_v27 = vpop.f32.mrb[6].mxu0  ;;  %v586_v28 = vadd.f32 %v513_v18, %v241_v20  ;;  %v245_v29 = vadd.f32 %v244_v26, %v1214_v54  ;;  %v246_v30 = vpop.f32.mrb[7].mxu1 }
 0x101   :  { %v519_v31 = vpop.f32.mrb[7].mxu0  ;;  %786 = vst [vmem:[%s1343_s6] sm:$0xff] %v870_v23  ;;  %v871_v32 = vpack.c.bf16 %v661_v24, %v660_v19  ;;  %v587_v33 = vadd.f32 %v515_v22, %v243_v25  ;;  %v247_v34 = vadd.f32 %v246_v30, %v1219_v56 }
 0x102   :  { %v630_v35 = vadd.f32 %v1222_v60, %v586_v28  ;;  %v588_v36 = vadd.f32 %v517_v27, %v245_v29 }
 0x103   :  { %787 = vst [vmem:[%s1343_s6 + $0x8] sm:$0xff] %v871_v32  ;;  %v631_v37 = vadd.f32 %v1225_v0, %v587_v33  ;;  %v589_v38 = vadd.f32 %v519_v31, %v247_v34 }
 0x104   :  { %v662_v39 = vmax.f32 %v630_v35, 0.0  ;;  %v632_v40 = vadd.f32 %v1222_v60, %v588_v36 }
 0x105   :  { %v663_v41 = vmax.f32 %v631_v37, 0.0  ;;  %v633_v42 = vadd.f32 %v1225_v0, %v589_v38  ;;  %v250_v43 = vpop.f32.mrb[8].mxu1 }
 0x106   :  { %v523_v44 = vpop.f32.mrb[8].mxu0  ;;  %v664_v45 = vmax.f32 %v632_v40, 0.0  ;;  %v251_v46 = vadd.f32 %v250_v43, %v1214_v54  ;;  %v252_v47 = vpop.f32.mrb[9].mxu1 }
 0x107   :  { %v525_v48 = vpop.f32.mrb[9].mxu0  ;;  %v872_v49 = vpack.c.bf16 %v663_v41, %v662_v39  ;;  %v665_v50 = vmax.f32 %v633_v42, 0.0  ;;  %v253_v51 = vadd.f32 %v252_v47, %v1219_v56  ;;  %v254_v52 = vpop.f32.mrb[10].mxu1 }
 0x108   :  { %v527_v53 = vpop.f32.mrb[10].mxu0  ;;  %v590_v55 = vadd.f32 %v523_v44, %v251_v46  ;;  %v255_v57 = vadd.f32 %v254_v52, %v1214_v54  ;;  %v256_v58 = vpop.f32.mrb[11].mxu1 }
 0x109   :  { %v529_v59 = vpop.f32.mrb[11].mxu0  ;;  %788 = vst [vmem:[%s1343_s6 + $0x10] sm:$0xff] %v872_v49  ;;  %v873_v61 = vpack.c.bf16 %v665_v50, %v664_v45  ;;  %v591_v62 = vadd.f32 %v525_v48, %v253_v51  ;;  %v257_v63 = vadd.f32 %v256_v58, %v1219_v56 }
 0x10a   :  { %v634_v1 = vadd.f32 %v1222_v60, %v590_v55  ;;  %v592_v2 = vadd.f32 %v527_v53, %v255_v57 }
 0x10b   :  { %789 = vst [vmem:[%s1343_s6 + $0x18] sm:$0xff] %v873_v61  ;;  %v635_v3 = vadd.f32 %v1225_v0, %v591_v62  ;;  %v593_v4 = vadd.f32 %v529_v59, %v257_v63 }
 0x10c   :  { %v666_v5 = vmax.f32 %v634_v1, 0.0  ;;  %v636_v6 = vadd.f32 %v1222_v60, %v592_v2 }
 0x10d   :  { %v667_v7 = vmax.f32 %v635_v3, 0.0  ;;  %v637_v8 = vadd.f32 %v1225_v0, %v593_v4  ;;  %v260_v9 = vpop.f32.mrb[12].mxu1 }
 0x10e   :  { %v533_v10 = vpop.f32.mrb[12].mxu0  ;;  %v668_v11 = vmax.f32 %v636_v6, 0.0  ;;  %v261_v12 = vadd.f32 %v260_v9, %v1214_v54  ;;  %v262_v13 = vpop.f32.mrb[13].mxu1 }
 0x10f   :  { %v535_v14 = vpop.f32.mrb[13].mxu0  ;;  %v874_v15 = vpack.c.bf16 %v667_v7, %v666_v5  ;;  %v669_v16 = vmax.f32 %v637_v8, 0.0  ;;  %v263_v17 = vadd.f32 %v262_v13, %v1219_v56  ;;  %v264_v18 = vpop.f32.mrb[14].mxu1 }
 0x110   :  { %v537_v19 = vpop.f32.mrb[14].mxu0  ;;  %v594_v20 = vadd.f32 %v533_v10, %v261_v12  ;;  %v265_v21 = vadd.f32 %v264_v18, %v1214_v54  ;;  %v266_v22 = vpop.f32.mrb[15].mxu1 }
 0x111   :  { %v539_v23 = vpop.f32.mrb[15].mxu0  ;;  %790 = vst [vmem:[%s1343_s6 + $0x20] sm:$0xff] %v874_v15  ;;  %v875_v24 = vpack.c.bf16 %v669_v16, %v668_v11  ;;  %v595_v25 = vadd.f32 %v535_v14, %v263_v17  ;;  %v267_v26 = vadd.f32 %v266_v22, %v1219_v56 }
 0x112   :  { %v638_v27 = vadd.f32 %v1222_v60, %v594_v20  ;;  %v596_v28 = vadd.f32 %v537_v19, %v265_v21 }
 0x113   :  { %791 = vst [vmem:[%s1343_s6 + $0x28] sm:$0xff] %v875_v24  ;;  %v639_v29 = vadd.f32 %v1225_v0, %v595_v25  ;;  %v597_v30 = vadd.f32 %v539_v23, %v267_v26 }
 0x114   :  { %v670_v31 = vmax.f32 %v638_v27, 0.0  ;;  %v640_v32 = vadd.f32 %v1222_v60, %v596_v28 }
 0x115   :  { %v671_v33 = vmax.f32 %v639_v29, 0.0  ;;  %v641_v34 = vadd.f32 %v1225_v0, %v597_v30  ;;  %v270_v35 = vpop.f32.mrb[16].mxu1 }
 0x116   :  { %v543_v36 = vpop.f32.mrb[16].mxu0  ;;  %v672_v37 = vmax.f32 %v640_v32, 0.0  ;;  %v271_v38 = vadd.f32 %v270_v35, %v1214_v54  ;;  %v272_v39 = vpop.f32.mrb[17].mxu1 }
 0x117   :  { %v545_v40 = vpop.f32.mrb[17].mxu0  ;;  %v876_v41 = vpack.c.bf16 %v671_v33, %v670_v31  ;;  %v673_v42 = vmax.f32 %v641_v34, 0.0  ;;  %v273_v43 = vadd.f32 %v272_v39, %v1219_v56  ;;  %v274_v44 = vpop.f32.mrb[18].mxu1 }
 0x118   :  { %v547_v45 = vpop.f32.mrb[18].mxu0  ;;  %v598_v46 = vadd.f32 %v543_v36, %v271_v38  ;;  %v275_v47 = vadd.f32 %v274_v44, %v1214_v54  ;;  %v276_v48 = vpop.f32.mrb[19].mxu1 }
 0x119   :  { %v549_v49 = vpop.f32.mrb[19].mxu0  ;;  %792 = vst [vmem:[%s1343_s6 + $0x30] sm:$0xff] %v876_v41  ;;  %v877_v50 = vpack.c.bf16 %v673_v42, %v672_v37  ;;  %v599_v51 = vadd.f32 %v545_v40, %v273_v43  ;;  %v277_v52 = vadd.f32 %v276_v48, %v1219_v56 }
 0x11a   :  { %v642_v53 = vadd.f32 %v1222_v60, %v598_v46  ;;  %v600_v55 = vadd.f32 %v547_v45, %v275_v47 }
 0x11b   :  { %793 = vst [vmem:[%s1343_s6 + $0x38] sm:$0xff] %v877_v50  ;;  %v643_v57 = vadd.f32 %v1225_v0, %v599_v51  ;;  %v601_v58 = vadd.f32 %v549_v49, %v277_v52 }
 0x11c   :  { %v674_v59 = vmax.f32 %v642_v53, 0.0  ;;  %v644_v61 = vadd.f32 %v1222_v60, %v600_v55 }
 0x11d   :  { %v675_v62 = vmax.f32 %v643_v57, 0.0  ;;  %v645_v63 = vadd.f32 %v1225_v0, %v601_v58  ;;  %v280_v1 = vpop.f32.mrb[20].mxu1 }
 0x11e   :  { %v553_v2 = vpop.f32.mrb[20].mxu0  ;;  %v676_v3 = vmax.f32 %v644_v61, 0.0  ;;  %v281_v4 = vadd.f32 %v280_v1, %v1214_v54  ;;  %v282_v5 = vpop.f32.mrb[21].mxu1 }
 0x11f   :  { %v555_v6 = vpop.f32.mrb[21].mxu0  ;;  %v878_v7 = vpack.c.bf16 %v675_v62, %v674_v59  ;;  %v677_v8 = vmax.f32 %v645_v63, 0.0  ;;  %v283_v9 = vadd.f32 %v282_v5, %v1219_v56  ;;  %v284_v10 = vpop.f32.mrb[22].mxu1 }
 0x120   :  { %v557_v11 = vpop.f32.mrb[22].mxu0  ;;  %v602_v12 = vadd.f32 %v553_v2, %v281_v4  ;;  %v285_v13 = vadd.f32 %v284_v10, %v1214_v54  ;;  %v286_v14 = vpop.f32.mrb[23].mxu1 }
 0x121   :  { %v559_v15 = vpop.f32.mrb[23].mxu0  ;;  %794 = vst [vmem:[%s1343_s6 + $0x40] sm:$0xff] %v878_v7  ;;  %v879_v16 = vpack.c.bf16 %v677_v8, %v676_v3  ;;  %v603_v17 = vadd.f32 %v555_v6, %v283_v9  ;;  %v287_v18 = vadd.f32 %v286_v14, %v1219_v56 }
 0x122   :  { %v646_v19 = vadd.f32 %v1222_v60, %v602_v12  ;;  %v604_v20 = vadd.f32 %v557_v11, %v285_v13 }
 0x123   :  { %795 = vst [vmem:[%s1343_s6 + $0x48] sm:$0xff] %v879_v16  ;;  %v647_v21 = vadd.f32 %v1225_v0, %v603_v17  ;;  %v605_v22 = vadd.f32 %v559_v15, %v287_v18 }
 0x124   :  { %v678_v23 = vmax.f32 %v646_v19, 0.0  ;;  %v648_v24 = vadd.f32 %v1222_v60, %v604_v20 }
 0x125   :  { %v679_v25 = vmax.f32 %v647_v21, 0.0  ;;  %v649_v26 = vadd.f32 %v1225_v0, %v605_v22  ;;  %v290_v27 = vpop.f32.mrb[24].mxu1 }
 0x126   :  { %v563_v28 = vpop.f32.mrb[24].mxu0  ;;  %v680_v29 = vmax.f32 %v648_v24, 0.0  ;;  %v291_v30 = vadd.f32 %v290_v27, %v1214_v54  ;;  %v292_v31 = vpop.f32.mrb[25].mxu1 }
 0x127   :  { %v565_v32 = vpop.f32.mrb[25].mxu0  ;;  %v880_v33 = vpack.c.bf16 %v679_v25, %v678_v23  ;;  %v681_v34 = vmax.f32 %v649_v26, 0.0  ;;  %v293_v35 = vadd.f32 %v292_v31, %v1219_v56  ;;  %v294_v36 = vpop.f32.mrb[26].mxu1 }
 0x128   :  { %v567_v37 = vpop.f32.mrb[26].mxu0  ;;  %v606_v38 = vadd.f32 %v563_v28, %v291_v30  ;;  %v295_v39 = vadd.f32 %v294_v36, %v1214_v54  ;;  %v296_v40 = vpop.f32.mrb[27].mxu1 }
 0x129   :  { %v569_v41 = vpop.f32.mrb[27].mxu0  ;;  %796 = vst [vmem:[%s1343_s6 + $0x50] sm:$0xff] %v880_v33  ;;  %v881_v42 = vpack.c.bf16 %v681_v34, %v680_v29  ;;  %v607_v43 = vadd.f32 %v565_v32, %v293_v35  ;;  %v297_v44 = vadd.f32 %v296_v40, %v1219_v56 }
 0x12a   :  { %v650_v45 = vadd.f32 %v1222_v60, %v606_v38  ;;  %v608_v46 = vadd.f32 %v567_v37, %v295_v39 }
 0x12b   :  { %797 = vst [vmem:[%s1343_s6 + $0x58] sm:$0xff] %v881_v42  ;;  %v651_v47 = vadd.f32 %v1225_v0, %v607_v43  ;;  %v609_v48 = vadd.f32 %v569_v41, %v297_v44 }
 0x12c   :  { %v682_v49 = vmax.f32 %v650_v45, 0.0  ;;  %v652_v50 = vadd.f32 %v1222_v60, %v608_v46 }
 0x12d   :  { %v683_v51 = vmax.f32 %v651_v47, 0.0  ;;  %v653_v52 = vadd.f32 %v1225_v0, %v609_v48  ;;  %v300_v53 = vpop.f32.mrb[28].mxu1 }
 0x12e   :  { %v573_v55 = vpop.f32.mrb[28].mxu0  ;;  %v684_v57 = vmax.f32 %v652_v50, 0.0  ;;  %v301_v58 = vadd.f32 %v300_v53, %v1214_v54  ;;  %v302_v59 = vpop.f32.mrb[29].mxu1 }
 0x12f   :  { %v575_v61 = vpop.f32.mrb[29].mxu0  ;;  %v882_v62 = vpack.c.bf16 %v683_v51, %v682_v49  ;;  %v685_v63 = vmax.f32 %v653_v52, 0.0  ;;  %v303_v1 = vadd.f32 %v302_v59, %v1219_v56  ;;  %v304_v2 = vpop.f32.mrb[30].mxu1 }
 0x130   :  { %v577_v3 = vpop.f32.mrb[30].mxu0  ;;  %v610_v4 = vadd.f32 %v573_v55, %v301_v58  ;;  %v305_v5 = vadd.f32 %v304_v2, %v1214_v54  ;;  %v306_v6 = vpop.f32.mrb[31].mxu1 }
 0x131   :  { %v579_v7 = vpop.f32.mrb[31].mxu0  ;;  %798 = vst [vmem:[%s1343_s6 + $0x60] sm:$0xff] %v882_v62  ;;  %v883_v8 = vpack.c.bf16 %v685_v63, %v684_v57  ;;  %v611_v9 = vadd.f32 %v575_v61, %v303_v1  ;;  %v307_v10 = vadd.f32 %v306_v6, %v1219_v56 }
 0x132   :  { %v654_v11 = vadd.f32 %v1222_v60, %v610_v4  ;;  %v612_v12 = vadd.f32 %v577_v3, %v305_v5 }
 0x133   :  { %799 = vst [vmem:[%s1343_s6 + $0x68] sm:$0xff] %v883_v8  ;;  %v655_v13 = vadd.f32 %v1225_v0, %v611_v9  ;;  %v613_v54 = vadd.f32 %v579_v7, %v307_v10 }
 0x134   :  { %v686_v14 = vmax.f32 %v654_v11, 0.0  ;;  %v656_v15 = vadd.f32 %v1222_v60, %v612_v12 }
 0x135   :  { %v687_v16 = vmax.f32 %v655_v13, 0.0  ;;  %v657_v17 = vadd.f32 %v1225_v0, %v613_v54 }
 0x136   :  { %v688_v18 = vmax.f32 %v656_v15, 0.0 }
 0x137   :  { %v884_v19 = vpack.c.bf16 %v687_v16, %v686_v14  ;;  %v689_v20 = vmax.f32 %v657_v17, 0.0 }
 0x139   :  { %800 = vst [vmem:[%s1343_s6 + $0x70] sm:$0xff] %v884_v19  ;;  %v885_v56 = vpack.c.bf16 %v689_v20, %v688_v18 }
 0x13b   :  { %801 = vst [vmem:[%s1343_s6 + $0x78] sm:$0xff] %v885_v56 }

// kernel: forward.21
= control target key start
LH: loop header
LB: loop body
LE: loop exit
PB: predicated region body
PF: predicated region fallthrough
CT: control target
= control target key end

     0   :  { %s939_s1 = inlined_call_operand.vmem [shape: bf16[256,128], index: 1, kind: input, shape index: {}]   ;;  %s940_s0 = inlined_call_operand.vmem [shape: bf16[128,256], index: 0, kind: input, shape index: {}]   ;;  %s941_s2 = inlined_call_operand.vmem [shape: f32[1,128], index: 2, kind: input, shape index: {}]   ;;  %s942_s3 = inlined_call_operand.vmem [shape: bf16[128,128], index: 3, kind: output, shape index: {}]  }
   0x1   :  { %v738_v0 = vld [vmem:[%s939_s1 + $0x40] sm:$0xff]   ;;  %v740_v2 = vld [vmem:[%s939_s1 + $0x48] sm:$0xff]   ;;  %v742_v4 = vld [vmem:[%s939_s1 + $0x50] sm:$0xff]  }
   0x2   :  { %v739_v1 = vld [vmem:[%s939_s1] sm:$0xff]   ;;  %658 = vmatprep.subr.bf16.mxu0 %v738_v0  ;;  %722 = vmatprep.subr.bf16.mxu1 %v738_v0  ;;  %v741_v3 = vld [vmem:[%s939_s1 + $0x8] sm:$0xff]   ;;  %v743_v5 = vld [vmem:[%s939_s1 + $0x10] sm:$0xff]  }
   0x3   :  { %659 = vmatpush3.bf16.msra.mxu0 %v739_v1  ;;  %730 = vmatpush3.bf16.msra.mxu1 %v739_v1  ;;  %v744_v6 = vld [vmem:[%s939_s1 + $0x58] sm:$0xff]   ;;  %v746_v8 = vld [vmem:[%s939_s1 + $0x60] sm:$0xff]   ;;  %v748_v10 = vld [vmem:[%s939_s1 + $0x68] sm:$0xff]  }
   0x4   :  { %660 = vmatprep.subr.bf16.mxu0 %v740_v2  ;;  %723 = vmatprep.subr.bf16.mxu1 %v740_v2  ;;  %v745_v7 = vld [vmem:[%s939_s1 + $0x18] sm:$0xff]   ;;  %v747_v9 = vld [vmem:[%s939_s1 + $0x20] sm:$0xff]   ;;  %v749_v13 = vld [vmem:[%s939_s1 + $0x28] sm:$0xff]  }
   0x5   :  { %v756_v11 = vld [vmem:[%s940_s0 + $0x4] ss:$8 sps:$4 sm:$0xff]   ;;  %v750_v14 = vld [vmem:[%s939_s1 + $0x70] sm:$0xff]   ;;  %v752_v16 = vld [vmem:[%s939_s1 + $0x78] sm:$0xff]  }
   0x6   :  { %v759_v12 = vld [vmem:[%s940_s0 + $0x44] ss:$8 sps:$4 sm:$0xff]   ;;  %307 = vmatprep.mubr.bf16.mxu0 %v756_v11  ;;  %v751_v15 = vld [vmem:[%s939_s1 + $0x30] sm:$0xff]   ;;  %v753_v17 = vld [vmem:[%s939_s1 + $0x38] sm:$0xff]  }
   0x7   :  { %661 = vmatpush3.bf16.msra.mxu0 %v741_v3  ;;  %731 = vmatpush3.bf16.msra.mxu1 %v741_v3  ;;  %v754_v18 = vld [vmem:[%s940_s0] ss:$8 sps:$4 sm:$0xff]   ;;  %v760_v20 = vld [vmem:[%s940_s0 + $0x14] ss:$8 sps:$4 sm:$0xff]   ;;  %v764_v22 = vld [vmem:[%s940_s0 + $0x10] ss:$8 sps:$4 sm:$0xff]  }
   0x8   :  { %662 = vmatprep.subr.bf16.mxu0 %v742_v4  ;;  %724 = vmatprep.subr.bf16.mxu1 %v742_v4  ;;  %v757_v19 = vld [vmem:[%s940_s0 + $0x40] ss:$8 sps:$4 sm:$0xff]   ;;  %v762_v21 = vld [vmem:[%s940_s0 + $0x54] ss:$8 sps:$4 sm:$0xff]   ;;  %v765_v23 = vld [vmem:[%s940_s0 + $0x50] ss:$8 sps:$4 sm:$0xff]  }
   0x9   :  { %339 = vmatprep.mubr.bf16.mxu1 %v759_v12  ;;  %v766_v24 = vld [vmem:[%s940_s0 + $0x24] ss:$8 sps:$4 sm:$0xff]   ;;  %v770_v26 = vld [vmem:[%s940_s0 + $0x20] ss:$8 sps:$4 sm:$0xff]   ;;  %v772_v28 = vld [vmem:[%s940_s0 + $0x34] ss:$8 sps:$4 sm:$0xff]  }
   0xa   :  { %v768_v25 = vld [vmem:[%s940_s0 + $0x64] ss:$8 sps:$4 sm:$0xff]   ;;  %v771_v27 = vld [vmem:[%s940_s0 + $0x60] ss:$8 sps:$4 sm:$0xff]   ;;  %v774_v29 = vld [vmem:[%s940_s0 + $0x74] ss:$8 sps:$4 sm:$0xff]  }
   0xb   :  { %663 = vmatpush3.bf16.msra.mxu0 %v743_v5  ;;  %732 = vmatpush3.bf16.msra.mxu1 %v743_v5  ;;  %v776_v30 = vld [vmem:[%s940_s0 + $0x30] ss:$8 sps:$4 sm:$0xff]   ;;  %v897_v35 = vld [vmem:[%s941_s2] ss:$0 sm:$0xff] }
   0xc   :  { %664 = vmatprep.subr.bf16.mxu0 %v744_v6  ;;  %725 = vmatprep.subr.bf16.mxu1 %v744_v6  ;;  %v777_v31 = vld [vmem:[%s940_s0 + $0x70] ss:$8 sps:$4 sm:$0xff]  }
   0xf   :  { %665 = vmatpush3.bf16.msra.mxu0 %v745_v7  ;;  %733 = vmatpush3.bf16.msra.mxu1 %v745_v7 }
  0x10   :  { %666 = vmatprep.subr.bf16.mxu0 %v746_v8  ;;  %726 = vmatprep.subr.bf16.mxu1 %v746_v8 }
  0x13   :  { %667 = vmatpush3.bf16.msra.mxu0 %v747_v9  ;;  %734 = vmatpush3.bf16.msra.mxu1 %v747_v9 }
  0x14   :  { %668 = vmatprep.subr.bf16.mxu0 %v748_v10  ;;  %727 = vmatprep.subr.bf16.mxu1 %v748_v10 }
  0x17   :  { %669 = vmatpush3.bf16.msra.mxu0 %v749_v13  ;;  %735 = vmatpush3.bf16.msra.mxu1 %v749_v13 }
  0x18   :  { %670 = vmatprep.subr.bf16.mxu0 %v750_v14  ;;  %728 = vmatprep.subr.bf16.mxu1 %v750_v14 }
  0x1b   :  { %671 = vmatpush3.bf16.msra.mxu0 %v751_v15  ;;  %736 = vmatpush3.bf16.msra.mxu1 %v751_v15 }
  0x1c   :  { %672 = vmatprep.subr.bf16.mxu0 %v752_v16  ;;  %729 = vmatprep.subr.bf16.mxu1 %v752_v16 }
  0x1f   :  { %673 = vmatpush3.bf16.msra.mxu0 %v753_v17  ;;  %737 = vmatpush3.bf16.msra.mxu1 %v753_v17 }
  0x22   :  { %308 = vmatmul.mubr.bf16.vlgmr.msra.gmra.mrb[0].mxu0 %v754_v18  ;;  %340 = vmatmul.mubr.bf16.vlgmr.msra.gmra.mrb[0].mxu1 %v757_v19 }
  0x23   :  { %315 = vmatprep.mubr.bf16.mxu0 %v760_v20  ;;  %347 = vmatprep.mubr.bf16.mxu1 %v762_v21 }
  0x2a   :  { %316 = vmatmul.mubr.bf16.gmra.mrb[4].mxu0 %v764_v22  ;;  %348 = vmatmul.mubr.bf16.gmra.mrb[4].mxu1 %v765_v23 }
  0x2b   :  { %323 = vmatprep.mubr.bf16.mxu0 %v766_v24  ;;  %355 = vmatprep.mubr.bf16.mxu1 %v768_v25 }
  0x32   :  { %324 = vmatmul.mubr.bf16.gmra.mrb[8].mxu0 %v770_v26  ;;  %356 = vmatmul.mubr.bf16.gmra.mrb[8].mxu1 %v771_v27 }
  0x33   :  { %331 = vmatprep.mubr.bf16.mxu0 %v772_v28  ;;  %363 = vmatprep.mubr.bf16.mxu1 %v774_v29 }
  0x3a   :  { %332 = vmatmul.mubr.bf16.gmra.mrb[12].mxu0 %v776_v30  ;;  %364 = vmatmul.mubr.bf16.gmra.mrb[12].mxu1 %v777_v31 }
  0xf5   :  { %v674_v32 = vpop.f32.mrb[0].mxu0  ;;  %v698_v33 = vpop.f32.mrb[0].mxu1 }
  0xf6   :  { %v675_v34 = vpop.f32.mrb[1].mxu0  ;;  %v699_v36 = vpop.f32.mrb[1].mxu1 }
  0xf7   :  { %v676_v37 = vadd.f32 %v675_v34, %v674_v32  ;;  %v700_v38 = vadd.f32 %v699_v36, %v698_v33  ;;  %v677_v39 = vpop.f32.mrb[2].mxu0  ;;  %v701_v40 = vpop.f32.mrb[2].mxu1 }
  0xf8   :  { %v678_v41 = vpop.f32.mrb[3].mxu0  ;;  %v702_v42 = vpop.f32.mrb[3].mxu1 }
  0xf9   :  { %v430_v43 = vadd.f32 %v676_v37, %v897_v35  ;;  %v438_v44 = vadd.f32 %v700_v38, %v897_v35  ;;  %v679_v45 = vadd.f32 %v678_v41, %v677_v39  ;;  %v703_v46 = vadd.f32 %v702_v42, %v701_v40 }
  0xfb   :  { %v431_v47 = vadd.f32 %v679_v45, %v897_v35  ;;  %v439_v48 = vadd.f32 %v703_v46, %v897_v35  ;;  %v446_v49 = vmax.f32 %v430_v43, 0.0  ;;  %v454_v50 = vmax.f32 %v438_v44, 0.0 }
  0xfd   :  { %v447_v51 = vmax.f32 %v431_v47, 0.0  ;;  %v455_v52 = vmax.f32 %v439_v48, 0.0  ;;  %v680_v53 = vpop.f32.mrb[4].mxu0  ;;  %v704_v54 = vpop.f32.mrb[4].mxu1 }
  0xfe   :  { %v681_v55 = vpop.f32.mrb[5].mxu0  ;;  %v705_v56 = vpop.f32.mrb[5].mxu1 }
  0xff   :  { %v614_v57 = vpack.c.bf16 %v447_v51, %v446_v49  ;;  %v634_v58 = vpack.c.bf16 %v455_v52, %v454_v50  ;;  %v682_v59 = vadd.f32 %v681_v55, %v680_v53  ;;  %v706_v60 = vadd.f32 %v705_v56, %v704_v54  ;;  %v683_v61 = vpop.f32.mrb[6].mxu0  ;;  %v707_v62 = vpop.f32.mrb[6].mxu1 }
 0x100   :  { %v684_v63 = vpop.f32.mrb[7].mxu0  ;;  %v708_v0 = vpop.f32.mrb[7].mxu1 }
 0x101   :  { %615 = vst [vmem:[%s942_s3] sm:$0xff] %v614_v57   ;;  %654 = vst [vmem:[%s942_s3 + $0x20] sm:$0xff] %v634_v58   ;;  %v432_v1 = vadd.f32 %v682_v59, %v897_v35  ;;  %v440_v2 = vadd.f32 %v706_v60, %v897_v35  ;;  %v685_v3 = vadd.f32 %v684_v63, %v683_v61 }
 0x102   :  { %v709_v4 = vadd.f32 %v708_v0, %v707_v62 }
 0x103   :  { %v433_v5 = vadd.f32 %v685_v3, %v897_v35  ;;  %v448_v7 = vmax.f32 %v432_v1, 0.0  ;;  %v456_v8 = vmax.f32 %v440_v2, 0.0 }
 0x104   :  { %v441_v6 = vadd.f32 %v709_v4, %v897_v35 }
 0x105   :  { %v449_v9 = vmax.f32 %v433_v5, 0.0  ;;  %v686_v11 = vpop.f32.mrb[8].mxu0  ;;  %v710_v12 = vpop.f32.mrb[8].mxu1 }
 0x106   :  { %v457_v10 = vmax.f32 %v441_v6, 0.0  ;;  %v687_v13 = vpop.f32.mrb[9].mxu0  ;;  %v711_v14 = vpop.f32.mrb[9].mxu1 }
 0x107   :  { %v619_v15 = vpack.c.bf16 %v449_v9, %v448_v7  ;;  %v688_v17 = vadd.f32 %v687_v13, %v686_v11  ;;  %v712_v18 = vadd.f32 %v711_v14, %v710_v12  ;;  %v689_v19 = vpop.f32.mrb[10].mxu0  ;;  %v713_v20 = vpop.f32.mrb[10].mxu1 }
 0x108   :  { %v639_v16 = vpack.c.bf16 %v457_v10, %v456_v8  ;;  %v690_v21 = vpop.f32.mrb[11].mxu0  ;;  %v714_v22 = vpop.f32.mrb[11].mxu1 }
 0x109   :  { %651 = vst [vmem:[%s942_s3 + $0x8] sm:$0xff] %v619_v15   ;;  %v434_v23 = vadd.f32 %v688_v17, %v897_v35  ;;  %v442_v24 = vadd.f32 %v712_v18, %v897_v35  ;;  %v691_v25 = vadd.f32 %v690_v21, %v689_v19  ;;  %v715_v26 = vadd.f32 %v714_v22, %v713_v20 }
 0x10a   :  { %655 = vst [vmem:[%s942_s3 + $0x28] sm:$0xff] %v639_v16  }
 0x10b   :  { %v435_v27 = vadd.f32 %v691_v25, %v897_v35  ;;  %v443_v28 = vadd.f32 %v715_v26, %v897_v35  ;;  %v450_v29 = vmax.f32 %v434_v23, 0.0  ;;  %v458_v30 = vmax.f32 %v442_v24, 0.0 }
 0x10d   :  { %v451_v31 = vmax.f32 %v435_v27, 0.0  ;;  %v459_v32 = vmax.f32 %v443_v28, 0.0  ;;  %v692_v33 = vpop.f32.mrb[12].mxu0  ;;  %v716_v34 = vpop.f32.mrb[12].mxu1 }
 0x10e   :  { %v693_v36 = vpop.f32.mrb[13].mxu0  ;;  %v717_v37 = vpop.f32.mrb[13].mxu1 }
 0x10f   :  { %v624_v38 = vpack.c.bf16 %v451_v31, %v450_v29  ;;  %v644_v39 = vpack.c.bf16 %v459_v32, %v458_v30  ;;  %v694_v40 = vadd.f32 %v693_v36, %v692_v33  ;;  %v718_v41 = vadd.f32 %v717_v37, %v716_v34  ;;  %v695_v42 = vpop.f32.mrb[14].mxu0  ;;  %v719_v43 = vpop.f32.mrb[14].mxu1 }
 0x110   :  { %v696_v44 = vpop.f32.mrb[15].mxu0  ;;  %v720_v45 = vpop.f32.mrb[15].mxu1 }
 0x111   :  { %652 = vst [vmem:[%s942_s3 + $0x10] sm:$0xff] %v624_v38   ;;  %656 = vst [vmem:[%s942_s3 + $0x30] sm:$0xff] %v644_v39   ;;  %v436_v46 = vadd.f32 %v694_v40, %v897_v35  ;;  %v444_v47 = vadd.f32 %v718_v41, %v897_v35  ;;  %v697_v48 = vadd.f32 %v696_v44, %v695_v42 }
 0x112   :  { %v721_v49 = vadd.f32 %v720_v45, %v719_v43 }
 0x113   :  { %v437_v50 = vadd.f32 %v697_v48, %v897_v35  ;;  %v452_v52 = vmax.f32 %v436_v46, 0.0  ;;  %v460_v53 = vmax.f32 %v444_v47, 0.0 }
 0x114   :  { %v445_v51 = vadd.f32 %v721_v49, %v897_v35 }
 0x115   :  { %v453_v54 = vmax.f32 %v437_v50, 0.0 }
 0x116   :  { %v461_v55 = vmax.f32 %v445_v51, 0.0 }
 0x117   :  { %v629_v56 = vpack.c.bf16 %v453_v54, %v452_v52 }
 0x118   :  { %v649_v57 = vpack.c.bf16 %v461_v55, %v460_v53 }
 0x119   :  { %653 = vst [vmem:[%s942_s3 + $0x18] sm:$0xff] %v629_v56  }
 0x11a   :  { %657 = vst [vmem:[%s942_s3 + $0x38] sm:$0xff] %v649_v57  }

// kernel: forward.19
= control target key start
LH: loop header
LB: loop body
LE: loop exit
PB: predicated region body
PF: predicated region fallthrough
CT: control target
= control target key end

     0   :  { %s3032_s1 = inlined_call_operand.vmem [shape: bf16[1152,128], index: 1, kind: input, shape index: {}]   ;;  %s3033_s0 = inlined_call_operand.vmem [shape: bf16[128,1152], index: 0, kind: input, shape index: {}]   ;;  %s3034_s2 = inlined_call_operand.vmem [shape: f32[1,128], index: 2, kind: input, shape index: {}]   ;;  %s3035_s3 = inlined_call_operand.vmem [shape: bf16[128,128], index: 3, kind: output, shape index: {}]  }
   0x1   :  { %v2278_v0 = vld [vmem:[%s3032_s1 + $0x40] sm:$0xff]   ;;  %v2282_v4 = vld [vmem:[%s3032_s1 + $0x48] sm:$0xff]   ;;  %v2286_v8 = vld [vmem:[%s3032_s1 + $0x50] sm:$0xff]  }
   0x2   :  { %v2279_v1 = vld [vmem:[%s3032_s1 + $0xc0] sm:$0xff]   ;;  %1958 = vmatprep.subr.bf16.mxu0 %v2278_v0  ;;  %v2283_v5 = vld [vmem:[%s3032_s1 + $0xc8] sm:$0xff]   ;;  %v2287_v9 = vld [vmem:[%s3032_s1 + $0xd0] sm:$0xff]  }
   0x3   :  { %v2280_v2 = vld [vmem:[%s3032_s1] sm:$0xff]   ;;  %2022 = vmatprep.subr.bf16.mxu1 %v2279_v1  ;;  %v2284_v6 = vld [vmem:[%s3032_s1 + $0x8] sm:$0xff]   ;;  %v2288_v10 = vld [vmem:[%s3032_s1 + $0x10] sm:$0xff]  }
   0x4   :  { %v2281_v3 = vld [vmem:[%s3032_s1 + $0x80] sm:$0xff]   ;;  %1959 = vmatpush3.bf16.msra.mxu0 %v2280_v2  ;;  %v2285_v7 = vld [vmem:[%s3032_s1 + $0x88] sm:$0xff]   ;;  %v2289_v11 = vld [vmem:[%s3032_s1 + $0x90] sm:$0xff]  }
   0x5   :  { %2023 = vmatpush3.bf16.msra.mxu1 %v2281_v3  ;;  %1960 = vmatprep.subr.bf16.mxu0 %v2282_v4  ;;  %v2290_v12 = vld [vmem:[%s3032_s1 + $0x58] sm:$0xff]   ;;  %v2294_v16 = vld [vmem:[%s3032_s1 + $0x60] sm:$0xff]   ;;  %v2298_v20 = vld [vmem:[%s3032_s1 + $0x68] sm:$0xff]  }
   0x6   :  { %2024 = vmatprep.subr.bf16.mxu1 %v2283_v5  ;;  %v2291_v13 = vld [vmem:[%s3032_s1 + $0xd8] sm:$0xff]   ;;  %v2295_v17 = vld [vmem:[%s3032_s1 + $0xe0] sm:$0xff]   ;;  %v2299_v21 = vld [vmem:[%s3032_s1 + $0xe8] sm:$0xff]  }
   0x7   :  { %v2292_v14 = vld [vmem:[%s3032_s1 + $0x18] sm:$0xff]   ;;  %v2296_v18 = vld [vmem:[%s3032_s1 + $0x20] sm:$0xff]   ;;  %v2300_v22 = vld [vmem:[%s3032_s1 + $0x28] sm:$0xff]  }
   0x8   :  { %1961 = vmatpush3.bf16.msra.mxu0 %v2284_v6  ;;  %v2293_v15 = vld [vmem:[%s3032_s1 + $0x98] sm:$0xff]   ;;  %v2297_v19 = vld [vmem:[%s3032_s1 + $0xa0] sm:$0xff]   ;;  %v2301_v23 = vld [vmem:[%s3032_s1 + $0xa8] sm:$0xff]  }
   0x9   :  { %2025 = vmatpush3.bf16.msra.mxu1 %v2285_v7  ;;  %1962 = vmatprep.subr.bf16.mxu0 %v2286_v8  ;;  %v2302_v24 = vld [vmem:[%s3032_s1 + $0x70] sm:$0xff]   ;;  %v2306_v28 = vld [vmem:[%s3032_s1 + $0x78] sm:$0xff]   ;;  %v2310_v32 = vld [vmem:[%s3033_s0] ss:$36 sps:$4 sm:$0xff]  }
   0xa   :  { %2026 = vmatprep.subr.bf16.mxu1 %v2287_v9  ;;  %v2303_v25 = vld [vmem:[%s3032_s1 + $0xf0] sm:$0xff]   ;;  %v2307_v29 = vld [vmem:[%s3032_s1 + $0xf8] sm:$0xff]   ;;  %v2312_v33 = vld [vmem:[%s3033_s0 + $0x4] ss:$36 sps:$4 sm:$0xff]  }
   0xb   :  { %v2304_v26 = vld [vmem:[%s3032_s1 + $0x30] sm:$0xff]   ;;  %v2308_v30 = vld [vmem:[%s3032_s1 + $0x38] sm:$0xff]   ;;  %v2313_v34 = vld [vmem:[%s3033_s0 + $0x8] ss:$36 sps:$4 sm:$0xff]   ;;  %1107 = vmatprep.mubr.bf16.mxu0 %v2312_v33 }
   0xc   :  { %1963 = vmatpush3.bf16.msra.mxu0 %v2288_v10  ;;  %v2305_v27 = vld [vmem:[%s3032_s1 + $0xb0] sm:$0xff]   ;;  %v2309_v31 = vld [vmem:[%s3032_s1 + $0xb8] sm:$0xff]   ;;  %v2316_v36 = vld [vmem:[%s3032_s1 + $0x140] sm:$0xff]  }
   0xd   :  { %2027 = vmatpush3.bf16.msra.mxu1 %v2289_v11  ;;  %1964 = vmatprep.subr.bf16.mxu0 %v2290_v12  ;;  %v2315_v35 = vld [vmem:[%s3033_s0 + $0xc] ss:$36 sps:$4 sm:$0xff]   ;;  %v2317_v37 = vld [vmem:[%s3032_s1 + $0x1c0] sm:$0xff]   ;;  %v2322_v41 = vld [vmem:[%s3033_s0 + $0x54] ss:$36 sps:$4 sm:$0xff]  }
   0xe   :  { %2028 = vmatprep.subr.bf16.mxu1 %v2291_v13  ;;  %1204 = vmatprep.mubr.bf16.mxu1 %v2315_v35  ;;  %v2318_v38 = vld [vmem:[%s3032_s1 + $0x100] sm:$0xff]   ;;  %v2320_v40 = vld [vmem:[%s3033_s0 + $0x4c] ss:$36 sps:$4 sm:$0xff]   ;;  %v2330_v48 = vld [vmem:[%s3033_s0 + $0x94] ss:$36 sps:$4 sm:$0xff]  }
   0xf   :  { %v2319_v39 = vld [vmem:[%s3032_s1 + $0x180] sm:$0xff]   ;;  %v2324_v42 = vld [vmem:[%s3033_s0 + $0x48] ss:$36 sps:$4 sm:$0xff]   ;;  %v2325_v43 = vld [vmem:[%s3033_s0 + $0x50] ss:$36 sps:$4 sm:$0xff]  }
  0x10   :  { %1965 = vmatpush3.bf16.msra.mxu0 %v2292_v14  ;;  %v2326_v44 = vld [vmem:[%s3032_s1 + $0x148] sm:$0xff]   ;;  %v2332_v49 = vld [vmem:[%s3033_s0 + $0x9c] ss:$36 sps:$4 sm:$0xff]   ;;  %v2334_v50 = vld [vmem:[%s3033_s0 + $0x90] ss:$36 sps:$4 sm:$0xff]  }
  0x11   :  { %2029 = vmatpush3.bf16.msra.mxu1 %v2293_v15  ;;  %1966 = vmatprep.subr.bf16.mxu0 %v2294_v16  ;;  %v2327_v45 = vld [vmem:[%s3032_s1 + $0x1c8] sm:$0xff]   ;;  %v2335_v51 = vld [vmem:[%s3033_s0 + $0x98] ss:$36 sps:$4 sm:$0xff]   ;;  %v2336_v52 = vld [vmem:[%s3032_s1 + $0x150] sm:$0xff]  }
  0x12   :  { %2030 = vmatprep.subr.bf16.mxu1 %v2295_v17  ;;  %v2328_v46 = vld [vmem:[%s3032_s1 + $0x108] sm:$0xff]   ;;  %v2337_v53 = vld [vmem:[%s3032_s1 + $0x1d0] sm:$0xff]   ;;  %v2340_v56 = vld [vmem:[%s3033_s0 + $0xdc] ss:$36 sps:$4 sm:$0xff]  }
  0x13   :  { %v2329_v47 = vld [vmem:[%s3032_s1 + $0x188] sm:$0xff]   ;;  %v2338_v54 = vld [vmem:[%s3032_s1 + $0x110] sm:$0xff]   ;;  %v2344_v58 = vld [vmem:[%s3033_s0 + $0xd8] ss:$36 sps:$4 sm:$0xff]  }
  0x14   :  { %1967 = vmatpush3.bf16.msra.mxu0 %v2296_v18  ;;  %v2339_v55 = vld [vmem:[%s3032_s1 + $0x190] sm:$0xff]   ;;  %v2342_v57 = vld [vmem:[%s3033_s0 + $0xe4] ss:$36 sps:$4 sm:$0xff]   ;;  %v2346_v60 = vld [vmem:[%s3032_s1 + $0x158] sm:$0xff]  }
  0x15   :  { %2031 = vmatpush3.bf16.msra.mxu1 %v2297_v19  ;;  %1968 = vmatprep.subr.bf16.mxu0 %v2298_v20  ;;  %v2345_v59 = vld [vmem:[%s3033_s0 + $0xe0] ss:$36 sps:$4 sm:$0xff]   ;;  %v2347_v61 = vld [vmem:[%s3032_s1 + $0x1d8] sm:$0xff]   ;;  %v2352_v1 = vld [vmem:[%s3033_s0 + $0x12c] ss:$36 sps:$4 sm:$0xff]  }
  0x16   :  { %2032 = vmatprep.subr.bf16.mxu1 %v2299_v21  ;;  %v2348_v62 = vld [vmem:[%s3032_s1 + $0x118] sm:$0xff]   ;;  %v2350_v0 = vld [vmem:[%s3033_s0 + $0x124] ss:$36 sps:$4 sm:$0xff]   ;;  %v2360_v8 = vld [vmem:[%s3033_s0 + $0x16c] ss:$36 sps:$4 sm:$0xff]  }
  0x17   :  { %v2349_v63 = vld [vmem:[%s3032_s1 + $0x198] sm:$0xff]   ;;  %v2354_v2 = vld [vmem:[%s3033_s0 + $0x120] ss:$36 sps:$4 sm:$0xff]   ;;  %v2355_v4 = vld [vmem:[%s3033_s0 + $0x128] ss:$36 sps:$4 sm:$0xff]  }
  0x18   :  { %1969 = vmatpush3.bf16.msra.mxu0 %v2300_v22  ;;  %v2356_v3 = vld [vmem:[%s3032_s1 + $0x160] sm:$0xff]   ;;  %v2362_v9 = vld [vmem:[%s3033_s0 + $0x174] ss:$36 sps:$4 sm:$0xff]   ;;  %v2366_v10 = vld [vmem:[%s3032_s1 + $0x168] sm:$0xff]  }
  0x19   :  { %2033 = vmatpush3.bf16.msra.mxu1 %v2301_v23  ;;  %1970 = vmatprep.subr.bf16.mxu0 %v2302_v24  ;;  %v2357_v5 = vld [vmem:[%s3032_s1 + $0x1e0] sm:$0xff]   ;;  %v2367_v11 = vld [vmem:[%s3032_s1 + $0x1e8] sm:$0xff]   ;;  %v2365_v15 = vld [vmem:[%s3033_s0 + $0x170] ss:$36 sps:$4 sm:$0xff]  }
  0x1a   :  { %2034 = vmatprep.subr.bf16.mxu1 %v2303_v25  ;;  %v2358_v6 = vld [vmem:[%s3032_s1 + $0x120] sm:$0xff]   ;;  %v2364_v12 = vld [vmem:[%s3033_s0 + $0x168] ss:$36 sps:$4 sm:$0xff]   ;;  %v2370_v16 = vld [vmem:[%s3033_s0 + $0x1b4] ss:$36 sps:$4 sm:$0xff]  }
  0x1b   :  { %v2359_v7 = vld [vmem:[%s3032_s1 + $0x1a0] sm:$0xff]   ;;  %v2368_v13 = vld [vmem:[%s3032_s1 + $0x128] sm:$0xff]   ;;  %v2376_v18 = vld [vmem:[%s3032_s1 + $0x170] sm:$0xff]  }
  0x1c   :  { %1971 = vmatpush3.bf16.msra.mxu0 %v2304_v26  ;;  %v2369_v14 = vld [vmem:[%s3032_s1 + $0x1a8] sm:$0xff]   ;;  %v2372_v17 = vld [vmem:[%s3033_s0 + $0x1bc] ss:$36 sps:$4 sm:$0xff]   ;;  %v2377_v19 = vld [vmem:[%s3032_s1 + $0x1f0] sm:$0xff]  }
  0x1d   :  { %2035 = vmatpush3.bf16.msra.mxu1 %v2305_v27  ;;  %1972 = vmatprep.subr.bf16.mxu0 %v2306_v28  ;;  %v2378_v20 = vld [vmem:[%s3032_s1 + $0x130] sm:$0xff]   ;;  %v2375_v23 = vld [vmem:[%s3033_s0 + $0x1b8] ss:$36 sps:$4 sm:$0xff]   ;;  %v2382_v25 = vld [vmem:[%s3033_s0 + $0x204] ss:$36 sps:$4 sm:$0xff]  }
  0x1e   :  { %2036 = vmatprep.subr.bf16.mxu1 %v2307_v29  ;;  %v2379_v21 = vld [vmem:[%s3032_s1 + $0x1b0] sm:$0xff]   ;;  %v2380_v24 = vld [vmem:[%s3033_s0 + $0x1fc] ss:$36 sps:$4 sm:$0xff]  }
  0x1f   :  { %v2374_v22 = vld [vmem:[%s3033_s0 + $0x1b0] ss:$36 sps:$4 sm:$0xff]   ;;  %v2386_v26 = vld [vmem:[%s3032_s1 + $0x178] sm:$0xff]  }
  0x20   :  { %1973 = vmatpush3.bf16.msra.mxu0 %v2308_v30  ;;  %v2387_v27 = vld [vmem:[%s3032_s1 + $0x1f8] sm:$0xff]   ;;  %v2390_v35 = vld [vmem:[%s3033_s0 + $0x10] ss:$36 sps:$4 sm:$0xff]  }
  0x21   :  { %2037 = vmatpush3.bf16.msra.mxu1 %v2309_v31  ;;  %2086 = vmatprep.subr.bf16.mxu0 %v2316_v36  ;;  %v2388_v28 = vld [vmem:[%s3032_s1 + $0x138] sm:$0xff]   ;;  %v2385_v31 = vld [vmem:[%s3033_s0 + $0x200] ss:$36 sps:$4 sm:$0xff]  }
  0x22   :  { %2150 = vmatprep.subr.bf16.mxu1 %v2317_v37  ;;  %v2389_v29 = vld [vmem:[%s3032_s1 + $0x1b8] sm:$0xff]  }
  0x23   :  { %1108 = vmatmul.mubr.bf16.vlgmr.msra.gmra.mrb[0].mxu0 %v2310_v32  ;;  %v2384_v30 = vld [vmem:[%s3033_s0 + $0x1f8] ss:$36 sps:$4 sm:$0xff]   ;;  %v2396_v32 = vld [vmem:[%s3032_s1 + $0x200] sm:$0xff]  }
  0x24   :  { %1205 = vmatmul.mubr.bf16.vlgmr.msra.gmra.mrb[0].mxu1 %v2313_v34  ;;  %2087 = vmatpush3.bf16.msra.mxu0 %v2318_v38  ;;  %v2392_v33 = vld [vmem:[%s3033_s0 + $0x14] ss:$36 sps:$4 sm:$0xff]   ;;  %v2395_v34 = vld [vmem:[%s3033_s0 + $0x1c] ss:$36 sps:$4 sm:$0xff]   ;;  %v2399_v38 = vld [vmem:[%s3033_s0 + $0x64] ss:$36 sps:$4 sm:$0xff]  }
  0x25   :  { %2151 = vmatpush3.bf16.msra.mxu1 %v2319_v39  ;;  %1115 = vmatprep.mubr.bf16.mxu0 %v2320_v40  ;;  %v2393_v36 = vld [vmem:[%s3033_s0 + $0x18] ss:$36 sps:$4 sm:$0xff]   ;;  %v2403_v39 = vld [vmem:[%s3032_s1 + $0x208] sm:$0xff]   ;;  %v2410_v40 = vld [vmem:[%s3032_s1 + $0x210] sm:$0xff]  }
  0x26   :  { %1212 = vmatprep.mubr.bf16.mxu1 %v2322_v41  ;;  %2088 = vmatprep.subr.bf16.mxu0 %v2326_v44  ;;  %v2397_v37 = vld [vmem:[%s3033_s0 + $0x5c] ss:$36 sps:$4 sm:$0xff]   ;;  %v2406_v44 = vld [vmem:[%s3033_s0 + $0xac] ss:$36 sps:$4 sm:$0xff]  }
  0x27   :  { %2152 = vmatprep.subr.bf16.mxu1 %v2327_v45  ;;  %v2401_v41 = vld [vmem:[%s3033_s0 + $0x58] ss:$36 sps:$4 sm:$0xff]  }
  0x28   :  { %2089 = vmatpush3.bf16.msra.mxu0 %v2328_v46  ;;  %v2417_v45 = vld [vmem:[%s3032_s1 + $0x218] sm:$0xff]   ;;  %v2424_v46 = vld [vmem:[%s3032_s1 + $0x220] sm:$0xff]  }
  0x29   :  { %2153 = vmatpush3.bf16.msra.mxu1 %v2329_v47  ;;  %2090 = vmatprep.subr.bf16.mxu0 %v2336_v52  ;;  %v2408_v47 = vld [vmem:[%s3033_s0 + $0xa0] ss:$36 sps:$4 sm:$0xff]   ;;  %v2415_v52 = vld [vmem:[%s3033_s0 + $0xe8] ss:$36 sps:$4 sm:$0xff]  }
  0x2a   :  { %2154 = vmatprep.subr.bf16.mxu1 %v2337_v53  ;;  %v2438_v53 = vld [vmem:[%s3032_s1 + $0x230] sm:$0xff]  }
  0x2b   :  { %1116 = vmatmul.mubr.bf16.gmra.mrb[4].mxu0 %v2324_v42  ;;  %v2402_v42 = vld [vmem:[%s3033_s0 + $0x60] ss:$36 sps:$4 sm:$0xff]  }
  0x2c   :  { %1213 = vmatmul.mubr.bf16.gmra.mrb[4].mxu1 %v2325_v43  ;;  %1123 = vmatprep.mubr.bf16.mxu0 %v2330_v48  ;;  %v2404_v43 = vld [vmem:[%s3033_s0 + $0xa4] ss:$36 sps:$4 sm:$0xff]  }
  0x2d   :  { %1220 = vmatprep.mubr.bf16.mxu1 %v2332_v49  ;;  %2091 = vmatpush3.bf16.msra.mxu0 %v2338_v54  ;;  %v2409_v48 = vld [vmem:[%s3033_s0 + $0xa8] ss:$36 sps:$4 sm:$0xff]   ;;  %v2416_v54 = vld [vmem:[%s3033_s0 + $0xf0] ss:$36 sps:$4 sm:$0xff]  }
  0x2e   :  { %2155 = vmatpush3.bf16.msra.mxu1 %v2339_v55  ;;  %2092 = vmatprep.subr.bf16.mxu0 %v2346_v60  ;;  %v2411_v49 = vld [vmem:[%s3033_s0 + $0xec] ss:$36 sps:$4 sm:$0xff]   ;;  %v2418_v55 = vld [vmem:[%s3033_s0 + $0x134] ss:$36 sps:$4 sm:$0xff]   ;;  %v2425_v60 = vld [vmem:[%s3033_s0 + $0x17c] ss:$36 sps:$4 sm:$0xff]  }
  0x2f   :  { %2156 = vmatprep.subr.bf16.mxu1 %v2347_v61  ;;  %v2427_v61 = vld [vmem:[%s3033_s0 + $0x184] ss:$36 sps:$4 sm:$0xff]  }
  0x31   :  { %2093 = vmatpush3.bf16.msra.mxu0 %v2348_v62  ;;  %v2429_v62 = vld [vmem:[%s3033_s0 + $0x178] ss:$36 sps:$4 sm:$0xff]  }
  0x32   :  { %2157 = vmatpush3.bf16.msra.mxu1 %v2349_v63  ;;  %2094 = vmatprep.subr.bf16.mxu0 %v2356_v3  ;;  %v2430_v63 = vld [vmem:[%s3033_s0 + $0x180] ss:$36 sps:$4 sm:$0xff]   ;;  %v2437_v3 = vld [vmem:[%s3033_s0 + $0x1c8] ss:$36 sps:$4 sm:$0xff]  }
  0x33   :  { %1124 = vmatmul.mubr.bf16.gmra.mrb[8].mxu0 %v2334_v50  ;;  %2158 = vmatprep.subr.bf16.mxu1 %v2357_v5  ;;  %v2413_v50 = vld [vmem:[%s3033_s0 + $0xf4] ss:$36 sps:$4 sm:$0xff]  }
  0x34   :  { %1221 = vmatmul.mubr.bf16.gmra.mrb[8].mxu1 %v2335_v51  ;;  %1131 = vmatprep.mubr.bf16.mxu0 %v2340_v56  ;;  %v2431_v51 = vld [vmem:[%s3032_s1 + $0x228] sm:$0xff]   ;;  %v2420_v56 = vld [vmem:[%s3033_s0 + $0x13c] ss:$36 sps:$4 sm:$0xff]   ;;  %v2441_v5 = vld [vmem:[%s3033_s0 + $0x214] ss:$36 sps:$4 sm:$0xff]  }
  0x35   :  { %1228 = vmatprep.mubr.bf16.mxu1 %v2342_v57  ;;  %2095 = vmatpush3.bf16.msra.mxu0 %v2358_v6  ;;  %v2445_v57 = vld [vmem:[%s3032_s1 + $0x238] sm:$0xff]   ;;  %v2443_v6 = vld [vmem:[%s3033_s0 + $0x208] ss:$36 sps:$4 sm:$0xff]  }
  0x36   :  { %2159 = vmatpush3.bf16.msra.mxu1 %v2359_v7  ;;  %2096 = vmatprep.subr.bf16.mxu0 %v2366_v10  ;;  %v2444_v7 = vld [vmem:[%s3033_s0 + $0x210] ss:$36 sps:$4 sm:$0xff]   ;;  %v2448_v10 = vld [vmem:[%s3033_s0 + $0x68] ss:$36 sps:$4 sm:$0xff]  }
  0x37   :  { %2160 = vmatprep.subr.bf16.mxu1 %v2367_v11  ;;  %v2449_v11 = vld [vmem:[%s3033_s0 + $0x188] ss:$36 sps:$4 sm:$0xff]  }
  0x39   :  { %2097 = vmatpush3.bf16.msra.mxu0 %v2368_v13  ;;  %v2451_v13 = vld [vmem:[%s3033_s0 + $0x1d0] ss:$36 sps:$4 sm:$0xff]  }
  0x3a   :  { %2161 = vmatpush3.bf16.msra.mxu1 %v2369_v14  ;;  %2098 = vmatprep.subr.bf16.mxu0 %v2376_v18  ;;  %v2452_v14 = vld [vmem:[%s3033_s0 + $0xf8] ss:$36 sps:$4 sm:$0xff]  }
  0x3b   :  { %1132 = vmatmul.mubr.bf16.gmra.mrb[12].mxu0 %v2344_v58  ;;  %2162 = vmatprep.subr.bf16.mxu1 %v2377_v19  ;;  %v2422_v58 = vld [vmem:[%s3033_s0 + $0x130] ss:$36 sps:$4 sm:$0xff]  }
  0x3c   :  { %1229 = vmatmul.mubr.bf16.gmra.mrb[12].mxu1 %v2345_v59  ;;  %1139 = vmatprep.mubr.bf16.mxu0 %v2350_v0  ;;  %v2423_v59 = vld [vmem:[%s3033_s0 + $0x138] ss:$36 sps:$4 sm:$0xff]   ;;  %v2432_v0 = vld [vmem:[%s3033_s0 + $0x1c4] ss:$36 sps:$4 sm:$0xff]  }
  0x3d   :  { %1236 = vmatprep.mubr.bf16.mxu1 %v2352_v1  ;;  %2099 = vmatpush3.bf16.msra.mxu0 %v2378_v20  ;;  %v2434_v1 = vld [vmem:[%s3033_s0 + $0x1cc] ss:$36 sps:$4 sm:$0xff]  }
  0x3e   :  { %2163 = vmatpush3.bf16.msra.mxu1 %v2379_v21  ;;  %2100 = vmatprep.subr.bf16.mxu0 %v2386_v26 }
  0x3f   :  { %2164 = vmatprep.subr.bf16.mxu1 %v2387_v27 }
  0x41   :  { %2101 = vmatpush3.bf16.msra.mxu0 %v2388_v28 }
  0x42   :  { %2165 = vmatpush3.bf16.msra.mxu1 %v2389_v29  ;;  %2230 = vmatprep.subr.bf16.mxu0 %v2396_v32 }
  0x43   :  { %1140 = vmatmul.mubr.bf16.gmra.mrb[16].mxu0 %v2354_v2  ;;  %2262 = vmatprep.subr.bf16.mxu1 %v2396_v32  ;;  %v2436_v2 = vld [vmem:[%s3033_s0 + $0x1c0] ss:$36 sps:$4 sm:$0xff]  }
  0x44   :  { %1237 = vmatmul.mubr.bf16.gmra.mrb[16].mxu1 %v2355_v4  ;;  %1147 = vmatprep.mubr.bf16.mxu0 %v2360_v8  ;;  %v2439_v4 = vld [vmem:[%s3033_s0 + $0x20c] ss:$36 sps:$4 sm:$0xff]   ;;  %v2446_v8 = vld [vmem:[%s3033_s0 + $0x20] ss:$36 sps:$4 sm:$0xff]  }
  0x45   :  { %1244 = vmatprep.mubr.bf16.mxu1 %v2362_v9  ;;  %v2447_v9 = vld [vmem:[%s3033_s0 + $0x140] ss:$36 sps:$4 sm:$0xff]  }
  0x4b   :  { %1148 = vmatmul.mubr.bf16.gmra.mrb[20].mxu0 %v2364_v12  ;;  %v2450_v12 = vld [vmem:[%s3033_s0 + $0xb0] ss:$36 sps:$4 sm:$0xff]  }
  0x4c   :  { %1245 = vmatmul.mubr.bf16.gmra.mrb[20].mxu1 %v2365_v15  ;;  %1155 = vmatprep.mubr.bf16.mxu0 %v2370_v16  ;;  %v2453_v15 = vld [vmem:[%s3033_s0 + $0x218] ss:$36 sps:$4 sm:$0xff]  }
  0x4d   :  { %1252 = vmatprep.mubr.bf16.mxu1 %v2372_v17 }
  0x53   :  { %1156 = vmatmul.mubr.bf16.gmra.mrb[24].mxu0 %v2374_v22 }
  0x54   :  { %1253 = vmatmul.mubr.bf16.gmra.mrb[24].mxu1 %v2375_v23  ;;  %1163 = vmatprep.mubr.bf16.mxu0 %v2380_v24 }
  0x55   :  { %1260 = vmatprep.mubr.bf16.mxu1 %v2382_v25 }
  0x5b   :  { %1164 = vmatmul.mubr.bf16.gmra.mrb[28].mxu0 %v2384_v30 }
  0x5c   :  { %1261 = vmatmul.mubr.bf16.gmra.mrb[28].mxu1 %v2385_v31  ;;  %1301 = vmatprep.mubr.bf16.mxu0 %v2392_v33 }
  0x5d   :  { %1398 = vmatprep.mubr.bf16.mxu1 %v2395_v34 }
  0x63   :  { %1302 = vmatmul.mubr.bf16.vlgmr.msra.gmra.mrb[32].mxu0 %v2390_v35 }
  0x64   :  { %1399 = vmatmul.mubr.bf16.vlgmr.msra.gmra.mrb[32].mxu1 %v2393_v36  ;;  %2231 = vmatpush3.bf16.msra.mxu0 %v2396_v32 }
  0x65   :  { %2270 = vmatpush3.bf16.msra.mxu1 %v2396_v32  ;;  %1309 = vmatprep.mubr.bf16.mxu0 %v2397_v37 }
  0x66   :  { %1406 = vmatprep.mubr.bf16.mxu1 %v2399_v38  ;;  %2232 = vmatprep.subr.bf16.mxu0 %v2403_v39 }
  0x67   :  { %2263 = vmatprep.subr.bf16.mxu1 %v2403_v39 }
  0x68   :  { %2233 = vmatpush3.bf16.msra.mxu0 %v2403_v39 }
  0x69   :  { %2271 = vmatpush3.bf16.msra.mxu1 %v2403_v39  ;;  %2234 = vmatprep.subr.bf16.mxu0 %v2410_v40 }
  0x6a   :  { %2264 = vmatprep.subr.bf16.mxu1 %v2410_v40 }
  0x6b   :  { %1310 = vmatmul.mubr.bf16.gmra.mrb[36].mxu0 %v2401_v41 }
  0x6c   :  { %1407 = vmatmul.mubr.bf16.gmra.mrb[36].mxu1 %v2402_v42  ;;  %1317 = vmatprep.mubr.bf16.mxu0 %v2404_v43 }
  0x6d   :  { %1414 = vmatprep.mubr.bf16.mxu1 %v2406_v44  ;;  %2235 = vmatpush3.bf16.msra.mxu0 %v2410_v40 }
  0x6e   :  { %2272 = vmatpush3.bf16.msra.mxu1 %v2410_v40  ;;  %2236 = vmatprep.subr.bf16.mxu0 %v2417_v45 }
  0x6f   :  { %2265 = vmatprep.subr.bf16.mxu1 %v2417_v45 }
  0x71   :  { %2237 = vmatpush3.bf16.msra.mxu0 %v2417_v45 }
  0x72   :  { %2273 = vmatpush3.bf16.msra.mxu1 %v2417_v45  ;;  %2238 = vmatprep.subr.bf16.mxu0 %v2424_v46 }
  0x73   :  { %1318 = vmatmul.mubr.bf16.gmra.mrb[40].mxu0 %v2408_v47  ;;  %2266 = vmatprep.subr.bf16.mxu1 %v2424_v46 }
  0x74   :  { %1415 = vmatmul.mubr.bf16.gmra.mrb[40].mxu1 %v2409_v48  ;;  %1325 = vmatprep.mubr.bf16.mxu0 %v2411_v49 }
  0x75   :  { %1422 = vmatprep.mubr.bf16.mxu1 %v2413_v50  ;;  %2239 = vmatpush3.bf16.msra.mxu0 %v2424_v46 }
  0x76   :  { %2274 = vmatpush3.bf16.msra.mxu1 %v2424_v46  ;;  %2240 = vmatprep.subr.bf16.mxu0 %v2431_v51 }
  0x77   :  { %2267 = vmatprep.subr.bf16.mxu1 %v2431_v51 }
  0x79   :  { %2241 = vmatpush3.bf16.msra.mxu0 %v2431_v51 }
  0x7a   :  { %2275 = vmatpush3.bf16.msra.mxu1 %v2431_v51  ;;  %2242 = vmatprep.subr.bf16.mxu0 %v2438_v53 }
  0x7b   :  { %1326 = vmatmul.mubr.bf16.gmra.mrb[44].mxu0 %v2415_v52  ;;  %2268 = vmatprep.subr.bf16.mxu1 %v2438_v53 }
  0x7c   :  { %1423 = vmatmul.mubr.bf16.gmra.mrb[44].mxu1 %v2416_v54  ;;  %1333 = vmatprep.mubr.bf16.mxu0 %v2418_v55 }
  0x7d   :  { %1430 = vmatprep.mubr.bf16.mxu1 %v2420_v56  ;;  %2243 = vmatpush3.bf16.msra.mxu0 %v2438_v53 }
  0x7e   :  { %2276 = vmatpush3.bf16.msra.mxu1 %v2438_v53  ;;  %2244 = vmatprep.subr.bf16.mxu0 %v2445_v57 }
  0x7f   :  { %2269 = vmatprep.subr.bf16.mxu1 %v2445_v57 }
  0x81   :  { %2245 = vmatpush3.bf16.msra.mxu0 %v2445_v57 }
  0x82   :  { %2277 = vmatpush3.bf16.msra.mxu1 %v2445_v57 }
  0x83   :  { %1334 = vmatmul.mubr.bf16.gmra.mrb[48].mxu0 %v2422_v58 }
  0x84   :  { %1431 = vmatmul.mubr.bf16.gmra.mrb[48].mxu1 %v2423_v59  ;;  %1341 = vmatprep.mubr.bf16.mxu0 %v2425_v60 }
  0x85   :  { %1438 = vmatprep.mubr.bf16.mxu1 %v2427_v61 }
  0x8b   :  { %1342 = vmatmul.mubr.bf16.gmra.mrb[52].mxu0 %v2429_v62 }
  0x8c   :  { %1439 = vmatmul.mubr.bf16.gmra.mrb[52].mxu1 %v2430_v63  ;;  %1349 = vmatprep.mubr.bf16.mxu0 %v2432_v0 }
  0x8d   :  { %1446 = vmatprep.mubr.bf16.mxu1 %v2434_v1 }
  0x93   :  { %1350 = vmatmul.mubr.bf16.gmra.mrb[56].mxu0 %v2436_v2 }
  0x94   :  { %1447 = vmatmul.mubr.bf16.gmra.mrb[56].mxu1 %v2437_v3  ;;  %1357 = vmatprep.mubr.bf16.mxu0 %v2439_v4 }
  0x95   :  { %1454 = vmatprep.mubr.bf16.mxu1 %v2441_v5 }
  0x9b   :  { %1358 = vmatmul.mubr.bf16.gmra.mrb[60].mxu0 %v2443_v6 }
  0x9c   :  { %1455 = vmatmul.mubr.bf16.gmra.mrb[60].mxu1 %v2444_v7  ;;  %2246 = vmatprep.mubr.bf16.mxu0 %v2446_v8 }
  0x9d   :  { %2254 = vmatprep.mubr.bf16.mxu1 %v2447_v9 }
  0xa3   :  { %2247 = vmatmul.mubr.bf16.vlgmr.msra.gmra.mrb[64].mxu0 %v2448_v10 }
  0xa4   :  { %2255 = vmatmul.mubr.bf16.vlgmr.msra.gmra.mrb[64].mxu1 %v2449_v11  ;;  %2250 = vmatprep.mubr.bf16.mxu0 %v2450_v12 }
  0xa5   :  { %2258 = vmatprep.mubr.bf16.mxu1 %v2451_v13 }
  0xab   :  { %2251 = vmatmul.mubr.bf16.gmra.mrb[68].mxu0 %v2452_v14 }
  0xac   :  { %2259 = vmatmul.mubr.bf16.gmra.mrb[68].mxu1 %v2453_v15 }
  0xf6   :  { %v1974_v16 = vpop.f32.mrb[0].mxu0 }
  0xf7   :  { %v2038_v17 = vpop.f32.mrb[0].mxu1  ;;  %v1975_v18 = vpop.f32.mrb[1].mxu0 }
  0xf8   :  { %v1976_v19 = vadd.f32 %v1975_v18, %v1974_v16  ;;  %v2039_v20 = vpop.f32.mrb[1].mxu1  ;;  %v1977_v21 = vpop.f32.mrb[2].mxu0 }
  0xf9   :  { %v2040_v22 = vadd.f32 %v2039_v20, %v2038_v17  ;;  %v2041_v23 = vpop.f32.mrb[2].mxu1  ;;  %v1978_v24 = vpop.f32.mrb[3].mxu0 }
  0xfa   :  { %v1979_v25 = vadd.f32 %v1978_v24, %v1977_v21  ;;  %v2042_v26 = vpop.f32.mrb[3].mxu1 }
  0xfb   :  { %v2906_v27 = vadd.f32 %v2040_v22, %v1976_v19  ;;  %v2043_v28 = vadd.f32 %v2042_v26, %v2041_v23 }
  0xfd   :  { %v2908_v29 = vadd.f32 %v2043_v28, %v1979_v25 }
  0xfe   :  { %v1980_v30 = vpop.f32.mrb[4].mxu0 }
  0xff   :  { %v2044_v31 = vpop.f32.mrb[4].mxu1  ;;  %v1981_v32 = vpop.f32.mrb[5].mxu0 }
 0x100   :  { %v1982_v33 = vadd.f32 %v1981_v32, %v1980_v30  ;;  %v2045_v34 = vpop.f32.mrb[5].mxu1  ;;  %v1983_v35 = vpop.f32.mrb[6].mxu0 }
 0x101   :  { %v2046_v36 = vadd.f32 %v2045_v34, %v2044_v31  ;;  %v2047_v37 = vpop.f32.mrb[6].mxu1  ;;  %v1984_v38 = vpop.f32.mrb[7].mxu0 }
 0x102   :  { %v1985_v39 = vadd.f32 %v1984_v38, %v1983_v35  ;;  %v2048_v40 = vpop.f32.mrb[7].mxu1 }
 0x103   :  { %v2910_v41 = vadd.f32 %v2046_v36, %v1982_v33  ;;  %v2049_v42 = vadd.f32 %v2048_v40, %v2047_v37 }
 0x105   :  { %v2912_v43 = vadd.f32 %v2049_v42, %v1985_v39 }
 0x106   :  { %v1986_v44 = vpop.f32.mrb[8].mxu0 }
 0x107   :  { %v2050_v45 = vpop.f32.mrb[8].mxu1  ;;  %v1987_v46 = vpop.f32.mrb[9].mxu0 }
 0x108   :  { %v1988_v47 = vadd.f32 %v1987_v46, %v1986_v44  ;;  %v2051_v48 = vpop.f32.mrb[9].mxu1  ;;  %v1989_v49 = vpop.f32.mrb[10].mxu0 }
 0x109   :  { %v2052_v50 = vadd.f32 %v2051_v48, %v2050_v45  ;;  %v2053_v51 = vpop.f32.mrb[10].mxu1  ;;  %v1990_v52 = vpop.f32.mrb[11].mxu0 }
 0x10a   :  { %v1991_v53 = vadd.f32 %v1990_v52, %v1989_v49  ;;  %v2054_v54 = vpop.f32.mrb[11].mxu1 }
 0x10b   :  { %v2914_v55 = vadd.f32 %v2052_v50, %v1988_v47  ;;  %v2055_v56 = vadd.f32 %v2054_v54, %v2053_v51 }
 0x10d   :  { %v2916_v57 = vadd.f32 %v2055_v56, %v1991_v53 }
 0x10e   :  { %v1992_v58 = vpop.f32.mrb[12].mxu0 }
 0x10f   :  { %v2056_v59 = vpop.f32.mrb[12].mxu1  ;;  %v1993_v60 = vpop.f32.mrb[13].mxu0 }
 0x110   :  { %v1994_v61 = vadd.f32 %v1993_v60, %v1992_v58  ;;  %v2057_v62 = vpop.f32.mrb[13].mxu1  ;;  %v1995_v63 = vpop.f32.mrb[14].mxu0 }
 0x111   :  { %v2058_v0 = vadd.f32 %v2057_v62, %v2056_v59  ;;  %v2059_v1 = vpop.f32.mrb[14].mxu1  ;;  %v1996_v2 = vpop.f32.mrb[15].mxu0 }
 0x112   :  { %v1997_v3 = vadd.f32 %v1996_v2, %v1995_v63  ;;  %v2060_v4 = vpop.f32.mrb[15].mxu1 }
 0x113   :  { %v2918_v5 = vadd.f32 %v2058_v0, %v1994_v61  ;;  %v2061_v6 = vadd.f32 %v2060_v4, %v2059_v1 }
 0x115   :  { %v2920_v7 = vadd.f32 %v2061_v6, %v1997_v3 }
 0x116   :  { %v1998_v8 = vpop.f32.mrb[16].mxu0 }
 0x117   :  { %v2062_v9 = vpop.f32.mrb[16].mxu1  ;;  %v1999_v10 = vpop.f32.mrb[17].mxu0 }
 0x118   :  { %v2000_v11 = vadd.f32 %v1999_v10, %v1998_v8  ;;  %v2063_v12 = vpop.f32.mrb[17].mxu1  ;;  %v2001_v13 = vpop.f32.mrb[18].mxu0 }
 0x119   :  { %v2064_v14 = vadd.f32 %v2063_v12, %v2062_v9  ;;  %v2065_v15 = vpop.f32.mrb[18].mxu1  ;;  %v2002_v16 = vpop.f32.mrb[19].mxu0 }
 0x11a   :  { %v2003_v17 = vadd.f32 %v2002_v16, %v2001_v13  ;;  %v2066_v18 = vpop.f32.mrb[19].mxu1 }
 0x11b   :  { %v2922_v19 = vadd.f32 %v2064_v14, %v2000_v11  ;;  %v2067_v20 = vadd.f32 %v2066_v18, %v2065_v15 }
 0x11d   :  { %v2924_v21 = vadd.f32 %v2067_v20, %v2003_v17 }
 0x11e   :  { %v2004_v22 = vpop.f32.mrb[20].mxu0 }
 0x11f   :  { %v2068_v23 = vpop.f32.mrb[20].mxu1  ;;  %v2005_v24 = vpop.f32.mrb[21].mxu0 }
 0x120   :  { %v2006_v25 = vadd.f32 %v2005_v24, %v2004_v22  ;;  %v2069_v26 = vpop.f32.mrb[21].mxu1  ;;  %v2007_v28 = vpop.f32.mrb[22].mxu0 }
 0x121   :  { %v2070_v30 = vadd.f32 %v2069_v26, %v2068_v23  ;;  %v2071_v31 = vpop.f32.mrb[22].mxu1  ;;  %v2008_v32 = vpop.f32.mrb[23].mxu0 }
 0x122   :  { %v2009_v33 = vadd.f32 %v2008_v32, %v2007_v28  ;;  %v2072_v34 = vpop.f32.mrb[23].mxu1 }
 0x123   :  { %v2926_v35 = vadd.f32 %v2070_v30, %v2006_v25  ;;  %v2073_v36 = vadd.f32 %v2072_v34, %v2071_v31 }
 0x125   :  { %v2928_v37 = vadd.f32 %v2073_v36, %v2009_v33 }
 0x126   :  { %v2010_v38 = vpop.f32.mrb[24].mxu0 }
 0x127   :  { %v2074_v39 = vpop.f32.mrb[24].mxu1  ;;  %v2011_v40 = vpop.f32.mrb[25].mxu0 }
 0x128   :  { %v2012_v42 = vadd.f32 %v2011_v40, %v2010_v38  ;;  %v2075_v44 = vpop.f32.mrb[25].mxu1  ;;  %v2013_v45 = vpop.f32.mrb[26].mxu0 }
 0x129   :  { %v2076_v46 = vadd.f32 %v2075_v44, %v2074_v39  ;;  %v2077_v47 = vpop.f32.mrb[26].mxu1  ;;  %v2014_v48 = vpop.f32.mrb[27].mxu0 }
 0x12a   :  { %v2015_v49 = vadd.f32 %v2014_v48, %v2013_v45  ;;  %v2078_v50 = vpop.f32.mrb[27].mxu1 }
 0x12b   :  { %v2930_v51 = vadd.f32 %v2076_v46, %v2012_v42  ;;  %v2079_v52 = vadd.f32 %v2078_v50, %v2077_v47 }
 0x12d   :  { %v2932_v53 = vadd.f32 %v2079_v52, %v2015_v49 }
 0x12e   :  { %v2016_v54 = vpop.f32.mrb[28].mxu0 }
 0x12f   :  { %v2080_v56 = vpop.f32.mrb[28].mxu1  ;;  %v2017_v58 = vpop.f32.mrb[29].mxu0 }
 0x130   :  { %v2018_v59 = vadd.f32 %v2017_v58, %v2016_v54  ;;  %v2081_v60 = vpop.f32.mrb[29].mxu1  ;;  %v2019_v61 = vpop.f32.mrb[30].mxu0 }
 0x131   :  { %v2082_v62 = vadd.f32 %v2081_v60, %v2080_v56  ;;  %v2083_v63 = vpop.f32.mrb[30].mxu1  ;;  %v2020_v0 = vpop.f32.mrb[31].mxu0 }
 0x132   :  { %v2021_v1 = vadd.f32 %v2020_v0, %v2019_v61  ;;  %v2084_v2 = vpop.f32.mrb[31].mxu1 }
 0x133   :  { %v2934_v3 = vadd.f32 %v2082_v62, %v2018_v59  ;;  %v2085_v4 = vadd.f32 %v2084_v2, %v2083_v63 }
 0x135   :  { %v2936_v6 = vadd.f32 %v2085_v4, %v2021_v1 }
 0x136   :  { %v2102_v8 = vpop.f32.mrb[32].mxu0 }
 0x137   :  { %v2166_v9 = vpop.f32.mrb[32].mxu1  ;;  %v2103_v10 = vpop.f32.mrb[33].mxu0 }
 0x138   :  { %v2104_v11 = vadd.f32 %v2103_v10, %v2102_v8  ;;  %v2167_v12 = vpop.f32.mrb[33].mxu1  ;;  %v2105_v13 = vpop.f32.mrb[34].mxu0 }
 0x139   :  { %v2168_v14 = vadd.f32 %v2167_v12, %v2166_v9  ;;  %v2169_v15 = vpop.f32.mrb[34].mxu1  ;;  %v2106_v16 = vpop.f32.mrb[35].mxu0 }
 0x13a   :  { %v1304_v17 = vadd.f32 %v2104_v11, %v2906_v27  ;;  %v2107_v18 = vadd.f32 %v2106_v16, %v2105_v13  ;;  %v2170_v20 = vpop.f32.mrb[35].mxu1 }
 0x13b   :  { %v2171_v22 = vadd.f32 %v2170_v20, %v2169_v15 }
 0x13c   :  { %v1307_v23 = vadd.f32 %v2107_v18, %v2908_v29  ;;  %v2940_v24 = vadd.f32 %v2168_v14, %v1304_v17 }
 0x13e   :  { %v2108_v25 = vpop.f32.mrb[36].mxu0  ;;  %v2942_v26 = vadd.f32 %v2171_v22, %v1307_v23 }
 0x13f   :  { %v2172_v28 = vpop.f32.mrb[36].mxu1  ;;  %v2109_v30 = vpop.f32.mrb[37].mxu0 }
 0x140   :  { %v2110_v31 = vadd.f32 %v2109_v30, %v2108_v25  ;;  %v2173_v32 = vpop.f32.mrb[37].mxu1  ;;  %v2111_v33 = vpop.f32.mrb[38].mxu0 }
 0x141   :  { %v2174_v34 = vadd.f32 %v2173_v32, %v2172_v28  ;;  %v2175_v36 = vpop.f32.mrb[38].mxu1  ;;  %v2112_v38 = vpop.f32.mrb[39].mxu0 }
 0x142   :  { %v1312_v27 = vadd.f32 %v2110_v31, %v2910_v41  ;;  %v2113_v39 = vadd.f32 %v2112_v38, %v2111_v33  ;;  %v2176_v40 = vpop.f32.mrb[39].mxu1 }
 0x143   :  { %v2177_v42 = vadd.f32 %v2176_v40, %v2175_v36 }
 0x144   :  { %v1315_v29 = vadd.f32 %v2113_v39, %v2912_v43  ;;  %v2946_v44 = vadd.f32 %v2174_v34, %v1312_v27 }
 0x146   :  { %v2114_v45 = vpop.f32.mrb[40].mxu0  ;;  %v2948_v46 = vadd.f32 %v2177_v42, %v1315_v29 }
 0x147   :  { %v2178_v47 = vpop.f32.mrb[40].mxu1  ;;  %v2115_v48 = vpop.f32.mrb[41].mxu0 }
 0x148   :  { %v2116_v49 = vadd.f32 %v2115_v48, %v2114_v45  ;;  %v2179_v50 = vpop.f32.mrb[41].mxu1  ;;  %v2117_v52 = vpop.f32.mrb[42].mxu0 }
 0x149   :  { %v2180_v54 = vadd.f32 %v2179_v50, %v2178_v47  ;;  %v2181_v56 = vpop.f32.mrb[42].mxu1  ;;  %v2118_v58 = vpop.f32.mrb[43].mxu0 }
 0x14a   :  { %v1320_v41 = vadd.f32 %v2116_v49, %v2914_v55  ;;  %v2119_v59 = vadd.f32 %v2118_v58, %v2117_v52  ;;  %v2182_v60 = vpop.f32.mrb[43].mxu1 }
 0x14b   :  { %v2183_v61 = vadd.f32 %v2182_v60, %v2181_v56 }
 0x14c   :  { %v1323_v43 = vadd.f32 %v2119_v59, %v2916_v57  ;;  %v2952_v62 = vadd.f32 %v2180_v54, %v1320_v41 }
 0x14e   :  { %v2120_v63 = vpop.f32.mrb[44].mxu0  ;;  %v2954_v0 = vadd.f32 %v2183_v61, %v1323_v43 }
 0x14f   :  { %v2184_v1 = vpop.f32.mrb[44].mxu1  ;;  %v2121_v2 = vpop.f32.mrb[45].mxu0 }
 0x150   :  { %v2122_v4 = vadd.f32 %v2121_v2, %v2120_v63  ;;  %v2185_v8 = vpop.f32.mrb[45].mxu1  ;;  %v2123_v9 = vpop.f32.mrb[46].mxu0 }
 0x151   :  { %v2186_v10 = vadd.f32 %v2185_v8, %v2184_v1  ;;  %v2187_v11 = vpop.f32.mrb[46].mxu1  ;;  %v2124_v12 = vpop.f32.mrb[47].mxu0 }
 0x152   :  { %v1328_v55 = vadd.f32 %v2122_v4, %v2918_v5  ;;  %v2125_v13 = vadd.f32 %v2124_v12, %v2123_v9  ;;  %v2188_v14 = vpop.f32.mrb[47].mxu1 }
 0x153   :  { %v2189_v15 = vadd.f32 %v2188_v14, %v2187_v11 }
 0x154   :  { %v1331_v57 = vadd.f32 %v2125_v13, %v2920_v7  ;;  %v2958_v16 = vadd.f32 %v2186_v10, %v1328_v55 }
 0x156   :  { %v2126_v17 = vpop.f32.mrb[48].mxu0  ;;  %v2960_v18 = vadd.f32 %v2189_v15, %v1331_v57 }
 0x157   :  { %v2190_v20 = vpop.f32.mrb[48].mxu1  ;;  %v2127_v22 = vpop.f32.mrb[49].mxu0 }
 0x158   :  { %v2128_v23 = vadd.f32 %v2127_v22, %v2126_v17  ;;  %v2191_v25 = vpop.f32.mrb[49].mxu1  ;;  %v2129_v28 = vpop.f32.mrb[50].mxu0 }
 0x159   :  { %v2192_v30 = vadd.f32 %v2191_v25, %v2190_v20  ;;  %v2193_v31 = vpop.f32.mrb[50].mxu1  ;;  %v2130_v32 = vpop.f32.mrb[51].mxu0 }
 0x15a   :  { %v1336_v5 = vadd.f32 %v2128_v23, %v2922_v19  ;;  %v2131_v33 = vadd.f32 %v2130_v32, %v2129_v28  ;;  %v2194_v34 = vpop.f32.mrb[51].mxu1 }
 0x15b   :  { %v2195_v36 = vadd.f32 %v2194_v34, %v2193_v31 }
 0x15c   :  { %v1339_v7 = vadd.f32 %v2131_v33, %v2924_v21  ;;  %v1433_v38 = vadd.f32 %v2192_v30, %v1336_v5  ;;  %v2979_v33 = vld [vmem:[%s3034_s2] ss:$0 sm:$0xff] }
 0x15e   :  { %v2132_v27 = vpop.f32.mrb[52].mxu0  ;;  %v2964_v39 = vadd.f32 %v2195_v36, %v1339_v7 }
 0x15f   :  { %v2196_v40 = vpop.f32.mrb[52].mxu1  ;;  %v2133_v42 = vpop.f32.mrb[53].mxu0 }
 0x160   :  { %v2134_v29 = vadd.f32 %v2133_v42, %v2132_v27  ;;  %v2197_v45 = vpop.f32.mrb[53].mxu1  ;;  %v2135_v47 = vpop.f32.mrb[54].mxu0 }
 0x161   :  { %v2198_v48 = vadd.f32 %v2197_v45, %v2196_v40  ;;  %v2199_v49 = vpop.f32.mrb[54].mxu1  ;;  %v2136_v50 = vpop.f32.mrb[55].mxu0 }
 0x162   :  { %v1344_v52 = vadd.f32 %v2134_v29, %v2926_v35  ;;  %v2137_v19 = vadd.f32 %v2136_v50, %v2135_v47  ;;  %v2200_v54 = vpop.f32.mrb[55].mxu1 }
 0x163   :  { %v2201_v56 = vadd.f32 %v2200_v54, %v2199_v49 }
 0x164   :  { %v1347_v58 = vadd.f32 %v2137_v19, %v2928_v37  ;;  %v1441_v21 = vadd.f32 %v2198_v48, %v1344_v52 }
 0x166   :  { %v2138_v41 = vpop.f32.mrb[56].mxu0  ;;  %v1444_v59 = vadd.f32 %v2201_v56, %v1347_v58 }
 0x167   :  { %v2202_v60 = vpop.f32.mrb[56].mxu1  ;;  %v2139_v61 = vpop.f32.mrb[57].mxu0 }
 0x168   :  { %v2140_v43 = vadd.f32 %v2139_v61, %v2138_v41  ;;  %v2203_v63 = vpop.f32.mrb[57].mxu1  ;;  %v2141_v1 = vpop.f32.mrb[58].mxu0 }
 0x169   :  { %v2204_v2 = vadd.f32 %v2203_v63, %v2202_v60  ;;  %v2205_v4 = vpop.f32.mrb[58].mxu1  ;;  %v2142_v8 = vpop.f32.mrb[59].mxu0 }
 0x16a   :  { %v1352_v9 = vadd.f32 %v2140_v43, %v2930_v51  ;;  %v2143_v10 = vadd.f32 %v2142_v8, %v2141_v1  ;;  %v2206_v35 = vpop.f32.mrb[59].mxu1 }
 0x16b   :  { %v2207_v11 = vadd.f32 %v2206_v35, %v2205_v4 }
 0x16c   :  { %v1355_v12 = vadd.f32 %v2143_v10, %v2932_v53  ;;  %v2970_v55 = vadd.f32 %v2204_v2, %v1352_v9 }
 0x16e   :  { %v2144_v37 = vpop.f32.mrb[60].mxu0  ;;  %v2972_v13 = vadd.f32 %v2207_v11, %v1355_v12 }
 0x16f   :  { %v2208_v14 = vpop.f32.mrb[60].mxu1  ;;  %v2145_v15 = vpop.f32.mrb[61].mxu0 }
 0x170   :  { %v2146_v57 = vadd.f32 %v2145_v15, %v2144_v37  ;;  %v2209_v17 = vpop.f32.mrb[61].mxu1  ;;  %v2147_v20 = vpop.f32.mrb[62].mxu0 }
 0x171   :  { %v2210_v22 = vadd.f32 %v2209_v17, %v2208_v14  ;;  %v2211_v23 = vpop.f32.mrb[62].mxu1  ;;  %v2148_v25 = vpop.f32.mrb[63].mxu0 }
 0x172   :  { %v1360_v51 = vadd.f32 %v2146_v57, %v2934_v3  ;;  %v2149_v28 = vadd.f32 %v2148_v25, %v2147_v20  ;;  %v2212_v30 = vpop.f32.mrb[63].mxu1 }
 0x173   :  { %v2213_v31 = vadd.f32 %v2212_v30, %v2211_v23 }
 0x174   :  { %v1363_v53 = vadd.f32 %v2149_v28, %v2936_v6  ;;  %v1457_v32 = vadd.f32 %v2210_v22, %v1360_v51 }
 0x176   :  { %v2248_v5 = vpop.f32.mrb[64].mxu0  ;;  %v1460_v34 = vadd.f32 %v2213_v31, %v1363_v53 }
 0x177   :  { %v1506_v36 = vadd.f32 %v2248_v5, %v2946_v44  ;;  %v2256_v7 = vpop.f32.mrb[64].mxu1  ;;  %v1497_v27 = vpop.f32.mrb[65].mxu0 }
 0x178   :  { %v1538_v40 = vadd.f32 %v2256_v7, %v1441_v21  ;;  %v1498_v3 = vadd.f32 %v1497_v27, %v2940_v24  ;;  %v1529_v42 = vpop.f32.mrb[65].mxu1  ;;  %v2249_v29 = vpop.f32.mrb[66].mxu0 }
 0x179   :  { %v1620_v45 = vadd.f32 %v2979_v33, %v1506_v36  ;;  %v1530_v6 = vadd.f32 %v1529_v42, %v1433_v38  ;;  %v1509_v47 = vadd.f32 %v2249_v29, %v2948_v46  ;;  %v2257_v48 = vpop.f32.mrb[66].mxu1  ;;  %v1500_v49 = vpop.f32.mrb[67].mxu0 }
 0x17a   :  { %v1628_v50 = vadd.f32 %v2979_v33, %v1538_v40  ;;  %v1618_v52 = vadd.f32 %v2979_v33, %v1498_v3  ;;  %v1541_v19 = vadd.f32 %v2257_v48, %v1444_v59  ;;  %v1501_v44 = vadd.f32 %v1500_v49, %v2942_v26  ;;  %v1532_v54 = vpop.f32.mrb[67].mxu1 }
 0x17b   :  { %v1626_v56 = vadd.f32 %v2979_v33, %v1530_v6  ;;  %v1621_v24 = vadd.f32 %v2979_v33, %v1509_v47  ;;  %v1533_v58 = vadd.f32 %v1532_v54, %v2964_v39  ;;  %v1636_v21 = vmax.f32 %v1620_v45, 0.0 }
 0x17c   :  { %v1629_v38 = vadd.f32 %v2979_v33, %v1541_v19  ;;  %v1619_v46 = vadd.f32 %v2979_v33, %v1501_v44  ;;  %v1644_v61 = vmax.f32 %v1628_v50, 0.0  ;;  %v1634_v43 = vmax.f32 %v1618_v52, 0.0 }
 0x17d   :  { %v1637_v41 = vmax.f32 %v1621_v24, 0.0  ;;  %v1627_v60 = vadd.f32 %v2979_v33, %v1533_v58  ;;  %v1642_v1 = vmax.f32 %v1626_v56, 0.0 }
 0x17e   :  { %v1645_v59 = vmax.f32 %v1629_v38, 0.0  ;;  %v1635_v63 = vmax.f32 %v1619_v46, 0.0  ;;  %v2252_v26 = vpop.f32.mrb[68].mxu0 }
 0x17f   :  { %v1919_v2 = vpack.c.bf16 %v1637_v41, %v1636_v21  ;;  %v1643_v4 = vmax.f32 %v1627_v60, 0.0  ;;  %v1522_v8 = vadd.f32 %v2252_v26, %v2958_v16  ;;  %v2260_v9 = vpop.f32.mrb[68].mxu1  ;;  %v1513_v39 = vpop.f32.mrb[69].mxu0 }
 0x180   :  { %v1939_v10 = vpack.c.bf16 %v1645_v59, %v1644_v61  ;;  %v1914_v35 = vpack.c.bf16 %v1635_v63, %v1634_v43  ;;  %v1554_v11 = vadd.f32 %v2260_v9, %v1457_v32  ;;  %v1514_v12 = vadd.f32 %v1513_v39, %v2952_v62  ;;  %v1545_v37 = vpop.f32.mrb[69].mxu1  ;;  %v2253_v14 = vpop.f32.mrb[70].mxu0 }
 0x181   :  { %1951 = vst [vmem:[%s3035_s3 + $0x8] sm:$0xff] %v1919_v2   ;;  %v1934_v15 = vpack.c.bf16 %v1643_v4, %v1642_v1  ;;  %v1624_v57 = vadd.f32 %v2979_v33, %v1522_v8  ;;  %v1546_v17 = vadd.f32 %v1545_v37, %v2970_v55  ;;  %v1525_v16 = vadd.f32 %v2253_v14, %v2960_v18  ;;  %v2261_v20 = vpop.f32.mrb[70].mxu1  ;;  %v1516_v22 = vpop.f32.mrb[71].mxu0 }
 0x182   :  { %1955 = vst [vmem:[%s3035_s3 + $0x28] sm:$0xff] %v1939_v10   ;;  %1915 = vst [vmem:[%s3035_s3] sm:$0xff] %v1914_v35   ;;  %v1632_v62 = vadd.f32 %v2979_v33, %v1554_v11  ;;  %v1622_v23 = vadd.f32 %v2979_v33, %v1514_v12  ;;  %v1557_v25 = vadd.f32 %v2261_v20, %v1460_v34  ;;  %v1548_v55 = vpop.f32.mrb[71].mxu1 }
 0x183   :  { %v1517_v51 = vadd.f32 %v1516_v22, %v2954_v0  ;;  %1954 = vst [vmem:[%s3035_s3 + $0x20] sm:$0xff] %v1934_v15   ;;  %v1630_v18 = vadd.f32 %v2979_v33, %v1546_v17  ;;  %v1625_v28 = vadd.f32 %v2979_v33, %v1525_v16  ;;  %v1549_v30 = vadd.f32 %v1548_v55, %v2972_v13 }
 0x184   :  { %v1633_v31 = vadd.f32 %v2979_v33, %v1557_v25  ;;  %v1640_v32 = vmax.f32 %v1624_v57, 0.0  ;;  %v1648_v0 = vmax.f32 %v1632_v62, 0.0  ;;  %v1638_v36 = vmax.f32 %v1622_v23, 0.0 }
 0x185   :  { %v1623_v53 = vadd.f32 %v2979_v33, %v1517_v51  ;;  %v1641_v5 = vmax.f32 %v1625_v28, 0.0  ;;  %v1631_v34 = vadd.f32 %v2979_v33, %v1549_v30  ;;  %v1646_v40 = vmax.f32 %v1630_v18, 0.0 }
 0x186   :  { %v1649_v7 = vmax.f32 %v1633_v31, 0.0 }
 0x187   :  { %v1639_v27 = vmax.f32 %v1623_v53, 0.0  ;;  %v1929_v3 = vpack.c.bf16 %v1641_v5, %v1640_v32  ;;  %v1647_v42 = vmax.f32 %v1631_v34, 0.0 }
 0x188   :  { %v1949_v29 = vpack.c.bf16 %v1649_v7, %v1648_v0 }
 0x189   :  { %v1924_v45 = vpack.c.bf16 %v1639_v27, %v1638_v36  ;;  %1953 = vst [vmem:[%s3035_s3 + $0x18] sm:$0xff] %v1929_v3   ;;  %v1944_v13 = vpack.c.bf16 %v1647_v42, %v1646_v40 }
 0x18a   :  { %1957 = vst [vmem:[%s3035_s3 + $0x38] sm:$0xff] %v1949_v29  }
 0x18b   :  { %1952 = vst [vmem:[%s3035_s3 + $0x10] sm:$0xff] %v1924_v45   ;;  %1956 = vst [vmem:[%s3035_s3 + $0x30] sm:$0xff] %v1944_v13  }

// kernel: forward.24
= control target key start
LH: loop header
LB: loop body
LE: loop exit
PB: predicated region body
PF: predicated region fallthrough
CT: control target
= control target key end

     0   :  { %s477_s1 = inlined_call_operand.vmem [shape: bf16[256,128], index: 1, kind: input, shape index: {}]   ;;  %s478_s0 = inlined_call_operand.vmem [shape: bf16[32,256], index: 0, kind: input, shape index: {}]   ;;  %s479_s2 = inlined_call_operand.vmem [shape: f32[1,128], index: 2, kind: input, shape index: {}]   ;;  %s480_s3 = inlined_call_operand.vmem [shape: bf16[32,128], index: 3, kind: output, shape index: {}]  }
   0x1   :  { %v366_v0 = vld [vmem:[%s477_s1 + $0x40] sm:$0xff]   ;;  %v368_v2 = vld [vmem:[%s477_s1 + $0x48] sm:$0xff]   ;;  %v370_v4 = vld [vmem:[%s477_s1 + $0x50] sm:$0xff]  }
   0x2   :  { %v367_v1 = vld [vmem:[%s477_s1] sm:$0xff]   ;;  %322 = vmatprep.subr.bf16.mxu0 %v366_v0  ;;  %350 = vmatprep.subr.bf16.mxu1 %v366_v0  ;;  %v369_v3 = vld [vmem:[%s477_s1 + $0x8] sm:$0xff]   ;;  %v371_v5 = vld [vmem:[%s477_s1 + $0x10] sm:$0xff]  }
   0x3   :  { %323 = vmatpush3.bf16.msra.mxu0 %v367_v1  ;;  %358 = vmatpush3.bf16.msra.mxu1 %v367_v1  ;;  %v372_v6 = vld [vmem:[%s477_s1 + $0x58] sm:$0xff]   ;;  %v374_v8 = vld [vmem:[%s477_s1 + $0x60] sm:$0xff]   ;;  %v376_v10 = vld [vmem:[%s477_s1 + $0x68] sm:$0xff]  }
   0x4   :  { %324 = vmatprep.subr.bf16.mxu0 %v368_v2  ;;  %351 = vmatprep.subr.bf16.mxu1 %v368_v2  ;;  %v373_v7 = vld [vmem:[%s477_s1 + $0x18] sm:$0xff]   ;;  %v375_v9 = vld [vmem:[%s477_s1 + $0x20] sm:$0xff]   ;;  %v377_v13 = vld [vmem:[%s477_s1 + $0x28] sm:$0xff]  }
   0x5   :  { %v384_v11 = vld [vmem:[%s478_s0 + $0x4] ss:$8 sps:$4 sm:$0xff]   ;;  %v387_v12 = vld [vmem:[%s478_s0 + $0x14] ss:$8 sps:$4 sm:$0xff]   ;;  %v382_v18 = vld [vmem:[%s478_s0] ss:$8 sps:$4 sm:$0xff]  }
   0x6   :  { %v378_v14 = vld [vmem:[%s477_s1 + $0x70] sm:$0xff]   ;;  %211 = vmatprep.mubr.bf16.mxu0 %v384_v11  ;;  %219 = vmatprep.mubr.bf16.mxu1 %v387_v12  ;;  %v380_v16 = vld [vmem:[%s477_s1 + $0x78] sm:$0xff]   ;;  %v302_v23 = vld [vmem:[%s479_s2] ss:$0 sm:$0xff] }
   0x7   :  { %325 = vmatpush3.bf16.msra.mxu0 %v369_v3  ;;  %359 = vmatpush3.bf16.msra.mxu1 %v369_v3  ;;  %v379_v15 = vld [vmem:[%s477_s1 + $0x30] sm:$0xff]   ;;  %v381_v17 = vld [vmem:[%s477_s1 + $0x38] sm:$0xff]  }
   0x8   :  { %326 = vmatprep.subr.bf16.mxu0 %v370_v4  ;;  %352 = vmatprep.subr.bf16.mxu1 %v370_v4  ;;  %v385_v19 = vld [vmem:[%s478_s0 + $0x10] ss:$8 sps:$4 sm:$0xff]  }
   0xb   :  { %327 = vmatpush3.bf16.msra.mxu0 %v371_v5  ;;  %360 = vmatpush3.bf16.msra.mxu1 %v371_v5 }
   0xc   :  { %328 = vmatprep.subr.bf16.mxu0 %v372_v6  ;;  %353 = vmatprep.subr.bf16.mxu1 %v372_v6 }
   0xf   :  { %329 = vmatpush3.bf16.msra.mxu0 %v373_v7  ;;  %361 = vmatpush3.bf16.msra.mxu1 %v373_v7 }
  0x10   :  { %330 = vmatprep.subr.bf16.mxu0 %v374_v8  ;;  %354 = vmatprep.subr.bf16.mxu1 %v374_v8 }
  0x13   :  { %331 = vmatpush3.bf16.msra.mxu0 %v375_v9  ;;  %362 = vmatpush3.bf16.msra.mxu1 %v375_v9 }
  0x14   :  { %332 = vmatprep.subr.bf16.mxu0 %v376_v10  ;;  %355 = vmatprep.subr.bf16.mxu1 %v376_v10 }
  0x17   :  { %333 = vmatpush3.bf16.msra.mxu0 %v377_v13  ;;  %363 = vmatpush3.bf16.msra.mxu1 %v377_v13 }
  0x18   :  { %334 = vmatprep.subr.bf16.mxu0 %v378_v14  ;;  %356 = vmatprep.subr.bf16.mxu1 %v378_v14 }
  0x1b   :  { %335 = vmatpush3.bf16.msra.mxu0 %v379_v15  ;;  %364 = vmatpush3.bf16.msra.mxu1 %v379_v15 }
  0x1c   :  { %336 = vmatprep.subr.bf16.mxu0 %v380_v16  ;;  %357 = vmatprep.subr.bf16.mxu1 %v380_v16 }
  0x1f   :  { %337 = vmatpush3.bf16.msra.mxu0 %v381_v17  ;;  %365 = vmatpush3.bf16.msra.mxu1 %v381_v17 }
  0x22   :  { %212 = vmatmul.mubr.bf16.vlgmr.msra.gmra.mrb[0].mxu0 %v382_v18  ;;  %220 = vmatmul.mubr.bf16.vlgmr.msra.gmra.mrb[0].mxu1 %v385_v19 }
  0xf5   :  { %v338_v20 = vpop.f32.mrb[0].mxu0  ;;  %v344_v21 = vpop.f32.mrb[0].mxu1 }
  0xf6   :  { %v339_v22 = vpop.f32.mrb[1].mxu0  ;;  %v345_v24 = vpop.f32.mrb[1].mxu1 }
  0xf7   :  { %v340_v25 = vadd.f32 %v339_v22, %v338_v20  ;;  %v346_v26 = vadd.f32 %v345_v24, %v344_v21  ;;  %v341_v27 = vpop.f32.mrb[2].mxu0  ;;  %v347_v28 = vpop.f32.mrb[2].mxu1 }
  0xf8   :  { %v342_v29 = vpop.f32.mrb[3].mxu0  ;;  %v348_v30 = vpop.f32.mrb[3].mxu1 }
  0xf9   :  { %v250_v31 = vadd.f32 %v340_v25, %v302_v23  ;;  %v252_v32 = vadd.f32 %v346_v26, %v302_v23  ;;  %v343_v33 = vadd.f32 %v342_v29, %v341_v27  ;;  %v349_v34 = vadd.f32 %v348_v30, %v347_v28 }
  0xfb   :  { %v251_v35 = vadd.f32 %v343_v33, %v302_v23  ;;  %v253_v36 = vadd.f32 %v349_v34, %v302_v23  ;;  %v254_v37 = vmax.f32 %v250_v31, 0.0  ;;  %v256_v38 = vmax.f32 %v252_v32, 0.0 }
  0xfd   :  { %v255_v39 = vmax.f32 %v251_v35, 0.0  ;;  %v257_v40 = vmax.f32 %v253_v36, 0.0 }
  0xff   :  { %v314_v41 = vpack.c.bf16 %v255_v39, %v254_v37  ;;  %v319_v42 = vpack.c.bf16 %v257_v40, %v256_v38 }
 0x101   :  { %315 = vst [vmem:[%s480_s3] sm:$0xff] %v314_v41   ;;  %321 = vst [vmem:[%s480_s3 + $0x8] sm:$0xff] %v319_v42  }

// kernel: forward.23
= control target key start
LH: loop header
LB: loop body
LE: loop exit
PB: predicated region body
PF: predicated region fallthrough
CT: control target
= control target key end

     0   :  { %v697_v1 = vmov 0   ;;  %v46_v58 = vlaneseq  ;;  %s915_s4 = inlined_call_operand.vmem [shape: bf16[256,256], index: 4, kind: input, shape index: {}]   ;;  %s916_s1 = inlined_call_operand.vmem [shape: bf16[128,256], index: 1, kind: input, shape index: {}]   ;;  %s917_s0 = inlined_call_operand.vmem [shape: bf16[32,128], index: 0, kind: input, shape index: {}]   ;;  %s918_s3 = inlined_call_operand.vmem [shape: bf16[32,256], index: 3, kind: input, shape index: {}]   ;;  %s919_s2 = inlined_call_operand.vmem [shape: f32[1,256], index: 2, kind: input, shape index: {}]   ;;  %s920_s5 = inlined_call_operand.vmem [shape: f32[1,256], index: 5, kind: input, shape index: {}]   ;;  %s921_s6 = inlined_call_operand.vmem [shape: bf16[32,256], index: 6, kind: output, shape index: {}]  }
   0x1   :  { %v617_v0 = vld [vmem:[%s915_s4 + $0x4] ss:$8 sps:$4 sm:$0xff]   ;;  %180 = vmatprep.mubr.bf16.mxu1 %v697_v1  ;;  %v619_v2 = vld [vmem:[%s915_s4] ss:$8 sps:$4 sm:$0xff]   ;;  %v620_v3 = vld [vmem:[%s915_s4 + $0x14] ss:$8 sps:$4 sm:$0xff]  }
   0x2   :  { %417 = vmatprep.subr.bf16.mxu0 %v617_v0  ;;  %v622_v4 = vld [vmem:[%s915_s4 + $0x10] ss:$8 sps:$4 sm:$0xff]   ;;  %v623_v5 = vld [vmem:[%s915_s4 + $0x24] ss:$8 sps:$4 sm:$0xff]   ;;  %v625_v6 = vld [vmem:[%s915_s4 + $0x20] ss:$8 sps:$4 sm:$0xff]  }
   0x3   :  { %418 = vmatpush1.bf16.msra.mxu0 %v619_v2  ;;  %v626_v7 = vld [vmem:[%s915_s4 + $0x34] ss:$8 sps:$4 sm:$0xff]   ;;  %v638_v8 = vld [vmem:[%s916_s1 + $0x4] ss:$8 sps:$4 sm:$0xff]   ;;  %v640_v9 = vld [vmem:[%s916_s1] ss:$8 sps:$4 sm:$0xff]  }
   0x4   :  { %419 = vmatprep.subr.bf16.mxu0 %v620_v3  ;;  %v628_v10 = vld [vmem:[%s915_s4 + $0x30] ss:$8 sps:$4 sm:$0xff]   ;;  %v629_v11 = vld [vmem:[%s915_s4 + $0x44] ss:$8 sps:$4 sm:$0xff]   ;;  %148 = vmatprep.subr.bf16.mxu1 %v638_v8  ;;  %v644_v12 = vld [vmem:[%s916_s1 + $0x14] ss:$8 sps:$4 sm:$0xff]  }
   0x5   :  { %149 = vmatpush1.bf16.msra.mxu1 %v640_v9  ;;  %v646_v13 = vld [vmem:[%s916_s1 + $0x10] ss:$8 sps:$4 sm:$0xff]   ;;  %v631_v14 = vld [vmem:[%s915_s4 + $0x40] ss:$8 sps:$4 sm:$0xff]   ;;  %v650_v15 = vld [vmem:[%s916_s1 + $0x24] ss:$8 sps:$4 sm:$0xff]  }
   0x6   :  { %150 = vmatprep.subr.bf16.mxu1 %v644_v12  ;;  %v632_v16 = vld [vmem:[%s915_s4 + $0x54] ss:$8 sps:$4 sm:$0xff]   ;;  %v652_v17 = vld [vmem:[%s916_s1 + $0x20] ss:$8 sps:$4 sm:$0xff]   ;;  %v634_v19 = vld [vmem:[%s915_s4 + $0x50] ss:$8 sps:$4 sm:$0xff]  }
   0x7   :  { %420 = vmatpush1.bf16.msra.mxu0 %v622_v4  ;;  %v656_v18 = vld [vmem:[%s916_s1 + $0x34] ss:$8 sps:$4 sm:$0xff]   ;;  %v635_v20 = vld [vmem:[%s915_s4 + $0x64] ss:$8 sps:$4 sm:$0xff]   ;;  %v658_v21 = vld [vmem:[%s916_s1 + $0x30] ss:$8 sps:$4 sm:$0xff]  }
   0x8   :  { %421 = vmatprep.subr.bf16.mxu0 %v623_v5  ;;  %v662_v22 = vld [vmem:[%s916_s1 + $0x44] ss:$8 sps:$4 sm:$0xff]   ;;  %v637_v23 = vld [vmem:[%s915_s4 + $0x60] ss:$8 sps:$4 sm:$0xff]   ;;  %v641_v24 = vld [vmem:[%s915_s4 + $0x74] ss:$8 sps:$4 sm:$0xff]  }
   0x9   :  { %151 = vmatpush1.bf16.msra.mxu1 %v646_v13  ;;  %v664_v25 = vld [vmem:[%s916_s1 + $0x40] ss:$8 sps:$4 sm:$0xff]   ;;  %v668_v26 = vld [vmem:[%s916_s1 + $0x54] ss:$8 sps:$4 sm:$0xff]   ;;  %v643_v27 = vld [vmem:[%s915_s4 + $0x70] ss:$8 sps:$4 sm:$0xff]  }
   0xa   :  { %152 = vmatprep.subr.bf16.mxu1 %v650_v15  ;;  %v647_v28 = vld [vmem:[%s915_s4 + $0x84] ss:$8 sps:$4 sm:$0xff]   ;;  %v670_v29 = vld [vmem:[%s916_s1 + $0x50] ss:$8 sps:$4 sm:$0xff]   ;;  %v649_v31 = vld [vmem:[%s915_s4 + $0x80] ss:$8 sps:$4 sm:$0xff]  }
   0xb   :  { %422 = vmatpush1.bf16.msra.mxu0 %v625_v6  ;;  %v674_v30 = vld [vmem:[%s916_s1 + $0x64] ss:$8 sps:$4 sm:$0xff]   ;;  %v653_v32 = vld [vmem:[%s915_s4 + $0x94] ss:$8 sps:$4 sm:$0xff]   ;;  %v676_v33 = vld [vmem:[%s916_s1 + $0x60] ss:$8 sps:$4 sm:$0xff]  }
   0xc   :  { %423 = vmatprep.subr.bf16.mxu0 %v626_v7  ;;  %v680_v34 = vld [vmem:[%s916_s1 + $0x74] ss:$8 sps:$4 sm:$0xff]   ;;  %v692_v35 = vld [vmem:[%s918_s3 + $0x4] ss:$8 sps:$4 sm:$0xff]   ;;  %v655_v36 = vld [vmem:[%s915_s4 + $0x90] ss:$8 sps:$4 sm:$0xff]  }
   0xd   :  { %153 = vmatpush1.bf16.msra.mxu1 %v652_v17  ;;  %v659_v37 = vld [vmem:[%s915_s4 + $0xa4] ss:$8 sps:$4 sm:$0xff]   ;;  %449 = vmatprep.mubr.bf16.mxu0 %v692_v35  ;;  %v682_v38 = vld [vmem:[%s916_s1 + $0x70] ss:$8 sps:$4 sm:$0xff]   ;;  %v661_v39 = vld [vmem:[%s915_s4 + $0xa0] ss:$8 sps:$4 sm:$0xff]  }
   0xe   :  { %154 = vmatprep.subr.bf16.mxu1 %v656_v18  ;;  %v665_v40 = vld [vmem:[%s915_s4 + $0xb4] ss:$8 sps:$4 sm:$0xff]   ;;  %v686_v41 = vld [vmem:[%s917_s0] sm:$0xff]   ;;  %v667_v42 = vld [vmem:[%s915_s4 + $0xb0] ss:$8 sps:$4 sm:$0xff]   ;;  %v47_v60 = vshrl.u32 %v46_v58, 7 }
   0xf   :  { %424 = vmatpush1.bf16.msra.mxu0 %v628_v10  ;;  %v671_v43 = vld [vmem:[%s915_s4 + $0xc4] ss:$8 sps:$4 sm:$0xff]   ;;  %v673_v44 = vld [vmem:[%s915_s4 + $0xc0] ss:$8 sps:$4 sm:$0xff]   ;;  %v677_v45 = vld [vmem:[%s915_s4 + $0xd4] ss:$8 sps:$4 sm:$0xff]  }
  0x10   :  { %425 = vmatprep.subr.bf16.mxu0 %v629_v11  ;;  %v693_v46 = vld [vmem:[%s917_s0 + $0x8] sm:$0xff]   ;;  %v679_v47 = vld [vmem:[%s915_s4 + $0xd0] ss:$8 sps:$4 sm:$0xff]   ;;  %v687_v50 = vld [vmem:[%s915_s4 + $0xf4] ss:$8 sps:$4 sm:$0xff]   ;;  %v48_v0 = vsub.s32 0, %v47_v60 }
  0x11   :  { %155 = vmatpush1.bf16.msra.mxu1 %v658_v21  ;;  %v683_v48 = vld [vmem:[%s915_s4 + $0xe4] ss:$8 sps:$4 sm:$0xff]   ;;  %v685_v49 = vld [vmem:[%s915_s4 + $0xe0] ss:$8 sps:$4 sm:$0xff]   ;;  %v689_v51 = vld [vmem:[%s915_s4 + $0xf0] ss:$8 sps:$4 sm:$0xff]  }
  0x12   :  { %156 = vmatprep.subr.bf16.mxu1 %v662_v22  ;;  %v690_v52 = vld [vmem:[%s918_s3] ss:$8 sps:$4 sm:$0xff]   ;;  %v694_v53 = vld [vmem:[%s918_s3 + $0x14] ss:$8 sps:$4 sm:$0xff]   ;;  %v696_v54 = vld [vmem:[%s918_s3 + $0x10] ss:$8 sps:$4 sm:$0xff]  }
  0x13   :  { %426 = vmatpush1.bf16.msra.mxu0 %v631_v14  ;;  %v44_v2 = vld [vmem:[%s919_s2] sm:$0x3]  ;;  %v52_v3 = vsub.s32 1, %v47_v60 }
  0x14   :  { %427 = vmatprep.subr.bf16.mxu0 %v632_v16  ;;  %v49_v4 = vrot.slane %v44_v2, %v48_v0  ;;  %v478_v6 = vld [vmem:[%s920_s5] sm:$0x3] }
  0x15   :  { %157 = vmatpush1.bf16.msra.mxu1 %v664_v25  ;;  %v53_v5 = vrot.slane %v44_v2, %v52_v3  ;;  %v483_v9 = vrot.slane %v478_v6, %v48_v0  ;;  %v487_v11 = vrot.slane %v478_v6, %v52_v3 }
  0x16   :  { %158 = vmatprep.subr.bf16.mxu1 %v668_v26 }
  0x17   :  { %428 = vmatpush1.bf16.msra.mxu0 %v634_v19 }
  0x18   :  { %429 = vmatprep.subr.bf16.mxu0 %v635_v20 }
  0x19   :  { %159 = vmatpush1.bf16.msra.mxu1 %v670_v29 }
  0x1a   :  { %160 = vmatprep.subr.bf16.mxu1 %v674_v30 }
  0x1b   :  { %430 = vmatpush1.bf16.msra.mxu0 %v637_v23 }
  0x1c   :  { %431 = vmatprep.subr.bf16.mxu0 %v641_v24 }
  0x1d   :  { %161 = vmatpush1.bf16.msra.mxu1 %v676_v33 }
  0x1e   :  { %162 = vmatprep.subr.bf16.mxu1 %v680_v34 }
  0x1f   :  { %432 = vmatpush1.bf16.msra.mxu0 %v643_v27 }
  0x20   :  { %433 = vmatprep.subr.bf16.mxu0 %v647_v28 }
  0x21   :  { %163 = vmatpush1.bf16.msra.mxu1 %v682_v38 }
  0x23   :  { %434 = vmatpush1.bf16.msra.mxu0 %v649_v31 }
  0x24   :  { %435 = vmatprep.subr.bf16.mxu0 %v653_v32  ;;  %181 = vmatmul.mubr.bf16.vlgmr.msra.gmra.mrb[0].mxu1 %v686_v41 }
  0x25   :  { %190 = vmatprep.mubr.bf16.mxu1 %v697_v1 }
  0x27   :  { %436 = vmatpush1.bf16.msra.mxu0 %v655_v36 }
  0x28   :  { %437 = vmatprep.subr.bf16.mxu0 %v659_v37 }
  0x2b   :  { %438 = vmatpush1.bf16.msra.mxu0 %v661_v39 }
  0x2c   :  { %439 = vmatprep.subr.bf16.mxu0 %v665_v40  ;;  %191 = vmatmul.mubr.bf16.gmra.mrb[4].mxu1 %v693_v46 }
  0x2f   :  { %440 = vmatpush1.bf16.msra.mxu0 %v667_v42 }
  0x30   :  { %441 = vmatprep.subr.bf16.mxu0 %v671_v43 }
  0x33   :  { %442 = vmatpush1.bf16.msra.mxu0 %v673_v44 }
  0x34   :  { %443 = vmatprep.subr.bf16.mxu0 %v677_v45 }
  0x37   :  { %444 = vmatpush1.bf16.msra.mxu0 %v679_v47 }
  0x38   :  { %445 = vmatprep.subr.bf16.mxu0 %v683_v48 }
  0x3b   :  { %446 = vmatpush1.bf16.msra.mxu0 %v685_v49 }
  0x3c   :  { %447 = vmatprep.subr.bf16.mxu0 %v687_v50 }
  0x3f   :  { %448 = vmatpush1.bf16.msra.mxu0 %v689_v51 }
  0x42   :  { %450 = vmatmul.mubr.bf16.vlgmr.msra.gmra.mrb[0].mxu0 %v690_v52 }
  0x43   :  { %459 = vmatprep.mubr.bf16.mxu0 %v694_v53 }
  0x4a   :  { %460 = vmatmul.mubr.bf16.gmra.mrb[4].mxu0 %v696_v54 }
  0xf7   :  { %v182_v55 = vpop.f32.mrb[0].mxu1 }
  0xf8   :  { %v184_v56 = vpop.f32.mrb[1].mxu1  ;;  %v183_v7 = vadd.f32 %v182_v55, %v49_v4 }
  0xf9   :  { %v186_v57 = vpop.f32.mrb[2].mxu1  ;;  %v185_v8 = vadd.f32 %v184_v56, %v53_v5 }
  0xfa   :  { %v188_v59 = vpop.f32.mrb[3].mxu1  ;;  %v187_v12 = vadd.f32 %v186_v57, %v49_v4 }
  0xfb   :  { %v189_v15 = vadd.f32 %v188_v59, %v53_v5 }
  0xff   :  { %v192_v61 = vpop.f32.mrb[4].mxu1 }
 0x100   :  { %v194_v62 = vpop.f32.mrb[5].mxu1  ;;  %v193_v25 = vadd.f32 %v192_v61, %v49_v4 }
 0x101   :  { %v196_v63 = vpop.f32.mrb[6].mxu1  ;;  %v195_v28 = vadd.f32 %v194_v62, %v53_v5 }
 0x102   :  { %v198_v1 = vpop.f32.mrb[7].mxu1  ;;  %v197_v33 = vadd.f32 %v196_v63, %v49_v4 }
 0x103   :  { %v199_v37 = vadd.f32 %v198_v1, %v53_v5 }
 0x115   :  { %v451_v10 = vpop.f32.mrb[0].mxu0 }
 0x116   :  { %v470_v13 = vadd.f32 %v451_v10, %v183_v7  ;;  %v453_v14 = vpop.f32.mrb[1].mxu0 }
 0x117   :  { %v471_v16 = vadd.f32 %v453_v14, %v185_v8  ;;  %v455_v17 = vpop.f32.mrb[2].mxu0 }
 0x118   :  { %v490_v18 = vadd.f32 %v483_v9, %v470_v13  ;;  %v472_v19 = vadd.f32 %v455_v17, %v187_v12  ;;  %v457_v20 = vpop.f32.mrb[3].mxu0 }
 0x119   :  { %v491_v21 = vadd.f32 %v487_v11, %v471_v16  ;;  %v473_v22 = vadd.f32 %v457_v20, %v189_v15 }
 0x11a   :  { %v498_v23 = vmax.f32 %v490_v18, 0.0  ;;  %v492_v24 = vadd.f32 %v483_v9, %v472_v19 }
 0x11b   :  { %v499_v26 = vmax.f32 %v491_v21, 0.0  ;;  %v493_v27 = vadd.f32 %v487_v11, %v473_v22 }
 0x11c   :  { %v500_v29 = vmax.f32 %v492_v24, 0.0 }
 0x11d   :  { %v596_v30 = vpack.c.bf16 %v499_v26, %v498_v23  ;;  %v501_v31 = vmax.f32 %v493_v27, 0.0  ;;  %v461_v32 = vpop.f32.mrb[4].mxu0 }
 0x11e   :  { %v474_v34 = vadd.f32 %v461_v32, %v193_v25  ;;  %v463_v35 = vpop.f32.mrb[5].mxu0 }
 0x11f   :  { %530 = vst [vmem:[%s921_s6] sm:$0xff] %v596_v30  ;;  %v597_v36 = vpack.c.bf16 %v501_v31, %v500_v29  ;;  %v475_v38 = vadd.f32 %v463_v35, %v195_v28  ;;  %v465_v39 = vpop.f32.mrb[6].mxu0 }
 0x120   :  { %v494_v40 = vadd.f32 %v483_v9, %v474_v34  ;;  %v476_v41 = vadd.f32 %v465_v39, %v197_v33  ;;  %v467_v42 = vpop.f32.mrb[7].mxu0 }
 0x121   :  { %531 = vst [vmem:[%s921_s6 + $0x8] sm:$0xff] %v597_v36  ;;  %v495_v43 = vadd.f32 %v487_v11, %v475_v38  ;;  %v477_v44 = vadd.f32 %v467_v42, %v199_v37 }
 0x122   :  { %v502_v45 = vmax.f32 %v494_v40, 0.0  ;;  %v496_v46 = vadd.f32 %v483_v9, %v476_v41 }
 0x123   :  { %v503_v47 = vmax.f32 %v495_v43, 0.0  ;;  %v497_v48 = vadd.f32 %v487_v11, %v477_v44 }
 0x124   :  { %v504_v49 = vmax.f32 %v496_v46, 0.0 }
 0x125   :  { %v598_v50 = vpack.c.bf16 %v503_v47, %v502_v45  ;;  %v505_v51 = vmax.f32 %v497_v48, 0.0 }
 0x127   :  { %532 = vst [vmem:[%s921_s6 + $0x10] sm:$0xff] %v598_v50  ;;  %v599_v52 = vpack.c.bf16 %v505_v51, %v504_v49 }
 0x129   :  { %533 = vst [vmem:[%s921_s6 + $0x18] sm:$0xff] %v599_v52 }

// kernel: forward.22
= control target key start
LH: loop header
LB: loop body
LE: loop exit
PB: predicated region body
PF: predicated region fallthrough
CT: control target
= control target key end

     0   :  { %s1663_s1 = inlined_call_operand.vmem [shape: bf16[1152,128], index: 1, kind: input, shape index: {}]   ;;  %s1664_s0 = inlined_call_operand.vmem [shape: bf16[32,1152], index: 0, kind: input, shape index: {}]   ;;  %s1665_s2 = inlined_call_operand.vmem [shape: f32[1,128], index: 2, kind: input, shape index: {}]   ;;  %s1666_s3 = inlined_call_operand.vmem [shape: bf16[32,128], index: 3, kind: output, shape index: {}]  }
   0x1   :  { %v1266_v0 = vld [vmem:[%s1663_s1 + $0x40] sm:$0xff]   ;;  %v1270_v4 = vld [vmem:[%s1663_s1 + $0x48] sm:$0xff]   ;;  %v1274_v8 = vld [vmem:[%s1663_s1 + $0x50] sm:$0xff]  }
   0x2   :  { %v1267_v1 = vld [vmem:[%s1663_s1 + $0xc0] sm:$0xff]   ;;  %1124 = vmatprep.subr.bf16.mxu0 %v1266_v0  ;;  %v1271_v5 = vld [vmem:[%s1663_s1 + $0xc8] sm:$0xff]   ;;  %v1275_v9 = vld [vmem:[%s1663_s1 + $0xd0] sm:$0xff]  }
   0x3   :  { %v1268_v2 = vld [vmem:[%s1663_s1] sm:$0xff]   ;;  %1152 = vmatprep.subr.bf16.mxu1 %v1267_v1  ;;  %v1272_v6 = vld [vmem:[%s1663_s1 + $0x8] sm:$0xff]   ;;  %v1276_v10 = vld [vmem:[%s1663_s1 + $0x10] sm:$0xff]  }
   0x4   :  { %v1269_v3 = vld [vmem:[%s1663_s1 + $0x80] sm:$0xff]   ;;  %1125 = vmatpush3.bf16.msra.mxu0 %v1268_v2  ;;  %v1273_v7 = vld [vmem:[%s1663_s1 + $0x88] sm:$0xff]   ;;  %v1277_v11 = vld [vmem:[%s1663_s1 + $0x90] sm:$0xff]  }
   0x5   :  { %1153 = vmatpush3.bf16.msra.mxu1 %v1269_v3  ;;  %1126 = vmatprep.subr.bf16.mxu0 %v1270_v4  ;;  %v1278_v12 = vld [vmem:[%s1663_s1 + $0x58] sm:$0xff]   ;;  %v1282_v16 = vld [vmem:[%s1663_s1 + $0x60] sm:$0xff]   ;;  %v1286_v20 = vld [vmem:[%s1663_s1 + $0x68] sm:$0xff]  }
   0x6   :  { %1154 = vmatprep.subr.bf16.mxu1 %v1271_v5  ;;  %v1279_v13 = vld [vmem:[%s1663_s1 + $0xd8] sm:$0xff]   ;;  %v1283_v17 = vld [vmem:[%s1663_s1 + $0xe0] sm:$0xff]   ;;  %v1287_v21 = vld [vmem:[%s1663_s1 + $0xe8] sm:$0xff]  }
   0x7   :  { %v1280_v14 = vld [vmem:[%s1663_s1 + $0x18] sm:$0xff]   ;;  %v1284_v18 = vld [vmem:[%s1663_s1 + $0x20] sm:$0xff]   ;;  %v1288_v22 = vld [vmem:[%s1663_s1 + $0x28] sm:$0xff]  }
   0x8   :  { %1127 = vmatpush3.bf16.msra.mxu0 %v1272_v6  ;;  %v1281_v15 = vld [vmem:[%s1663_s1 + $0x98] sm:$0xff]   ;;  %v1285_v19 = vld [vmem:[%s1663_s1 + $0xa0] sm:$0xff]   ;;  %v1289_v23 = vld [vmem:[%s1663_s1 + $0xa8] sm:$0xff]  }
   0x9   :  { %1155 = vmatpush3.bf16.msra.mxu1 %v1273_v7  ;;  %1128 = vmatprep.subr.bf16.mxu0 %v1274_v8  ;;  %v1290_v24 = vld [vmem:[%s1663_s1 + $0x70] sm:$0xff]   ;;  %v1294_v28 = vld [vmem:[%s1663_s1 + $0x78] sm:$0xff]   ;;  %v1298_v32 = vld [vmem:[%s1664_s0] ss:$36 sps:$4 sm:$0xff]  }
   0xa   :  { %1156 = vmatprep.subr.bf16.mxu1 %v1275_v9  ;;  %v1291_v25 = vld [vmem:[%s1663_s1 + $0xf0] sm:$0xff]   ;;  %v1295_v29 = vld [vmem:[%s1663_s1 + $0xf8] sm:$0xff]   ;;  %v1300_v33 = vld [vmem:[%s1664_s0 + $0x4] ss:$36 sps:$4 sm:$0xff]  }
   0xb   :  { %v1292_v26 = vld [vmem:[%s1663_s1 + $0x30] sm:$0xff]   ;;  %v1296_v30 = vld [vmem:[%s1663_s1 + $0x38] sm:$0xff]   ;;  %v1301_v34 = vld [vmem:[%s1664_s0 + $0x8] ss:$36 sps:$4 sm:$0xff]   ;;  %747 = vmatprep.mubr.bf16.mxu0 %v1300_v33 }
   0xc   :  { %1129 = vmatpush3.bf16.msra.mxu0 %v1276_v10  ;;  %v1293_v27 = vld [vmem:[%s1663_s1 + $0xb0] sm:$0xff]   ;;  %v1297_v31 = vld [vmem:[%s1663_s1 + $0xb8] sm:$0xff]   ;;  %v1304_v36 = vld [vmem:[%s1663_s1 + $0x140] sm:$0xff]  }
   0xd   :  { %1157 = vmatpush3.bf16.msra.mxu1 %v1277_v11  ;;  %1130 = vmatprep.subr.bf16.mxu0 %v1278_v12  ;;  %v1303_v35 = vld [vmem:[%s1664_s0 + $0xc] ss:$36 sps:$4 sm:$0xff]   ;;  %v1305_v37 = vld [vmem:[%s1663_s1 + $0x100] sm:$0xff]   ;;  %v1316_v48 = vld [vmem:[%s1663_s1 + $0x158] sm:$0xff]  }
   0xe   :  { %1158 = vmatprep.subr.bf16.mxu1 %v1279_v13  ;;  %796 = vmatprep.mubr.bf16.mxu1 %v1303_v35  ;;  %v1306_v38 = vld [vmem:[%s1663_s1 + $0x1c0] sm:$0xff]   ;;  %v1308_v40 = vld [vmem:[%s1663_s1 + $0x148] sm:$0xff]   ;;  %v1312_v44 = vld [vmem:[%s1663_s1 + $0x150] sm:$0xff]  }
   0xf   :  { %v1307_v39 = vld [vmem:[%s1663_s1 + $0x180] sm:$0xff]   ;;  %v1309_v41 = vld [vmem:[%s1663_s1 + $0x108] sm:$0xff]   ;;  %v1313_v45 = vld [vmem:[%s1663_s1 + $0x110] sm:$0xff]  }
  0x10   :  { %1131 = vmatpush3.bf16.msra.mxu0 %v1280_v14  ;;  %v1310_v42 = vld [vmem:[%s1663_s1 + $0x1c8] sm:$0xff]   ;;  %v1314_v46 = vld [vmem:[%s1663_s1 + $0x1d0] sm:$0xff]   ;;  %v1317_v49 = vld [vmem:[%s1663_s1 + $0x118] sm:$0xff]  }
  0x11   :  { %1159 = vmatpush3.bf16.msra.mxu1 %v1281_v15  ;;  %1132 = vmatprep.subr.bf16.mxu0 %v1282_v16  ;;  %v1311_v43 = vld [vmem:[%s1663_s1 + $0x188] sm:$0xff]   ;;  %v1315_v47 = vld [vmem:[%s1663_s1 + $0x190] sm:$0xff]   ;;  %v1318_v50 = vld [vmem:[%s1663_s1 + $0x1d8] sm:$0xff]  }
  0x12   :  { %1160 = vmatprep.subr.bf16.mxu1 %v1283_v17  ;;  %v1319_v51 = vld [vmem:[%s1663_s1 + $0x198] sm:$0xff]   ;;  %v1320_v52 = vld [vmem:[%s1663_s1 + $0x160] sm:$0xff]   ;;  %v1324_v56 = vld [vmem:[%s1663_s1 + $0x168] sm:$0xff]  }
  0x13   :  { %v1321_v53 = vld [vmem:[%s1663_s1 + $0x120] sm:$0xff]   ;;  %v1325_v57 = vld [vmem:[%s1664_s0 + $0x4c] ss:$36 sps:$4 sm:$0xff]   ;;  %v1327_v58 = vld [vmem:[%s1664_s0 + $0x54] ss:$36 sps:$4 sm:$0xff]  }
  0x14   :  { %1133 = vmatpush3.bf16.msra.mxu0 %v1284_v18  ;;  %v1322_v54 = vld [vmem:[%s1663_s1 + $0x1e0] sm:$0xff]   ;;  %v1329_v59 = vld [vmem:[%s1663_s1 + $0x128] sm:$0xff]   ;;  %v1331_v61 = vld [vmem:[%s1664_s0 + $0x50] ss:$36 sps:$4 sm:$0xff]  }
  0x15   :  { %1161 = vmatpush3.bf16.msra.mxu1 %v1285_v19  ;;  %1134 = vmatprep.subr.bf16.mxu0 %v1286_v20  ;;  %v1323_v55 = vld [vmem:[%s1663_s1 + $0x1a0] sm:$0xff]   ;;  %v1330_v60 = vld [vmem:[%s1664_s0 + $0x48] ss:$36 sps:$4 sm:$0xff]   ;;  %v1334_v0 = vld [vmem:[%s1663_s1 + $0x170] sm:$0xff]  }
  0x16   :  { %1162 = vmatprep.subr.bf16.mxu1 %v1287_v21  ;;  %v1332_v62 = vld [vmem:[%s1663_s1 + $0x1e8] sm:$0xff]   ;;  %v1335_v1 = vld [vmem:[%s1663_s1 + $0x130] sm:$0xff]   ;;  %v1338_v4 = vld [vmem:[%s1663_s1 + $0x178] sm:$0xff]  }
  0x17   :  { %v1333_v63 = vld [vmem:[%s1663_s1 + $0x1a8] sm:$0xff]   ;;  %v1336_v2 = vld [vmem:[%s1663_s1 + $0x1f0] sm:$0xff]   ;;  %v1339_v5 = vld [vmem:[%s1663_s1 + $0x138] sm:$0xff]  }
  0x18   :  { %1135 = vmatpush3.bf16.msra.mxu0 %v1288_v22  ;;  %v1337_v3 = vld [vmem:[%s1663_s1 + $0x1b0] sm:$0xff]   ;;  %v1340_v6 = vld [vmem:[%s1663_s1 + $0x1f8] sm:$0xff]   ;;  %v1345_v10 = vld [vmem:[%s1663_s1 + $0x200] sm:$0xff]  }
  0x19   :  { %1163 = vmatpush3.bf16.msra.mxu1 %v1289_v23  ;;  %1136 = vmatprep.subr.bf16.mxu0 %v1290_v24  ;;  %v1341_v7 = vld [vmem:[%s1664_s0 + $0x10] ss:$36 sps:$4 sm:$0xff]   ;;  %v1344_v9 = vld [vmem:[%s1663_s1 + $0x1b8] sm:$0xff]   ;;  %v1349_v13 = vld [vmem:[%s1663_s1 + $0x208] sm:$0xff]  }
  0x1a   :  { %1164 = vmatprep.subr.bf16.mxu1 %v1291_v25  ;;  %v1343_v8 = vld [vmem:[%s1664_s0 + $0x14] ss:$36 sps:$4 sm:$0xff]   ;;  %v1348_v12 = vld [vmem:[%s1664_s0 + $0x1c] ss:$36 sps:$4 sm:$0xff]   ;;  %v1354_v17 = vld [vmem:[%s1664_s0 + $0x64] ss:$36 sps:$4 sm:$0xff]  }
  0x1b   :  { %v1346_v11 = vld [vmem:[%s1664_s0 + $0x18] ss:$36 sps:$4 sm:$0xff]   ;;  %v1353_v16 = vld [vmem:[%s1663_s1 + $0x210] sm:$0xff]   ;;  %v1356_v18 = vld [vmem:[%s1664_s0 + $0x60] ss:$36 sps:$4 sm:$0xff]  }
  0x1c   :  { %1137 = vmatpush3.bf16.msra.mxu0 %v1292_v26  ;;  %v1350_v14 = vld [vmem:[%s1664_s0 + $0x5c] ss:$36 sps:$4 sm:$0xff]   ;;  %v1359_v22 = vld [vmem:[%s1663_s1 + $0x228] sm:$0xff]   ;;  %v1360_v23 = vld [vmem:[%s1663_s1 + $0x230] sm:$0xff]  }
  0x1d   :  { %1165 = vmatpush3.bf16.msra.mxu1 %v1293_v27  ;;  %1138 = vmatprep.subr.bf16.mxu0 %v1294_v28  ;;  %v1352_v15 = vld [vmem:[%s1664_s0 + $0x58] ss:$36 sps:$4 sm:$0xff]   ;;  %v1358_v20 = vld [vmem:[%s1663_s1 + $0x220] sm:$0xff]   ;;  %v1363_v25 = vld [vmem:[%s1664_s0 + $0x68] ss:$36 sps:$4 sm:$0xff]  }
  0x1e   :  { %1166 = vmatprep.subr.bf16.mxu1 %v1295_v29  ;;  %v1357_v19 = vld [vmem:[%s1663_s1 + $0x218] sm:$0xff]   ;;  %v1362_v21 = vld [vmem:[%s1664_s0 + $0x20] ss:$36 sps:$4 sm:$0xff]  }
  0x1f   :  { %v1361_v24 = vld [vmem:[%s1663_s1 + $0x238] sm:$0xff]  }
  0x20   :  { %1139 = vmatpush3.bf16.msra.mxu0 %v1296_v30 }
  0x21   :  { %1167 = vmatpush3.bf16.msra.mxu1 %v1297_v31  ;;  %1180 = vmatprep.subr.bf16.mxu0 %v1304_v36 }
  0x22   :  { %1208 = vmatprep.subr.bf16.mxu1 %v1306_v38 }
  0x23   :  { %748 = vmatmul.mubr.bf16.vlgmr.msra.gmra.mrb[0].mxu0 %v1298_v32 }
  0x24   :  { %797 = vmatmul.mubr.bf16.vlgmr.msra.gmra.mrb[0].mxu1 %v1301_v34  ;;  %1181 = vmatpush3.bf16.msra.mxu0 %v1305_v37 }
  0x25   :  { %1209 = vmatpush3.bf16.msra.mxu1 %v1307_v39  ;;  %1182 = vmatprep.subr.bf16.mxu0 %v1308_v40 }
  0x26   :  { %1210 = vmatprep.subr.bf16.mxu1 %v1310_v42  ;;  %755 = vmatprep.mubr.bf16.mxu0 %v1325_v57 }
  0x27   :  { %804 = vmatprep.mubr.bf16.mxu1 %v1327_v58 }
  0x28   :  { %1183 = vmatpush3.bf16.msra.mxu0 %v1309_v41 }
  0x29   :  { %1211 = vmatpush3.bf16.msra.mxu1 %v1311_v43  ;;  %1184 = vmatprep.subr.bf16.mxu0 %v1312_v44 }
  0x2a   :  { %1212 = vmatprep.subr.bf16.mxu1 %v1314_v46 }
  0x2b   :  { %756 = vmatmul.mubr.bf16.gmra.mrb[4].mxu0 %v1330_v60 }
  0x2c   :  { %1185 = vmatpush3.bf16.msra.mxu0 %v1313_v45  ;;  %805 = vmatmul.mubr.bf16.gmra.mrb[4].mxu1 %v1331_v61 }
  0x2d   :  { %1213 = vmatpush3.bf16.msra.mxu1 %v1315_v47  ;;  %1186 = vmatprep.subr.bf16.mxu0 %v1316_v48 }
  0x2e   :  { %1214 = vmatprep.subr.bf16.mxu1 %v1318_v50  ;;  %845 = vmatprep.mubr.bf16.mxu0 %v1343_v8 }
  0x2f   :  { %894 = vmatprep.mubr.bf16.mxu1 %v1348_v12 }
  0x30   :  { %1187 = vmatpush3.bf16.msra.mxu0 %v1317_v49 }
  0x31   :  { %1215 = vmatpush3.bf16.msra.mxu1 %v1319_v51  ;;  %1188 = vmatprep.subr.bf16.mxu0 %v1320_v52 }
  0x32   :  { %1216 = vmatprep.subr.bf16.mxu1 %v1322_v54 }
  0x34   :  { %1189 = vmatpush3.bf16.msra.mxu0 %v1321_v53 }
  0x35   :  { %1217 = vmatpush3.bf16.msra.mxu1 %v1323_v55  ;;  %1190 = vmatprep.subr.bf16.mxu0 %v1324_v56 }
  0x36   :  { %1218 = vmatprep.subr.bf16.mxu1 %v1332_v62 }
  0x38   :  { %1191 = vmatpush3.bf16.msra.mxu0 %v1329_v59 }
  0x39   :  { %1219 = vmatpush3.bf16.msra.mxu1 %v1333_v63  ;;  %1192 = vmatprep.subr.bf16.mxu0 %v1334_v0 }
  0x3a   :  { %1220 = vmatprep.subr.bf16.mxu1 %v1336_v2 }
  0x3c   :  { %1193 = vmatpush3.bf16.msra.mxu0 %v1335_v1 }
  0x3d   :  { %1221 = vmatpush3.bf16.msra.mxu1 %v1337_v3  ;;  %1194 = vmatprep.subr.bf16.mxu0 %v1338_v4 }
  0x3e   :  { %1222 = vmatprep.subr.bf16.mxu1 %v1340_v6 }
  0x40   :  { %1195 = vmatpush3.bf16.msra.mxu0 %v1339_v5 }
  0x41   :  { %1223 = vmatpush3.bf16.msra.mxu1 %v1344_v9  ;;  %1246 = vmatprep.subr.bf16.mxu0 %v1345_v10 }
  0x43   :  { %846 = vmatmul.mubr.bf16.vlgmr.msra.gmra.mrb[8].mxu0 %v1341_v7 }
  0x44   :  { %1247 = vmatpush3.bf16.msra.mxu0 %v1345_v10  ;;  %895 = vmatmul.mubr.bf16.vlgmr.msra.gmra.mrb[8].mxu1 %v1346_v11 }
  0x45   :  { %1248 = vmatprep.subr.bf16.mxu0 %v1349_v13  ;;  %853 = vmatprep.mubr.bf16.mxu0 %v1350_v14 }
  0x46   :  { %902 = vmatprep.mubr.bf16.mxu1 %v1354_v17 }
  0x48   :  { %1249 = vmatpush3.bf16.msra.mxu0 %v1349_v13 }
  0x49   :  { %1250 = vmatprep.subr.bf16.mxu0 %v1353_v16 }
  0x4b   :  { %854 = vmatmul.mubr.bf16.gmra.mrb[12].mxu0 %v1352_v15 }
  0x4c   :  { %1251 = vmatpush3.bf16.msra.mxu0 %v1353_v16  ;;  %903 = vmatmul.mubr.bf16.gmra.mrb[12].mxu1 %v1356_v18 }
  0x4d   :  { %1252 = vmatprep.subr.bf16.mxu0 %v1357_v19  ;;  %1262 = vmatprep.mubr.bf16.mxu0 %v1362_v21 }
  0x50   :  { %1253 = vmatpush3.bf16.msra.mxu0 %v1357_v19 }
  0x51   :  { %1254 = vmatprep.subr.bf16.mxu0 %v1358_v20 }
  0x54   :  { %1255 = vmatpush3.bf16.msra.mxu0 %v1358_v20 }
  0x55   :  { %1256 = vmatprep.subr.bf16.mxu0 %v1359_v22 }
  0x58   :  { %1257 = vmatpush3.bf16.msra.mxu0 %v1359_v22 }
  0x59   :  { %1258 = vmatprep.subr.bf16.mxu0 %v1360_v23 }
  0x5c   :  { %1259 = vmatpush3.bf16.msra.mxu0 %v1360_v23  ;;  %v1104_v23 = vld [vmem:[%s1665_s2] ss:$0 sm:$0xff] }
  0x5d   :  { %1260 = vmatprep.subr.bf16.mxu0 %v1361_v24 }
  0x60   :  { %1261 = vmatpush3.bf16.msra.mxu0 %v1361_v24 }
  0x63   :  { %1263 = vmatmul.mubr.bf16.vlgmr.msra.gmra.mrb[16].mxu0 %v1363_v25 }
  0xf6   :  { %v1140_v26 = vpop.f32.mrb[0].mxu0 }
  0xf7   :  { %v1168_v27 = vpop.f32.mrb[0].mxu1  ;;  %v1141_v28 = vpop.f32.mrb[1].mxu0 }
  0xf8   :  { %v1142_v29 = vadd.f32 %v1141_v28, %v1140_v26  ;;  %v1169_v30 = vpop.f32.mrb[1].mxu1  ;;  %v1143_v31 = vpop.f32.mrb[2].mxu0 }
  0xf9   :  { %v1170_v32 = vadd.f32 %v1169_v30, %v1168_v27  ;;  %v1171_v33 = vpop.f32.mrb[2].mxu1  ;;  %v1144_v34 = vpop.f32.mrb[3].mxu0 }
  0xfa   :  { %v1145_v35 = vadd.f32 %v1144_v34, %v1143_v31  ;;  %v1172_v36 = vpop.f32.mrb[3].mxu1 }
  0xfb   :  { %v799_v37 = vadd.f32 %v1170_v32, %v1142_v29  ;;  %v1173_v38 = vadd.f32 %v1172_v36, %v1171_v33 }
  0xfd   :  { %v802_v39 = vadd.f32 %v1173_v38, %v1145_v35 }
  0xfe   :  { %v1146_v40 = vpop.f32.mrb[4].mxu0 }
  0xff   :  { %v1174_v41 = vpop.f32.mrb[4].mxu1  ;;  %v1147_v42 = vpop.f32.mrb[5].mxu0 }
 0x100   :  { %v1175_v43 = vpop.f32.mrb[5].mxu1  ;;  %v1148_v44 = vadd.f32 %v1147_v42, %v1146_v40  ;;  %v1149_v46 = vpop.f32.mrb[6].mxu0 }
 0x101   :  { %v1176_v45 = vadd.f32 %v1175_v43, %v1174_v41  ;;  %v1177_v47 = vpop.f32.mrb[6].mxu1  ;;  %v1150_v48 = vpop.f32.mrb[7].mxu0 }
 0x102   :  { %v1178_v49 = vpop.f32.mrb[7].mxu1  ;;  %v1151_v51 = vadd.f32 %v1150_v48, %v1149_v46 }
 0x103   :  { %v807_v50 = vadd.f32 %v1176_v45, %v1148_v44  ;;  %v1179_v52 = vadd.f32 %v1178_v49, %v1177_v47 }
 0x105   :  { %v810_v53 = vadd.f32 %v1179_v52, %v1151_v51 }
 0x116   :  { %v1196_v54 = vpop.f32.mrb[8].mxu0 }
 0x117   :  { %v1197_v55 = vpop.f32.mrb[9].mxu0  ;;  %v1224_v58 = vpop.f32.mrb[8].mxu1 }
 0x118   :  { %v1198_v56 = vadd.f32 %v1197_v55, %v1196_v54  ;;  %v1199_v57 = vpop.f32.mrb[10].mxu0  ;;  %v1225_v62 = vpop.f32.mrb[9].mxu1 }
 0x119   :  { %v1200_v59 = vpop.f32.mrb[11].mxu0  ;;  %v1226_v63 = vadd.f32 %v1225_v62, %v1224_v58  ;;  %v1227_v0 = vpop.f32.mrb[10].mxu1 }
 0x11a   :  { %v848_v60 = vadd.f32 %v1198_v56, %v799_v37  ;;  %v1201_v61 = vadd.f32 %v1200_v59, %v1199_v57  ;;  %v1228_v2 = vpop.f32.mrb[11].mxu1 }
 0x11b   :  { %v1229_v3 = vadd.f32 %v1228_v2, %v1227_v0 }
 0x11c   :  { %v851_v1 = vadd.f32 %v1201_v61, %v802_v39  ;;  %v897_v4 = vadd.f32 %v1226_v63, %v848_v60 }
 0x11e   :  { %v1202_v5 = vpop.f32.mrb[12].mxu0  ;;  %v900_v7 = vadd.f32 %v1229_v3, %v851_v1 }
 0x11f   :  { %v1203_v6 = vpop.f32.mrb[13].mxu0  ;;  %v1230_v10 = vpop.f32.mrb[12].mxu1 }
 0x120   :  { %v1204_v8 = vadd.f32 %v1203_v6, %v1202_v5  ;;  %v1205_v9 = vpop.f32.mrb[14].mxu0  ;;  %v1231_v14 = vpop.f32.mrb[13].mxu1 }
 0x121   :  { %v1206_v11 = vpop.f32.mrb[15].mxu0  ;;  %v1232_v15 = vadd.f32 %v1231_v14, %v1230_v10  ;;  %v1233_v16 = vpop.f32.mrb[14].mxu1 }
 0x122   :  { %v856_v12 = vadd.f32 %v1204_v8, %v807_v50  ;;  %v1207_v13 = vadd.f32 %v1206_v11, %v1205_v9  ;;  %v1234_v18 = vpop.f32.mrb[15].mxu1 }
 0x123   :  { %v1235_v19 = vadd.f32 %v1234_v18, %v1233_v16 }
 0x124   :  { %v859_v17 = vadd.f32 %v1207_v13, %v810_v53  ;;  %v905_v20 = vadd.f32 %v1232_v15, %v856_v12 }
 0x126   :  { %v908_v21 = vadd.f32 %v1235_v19, %v859_v17 }
 0x136   :  { %v1264_v22 = vpop.f32.mrb[16].mxu0 }
 0x137   :  { %v954_v24 = vadd.f32 %v1264_v22, %v905_v20  ;;  %v945_v25 = vpop.f32.mrb[17].mxu0 }
 0x138   :  { %v946_v26 = vadd.f32 %v945_v25, %v897_v4  ;;  %v1265_v27 = vpop.f32.mrb[18].mxu0 }
 0x139   :  { %v984_v28 = vadd.f32 %v1104_v23, %v954_v24  ;;  %v957_v29 = vadd.f32 %v1265_v27, %v908_v21  ;;  %v948_v30 = vpop.f32.mrb[19].mxu0 }
 0x13a   :  { %v982_v31 = vadd.f32 %v1104_v23, %v946_v26  ;;  %v949_v32 = vadd.f32 %v948_v30, %v900_v7 }
 0x13b   :  { %v985_v33 = vadd.f32 %v1104_v23, %v957_v29  ;;  %v988_v35 = vmax.f32 %v984_v28, 0.0 }
 0x13c   :  { %v983_v34 = vadd.f32 %v1104_v23, %v949_v32  ;;  %v986_v37 = vmax.f32 %v982_v31, 0.0 }
 0x13d   :  { %v989_v36 = vmax.f32 %v985_v33, 0.0 }
 0x13e   :  { %v987_v38 = vmax.f32 %v983_v34, 0.0 }
 0x13f   :  { %v1121_v39 = vpack.c.bf16 %v989_v36, %v988_v35 }
 0x140   :  { %v1116_v40 = vpack.c.bf16 %v987_v38, %v986_v37 }
 0x141   :  { %1123 = vst [vmem:[%s1666_s3 + $0x8] sm:$0xff] %v1121_v39  }
 0x142   :  { %1117 = vst [vmem:[%s1666_s3] sm:$0xff] %v1116_v40  }

// kernel: forward.27
= control target key start
LH: loop header
LB: loop body
LE: loop exit
PB: predicated region body
PF: predicated region fallthrough
CT: control target
= control target key end

     0   :  { %s354_s1 = inlined_call_operand.vmem [shape: bf16[256,128], index: 1, kind: input, shape index: {}]   ;;  %s355_s0 = inlined_call_operand.vmem [shape: bf16[8,256], index: 0, kind: input, shape index: {}]   ;;  %s356_s2 = inlined_call_operand.vmem [shape: f32[1,128], index: 2, kind: input, shape index: {}]   ;;  %s357_s3 = inlined_call_operand.vmem [shape: bf16[8,128], index: 3, kind: output, shape index: {}]  }
   0x1   :  { %v259_v0 = vld [vmem:[%s354_s1 + $0x40] sm:$0xff]   ;;  %v261_v2 = vld [vmem:[%s354_s1 + $0x48] sm:$0xff]   ;;  %v263_v4 = vld [vmem:[%s354_s1 + $0x50] sm:$0xff]  }
   0x2   :  { %v260_v1 = vld [vmem:[%s354_s1] sm:$0xff]   ;;  %237 = vmatprep.subr.bf16.mxu0 %v259_v0  ;;  %v262_v3 = vld [vmem:[%s354_s1 + $0x8] sm:$0xff]   ;;  %v264_v5 = vld [vmem:[%s354_s1 + $0x10] sm:$0xff]  }
   0x3   :  { %238 = vmatpush3.bf16.msra.mxu0 %v260_v1  ;;  %v265_v6 = vld [vmem:[%s354_s1 + $0x58] sm:$0xff]   ;;  %v267_v8 = vld [vmem:[%s354_s1 + $0x60] sm:$0xff]   ;;  %v269_v10 = vld [vmem:[%s354_s1 + $0x68] sm:$0xff]  }
   0x4   :  { %239 = vmatprep.subr.bf16.mxu0 %v261_v2  ;;  %v266_v7 = vld [vmem:[%s354_s1 + $0x18] sm:$0xff]   ;;  %v268_v9 = vld [vmem:[%s354_s1 + $0x20] sm:$0xff]   ;;  %v270_v13 = vld [vmem:[%s354_s1 + $0x28] sm:$0xff]  }
   0x5   :  { %v21_v11 = vld [vmem:[%s355_s0] sm:$0xff]  ;;  %v271_v14 = vld [vmem:[%s354_s1 + $0x70] sm:$0xff]   ;;  %v273_v16 = vld [vmem:[%s354_s1 + $0x78] sm:$0xff]  }
   0x6   :  { %v219_v12 = vcombine.high %v21_v11, %v21_v11  ;;  %v272_v15 = vld [vmem:[%s354_s1 + $0x30] sm:$0xff]   ;;  %v274_v17 = vld [vmem:[%s354_s1 + $0x38] sm:$0xff]   ;;  %v218_v18 = vcombine.low %v21_v11, %v21_v11  ;;  %v236_v21 = vld [vmem:[%s356_s2] ss:$0 sm:$0xff] }
   0x7   :  { %240 = vmatpush3.bf16.msra.mxu0 %v262_v3 }
   0x8   :  { %241 = vmatprep.subr.bf16.mxu0 %v263_v4  ;;  %189 = vmatprep.mubr.bf16.mxu0 %v219_v12 }
   0xb   :  { %242 = vmatpush3.bf16.msra.mxu0 %v264_v5 }
   0xc   :  { %243 = vmatprep.subr.bf16.mxu0 %v265_v6 }
   0xf   :  { %244 = vmatpush3.bf16.msra.mxu0 %v266_v7 }
  0x10   :  { %245 = vmatprep.subr.bf16.mxu0 %v267_v8 }
  0x13   :  { %246 = vmatpush3.bf16.msra.mxu0 %v268_v9 }
  0x14   :  { %247 = vmatprep.subr.bf16.mxu0 %v269_v10 }
  0x17   :  { %248 = vmatpush3.bf16.msra.mxu0 %v270_v13 }
  0x18   :  { %249 = vmatprep.subr.bf16.mxu0 %v271_v14 }
  0x1b   :  { %250 = vmatpush3.bf16.msra.mxu0 %v272_v15 }
  0x1c   :  { %251 = vmatprep.subr.bf16.mxu0 %v273_v16 }
  0x1f   :  { %252 = vmatpush3.bf16.msra.mxu0 %v274_v17 }
  0x22   :  { %190 = vmatmul.mubr.bf16.vlgmr.msra.gmra.mrb[0].mxu0 %v218_v18 }
  0xf5   :  { %v253_v19 = vpop.f32.mrb[0].mxu0 }
  0xf6   :  { %v254_v20 = vpop.f32.mrb[1].mxu0 }
  0xf7   :  { %v255_v22 = vadd.f32 %v254_v20, %v253_v19  ;;  %v256_v23 = vpop.f32.mrb[2].mxu0 }
  0xf8   :  { %v257_v24 = vpop.f32.mrb[3].mxu0 }
  0xf9   :  { %v210_v25 = vadd.f32 %v255_v22, %v236_v21 }
  0xfb   :  { %v211_v26 = vmax.f32 %v210_v25, 0.0 }
  0xfd   :  { %v212_v27 = vpack.c.bf16 %v211_v26, %v211_v26 }
  0xff   :  { %213 = vst [vmem:[%s357_s3] sm:$0xf] %v212_v27 }

// kernel: forward.26
= control target key start
LH: loop header
LB: loop body
LE: loop exit
PB: predicated region body
PF: predicated region fallthrough
CT: control target
= control target key end

     0   :  { %v573_v1 = vmov 0   ;;  %v43_v56 = vlaneseq  ;;  %s768_s4 = inlined_call_operand.vmem [shape: bf16[256,256], index: 4, kind: input, shape index: {}]   ;;  %s769_s1 = inlined_call_operand.vmem [shape: bf16[128,256], index: 1, kind: input, shape index: {}]   ;;  %s770_s3 = inlined_call_operand.vmem [shape: bf16[8,256], index: 3, kind: input, shape index: {}]   ;;  %s771_s0 = inlined_call_operand.vmem [shape: bf16[8,128], index: 0, kind: input, shape index: {}]   ;;  %s772_s2 = inlined_call_operand.vmem [shape: f32[1,256], index: 2, kind: input, shape index: {}]   ;;  %s773_s5 = inlined_call_operand.vmem [shape: f32[1,256], index: 5, kind: input, shape index: {}]   ;;  %s774_s6 = inlined_call_operand.vmem [shape: bf16[8,256], index: 6, kind: output, shape index: {}]  }
   0x1   :  { %v499_v0 = vld [vmem:[%s768_s4 + $0x4] ss:$8 sps:$4 sm:$0xff]   ;;  %165 = vmatprep.mubr.bf16.mxu0 %v573_v1  ;;  %v501_v2 = vld [vmem:[%s768_s4] ss:$8 sps:$4 sm:$0xff]   ;;  %v502_v3 = vld [vmem:[%s768_s4 + $0x14] ss:$8 sps:$4 sm:$0xff]  }
   0x2   :  { %374 = vmatprep.subr.bf16.mxu1 %v499_v0  ;;  %v504_v4 = vld [vmem:[%s768_s4 + $0x10] ss:$8 sps:$4 sm:$0xff]   ;;  %v505_v5 = vld [vmem:[%s768_s4 + $0x24] ss:$8 sps:$4 sm:$0xff]   ;;  %v507_v6 = vld [vmem:[%s768_s4 + $0x20] ss:$8 sps:$4 sm:$0xff]  }
   0x3   :  { %375 = vmatpush1.bf16.msra.mxu1 %v501_v2  ;;  %v508_v7 = vld [vmem:[%s768_s4 + $0x34] ss:$8 sps:$4 sm:$0xff]   ;;  %v520_v8 = vld [vmem:[%s769_s1 + $0x4] ss:$8 sps:$4 sm:$0xff]   ;;  %v522_v9 = vld [vmem:[%s769_s1] ss:$8 sps:$4 sm:$0xff]  }
   0x4   :  { %376 = vmatprep.subr.bf16.mxu1 %v502_v3  ;;  %v510_v10 = vld [vmem:[%s768_s4 + $0x30] ss:$8 sps:$4 sm:$0xff]   ;;  %v511_v11 = vld [vmem:[%s768_s4 + $0x44] ss:$8 sps:$4 sm:$0xff]   ;;  %133 = vmatprep.subr.bf16.mxu0 %v520_v8  ;;  %v526_v12 = vld [vmem:[%s769_s1 + $0x14] ss:$8 sps:$4 sm:$0xff]  }
   0x5   :  { %134 = vmatpush1.bf16.msra.mxu0 %v522_v9  ;;  %v528_v13 = vld [vmem:[%s769_s1 + $0x10] ss:$8 sps:$4 sm:$0xff]   ;;  %v513_v14 = vld [vmem:[%s768_s4 + $0x40] ss:$8 sps:$4 sm:$0xff]   ;;  %v532_v15 = vld [vmem:[%s769_s1 + $0x24] ss:$8 sps:$4 sm:$0xff]  }
   0x6   :  { %135 = vmatprep.subr.bf16.mxu0 %v526_v12  ;;  %v514_v16 = vld [vmem:[%s768_s4 + $0x54] ss:$8 sps:$4 sm:$0xff]   ;;  %v534_v17 = vld [vmem:[%s769_s1 + $0x20] ss:$8 sps:$4 sm:$0xff]   ;;  %v516_v19 = vld [vmem:[%s768_s4 + $0x50] ss:$8 sps:$4 sm:$0xff]  }
   0x7   :  { %377 = vmatpush1.bf16.msra.mxu1 %v504_v4  ;;  %v538_v18 = vld [vmem:[%s769_s1 + $0x34] ss:$8 sps:$4 sm:$0xff]   ;;  %v517_v20 = vld [vmem:[%s768_s4 + $0x64] ss:$8 sps:$4 sm:$0xff]   ;;  %v540_v21 = vld [vmem:[%s769_s1 + $0x30] ss:$8 sps:$4 sm:$0xff]  }
   0x8   :  { %378 = vmatprep.subr.bf16.mxu1 %v505_v5  ;;  %v544_v22 = vld [vmem:[%s769_s1 + $0x44] ss:$8 sps:$4 sm:$0xff]   ;;  %v519_v23 = vld [vmem:[%s768_s4 + $0x60] ss:$8 sps:$4 sm:$0xff]   ;;  %v523_v24 = vld [vmem:[%s768_s4 + $0x74] ss:$8 sps:$4 sm:$0xff]  }
   0x9   :  { %136 = vmatpush1.bf16.msra.mxu0 %v528_v13  ;;  %v546_v25 = vld [vmem:[%s769_s1 + $0x40] ss:$8 sps:$4 sm:$0xff]   ;;  %v550_v26 = vld [vmem:[%s769_s1 + $0x54] ss:$8 sps:$4 sm:$0xff]   ;;  %v525_v27 = vld [vmem:[%s768_s4 + $0x70] ss:$8 sps:$4 sm:$0xff]  }
   0xa   :  { %137 = vmatprep.subr.bf16.mxu0 %v532_v15  ;;  %v529_v28 = vld [vmem:[%s768_s4 + $0x84] ss:$8 sps:$4 sm:$0xff]   ;;  %v552_v29 = vld [vmem:[%s769_s1 + $0x50] ss:$8 sps:$4 sm:$0xff]   ;;  %v531_v31 = vld [vmem:[%s768_s4 + $0x80] ss:$8 sps:$4 sm:$0xff]  }
   0xb   :  { %379 = vmatpush1.bf16.msra.mxu1 %v507_v6  ;;  %v556_v30 = vld [vmem:[%s769_s1 + $0x64] ss:$8 sps:$4 sm:$0xff]   ;;  %v535_v32 = vld [vmem:[%s768_s4 + $0x94] ss:$8 sps:$4 sm:$0xff]   ;;  %v558_v34 = vld [vmem:[%s769_s1 + $0x60] ss:$8 sps:$4 sm:$0xff]  }
   0xc   :  { %380 = vmatprep.subr.bf16.mxu1 %v508_v7  ;;  %v174_v33 = vld [vmem:[%s770_s3] sm:$0xff]  ;;  %v562_v36 = vld [vmem:[%s769_s1 + $0x74] ss:$8 sps:$4 sm:$0xff]   ;;  %v537_v37 = vld [vmem:[%s768_s4 + $0x90] ss:$8 sps:$4 sm:$0xff]   ;;  %v44_v58 = vshrl.u32 %v43_v56, 7 }
   0xd   :  { %138 = vmatpush1.bf16.msra.mxu0 %v534_v17  ;;  %v463_v35 = vcombine.high %v174_v33, %v174_v33  ;;  %v541_v38 = vld [vmem:[%s768_s4 + $0xa4] ss:$8 sps:$4 sm:$0xff]   ;;  %v564_v39 = vld [vmem:[%s769_s1 + $0x70] ss:$8 sps:$4 sm:$0xff]   ;;  %v543_v40 = vld [vmem:[%s768_s4 + $0xa0] ss:$8 sps:$4 sm:$0xff]   ;;  %v462_v52 = vcombine.low %v174_v33, %v174_v33 }
   0xe   :  { %139 = vmatprep.subr.bf16.mxu0 %v538_v18  ;;  %v547_v41 = vld [vmem:[%s768_s4 + $0xb4] ss:$8 sps:$4 sm:$0xff]   ;;  %v24_v42 = vld [vmem:[%s771_s0] sm:$0xf]  ;;  %v549_v43 = vld [vmem:[%s768_s4 + $0xb0] ss:$8 sps:$4 sm:$0xff]  }
   0xf   :  { %381 = vmatpush1.bf16.msra.mxu1 %v510_v10  ;;  %406 = vmatprep.mubr.bf16.mxu1 %v463_v35  ;;  %v553_v44 = vld [vmem:[%s768_s4 + $0xc4] ss:$8 sps:$4 sm:$0xff]   ;;  %v555_v45 = vld [vmem:[%s768_s4 + $0xc0] ss:$8 sps:$4 sm:$0xff]   ;;  %v559_v46 = vld [vmem:[%s768_s4 + $0xd4] ss:$8 sps:$4 sm:$0xff]  }
  0x10   :  { %382 = vmatprep.subr.bf16.mxu1 %v511_v11  ;;  %v561_v47 = vld [vmem:[%s768_s4 + $0xd0] ss:$8 sps:$4 sm:$0xff]   ;;  %v565_v48 = vld [vmem:[%s768_s4 + $0xe4] ss:$8 sps:$4 sm:$0xff]   ;;  %v567_v49 = vld [vmem:[%s768_s4 + $0xe0] ss:$8 sps:$4 sm:$0xff]  }
  0x11   :  { %140 = vmatpush1.bf16.msra.mxu0 %v540_v21  ;;  %v568_v50 = vld [vmem:[%s768_s4 + $0xf4] ss:$8 sps:$4 sm:$0xff]   ;;  %v570_v51 = vld [vmem:[%s768_s4 + $0xf0] ss:$8 sps:$4 sm:$0xff]   ;;  %v45_v59 = vsub.s32 0, %v44_v58  ;;  %v49_v61 = vsub.s32 1, %v44_v58 }
  0x12   :  { %141 = vmatprep.subr.bf16.mxu0 %v544_v22  ;;  %v41_v60 = vld [vmem:[%s772_s2] sm:$0x3] }
  0x13   :  { %383 = vmatpush1.bf16.msra.mxu1 %v513_v14  ;;  %v46_v62 = vrot.slane %v41_v60, %v45_v59  ;;  %v50_v63 = vrot.slane %v41_v60, %v49_v61  ;;  %v417_v0 = vld [vmem:[%s773_s5] sm:$0x3] }
  0x14   :  { %384 = vmatprep.subr.bf16.mxu1 %v514_v16  ;;  %v422_v3 = vrot.slane %v417_v0, %v45_v59  ;;  %v426_v5 = vrot.slane %v417_v0, %v49_v61 }
  0x15   :  { %142 = vmatpush1.bf16.msra.mxu0 %v546_v25 }
  0x16   :  { %143 = vmatprep.subr.bf16.mxu0 %v550_v26 }
  0x17   :  { %385 = vmatpush1.bf16.msra.mxu1 %v516_v19 }
  0x18   :  { %386 = vmatprep.subr.bf16.mxu1 %v517_v20 }
  0x19   :  { %144 = vmatpush1.bf16.msra.mxu0 %v552_v29 }
  0x1a   :  { %145 = vmatprep.subr.bf16.mxu0 %v556_v30 }
  0x1b   :  { %387 = vmatpush1.bf16.msra.mxu1 %v519_v23 }
  0x1c   :  { %388 = vmatprep.subr.bf16.mxu1 %v523_v24 }
  0x1d   :  { %146 = vmatpush1.bf16.msra.mxu0 %v558_v34 }
  0x1e   :  { %147 = vmatprep.subr.bf16.mxu0 %v562_v36 }
  0x1f   :  { %389 = vmatpush1.bf16.msra.mxu1 %v525_v27 }
  0x20   :  { %390 = vmatprep.subr.bf16.mxu1 %v529_v28 }
  0x21   :  { %148 = vmatpush1.bf16.msra.mxu0 %v564_v39 }
  0x23   :  { %391 = vmatpush1.bf16.msra.mxu1 %v531_v31 }
  0x24   :  { %392 = vmatprep.subr.bf16.mxu1 %v535_v32  ;;  %166 = vmatmul.mubr.bf16.vlgmr.msra.gmra.mrb[0].mxu0 %v24_v42 }
  0x27   :  { %393 = vmatpush1.bf16.msra.mxu1 %v537_v37 }
  0x28   :  { %394 = vmatprep.subr.bf16.mxu1 %v541_v38 }
  0x2b   :  { %395 = vmatpush1.bf16.msra.mxu1 %v543_v40 }
  0x2c   :  { %396 = vmatprep.subr.bf16.mxu1 %v547_v41 }
  0x2f   :  { %397 = vmatpush1.bf16.msra.mxu1 %v549_v43 }
  0x30   :  { %398 = vmatprep.subr.bf16.mxu1 %v553_v44 }
  0x33   :  { %399 = vmatpush1.bf16.msra.mxu1 %v555_v45 }
  0x34   :  { %400 = vmatprep.subr.bf16.mxu1 %v559_v46 }
  0x37   :  { %401 = vmatpush1.bf16.msra.mxu1 %v561_v47 }
  0x38   :  { %402 = vmatprep.subr.bf16.mxu1 %v565_v48 }
  0x3b   :  { %403 = vmatpush1.bf16.msra.mxu1 %v567_v49 }
  0x3c   :  { %404 = vmatprep.subr.bf16.mxu1 %v568_v50 }
  0x3f   :  { %405 = vmatpush1.bf16.msra.mxu1 %v570_v51 }
  0x42   :  { %407 = vmatmul.mubr.bf16.vlgmr.msra.gmra.mrb[0].mxu1 %v462_v52 }
  0xf7   :  { %v167_v53 = vpop.f32.mrb[0].mxu0 }
  0xf8   :  { %v169_v54 = vpop.f32.mrb[1].mxu0  ;;  %v168_v1 = vadd.f32 %v167_v53, %v46_v62 }
  0xf9   :  { %v171_v55 = vpop.f32.mrb[2].mxu0  ;;  %v170_v2 = vadd.f32 %v169_v54, %v50_v63 }
  0xfa   :  { %v172_v57 = vpop.f32.mrb[3].mxu0 }
 0x115   :  { %v408_v4 = vpop.f32.mrb[0].mxu1 }
 0x116   :  { %v415_v6 = vadd.f32 %v408_v4, %v168_v1  ;;  %v410_v7 = vpop.f32.mrb[1].mxu1 }
 0x117   :  { %v416_v8 = vadd.f32 %v410_v7, %v170_v2  ;;  %v412_v9 = vpop.f32.mrb[2].mxu1 }
 0x118   :  { %v429_v10 = vadd.f32 %v422_v3, %v415_v6  ;;  %v413_v11 = vpop.f32.mrb[3].mxu1 }
 0x119   :  { %v430_v12 = vadd.f32 %v426_v5, %v416_v8 }
 0x11a   :  { %v431_v13 = vmax.f32 %v429_v10, 0.0 }
 0x11b   :  { %v432_v14 = vmax.f32 %v430_v12, 0.0 }
 0x11d   :  { %v497_v15 = vpack.c.bf16 %v432_v14, %v431_v13 }
 0x11f   :  { %441 = vst [vmem:[%s774_s6] sm:$0xff] %v497_v15 }

// kernel: tile.8
= control target key start
LH: loop header
LB: loop body
LE: loop exit
PB: predicated region body
PF: predicated region fallthrough
CT: control target
= control target key end

     0   :  { %s154_s0 = inlined_call_operand.vmem [shape: f32[8,8], index: 0, kind: input, shape index: {}]   ;;  %s155_s1 = inlined_call_operand.vmem [shape: f32[2,8,2,8], index: 1, kind: output, shape index: {}]  }
   0x1   :  { %v4_v0 = vld [vmem:[%s154_s0] ss:$0 sm:$0xff]  ;;  %v51_v1 = vld [vmem:[%s154_s0 + $0x1] ss:$0 sm:$0xff]  ;;  %v54_v2 = vld [vmem:[%s154_s0 + $0x2] ss:$0 sm:$0xff] }
   0x2   :  { %5 = vst [vmem:[%s155_s1] sm:$0x3] %v4_v0  ;;  %50 = vst [vmem:[%s155_s1 + $0x10] sm:$0x3] %v4_v0  ;;  %v57_v3 = vld [vmem:[%s154_s0 + $0x3] ss:$0 sm:$0xff] }
   0x3   :  { %52 = vst [vmem:[%s155_s1 + $0x2] sm:$0x3] %v51_v1  ;;  %53 = vst [vmem:[%s155_s1 + $0x12] sm:$0x3] %v51_v1  ;;  %v60_v4 = vld [vmem:[%s154_s0 + $0x4] ss:$0 sm:$0xff] }
   0x4   :  { %55 = vst [vmem:[%s155_s1 + $0x4] sm:$0x3] %v54_v2  ;;  %56 = vst [vmem:[%s155_s1 + $0x14] sm:$0x3] %v54_v2  ;;  %v63_v5 = vld [vmem:[%s154_s0 + $0x5] ss:$0 sm:$0xff] }
   0x5   :  { %58 = vst [vmem:[%s155_s1 + $0x6] sm:$0x3] %v57_v3  ;;  %59 = vst [vmem:[%s155_s1 + $0x16] sm:$0x3] %v57_v3  ;;  %v66_v6 = vld [vmem:[%s154_s0 + $0x6] ss:$0 sm:$0xff] }
   0x6   :  { %61 = vst [vmem:[%s155_s1 + $0x8] sm:$0x3] %v60_v4  ;;  %62 = vst [vmem:[%s155_s1 + $0x18] sm:$0x3] %v60_v4  ;;  %v69_v7 = vld [vmem:[%s154_s0 + $0x7] ss:$0 sm:$0xff] }
   0x7   :  { %64 = vst [vmem:[%s155_s1 + $0xa] sm:$0x3] %v63_v5  ;;  %65 = vst [vmem:[%s155_s1 + $0x1a] sm:$0x3] %v63_v5 }
   0x8   :  { %67 = vst [vmem:[%s155_s1 + $0xc] sm:$0x3] %v66_v6  ;;  %68 = vst [vmem:[%s155_s1 + $0x1c] sm:$0x3] %v66_v6 }
   0x9   :  { %70 = vst [vmem:[%s155_s1 + $0xe] sm:$0x3] %v69_v7  ;;  %71 = vst [vmem:[%s155_s1 + $0x1e] sm:$0x3] %v69_v7 }

// kernel: tile.9
= control target key start
LH: loop header
LB: loop body
LE: loop exit
PB: predicated region body
PF: predicated region fallthrough
CT: control target
= control target key end

     0   :  { %vm82_vm0 = vcmask 1047556   ;;  %vm84_vm1 = vcmask 64512   ;;  %vm103_vm2 = vcmask 130112   ;;  %s225_s0 = inlined_call_operand.vmem [shape: f32[2,8,2,8], index: 0, kind: input, shape index: {}]   ;;  %s226_s1 = inlined_call_operand.vmem [shape: f32[16,16], index: 1, kind: output, shape index: {}]  }
   0x1   :  { %v138_v0 = vld [vmem:[%s225_s0 + $0xe] sm:$0x3]  ;;  %v139_v1 = vld [vmem:[%s225_s0 + $0xc] sm:$0x3]  ;;  %v140_v2 = vld [vmem:[%s225_s0 + $0xa] sm:$0x3] }
   0x2   :  { %48 = vst [vmem:[#allocation0 + $0x38] sm:$0x3] %v138_v0  ;;  %53 = vst [vmem:[#allocation0 + $0x30] sm:$0x3] %v139_v1  ;;  %v141_v3 = vld [vmem:[%s225_s0 + $0x8] sm:$0x3] }
   0x3   :  { %58 = vst [vmem:[#allocation0 + $0x28] sm:$0x3] %v140_v2  ;;  %v142_v4 = vld [vmem:[%s225_s0 + $0x6] sm:$0x3]  ;;  %v143_v5 = vld [vmem:[%s225_s0 + $0x4] sm:$0x3] }
   0x4   :  { %63 = vst [vmem:[#allocation0 + $0x20] sm:$0x3] %v141_v3  ;;  %68 = vst [vmem:[#allocation0 + $0x18] sm:$0x3] %v142_v4  ;;  %v144_v6 = vld [vmem:[%s225_s0 + $0x2] sm:$0x3] }
   0x5   :  { %73 = vst [vmem:[#allocation0 + $0x10] sm:$0x3] %v143_v5  ;;  %v78_v7 = vld [vmem:[%s225_s0] sm:$0x3]  ;;  %77 = vst [vmem:[#allocation0 + $0x8] sm:$0x3] %v144_v6 }
   0x6   :  { %79 = vst [vmem:[#allocation0] sm:$0x3] %v78_v7  ;;  %v130_v8 = vld [vmem:[%s225_s0 + $0x1e] sm:$0x3]  ;;  %v131_v9 = vld [vmem:[%s225_s0 + $0x1c] sm:$0x3] }
   0x7   :  { %v132_v10 = vld [vmem:[%s225_s0 + $0x1a] sm:$0x3]  ;;  %8 = vst [vmem:[#allocation0 + $0x78] sm:$0x3] %v130_v8  ;;  %13 = vst [vmem:[#allocation0 + $0x70] sm:$0x3] %v131_v9 }
   0x8   :  { %18 = vst [vmem:[#allocation0 + $0x68] sm:$0x3] %v132_v10  ;;  %v133_v11 = vld [vmem:[%s225_s0 + $0x18] sm:$0x3]  ;;  %v134_v12 = vld [vmem:[%s225_s0 + $0x16] sm:$0x3] }
   0x9   :  { %v135_v13 = vld [vmem:[%s225_s0 + $0x14] sm:$0x3]  ;;  %23 = vst [vmem:[#allocation0 + $0x60] sm:$0x3] %v133_v11  ;;  %28 = vst [vmem:[#allocation0 + $0x58] sm:$0x3] %v134_v12 }
   0xa   :  { %33 = vst [vmem:[#allocation0 + $0x50] sm:$0x3] %v135_v13  ;;  %v136_v14 = vld [vmem:[%s225_s0 + $0x12] sm:$0x3]  ;;  %v137_v15 = vld [vmem:[%s225_s0 + $0x10] sm:$0x3] }
   0xb   :  { %38 = vst [vmem:[#allocation0 + $0x48] sm:$0x3] %v136_v14  ;;  %43 = vst [vmem:[#allocation0 + $0x40] sm:$0x3] %v137_v15  ;;  %s148_s0 = smov 8  }
   0xc   :  { %v98_v16 = vld [vmem:[#allocation0 + $0x1] ss:$8 sm:$0xf0]   ;;  %v81_v17 = vld [vmem:[#allocation0] ss:$8 sm:$0xf0]  }
   0xd   :  { %v96_v18 = vld [vmem:[#allocation0 + $0x1] ss:$8 sm:$0xf]   ;;  %v80_v19 = vld [vmem:[#allocation0] ss:$8 sm:$0xf]  }
   0xe   :  { %v100_v20 = vsel %vm82_vm0, %v98_v16, %v96_v18  ;;  %v83_v21 = vsel %vm82_vm0, %v81_v17, %v80_v19 }
   0xf   :  { %101 = vrot.lane.b32.xlu0 %v100_v20, %s148_s0  ;;  %85 = vst.msk [vmem:[%s226_s1] sm:$0xff] %vm84_vm1, %v83_v21  }
  0x10   :  { %v108_v22 = vld [vmem:[#allocation0 + $0x41] ss:$8 sm:$0xf0]   ;;  %v89_v23 = vld [vmem:[#allocation0 + $0x40] ss:$8 sm:$0xf0]  }
  0x12   :  { %v106_v24 = vld [vmem:[#allocation0 + $0x41] ss:$8 sm:$0xf]   ;;  %v87_v25 = vld [vmem:[#allocation0 + $0x40] ss:$8 sm:$0xf]  }
  0x13   :  { %v110_v26 = vsel %vm82_vm0, %v108_v22, %v106_v24  ;;  %v91_v27 = vsel %vm82_vm0, %v89_v23, %v87_v25 }
  0x14   :  { %145 = vst.msk [vmem:[%s226_s1 + $0x8] sm:$0xff] %vm84_vm1, %v91_v27   ;;  %111 = vrot.lane.b32.xlu0 %v110_v26, %s148_s0 }
  0x81   :  { %v102_v28 = vpop.permute.xlu0 %101  }
  0x82   :  { %104 = vst.msk [vmem:[%s226_s1] sm:$0xff] %vm103_vm2, %v102_v28  }
  0x86   :  { %v112_v29 = vpop.permute.xlu0 %111  }
  0x87   :  { %146 = vst.msk [vmem:[%s226_s1 + $0x8] sm:$0xff] %vm103_vm2, %v112_v29  }

// kernel: forward.25
= control target key start
LH: loop header
LB: loop body
LE: loop exit
PB: predicated region body
PF: predicated region fallthrough
CT: control target
= control target key end

     0   :  { %vm1138_vm0 = vmmov 0   ;;  %s1396_s1 = inlined_call_operand.vmem [shape: bf16[1152,128], index: 1, kind: input, shape index: {}]   ;;  %s1397_s0 = inlined_call_operand.vmem [shape: bf16[8,1152], index: 0, kind: input, shape index: {}]   ;;  %s1398_s2 = inlined_call_operand.vmem [shape: f32[1,128], index: 2, kind: input, shape index: {}]   ;;  %s1399_s3 = inlined_call_operand.vmem [shape: bf16[8,128], index: 3, kind: output, shape index: {}]  }
   0x1   :  { %v1056_v0 = vld [vmem:[%s1396_s1 + $0x40] sm:$0xff]   ;;  %v1060_v4 = vld [vmem:[%s1396_s1 + $0x48] sm:$0xff]   ;;  %v1064_v8 = vld [vmem:[%s1396_s1 + $0x50] sm:$0xff]  }
   0x2   :  { %v1057_v1 = vld [vmem:[%s1396_s1 + $0xc0] sm:$0xff]   ;;  %937 = vmatprep.subr.bf16.mxu0 %v1056_v0  ;;  %v1061_v5 = vld [vmem:[%s1396_s1 + $0xc8] sm:$0xff]   ;;  %v1065_v9 = vld [vmem:[%s1396_s1 + $0xd0] sm:$0xff]  }
   0x3   :  { %v1058_v2 = vld [vmem:[%s1396_s1] sm:$0xff]   ;;  %959 = vmatprep.subr.bf16.mxu1 %v1057_v1  ;;  %v1062_v6 = vld [vmem:[%s1396_s1 + $0x8] sm:$0xff]   ;;  %v1066_v10 = vld [vmem:[%s1396_s1 + $0x10] sm:$0xff]  }
   0x4   :  { %v1059_v3 = vld [vmem:[%s1396_s1 + $0x80] sm:$0xff]   ;;  %938 = vmatpush3.bf16.msra.mxu0 %v1058_v2  ;;  %v1063_v7 = vld [vmem:[%s1396_s1 + $0x88] sm:$0xff]   ;;  %v1067_v11 = vld [vmem:[%s1396_s1 + $0x90] sm:$0xff]  }
   0x5   :  { %960 = vmatpush3.bf16.msra.mxu1 %v1059_v3  ;;  %939 = vmatprep.subr.bf16.mxu0 %v1060_v4  ;;  %v1068_v12 = vld [vmem:[%s1396_s1 + $0x58] sm:$0xff]   ;;  %v1072_v16 = vld [vmem:[%s1396_s1 + $0x60] sm:$0xff]   ;;  %v1076_v20 = vld [vmem:[%s1396_s1 + $0x68] sm:$0xff]  }
   0x6   :  { %961 = vmatprep.subr.bf16.mxu1 %v1061_v5  ;;  %v1069_v13 = vld [vmem:[%s1396_s1 + $0xd8] sm:$0xff]   ;;  %v1073_v17 = vld [vmem:[%s1396_s1 + $0xe0] sm:$0xff]   ;;  %v1077_v21 = vld [vmem:[%s1396_s1 + $0xe8] sm:$0xff]  }
   0x7   :  { %v1070_v14 = vld [vmem:[%s1396_s1 + $0x18] sm:$0xff]   ;;  %v1074_v18 = vld [vmem:[%s1396_s1 + $0x20] sm:$0xff]   ;;  %v1078_v22 = vld [vmem:[%s1396_s1 + $0x28] sm:$0xff]  }
   0x8   :  { %940 = vmatpush3.bf16.msra.mxu0 %v1062_v6  ;;  %v1071_v15 = vld [vmem:[%s1396_s1 + $0x98] sm:$0xff]   ;;  %v1075_v19 = vld [vmem:[%s1396_s1 + $0xa0] sm:$0xff]   ;;  %v1079_v23 = vld [vmem:[%s1396_s1 + $0xa8] sm:$0xff]  }
   0x9   :  { %962 = vmatpush3.bf16.msra.mxu1 %v1063_v7  ;;  %941 = vmatprep.subr.bf16.mxu0 %v1064_v8  ;;  %v1080_v24 = vld [vmem:[%s1396_s1 + $0x70] sm:$0xff]   ;;  %v1084_v28 = vld [vmem:[%s1396_s1 + $0x78] sm:$0xff]   ;;  %v21_v32 = vld [vmem:[%s1397_s0] sm:$0xff] }
   0xa   :  { %963 = vmatprep.subr.bf16.mxu1 %v1065_v9  ;;  %v1081_v25 = vld [vmem:[%s1396_s1 + $0xf0] sm:$0xff]   ;;  %v1085_v29 = vld [vmem:[%s1396_s1 + $0xf8] sm:$0xff]   ;;  %v22_v33 = vld [vmem:[%s1397_s0 + $0x8] sm:$0xff]  ;;  %v855_v34 = vcombine.low %v21_v32, %v21_v32  ;;  %v856_v35 = vcombine.high %v21_v32, %v21_v32 }
   0xb   :  { %v1082_v26 = vld [vmem:[%s1396_s1 + $0x30] sm:$0xff]   ;;  %v1086_v30 = vld [vmem:[%s1396_s1 + $0x38] sm:$0xff]   ;;  %v857_v36 = vcombine.low %v22_v33, %v22_v33  ;;  %v858_v37 = vcombine.high %v22_v33, %v22_v33  ;;  %v1092_v38 = vld [vmem:[%s1396_s1 + $0x140] sm:$0xff]  }
   0xc   :  { %942 = vmatpush3.bf16.msra.mxu0 %v1066_v10  ;;  %v1083_v27 = vld [vmem:[%s1396_s1 + $0xb0] sm:$0xff]   ;;  %v1087_v31 = vld [vmem:[%s1396_s1 + $0xb8] sm:$0xff]   ;;  %v1093_v39 = vld [vmem:[%s1396_s1 + $0x100] sm:$0xff]   ;;  %666 = vmatprep.mubr.bf16.mxu0 %v856_v35 }
   0xd   :  { %964 = vmatpush3.bf16.msra.mxu1 %v1067_v11  ;;  %943 = vmatprep.subr.bf16.mxu0 %v1068_v12  ;;  %v1094_v40 = vld [vmem:[%s1396_s1 + $0x1c0] sm:$0xff]   ;;  %v1096_v42 = vld [vmem:[%s1396_s1 + $0x148] sm:$0xff]   ;;  %v1100_v46 = vld [vmem:[%s1396_s1 + $0x150] sm:$0xff]  }
   0xe   :  { %965 = vmatprep.subr.bf16.mxu1 %v1069_v13  ;;  %706 = vmatprep.mubr.bf16.mxu1 %v858_v37  ;;  %v1095_v41 = vld [vmem:[%s1396_s1 + $0x180] sm:$0xff]   ;;  %v1097_v43 = vld [vmem:[%s1396_s1 + $0x108] sm:$0xff]   ;;  %v1101_v47 = vld [vmem:[%s1396_s1 + $0x110] sm:$0xff]   ;;  %v1137_v13 = vmov 0.0  }
   0xf   :  { %v1098_v44 = vld [vmem:[%s1396_s1 + $0x1c8] sm:$0xff]   ;;  %v1102_v48 = vld [vmem:[%s1396_s1 + $0x1d0] sm:$0xff]   ;;  %v1104_v50 = vld [vmem:[%s1396_s1 + $0x158] sm:$0xff]  }
  0x10   :  { %944 = vmatpush3.bf16.msra.mxu0 %v1070_v14  ;;  %v1099_v45 = vld [vmem:[%s1396_s1 + $0x188] sm:$0xff]   ;;  %v1103_v49 = vld [vmem:[%s1396_s1 + $0x190] sm:$0xff]   ;;  %v1105_v51 = vld [vmem:[%s1396_s1 + $0x118] sm:$0xff]  }
  0x11   :  { %966 = vmatpush3.bf16.msra.mxu1 %v1071_v15  ;;  %945 = vmatprep.subr.bf16.mxu0 %v1072_v16  ;;  %v1106_v52 = vld [vmem:[%s1396_s1 + $0x1d8] sm:$0xff]   ;;  %v1108_v54 = vld [vmem:[%s1396_s1 + $0x160] sm:$0xff]   ;;  %v1112_v58 = vld [vmem:[%s1396_s1 + $0x168] sm:$0xff]  }
  0x12   :  { %967 = vmatprep.subr.bf16.mxu1 %v1073_v17  ;;  %v1107_v53 = vld [vmem:[%s1396_s1 + $0x198] sm:$0xff]   ;;  %v1109_v55 = vld [vmem:[%s1396_s1 + $0x120] sm:$0xff]   ;;  %v1113_v59 = vld [vmem:[%s1396_s1 + $0x128] sm:$0xff]  }
  0x13   :  { %v1110_v56 = vld [vmem:[%s1396_s1 + $0x1e0] sm:$0xff]   ;;  %v1114_v60 = vld [vmem:[%s1396_s1 + $0x1e8] sm:$0xff]   ;;  %v1116_v62 = vld [vmem:[%s1396_s1 + $0x170] sm:$0xff]  }
  0x14   :  { %946 = vmatpush3.bf16.msra.mxu0 %v1074_v18  ;;  %v1111_v57 = vld [vmem:[%s1396_s1 + $0x1a0] sm:$0xff]   ;;  %v1115_v61 = vld [vmem:[%s1396_s1 + $0x1a8] sm:$0xff]   ;;  %v1117_v63 = vld [vmem:[%s1396_s1 + $0x130] sm:$0xff]  }
  0x15   :  { %968 = vmatpush3.bf16.msra.mxu1 %v1075_v19  ;;  %947 = vmatprep.subr.bf16.mxu0 %v1076_v20  ;;  %v1118_v0 = vld [vmem:[%s1396_s1 + $0x1f0] sm:$0xff]   ;;  %v1120_v2 = vld [vmem:[%s1396_s1 + $0x178] sm:$0xff]   ;;  %v1128_v12 = vld [vmem:[%s1396_s1 + $0x200] sm:$0xff]  }
  0x16   :  { %969 = vmatprep.subr.bf16.mxu1 %v1077_v21  ;;  %v1119_v1 = vld [vmem:[%s1396_s1 + $0x1b0] sm:$0xff]   ;;  %v1121_v3 = vld [vmem:[%s1396_s1 + $0x138] sm:$0xff]   ;;  %v1129_v14 = vld [vmem:[%s1396_s1 + $0x208] sm:$0xff]  }
  0x17   :  { %v1122_v4 = vld [vmem:[%s1396_s1 + $0x1f8] sm:$0xff]   ;;  %v23_v5 = vld [vmem:[%s1397_s0 + $0x10] sm:$0xff]  ;;  %v1132_v17 = vld [vmem:[%s1396_s1 + $0x220] sm:$0xff]  }
  0x18   :  { %948 = vmatpush3.bf16.msra.mxu0 %v1078_v22  ;;  %v860_v6 = vcombine.high %v23_v5, %v23_v5  ;;  %v1125_v7 = vld [vmem:[%s1396_s1 + $0x1b8] sm:$0xff]   ;;  %v859_v8 = vcombine.low %v23_v5, %v23_v5  ;;  %v1130_v15 = vld [vmem:[%s1396_s1 + $0x210] sm:$0xff]   ;;  %v1133_v18 = vld [vmem:[%s1396_s1 + $0x228] sm:$0xff]  }
  0x19   :  { %970 = vmatpush3.bf16.msra.mxu1 %v1079_v23  ;;  %949 = vmatprep.subr.bf16.mxu0 %v1080_v24  ;;  %v24_v9 = vld [vmem:[%s1397_s0 + $0x18] sm:$0xff]  ;;  %v1134_v19 = vld [vmem:[%s1396_s1 + $0x230] sm:$0xff]   ;;  %v1136_v21 = vld [vmem:[%s1397_s0 + $0x20] ss:$0 sps:$4 sm:$0xff]  }
  0x1a   :  { %971 = vmatprep.subr.bf16.mxu1 %v1081_v25  ;;  %v861_v10 = vcombine.low %v24_v9, %v24_v9  ;;  %v862_v11 = vcombine.high %v24_v9, %v24_v9  ;;  %v1131_v16 = vld [vmem:[%s1396_s1 + $0x218] sm:$0xff]  }
  0x1b   :  { %v1135_v20 = vld [vmem:[%s1396_s1 + $0x238] sm:$0xff]  }
  0x1c   :  { %950 = vmatpush3.bf16.msra.mxu0 %v1082_v26 }
  0x1d   :  { %972 = vmatpush3.bf16.msra.mxu1 %v1083_v27  ;;  %951 = vmatprep.subr.bf16.mxu0 %v1084_v28 }
  0x1e   :  { %973 = vmatprep.subr.bf16.mxu1 %v1085_v29 }
  0x20   :  { %952 = vmatpush3.bf16.msra.mxu0 %v1086_v30 }
  0x21   :  { %974 = vmatpush3.bf16.msra.mxu1 %v1087_v31  ;;  %981 = vmatprep.subr.bf16.mxu0 %v1092_v38 }
  0x22   :  { %1003 = vmatprep.subr.bf16.mxu1 %v1094_v40 }
  0x23   :  { %667 = vmatmul.mubr.bf16.vlgmr.msra.gmra.mrb[0].mxu0 %v855_v34 }
  0x24   :  { %707 = vmatmul.mubr.bf16.vlgmr.msra.gmra.mrb[0].mxu1 %v857_v36  ;;  %982 = vmatpush3.bf16.msra.mxu0 %v1093_v39 }
  0x25   :  { %1004 = vmatpush3.bf16.msra.mxu1 %v1095_v41  ;;  %983 = vmatprep.subr.bf16.mxu0 %v1096_v42 }
  0x26   :  { %1005 = vmatprep.subr.bf16.mxu1 %v1098_v44  ;;  %746 = vmatprep.mubr.bf16.mxu0 %v860_v6 }
  0x27   :  { %786 = vmatprep.mubr.bf16.mxu1 %v862_v11 }
  0x28   :  { %984 = vmatpush3.bf16.msra.mxu0 %v1097_v43 }
  0x29   :  { %1006 = vmatpush3.bf16.msra.mxu1 %v1099_v45  ;;  %985 = vmatprep.subr.bf16.mxu0 %v1100_v46  ;;  %v936_v46 = vld [vmem:[%s1398_s2] ss:$0 sm:$0xff] }
  0x2a   :  { %1007 = vmatprep.subr.bf16.mxu1 %v1102_v48 }
  0x2c   :  { %986 = vmatpush3.bf16.msra.mxu0 %v1101_v47 }
  0x2d   :  { %1008 = vmatpush3.bf16.msra.mxu1 %v1103_v49  ;;  %987 = vmatprep.subr.bf16.mxu0 %v1104_v50 }
  0x2e   :  { %1009 = vmatprep.subr.bf16.mxu1 %v1106_v52 }
  0x30   :  { %988 = vmatpush3.bf16.msra.mxu0 %v1105_v51 }
  0x31   :  { %1010 = vmatpush3.bf16.msra.mxu1 %v1107_v53  ;;  %989 = vmatprep.subr.bf16.mxu0 %v1108_v54 }
  0x32   :  { %1011 = vmatprep.subr.bf16.mxu1 %v1110_v56 }
  0x34   :  { %990 = vmatpush3.bf16.msra.mxu0 %v1109_v55 }
  0x35   :  { %1012 = vmatpush3.bf16.msra.mxu1 %v1111_v57  ;;  %991 = vmatprep.subr.bf16.mxu0 %v1112_v58 }
  0x36   :  { %1013 = vmatprep.subr.bf16.mxu1 %v1114_v60 }
  0x38   :  { %992 = vmatpush3.bf16.msra.mxu0 %v1113_v59 }
  0x39   :  { %1014 = vmatpush3.bf16.msra.mxu1 %v1115_v61  ;;  %993 = vmatprep.subr.bf16.mxu0 %v1116_v62 }
  0x3a   :  { %1015 = vmatprep.subr.bf16.mxu1 %v1118_v0 }
  0x3c   :  { %994 = vmatpush3.bf16.msra.mxu0 %v1117_v63 }
  0x3d   :  { %1016 = vmatpush3.bf16.msra.mxu1 %v1119_v1  ;;  %995 = vmatprep.subr.bf16.mxu0 %v1120_v2 }
  0x3e   :  { %1017 = vmatprep.subr.bf16.mxu1 %v1122_v4 }
  0x40   :  { %996 = vmatpush3.bf16.msra.mxu0 %v1121_v3 }
  0x41   :  { %1018 = vmatpush3.bf16.msra.mxu1 %v1125_v7  ;;  %1034 = vmatprep.subr.bf16.mxu0 %v1137_v13 }
  0x43   :  { %747 = vmatmul.mubr.bf16.vlgmr.msra.gmra.mrb[4].mxu0 %v859_v8 }
  0x44   :  { %1035 = vmatpush3.bf16.msra.mxu0 %v1128_v12  ;;  %787 = vmatmul.mubr.bf16.vlgmr.msra.gmra.mrb[4].mxu1 %v861_v10 }
  0x45   :  { %1036 = vmatprep.subr.bf16.mxu0 %v1137_v13  ;;  %1050 = vmatprep.mubr.msk.bf16.mxu0 %vm1138_vm0, %v1137_v13 }
  0x48   :  { %1037 = vmatpush3.bf16.msra.mxu0 %v1129_v14 }
  0x49   :  { %1038 = vmatprep.subr.bf16.mxu0 %v1137_v13 }
  0x4c   :  { %1039 = vmatpush3.bf16.msra.mxu0 %v1130_v15 }
  0x4d   :  { %1040 = vmatprep.subr.bf16.mxu0 %v1137_v13 }
  0x50   :  { %1041 = vmatpush3.bf16.msra.mxu0 %v1131_v16 }
  0x51   :  { %1042 = vmatprep.subr.bf16.mxu0 %v1137_v13 }
  0x54   :  { %1043 = vmatpush3.bf16.msra.mxu0 %v1132_v17 }
  0x55   :  { %1044 = vmatprep.subr.bf16.mxu0 %v1137_v13 }
  0x58   :  { %1045 = vmatpush3.bf16.msra.mxu0 %v1133_v18 }
  0x59   :  { %1046 = vmatprep.subr.bf16.mxu0 %v1137_v13 }
  0x5c   :  { %1047 = vmatpush3.bf16.msra.mxu0 %v1134_v19 }
  0x5d   :  { %1048 = vmatprep.subr.bf16.mxu0 %v1137_v13 }
  0x60   :  { %1049 = vmatpush3.bf16.msra.mxu0 %v1135_v20 }
  0x63   :  { %1051 = vmatmul.mubr.bf16.vlgmr.msra.gmra.mrb[8].mxu0 %v1136_v21 }
  0xf6   :  { %v953_v22 = vpop.f32.mrb[0].mxu0 }
  0xf7   :  { %v975_v23 = vpop.f32.mrb[0].mxu1  ;;  %v954_v24 = vpop.f32.mrb[1].mxu0 }
  0xf8   :  { %v976_v25 = vpop.f32.mrb[1].mxu1  ;;  %v955_v26 = vadd.f32 %v954_v24, %v953_v22  ;;  %v956_v28 = vpop.f32.mrb[2].mxu0 }
  0xf9   :  { %v977_v27 = vadd.f32 %v976_v25, %v975_v23  ;;  %v978_v29 = vpop.f32.mrb[2].mxu1  ;;  %v957_v30 = vpop.f32.mrb[3].mxu0 }
  0xfa   :  { %v979_v31 = vpop.f32.mrb[3].mxu1 }
  0xfb   :  { %v709_v32 = vadd.f32 %v977_v27, %v955_v26 }
 0x116   :  { %v997_v33 = vpop.f32.mrb[4].mxu0 }
 0x117   :  { %v998_v34 = vpop.f32.mrb[5].mxu0  ;;  %v1019_v35 = vpop.f32.mrb[4].mxu1 }
 0x118   :  { %v999_v36 = vadd.f32 %v998_v34, %v997_v33  ;;  %v1000_v37 = vpop.f32.mrb[6].mxu0  ;;  %v1020_v38 = vpop.f32.mrb[5].mxu1 }
 0x119   :  { %v1001_v39 = vpop.f32.mrb[7].mxu0  ;;  %v1021_v40 = vadd.f32 %v1020_v38, %v1019_v35  ;;  %v1022_v41 = vpop.f32.mrb[6].mxu1 }
 0x11a   :  { %v749_v42 = vadd.f32 %v999_v36, %v709_v32  ;;  %v1023_v43 = vpop.f32.mrb[7].mxu1 }
 0x11c   :  { %v789_v44 = vadd.f32 %v1021_v40, %v749_v42 }
 0x136   :  { %v828_v45 = vpop.f32.mrb[8].mxu0 }
 0x137   :  { %v829_v47 = vadd.f32 %v828_v45, %v789_v44  ;;  %v1052_v48 = vpop.f32.mrb[9].mxu0 }
 0x138   :  { %v831_v49 = vpop.f32.mrb[10].mxu0 }
 0x139   :  { %v847_v50 = vadd.f32 %v936_v46, %v829_v47  ;;  %v1053_v51 = vpop.f32.mrb[11].mxu0 }
 0x13b   :  { %v848_v52 = vmax.f32 %v847_v50, 0.0 }
 0x13d   :  { %v849_v53 = vpack.c.bf16 %v848_v52, %v848_v52 }
 0x13f   :  { %850 = vst [vmem:[%s1399_s3] sm:$0xf] %v849_v53 }

// kernel: eq.10
= control target key start
LH: loop header
LB: loop body
LE: loop exit
PB: predicated region body
PF: predicated region fallthrough
CT: control target
= control target key end

     0   :  { %vm7_vm0 = vcmask 64512   ;;  %vm13_vm1 = vcmask 130112   ;;  %s39_s0 = inlined_call_operand.vmem [shape: s32[2,8], index: 0, kind: input, shape index: {}]   ;;  %s40_s1 = inlined_call_operand.vmem [shape: s32[16], index: 1, kind: output, shape index: {}]  }
   0x1   :  { %v4_v0 = vld [vmem:[%s39_s0] sm:$0x3]  ;;  %s22_s0 = smov 8  }
   0x2   :  { %5 = vst [vmem:[#allocation1] sm:$0x3] %v4_v0 }
   0x9   :  { %v10_v1 = vld [vmem:[#allocation1 + $0x1] sm:$0x1]   ;;  %v6_v2 = vld [vmem:[#allocation1] sm:$0x1]  }
   0xa   :  { %11 = vrot.lane.b32.xlu0 %v10_v1, %s22_s0  ;;  %8 = vst.msk [vmem:[#allocation0] sm:$0x1] %vm7_vm0, %v6_v2  }
  0x7c   :  { %v12_v3 = vpop.permute.xlu0 %11  }
  0x7d   :  { %14 = vst.msk [vmem:[#allocation0] sm:$0x1] %vm13_vm1, %v12_v3  }
  0x84   :  { %v18_v4 = vld [vmem:[#allocation0] sm:$0x1] }
  0x85   :  { %20 = vst [vmem:[%s40_s1] sm:$0x1] %v18_v4 }

// kernel: forward.29
= control target key start
LH: loop header
LB: loop body
LE: loop exit
PB: predicated region body
PF: predicated region fallthrough
CT: control target
= control target key end

     0   :  { %v817_v1 = vmov 0   ;;  %v49_v24 = vlaneseq  ;;  %v818_v25 = vmov 1966171168   ;;  %s1083_s4 = inlined_call_operand.vmem [shape: bf16[256,256], index: 4, kind: input, shape index: {}]   ;;  %s1084_s1 = inlined_call_operand.vmem [shape: bf16[128,256], index: 1, kind: input, shape index: {}]   ;;  %s1085_s3 = inlined_call_operand.vmem [shape: bf16[2,256], index: 3, kind: input, shape index: {}]   ;;  %s1086_s6 = inlined_call_operand.vmem [shape: bf16[256,128], index: 6, kind: input, shape index: {}]   ;;  %s1087_s0 = inlined_call_operand.vmem [shape: bf16[2,128], index: 0, kind: input, shape index: {}]   ;;  %s1088_s2 = inlined_call_operand.vmem [shape: f32[1,256], index: 2, kind: input, shape index: {}]   ;;  %s1089_s5 = inlined_call_operand.vmem [shape: f32[1,256], index: 5, kind: input, shape index: {}]   ;;  %s1090_s7 = inlined_call_operand.vmem [shape: f32[1,128], index: 7, kind: input, shape index: {}]   ;;  %s1091_s8 = inlined_call_operand.vmem [shape: f32[2,128], index: 8, kind: output, shape index: {}]  }
   0x1   :  { %v729_v0 = vld [vmem:[%s1083_s4 + $0x4] ss:$8 sps:$4 sm:$0xff]   ;;  %171 = vmatprep.mubr.bf16.mxu0 %v817_v1  ;;  %v731_v2 = vld [vmem:[%s1083_s4] ss:$8 sps:$4 sm:$0xff]   ;;  %v732_v3 = vld [vmem:[%s1083_s4 + $0x14] ss:$8 sps:$4 sm:$0xff]   ;;  %v223_v26 = vunpack.c.l.s4 %v818_v25 }
   0x2   :  { %398 = vmatprep.subr.bf16.mxu1 %v729_v0  ;;  %v734_v4 = vld [vmem:[%s1083_s4 + $0x10] ss:$8 sps:$4 sm:$0xff]   ;;  %v735_v5 = vld [vmem:[%s1083_s4 + $0x24] ss:$8 sps:$4 sm:$0xff]   ;;  %v737_v6 = vld [vmem:[%s1083_s4 + $0x20] ss:$8 sps:$4 sm:$0xff]  }
   0x3   :  { %399 = vmatpush1.bf16.msra.mxu1 %v731_v2  ;;  %v738_v7 = vld [vmem:[%s1083_s4 + $0x34] ss:$8 sps:$4 sm:$0xff]   ;;  %v750_v8 = vld [vmem:[%s1084_s1 + $0x4] ss:$8 sps:$4 sm:$0xff]   ;;  %v752_v9 = vld [vmem:[%s1084_s1] ss:$8 sps:$4 sm:$0xff]   ;;  %v224_v32 = vunpack.c.0.s8 %v223_v26 }
   0x4   :  { %400 = vmatprep.subr.bf16.mxu1 %v732_v3  ;;  %v740_v10 = vld [vmem:[%s1083_s4 + $0x30] ss:$8 sps:$4 sm:$0xff]   ;;  %v741_v11 = vld [vmem:[%s1083_s4 + $0x44] ss:$8 sps:$4 sm:$0xff]   ;;  %139 = vmatprep.subr.bf16.mxu0 %v750_v8  ;;  %v756_v12 = vld [vmem:[%s1084_s1 + $0x14] ss:$8 sps:$4 sm:$0xff]  }
   0x5   :  { %140 = vmatpush1.bf16.msra.mxu0 %v752_v9  ;;  %v758_v13 = vld [vmem:[%s1084_s1 + $0x10] ss:$8 sps:$4 sm:$0xff]   ;;  %v743_v14 = vld [vmem:[%s1083_s4 + $0x40] ss:$8 sps:$4 sm:$0xff]   ;;  %v762_v15 = vld [vmem:[%s1084_s1 + $0x24] ss:$8 sps:$4 sm:$0xff]  }
   0x6   :  { %141 = vmatprep.subr.bf16.mxu0 %v756_v12  ;;  %v744_v16 = vld [vmem:[%s1083_s4 + $0x54] ss:$8 sps:$4 sm:$0xff]   ;;  %v764_v17 = vld [vmem:[%s1084_s1 + $0x20] ss:$8 sps:$4 sm:$0xff]   ;;  %v746_v19 = vld [vmem:[%s1083_s4 + $0x50] ss:$8 sps:$4 sm:$0xff]  }
   0x7   :  { %401 = vmatpush1.bf16.msra.mxu1 %v734_v4  ;;  %v768_v18 = vld [vmem:[%s1084_s1 + $0x34] ss:$8 sps:$4 sm:$0xff]   ;;  %v747_v20 = vld [vmem:[%s1083_s4 + $0x64] ss:$8 sps:$4 sm:$0xff]   ;;  %v770_v21 = vld [vmem:[%s1084_s1 + $0x30] ss:$8 sps:$4 sm:$0xff]  }
   0x8   :  { %402 = vmatprep.subr.bf16.mxu1 %v735_v5  ;;  %v774_v22 = vld [vmem:[%s1084_s1 + $0x44] ss:$8 sps:$4 sm:$0xff]   ;;  %v749_v23 = vld [vmem:[%s1083_s4 + $0x60] ss:$8 sps:$4 sm:$0xff]   ;;  %v753_v27 = vld [vmem:[%s1083_s4 + $0x74] ss:$8 sps:$4 sm:$0xff]  }
   0x9   :  { %142 = vmatpush1.bf16.msra.mxu0 %v758_v13  ;;  %v776_v28 = vld [vmem:[%s1084_s1 + $0x40] ss:$8 sps:$4 sm:$0xff]   ;;  %v780_v29 = vld [vmem:[%s1084_s1 + $0x54] ss:$8 sps:$4 sm:$0xff]   ;;  %v755_v30 = vld [vmem:[%s1083_s4 + $0x70] ss:$8 sps:$4 sm:$0xff]  }
   0xa   :  { %143 = vmatprep.subr.bf16.mxu0 %v762_v15  ;;  %v945_v31 = vshrl.u32 %v49_v24, 7  ;;  %v759_v33 = vld [vmem:[%s1083_s4 + $0x84] ss:$8 sps:$4 sm:$0xff]   ;;  %v782_v34 = vld [vmem:[%s1084_s1 + $0x50] ss:$8 sps:$4 sm:$0xff]  }
   0xb   :  { %403 = vmatpush1.bf16.msra.mxu1 %v737_v6  ;;  %v786_v35 = vld [vmem:[%s1084_s1 + $0x64] ss:$8 sps:$4 sm:$0xff]   ;;  %v761_v36 = vld [vmem:[%s1083_s4 + $0x80] ss:$8 sps:$4 sm:$0xff]   ;;  %v765_v38 = vld [vmem:[%s1083_s4 + $0x94] ss:$8 sps:$4 sm:$0xff]  }
   0xc   :  { %404 = vmatprep.subr.bf16.mxu1 %v738_v7  ;;  %v960_v37 = vsub.s32 %v224_v32, %v945_v31  ;;  %v655_v39 = vld.sshfl [vmem:[%s1085_s3] sm:$0x11 pattern:$0x75316420]  ;;  %v792_v42 = vld [vmem:[%s1084_s1 + $0x74] ss:$8 sps:$4 sm:$0xff]  }
   0xd   :  { %144 = vmatpush1.bf16.msra.mxu0 %v764_v17  ;;  %v788_v40 = vld [vmem:[%s1084_s1 + $0x60] ss:$8 sps:$4 sm:$0xff]   ;;  %v221_v41 = vcombine.high %v655_v39, %v655_v39  ;;  %v767_v43 = vld [vmem:[%s1083_s4 + $0x90] ss:$8 sps:$4 sm:$0xff]   ;;  %v771_v45 = vld [vmem:[%s1083_s4 + $0xa4] ss:$8 sps:$4 sm:$0xff]  }
   0xe   :  { %145 = vmatprep.subr.bf16.mxu0 %v768_v18  ;;  %v773_v46 = vld [vmem:[%s1083_s4 + $0xa0] ss:$8 sps:$4 sm:$0xff]   ;;  %v794_v47 = vld [vmem:[%s1084_s1 + $0x70] ss:$8 sps:$4 sm:$0xff]   ;;  %v777_v48 = vld [vmem:[%s1083_s4 + $0xb4] ss:$8 sps:$4 sm:$0xff]   ;;  %v228_v3 = vrot.slane %v655_v39, %v960_v37 }
   0xf   :  { %405 = vmatpush1.bf16.msra.mxu1 %v740_v10  ;;  %v235_v44 = vrot.slane %v221_v41, %v960_v37  ;;  %v801_v49 = vld [vmem:[%s1086_s6 + $0x40] sm:$0xff]   ;;  %v779_v52 = vld [vmem:[%s1083_s4 + $0xb0] ss:$8 sps:$4 sm:$0xff]   ;;  %v803_v53 = vld [vmem:[%s1086_s6 + $0x48] sm:$0xff]   ;;  %v55_v18 = vsub.s32 1, %v945_v31 }
  0x10   :  { %406 = vmatprep.subr.bf16.mxu1 %v741_v11  ;;  %v30_v50 = vld [vmem:[%s1087_s0] sm:$0x1]  ;;  %v783_v54 = vld [vmem:[%s1083_s4 + $0xc4] ss:$8 sps:$4 sm:$0xff]   ;;  %v805_v56 = vld [vmem:[%s1086_s6 + $0x50] sm:$0xff]  }
  0x11   :  { %146 = vmatpush1.bf16.msra.mxu0 %v770_v21  ;;  %430 = vmatprep.mubr.bf16.mxu1 %v235_v44  ;;  %v802_v51 = vld [vmem:[%s1086_s6] sm:$0xff]   ;;  %v804_v55 = vld [vmem:[%s1086_s6 + $0x8] sm:$0xff]   ;;  %v789_v58 = vld [vmem:[%s1083_s4 + $0xd4] ss:$8 sps:$4 sm:$0xff]  }
  0x12   :  { %147 = vmatprep.subr.bf16.mxu0 %v774_v22  ;;  %v785_v57 = vld [vmem:[%s1083_s4 + $0xc0] ss:$8 sps:$4 sm:$0xff]   ;;  %v806_v59 = vld [vmem:[%s1086_s6 + $0x10] sm:$0xff]   ;;  %v807_v60 = vld [vmem:[%s1086_s6 + $0x58] sm:$0xff]  }
  0x13   :  { %407 = vmatpush1.bf16.msra.mxu1 %v743_v14  ;;  %v791_v61 = vld [vmem:[%s1083_s4 + $0xd0] ss:$8 sps:$4 sm:$0xff]   ;;  %v795_v62 = vld [vmem:[%s1083_s4 + $0xe4] ss:$8 sps:$4 sm:$0xff]   ;;  %v797_v0 = vld [vmem:[%s1083_s4 + $0xe0] ss:$8 sps:$4 sm:$0xff]  }
  0x14   :  { %408 = vmatprep.subr.bf16.mxu1 %v744_v16  ;;  %v808_v63 = vld [vmem:[%s1086_s6 + $0x18] sm:$0xff]   ;;  %v809_v4 = vld [vmem:[%s1086_s6 + $0x60] sm:$0xff]   ;;  %v811_v6 = vld [vmem:[%s1086_s6 + $0x68] sm:$0xff]   ;;  %v51_v16 = vsub.s32 0, %v945_v31 }
  0x15   :  { %148 = vmatpush1.bf16.msra.mxu0 %v776_v28  ;;  %v798_v1 = vld [vmem:[%s1083_s4 + $0xf4] ss:$8 sps:$4 sm:$0xff]   ;;  %v800_v2 = vld [vmem:[%s1083_s4 + $0xf0] ss:$8 sps:$4 sm:$0xff]   ;;  %v810_v5 = vld [vmem:[%s1086_s6 + $0x20] sm:$0xff]  }
  0x16   :  { %149 = vmatprep.subr.bf16.mxu0 %v780_v29  ;;  %v812_v7 = vld [vmem:[%s1086_s6 + $0x28] sm:$0xff]   ;;  %v813_v8 = vld [vmem:[%s1086_s6 + $0x70] sm:$0xff]   ;;  %v815_v10 = vld [vmem:[%s1086_s6 + $0x78] sm:$0xff]  }
  0x17   :  { %409 = vmatpush1.bf16.msra.mxu1 %v746_v19  ;;  %v814_v9 = vld [vmem:[%s1086_s6 + $0x30] sm:$0xff]   ;;  %v816_v11 = vld [vmem:[%s1086_s6 + $0x38] sm:$0xff]   ;;  %v47_v17 = vld [vmem:[%s1088_s2] sm:$0x3] }
  0x18   :  { %410 = vmatprep.subr.bf16.mxu1 %v747_v20  ;;  %v52_v19 = vrot.slane %v47_v17, %v51_v16  ;;  %v56_v20 = vrot.slane %v47_v17, %v55_v18  ;;  %v441_v21 = vld [vmem:[%s1089_s5] sm:$0x3] }
  0x19   :  { %150 = vmatpush1.bf16.msra.mxu0 %v782_v34  ;;  %v446_v24 = vrot.slane %v441_v21, %v51_v16  ;;  %v450_v26 = vrot.slane %v441_v21, %v55_v18  ;;  %v688_v39 = vld [vmem:[%s1090_s7] ss:$0 sm:$0xff] }
  0x1a   :  { %151 = vmatprep.subr.bf16.mxu0 %v786_v35 }
  0x1b   :  { %411 = vmatpush1.bf16.msra.mxu1 %v749_v23 }
  0x1c   :  { %412 = vmatprep.subr.bf16.mxu1 %v753_v27 }
  0x1d   :  { %152 = vmatpush1.bf16.msra.mxu0 %v788_v40 }
  0x1e   :  { %153 = vmatprep.subr.bf16.mxu0 %v792_v42 }
  0x1f   :  { %413 = vmatpush1.bf16.msra.mxu1 %v755_v30 }
  0x20   :  { %414 = vmatprep.subr.bf16.mxu1 %v759_v33 }
  0x21   :  { %154 = vmatpush1.bf16.msra.mxu0 %v794_v47 }
  0x22   :  { %705 = vmatprep.subr.bf16.mxu0 %v801_v49 }
  0x23   :  { %415 = vmatpush1.bf16.msra.mxu1 %v761_v36 }
  0x24   :  { %416 = vmatprep.subr.bf16.mxu1 %v765_v38  ;;  %172 = vmatmul.mubr.bf16.vlgmr.msra.gmra.mrb[0].mxu0 %v30_v50 }
  0x25   :  { %706 = vmatpush3.bf16.msra.mxu0 %v802_v51 }
  0x26   :  { %707 = vmatprep.subr.bf16.mxu0 %v803_v53 }
  0x27   :  { %417 = vmatpush1.bf16.msra.mxu1 %v767_v43 }
  0x28   :  { %418 = vmatprep.subr.bf16.mxu1 %v771_v45 }
  0x29   :  { %708 = vmatpush3.bf16.msra.mxu0 %v804_v55 }
  0x2a   :  { %709 = vmatprep.subr.bf16.mxu0 %v805_v56 }
  0x2b   :  { %419 = vmatpush1.bf16.msra.mxu1 %v773_v46 }
  0x2c   :  { %420 = vmatprep.subr.bf16.mxu1 %v777_v48 }
  0x2d   :  { %710 = vmatpush3.bf16.msra.mxu0 %v806_v59 }
  0x2e   :  { %711 = vmatprep.subr.bf16.mxu0 %v807_v60 }
  0x2f   :  { %421 = vmatpush1.bf16.msra.mxu1 %v779_v52 }
  0x30   :  { %422 = vmatprep.subr.bf16.mxu1 %v783_v54 }
  0x31   :  { %712 = vmatpush3.bf16.msra.mxu0 %v808_v63 }
  0x32   :  { %713 = vmatprep.subr.bf16.mxu0 %v809_v4 }
  0x33   :  { %423 = vmatpush1.bf16.msra.mxu1 %v785_v57 }
  0x34   :  { %424 = vmatprep.subr.bf16.mxu1 %v789_v58 }
  0x35   :  { %714 = vmatpush3.bf16.msra.mxu0 %v810_v5 }
  0x36   :  { %715 = vmatprep.subr.bf16.mxu0 %v811_v6 }
  0x37   :  { %425 = vmatpush1.bf16.msra.mxu1 %v791_v61 }
  0x38   :  { %426 = vmatprep.subr.bf16.mxu1 %v795_v62 }
  0x39   :  { %716 = vmatpush3.bf16.msra.mxu0 %v812_v7 }
  0x3a   :  { %717 = vmatprep.subr.bf16.mxu0 %v813_v8 }
  0x3b   :  { %427 = vmatpush1.bf16.msra.mxu1 %v797_v0 }
  0x3c   :  { %428 = vmatprep.subr.bf16.mxu1 %v798_v1 }
  0x3d   :  { %718 = vmatpush3.bf16.msra.mxu0 %v814_v9 }
  0x3e   :  { %719 = vmatprep.subr.bf16.mxu0 %v815_v10 }
  0x3f   :  { %429 = vmatpush1.bf16.msra.mxu1 %v800_v2 }
  0x41   :  { %720 = vmatpush3.bf16.msra.mxu0 %v816_v11 }
  0x42   :  { %431 = vmatmul.mubr.bf16.vlgmr.msra.gmra.mrb[0].mxu1 %v228_v3 }
  0xf7   :  { %v173_v12 = vpop.f32.mrb[0].mxu0 }
  0xf8   :  { %v175_v13 = vpop.f32.mrb[1].mxu0  ;;  %v174_v22 = vadd.f32 %v173_v12, %v52_v19 }
  0xf9   :  { %v177_v14 = vpop.f32.mrb[2].mxu0  ;;  %v176_v23 = vadd.f32 %v175_v13, %v56_v20 }
  0xfa   :  { %v178_v15 = vpop.f32.mrb[3].mxu0 }
 0x115   :  { %v432_v25 = vpop.f32.mrb[0].mxu1 }
 0x116   :  { %v439_v27 = vadd.f32 %v432_v25, %v174_v22  ;;  %v434_v28 = vpop.f32.mrb[1].mxu1 }
 0x117   :  { %v440_v29 = vadd.f32 %v434_v28, %v176_v23  ;;  %v436_v30 = vpop.f32.mrb[2].mxu1 }
 0x118   :  { %v453_v32 = vadd.f32 %v446_v24, %v439_v27  ;;  %v437_v33 = vpop.f32.mrb[3].mxu1 }
 0x119   :  { %v454_v34 = vadd.f32 %v450_v26, %v440_v29 }
 0x11a   :  { %v455_v35 = vmax.f32 %v453_v32, 0.0 }
 0x11b   :  { %v456_v31 = vmax.f32 %v454_v34, 0.0 }
 0x11c   :  { %v457_v37 = vpack.c.bf16 %v455_v35, %v455_v35 }
 0x11d   :  { %v458_v36 = vpack.c.bf16 %v456_v31, %v456_v31 }
 0x11f   :  { %626 = vmatprep.mubr.bf16.mxu0 %v458_v36 }
 0x120   :  { %627 = vmatmul.mubr.bf16.vlgmr.msra.gmra.mrb[4].mxu0 %v457_v37 }
 0x1f3   :  { %v721_v38 = vpop.f32.mrb[4].mxu0 }
 0x1f4   :  { %v722_v40 = vpop.f32.mrb[5].mxu0 }
 0x1f5   :  { %v723_v41 = vadd.f32 %v722_v40, %v721_v38  ;;  %v724_v42 = vpop.f32.mrb[6].mxu0 }
 0x1f6   :  { %v725_v43 = vpop.f32.mrb[7].mxu0 }
 0x1f7   :  { %v629_v44 = vadd.f32 %v723_v41, %v688_v39 }
 0x1f9   :  { %634 = vst [vmem:[%s1091_s8] sm:$0x3] %v629_v44 }

// kernel: forward.28
= control target key start
LH: loop header
LB: loop body
LE: loop exit
PB: predicated region body
PF: predicated region fallthrough
CT: control target
= control target key end

     0   :  { %v1161_v1 = vmov 0.0   ;;  %v1162_v23 = vmov 1966171168   ;;  %v173_v25 = vlaneseq  ;;  %vm1163_vm0 = vmmov 0   ;;  %s1436_s1 = inlined_call_operand.vmem [shape: bf16[1152,128], index: 1, kind: input, shape index: {}]   ;;  %s1437_s0 = inlined_call_operand.vmem [shape: bf16[2,1152], index: 0, kind: input, shape index: {}]   ;;  %s1438_s2 = inlined_call_operand.vmem [shape: f32[1,128], index: 2, kind: input, shape index: {}]   ;;  %s1439_s3 = inlined_call_operand.vmem [shape: bf16[2,128], index: 3, kind: output, shape index: {}]  }
   0x1   :  { %v1088_v0 = vld [vmem:[%s1436_s1 + $0x40] sm:$0xff]   ;;  %19 = vst [vmem:[#allocation2] sm:$0x3] %v1161_v1  ;;  %v1092_v5 = vld [vmem:[%s1436_s1 + $0x48] sm:$0xff]   ;;  %v1096_v9 = vld [vmem:[%s1436_s1 + $0x50] sm:$0xff]   ;;  %v171_v24 = vunpack.c.l.s4 %v1162_v23 }
   0x2   :  { %v1089_v2 = vld [vmem:[%s1436_s1 + $0xc0] sm:$0xff]   ;;  %968 = vmatprep.subr.bf16.mxu0 %v1088_v0  ;;  %v1093_v6 = vld [vmem:[%s1436_s1 + $0xc8] sm:$0xff]   ;;  %v1097_v10 = vld [vmem:[%s1436_s1 + $0xd0] sm:$0xff]   ;;  %v174_v31 = vshrl.u32 %v173_v25, 7 }
   0x3   :  { %v1090_v3 = vld [vmem:[%s1436_s1] sm:$0xff]   ;;  %990 = vmatprep.subr.bf16.mxu1 %v1089_v2  ;;  %v1094_v7 = vld [vmem:[%s1436_s1 + $0x8] sm:$0xff]   ;;  %v1098_v11 = vld [vmem:[%s1436_s1 + $0x10] sm:$0xff]   ;;  %v172_v30 = vunpack.c.0.s8 %v171_v24 }
   0x4   :  { %v1091_v4 = vld [vmem:[%s1436_s1 + $0x80] sm:$0xff]   ;;  %969 = vmatpush3.bf16.msra.mxu0 %v1090_v3  ;;  %v1095_v8 = vld [vmem:[%s1436_s1 + $0x88] sm:$0xff]   ;;  %v1099_v12 = vld [vmem:[%s1436_s1 + $0x90] sm:$0xff]  }
   0x5   :  { %991 = vmatpush3.bf16.msra.mxu1 %v1091_v4  ;;  %970 = vmatprep.subr.bf16.mxu0 %v1092_v5  ;;  %v1100_v13 = vld [vmem:[%s1436_s1 + $0x58] sm:$0xff]   ;;  %v1104_v17 = vld [vmem:[%s1436_s1 + $0x60] sm:$0xff]   ;;  %v1108_v21 = vld [vmem:[%s1436_s1 + $0x68] sm:$0xff]   ;;  %v1275_v36 = vsub.s32 %v172_v30, %v174_v31 }
   0x6   :  { %992 = vmatprep.subr.bf16.mxu1 %v1093_v6  ;;  %v1101_v14 = vld [vmem:[%s1436_s1 + $0xd8] sm:$0xff]   ;;  %v1105_v18 = vld [vmem:[%s1436_s1 + $0xe0] sm:$0xff]   ;;  %v1109_v22 = vld [vmem:[%s1436_s1 + $0xe8] sm:$0xff]  }
   0x7   :  { %v1102_v15 = vld [vmem:[%s1436_s1 + $0x18] sm:$0xff]   ;;  %v1106_v19 = vld [vmem:[%s1436_s1 + $0x20] sm:$0xff]   ;;  %v1110_v26 = vld [vmem:[%s1436_s1 + $0x28] sm:$0xff]  }
   0x8   :  { %971 = vmatpush3.bf16.msra.mxu0 %v1094_v7  ;;  %v1103_v16 = vld [vmem:[%s1436_s1 + $0x98] sm:$0xff]   ;;  %v1107_v20 = vld [vmem:[%s1436_s1 + $0xa0] sm:$0xff]   ;;  %v1111_v27 = vld [vmem:[%s1436_s1 + $0xa8] sm:$0xff]  }
   0x9   :  { %993 = vmatpush3.bf16.msra.mxu1 %v1095_v8  ;;  %972 = vmatprep.subr.bf16.mxu0 %v1096_v9  ;;  %v1112_v28 = vld [vmem:[%s1436_s1 + $0x70] sm:$0xff]   ;;  %v1116_v34 = vld [vmem:[%s1436_s1 + $0x78] sm:$0xff]   ;;  %v21_v39 = vld [vmem:[%s1437_s0] sm:$0xff] }
   0xa   :  { %994 = vmatprep.subr.bf16.mxu1 %v1097_v10  ;;  %v1113_v29 = vld [vmem:[%s1436_s1 + $0xf0] sm:$0xff]   ;;  %v1117_v35 = vld [vmem:[%s1436_s1 + $0xf8] sm:$0xff]   ;;  %v169_v40 = vcombine.high %v21_v39, %v21_v39  ;;  %v176_v41 = vrot.slane %v21_v39, %v1275_v36  ;;  %v1121_v42 = vld [vmem:[%s1436_s1 + $0x140] sm:$0xff]  }
   0xb   :  { %v1114_v32 = vld [vmem:[%s1436_s1 + $0x30] sm:$0xff]   ;;  %v1118_v37 = vld [vmem:[%s1436_s1 + $0x38] sm:$0xff]   ;;  %v1123_v45 = vld [vmem:[%s1436_s1 + $0x1c0] sm:$0xff]  }
   0xc   :  { %973 = vmatpush3.bf16.msra.mxu0 %v1098_v11  ;;  %v1115_v33 = vld [vmem:[%s1436_s1 + $0xb0] sm:$0xff]   ;;  %v1119_v38 = vld [vmem:[%s1436_s1 + $0xb8] sm:$0xff]   ;;  %v184_v43 = vcombine.high %v176_v41, %v176_v41  ;;  %v192_v44 = vrot.slane %v176_v41, %v1275_v36  ;;  %v1295_v46 = vrot.slane %v169_v40, %v1275_v36  ;;  %v1122_v48 = vld [vmem:[%s1436_s1 + $0x100] sm:$0xff]  }
   0xd   :  { %995 = vmatpush3.bf16.msra.mxu1 %v1099_v12  ;;  %974 = vmatprep.subr.bf16.mxu0 %v1100_v13  ;;  %v1125_v51 = vld [vmem:[%s1436_s1 + $0x148] sm:$0xff]   ;;  %v1124_v53 = vld [vmem:[%s1436_s1 + $0x180] sm:$0xff]   ;;  %v1129_v58 = vld [vmem:[%s1436_s1 + $0x150] sm:$0xff]  }
   0xe   :  { %996 = vmatprep.subr.bf16.mxu1 %v1101_v14  ;;  %v206_v47 = vrot.slane %v184_v43, %v1275_v36  ;;  %v185_v49 = vcombine.high %v1295_v46, %v1295_v46  ;;  %v214_v50 = vcombine.high %v192_v44, %v192_v44  ;;  %v1127_v55 = vld [vmem:[%s1436_s1 + $0x1c8] sm:$0xff]   ;;  %v1131_v60 = vld [vmem:[%s1436_s1 + $0x1d0] sm:$0xff]   ;;  %v1133_v62 = vld [vmem:[%s1436_s1 + $0x158] sm:$0xff]  }
   0xf   :  { %v1126_v56 = vld [vmem:[%s1436_s1 + $0x108] sm:$0xff]   ;;  %v1130_v61 = vld [vmem:[%s1436_s1 + $0x110] sm:$0xff]   ;;  %v1135_v0 = vld [vmem:[%s1436_s1 + $0x1d8] sm:$0xff]  }
  0x10   :  { %975 = vmatpush3.bf16.msra.mxu0 %v1102_v15  ;;  %705 = vmatprep.mubr.bf16.mxu0 %v206_v47  ;;  %v216_v52 = vcombine.high %v206_v47, %v206_v47  ;;  %v213_v54 = vrot.slane %v185_v49, %v1275_v36  ;;  %v1128_v59 = vld [vmem:[%s1436_s1 + $0x188] sm:$0xff]   ;;  %v1132_v63 = vld [vmem:[%s1436_s1 + $0x190] sm:$0xff]   ;;  %v1134_v2 = vld [vmem:[%s1436_s1 + $0x118] sm:$0xff]  }
  0x11   :  { %997 = vmatpush3.bf16.msra.mxu1 %v1103_v16  ;;  %976 = vmatprep.subr.bf16.mxu0 %v1104_v17  ;;  %v1137_v3 = vld [vmem:[%s1436_s1 + $0x160] sm:$0xff]   ;;  %v1136_v4 = vld [vmem:[%s1436_s1 + $0x198] sm:$0xff]   ;;  %v1141_v7 = vld [vmem:[%s1436_s1 + $0x168] sm:$0xff]  }
  0x12   :  { %998 = vmatprep.subr.bf16.mxu1 %v1105_v18  ;;  %745 = vmatprep.mubr.bf16.mxu1 %v216_v52  ;;  %v217_v57 = vcombine.high %v213_v54, %v213_v54  ;;  %v1139_v5 = vld [vmem:[%s1436_s1 + $0x1e0] sm:$0xff]   ;;  %v1143_v9 = vld [vmem:[%s1436_s1 + $0x1e8] sm:$0xff]   ;;  %v1145_v11 = vld [vmem:[%s1436_s1 + $0x170] sm:$0xff]  }
  0x13   :  { %v1138_v6 = vld [vmem:[%s1436_s1 + $0x120] sm:$0xff]   ;;  %v1142_v10 = vld [vmem:[%s1436_s1 + $0x128] sm:$0xff]   ;;  %v1147_v13 = vld [vmem:[%s1436_s1 + $0x1f0] sm:$0xff]  }
  0x14   :  { %977 = vmatpush3.bf16.msra.mxu0 %v1106_v19  ;;  %v1140_v8 = vld [vmem:[%s1436_s1 + $0x1a0] sm:$0xff]   ;;  %v1144_v12 = vld [vmem:[%s1436_s1 + $0x1a8] sm:$0xff]   ;;  %v1146_v14 = vld [vmem:[%s1436_s1 + $0x130] sm:$0xff]   ;;  %v199_v19 = vrot.slane %v1295_v46, %v1275_v36 }
  0x15   :  { %999 = vmatpush3.bf16.msra.mxu1 %v1107_v20  ;;  %978 = vmatprep.subr.bf16.mxu0 %v1108_v21  ;;  %v1149_v15 = vld [vmem:[%s1436_s1 + $0x178] sm:$0xff]   ;;  %v1148_v16 = vld [vmem:[%s1436_s1 + $0x1b0] sm:$0xff]   ;;  %v1153_v21 = vld [vmem:[%s1436_s1 + $0x200] sm:$0xff]  }
  0x16   :  { %1000 = vmatprep.subr.bf16.mxu1 %v1109_v22  ;;  %v1151_v17 = vld [vmem:[%s1436_s1 + $0x1f8] sm:$0xff]   ;;  %v215_v22 = vcombine.high %v199_v19, %v199_v19  ;;  %v894_v23 = vld.sshfl [vmem:[%s1437_s0 + $0x8] sm:$0x1 pattern:$0x75316420]  ;;  %v1159_v30 = vld [vmem:[%s1436_s1 + $0x230] sm:$0xff]  }
  0x17   :  { %v1150_v18 = vld [vmem:[%s1436_s1 + $0x138] sm:$0xff]   ;;  %v1154_v24 = vld [vmem:[%s1436_s1 + $0x208] sm:$0xff]   ;;  %v231_v25 = vrot.slane %v894_v23, %v1275_v36 }
  0x18   :  { %979 = vmatpush3.bf16.msra.mxu0 %v1110_v26  ;;  %v1152_v20 = vld [vmem:[%s1436_s1 + $0x1b8] sm:$0xff]   ;;  %v1155_v26 = vld [vmem:[%s1436_s1 + $0x210] sm:$0xff]  }
  0x19   :  { %1001 = vmatpush3.bf16.msra.mxu1 %v1111_v27  ;;  %980 = vmatprep.subr.bf16.mxu0 %v1112_v28  ;;  %v1156_v27 = vld [vmem:[%s1436_s1 + $0x218] sm:$0xff]   ;;  %v1157_v28 = vld [vmem:[%s1436_s1 + $0x220] sm:$0xff]  }
  0x1a   :  { %1002 = vmatprep.subr.bf16.mxu1 %v1113_v29  ;;  %v1158_v29 = vld [vmem:[%s1436_s1 + $0x228] sm:$0xff]   ;;  %v1160_v31 = vld [vmem:[%s1436_s1 + $0x238] sm:$0xff]  }
  0x1c   :  { %981 = vmatpush3.bf16.msra.mxu0 %v1114_v32 }
  0x1d   :  { %1003 = vmatpush3.bf16.msra.mxu1 %v1115_v33  ;;  %982 = vmatprep.subr.bf16.mxu0 %v1116_v34 }
  0x1e   :  { %1004 = vmatprep.subr.bf16.mxu1 %v1117_v35 }
  0x20   :  { %983 = vmatpush3.bf16.msra.mxu0 %v1118_v37 }
  0x21   :  { %1005 = vmatpush3.bf16.msra.mxu1 %v1119_v38  ;;  %1012 = vmatprep.subr.bf16.mxu0 %v1121_v42 }
  0x22   :  { %1034 = vmatprep.subr.bf16.mxu1 %v1123_v45 }
  0x23   :  { %706 = vmatmul.mubr.bf16.vlgmr.msra.gmra.mrb[0].mxu0 %v192_v44 }
  0x24   :  { %1013 = vmatpush3.bf16.msra.mxu0 %v1122_v48  ;;  %746 = vmatmul.mubr.bf16.vlgmr.msra.gmra.mrb[0].mxu1 %v214_v50 }
  0x25   :  { %1014 = vmatprep.subr.bf16.mxu0 %v1125_v51  ;;  %1035 = vmatpush3.bf16.msra.mxu1 %v1124_v53 }
  0x26   :  { %785 = vmatprep.mubr.bf16.mxu0 %v213_v54  ;;  %1036 = vmatprep.subr.bf16.mxu1 %v1127_v55  ;;  %v20_v54 = vld [vmem:[#allocation2] sm:$0x3] }
  0x27   :  { %825 = vmatprep.mubr.bf16.mxu1 %v217_v57 }
  0x28   :  { %1015 = vmatpush3.bf16.msra.mxu0 %v1126_v56 }
  0x29   :  { %1016 = vmatprep.subr.bf16.mxu0 %v1129_v58  ;;  %1037 = vmatpush3.bf16.msra.mxu1 %v1128_v59 }
  0x2a   :  { %1038 = vmatprep.subr.bf16.mxu1 %v1131_v60 }
  0x2c   :  { %1017 = vmatpush3.bf16.msra.mxu0 %v1130_v61  ;;  %v967_v61 = vld [vmem:[%s1438_s2] ss:$0 sm:$0xff] }
  0x2d   :  { %1018 = vmatprep.subr.bf16.mxu0 %v1133_v62  ;;  %1039 = vmatpush3.bf16.msra.mxu1 %v1132_v63 }
  0x2e   :  { %1040 = vmatprep.subr.bf16.mxu1 %v1135_v0 }
  0x30   :  { %1019 = vmatpush3.bf16.msra.mxu0 %v1134_v2 }
  0x31   :  { %1020 = vmatprep.subr.bf16.mxu0 %v1137_v3  ;;  %1041 = vmatpush3.bf16.msra.mxu1 %v1136_v4 }
  0x32   :  { %1042 = vmatprep.subr.bf16.mxu1 %v1139_v5 }
  0x34   :  { %1021 = vmatpush3.bf16.msra.mxu0 %v1138_v6 }
  0x35   :  { %1022 = vmatprep.subr.bf16.mxu0 %v1141_v7  ;;  %1043 = vmatpush3.bf16.msra.mxu1 %v1140_v8 }
  0x36   :  { %1044 = vmatprep.subr.bf16.mxu1 %v1143_v9 }
  0x38   :  { %1023 = vmatpush3.bf16.msra.mxu0 %v1142_v10 }
  0x39   :  { %1024 = vmatprep.subr.bf16.mxu0 %v1145_v11  ;;  %1045 = vmatpush3.bf16.msra.mxu1 %v1144_v12 }
  0x3a   :  { %1046 = vmatprep.subr.bf16.mxu1 %v1147_v13 }
  0x3c   :  { %1025 = vmatpush3.bf16.msra.mxu0 %v1146_v14 }
  0x3d   :  { %1026 = vmatprep.subr.bf16.mxu0 %v1149_v15  ;;  %1047 = vmatpush3.bf16.msra.mxu1 %v1148_v16 }
  0x3e   :  { %1048 = vmatprep.subr.bf16.mxu1 %v1151_v17 }
  0x40   :  { %1027 = vmatpush3.bf16.msra.mxu0 %v1150_v18 }
  0x41   :  { %1065 = vmatprep.subr.bf16.mxu0 %v1161_v1  ;;  %1049 = vmatpush3.bf16.msra.mxu1 %v1152_v20 }
  0x43   :  { %786 = vmatmul.mubr.bf16.vlgmr.msra.gmra.mrb[4].mxu0 %v199_v19 }
  0x44   :  { %1066 = vmatpush3.bf16.msra.mxu0 %v1153_v21  ;;  %1081 = vmatprep.mubr.msk.bf16.mxu0 %vm1163_vm0, %v1161_v1 }
  0x45   :  { %826 = vmatmul.mubr.bf16.vlgmr.msra.gmra.mrb[4].mxu1 %v215_v22  ;;  %1067 = vmatprep.subr.bf16.mxu0 %v1161_v1 }
  0x48   :  { %1068 = vmatpush3.bf16.msra.mxu0 %v1154_v24 }
  0x49   :  { %1069 = vmatprep.subr.bf16.mxu0 %v1161_v1 }
  0x4c   :  { %1070 = vmatpush3.bf16.msra.mxu0 %v1155_v26 }
  0x4d   :  { %1071 = vmatprep.subr.bf16.mxu0 %v1161_v1 }
  0x50   :  { %1072 = vmatpush3.bf16.msra.mxu0 %v1156_v27 }
  0x51   :  { %1073 = vmatprep.subr.bf16.mxu0 %v1161_v1 }
  0x54   :  { %1074 = vmatpush3.bf16.msra.mxu0 %v1157_v28 }
  0x55   :  { %1075 = vmatprep.subr.bf16.mxu0 %v1161_v1 }
  0x58   :  { %1076 = vmatpush3.bf16.msra.mxu0 %v1158_v29 }
  0x59   :  { %1077 = vmatprep.subr.bf16.mxu0 %v1161_v1 }
  0x5c   :  { %1078 = vmatpush3.bf16.msra.mxu0 %v1159_v30 }
  0x5d   :  { %1079 = vmatprep.subr.bf16.mxu0 %v1161_v1 }
  0x60   :  { %1080 = vmatpush3.bf16.msra.mxu0 %v1160_v31 }
  0x63   :  { %1082 = vmatmul.mubr.bf16.vlgmr.msra.gmra.mrb[8].mxu0 %v231_v25 }
  0xf6   :  { %v984_v32 = vpop.f32.mrb[0].mxu0 }
  0xf7   :  { %v985_v33 = vpop.f32.mrb[1].mxu0  ;;  %v1006_v34 = vpop.f32.mrb[0].mxu1 }
  0xf8   :  { %v986_v35 = vadd.f32 %v985_v33, %v984_v32  ;;  %v987_v36 = vpop.f32.mrb[2].mxu0  ;;  %v1007_v37 = vpop.f32.mrb[1].mxu1 }
  0xf9   :  { %v988_v38 = vpop.f32.mrb[3].mxu0  ;;  %v1008_v39 = vadd.f32 %v1007_v37, %v1006_v34  ;;  %v1009_v40 = vpop.f32.mrb[2].mxu1 }
  0xfa   :  { %v1010_v41 = vpop.f32.mrb[3].mxu1 }
  0xfb   :  { %v748_v42 = vadd.f32 %v1008_v39, %v986_v35 }
 0x116   :  { %v1028_v43 = vpop.f32.mrb[4].mxu0 }
 0x117   :  { %v1029_v44 = vpop.f32.mrb[5].mxu0 }
 0x118   :  { %v1030_v45 = vadd.f32 %v1029_v44, %v1028_v43  ;;  %v1031_v46 = vpop.f32.mrb[6].mxu0  ;;  %v1050_v47 = vpop.f32.mrb[4].mxu1 }
 0x119   :  { %v1032_v48 = vpop.f32.mrb[7].mxu0  ;;  %v1051_v1 = vpop.f32.mrb[5].mxu1 }
 0x11a   :  { %v788_v49 = vadd.f32 %v1030_v45, %v748_v42  ;;  %v1052_v50 = vadd.f32 %v1051_v1, %v1050_v47  ;;  %v1053_v51 = vpop.f32.mrb[6].mxu1 }
 0x11b   :  { %v1054_v52 = vpop.f32.mrb[7].mxu1 }
 0x11c   :  { %v828_v53 = vadd.f32 %v1052_v50, %v788_v49 }
 0x136   :  { %v867_v55 = vpop.f32.mrb[8].mxu0 }
 0x137   :  { %v868_v56 = vadd.f32 %v867_v55, %v828_v53  ;;  %v1083_v57 = vpop.f32.mrb[9].mxu0 }
 0x138   :  { %v870_v58 = vpop.f32.mrb[10].mxu0 }
 0x139   :  { %v873_v59 = vadd.f32 %v868_v56, %v20_v54  ;;  %v1084_v60 = vpop.f32.mrb[11].mxu0 }
 0x13b   :  { %874 = vst [vmem:[#allocation2] sm:$0x3] %v873_v59 }
 0x142   :  { %v878_v62 = vld [vmem:[#allocation2] sm:$0x3] }
 0x143   :  { %v886_v63 = vadd.f32 %v967_v61, %v878_v62 }
 0x145   :  { %v887_v0 = vmax.f32 %v886_v63, 0.0 }
 0x147   :  { %v888_v2 = vpack.c.bf16 %v887_v0, %v887_v0 }
 0x149   :  { %889 = vst [vmem:[%s1439_s3] sm:$0x1] %v888_v2 }

// kernel: forward.33
= control target key start
LH: loop header
LB: loop body
LE: loop exit
PB: predicated region body
PF: predicated region fallthrough
CT: control target
= control target key end

     0   :  { %vm18_vm0 = vcmask 1041408   ;;  %v122_v6 = vmov 0.0   ;;  %vm123_vm1 = vmmov 0   ;;  %vm103_vm2 = vcmask 9216   ;;  %s156_s1 = inlined_call_operand.vmem [shape: f32[2,128], index: 1, kind: input, shape index: {}]   ;;  %s157_s0 = inlined_call_operand.vmem [shape: f32[2,128], index: 0, kind: input, shape index: {}]   ;;  %s158_s2 = inlined_call_operand.<no memory space> [shape: f32[1,1], index: 2, kind: input, shape index: {}]   ;;  %s159_s3 = inlined_call_operand.vmem [shape: f32[2,2], index: 3, kind: output, shape index: {}]  }
   0x1   :  { %v16_v0 = vld [vmem:[%s156_s1] sm:$0x3]  ;;  %111 = vmatprep.subr.mxu0 %v122_v6  ;;  %113 = vmatprep.mubr.msk.f32.mxu0 %vm123_vm1, %v122_v6  ;;  %v101_v13 = vstv %s158_s2 }
   0x2   :  { %v15_v1 = vld [vmem:[%s157_s0] sm:$0x3]  ;;  %v24_v2 = vmul.f32 %v16_v0, %v16_v0 }
   0x3   :  { %v17_v3 = vmul.f32 %v15_v1, %v15_v1 }
   0x4   :  { %v25_v4 = vsel %vm18_vm0, %v24_v2, 0.0 }
   0x5   :  { %26 = vadd.xlane.f32.xlu0 %v25_v4  ;;  %v19_v5 = vsel %vm18_vm0, %v17_v3, 0.0 }
   0x9   :  { %20 = vadd.xlane.f32.xlu0 %v19_v5 }
  0x92   :  { %v27_v7 = vpop.xlane.xlu0 %26 }
  0x93   :  { %118 = vrsqrt.f32 %v27_v7 }
  0x96   :  { %v21_v8 = vpop.xlane.xlu0 %20 }
  0x97   :  { %120 = vrsqrt.f32 %v21_v8 }
  0x9d   :  { %v119_v9 = vpop.eup %118 }
  0x9e   :  { %v29_v10 = vmul.f32 %v119_v9, %v16_v0 }
  0xa0   :  { %112 = vmatpush3.xpose.msra.mxu0 %v29_v10 }
  0xa1   :  { %v121_v11 = vpop.eup %120 }
  0xa2   :  { %v23_v12 = vmul.f32 %v121_v11, %v15_v1 }
  0xa4   :  { %114 = vmatmul.mubr.f32.vlgmr.msra.gmra.mrb[0].mxu0 %v23_v12 }
 0x177   :  { %v96_v14 = vpop.f32.mrb[0].mxu0 }
 0x178   :  { %v102_v15 = vmul.f32 %v101_v13, %v96_v14  ;;  %v115_v16 = vpop.f32.mrb[1].mxu0 }
 0x17a   :  { %104 = vst.msk [vmem:[%s159_s3] sm:$0x3] %vm103_vm2, %v102_v15 }

// kernel: forward.32
= control target key start
LH: loop header
LB: loop body
LE: loop exit
PB: predicated region body
PF: predicated region fallthrough
CT: control target
= control target key end

     0   :  { %vm27_vm0 = vcmask 1041408   ;;  %v375_v2 = vmov 0.0   ;;  %vm376_vm1 = vmmov 0   ;;  %s477_s0 = inlined_call_operand.vmem [shape: f32[2,128], index: 0, kind: input, shape index: {}]   ;;  %s478_s3 = inlined_call_operand.vmem [shape: bf16[128,128], index: 3, kind: input, shape index: {}]   ;;  %s479_s4 = inlined_call_operand.vmem [shape: bf16[128,128], index: 4, kind: input, shape index: {}]   ;;  %s480_s1 = inlined_call_operand.vmem [shape: f32[1,128], index: 1, kind: input, shape index: {}]   ;;  %s481_s2 = inlined_call_operand.vmem [shape: f32[1,128], index: 2, kind: input, shape index: {}]   ;;  %s482_s5 = inlined_call_operand.vmem [shape: f32[1,128], index: 5, kind: input, shape index: {}]   ;;  %s483_s6 = inlined_call_operand.vmem [shape: f32[2,128], index: 6, kind: output, shape index: {}]  }
   0x1   :  { %v24_v0 = vld [vmem:[%s477_s0] sm:$0x3]  ;;  %315 = vmatprep.subr.bf16.mxu0 %v375_v2  ;;  %335 = vmatprep.subr.bf16.mxu1 %v375_v2  ;;  %v358_v4 = vld [vmem:[%s478_s3 + $0x8] sm:$0xff]   ;;  %v359_v10 = vld [vmem:[%s478_s3 + $0x10] sm:$0xff]  }
   0x2   :  { %v28_v1 = vsel %vm27_vm0, %v24_v0, 0.0  ;;  %v357_v3 = vld [vmem:[%s478_s3] sm:$0xff]   ;;  %v360_v11 = vld [vmem:[%s478_s3 + $0x18] sm:$0xff]   ;;  %331 = vmatprep.mubr.msk.bf16.mxu0 %vm376_vm1, %v375_v2  ;;  %351 = vmatprep.mubr.msk.bf16.mxu1 %vm376_vm1, %v375_v2  ;;  %v362_v13 = vld [vmem:[%s478_s3 + $0x28] sm:$0xff]  }
   0x3   :  { %29 = vadd.xlane.f32.xlu0 %v28_v1  ;;  %316 = vmatpush3.bf16.msra.mxu0 %v357_v3  ;;  %v361_v12 = vld [vmem:[%s478_s3 + $0x20] sm:$0xff]   ;;  %v363_v14 = vld [vmem:[%s478_s3 + $0x30] sm:$0xff]   ;;  %v364_v15 = vld [vmem:[%s478_s3 + $0x38] sm:$0xff]  }
   0x4   :  { %317 = vmatprep.subr.bf16.mxu0 %v375_v2  ;;  %v365_v16 = vld [vmem:[%s479_s4] sm:$0xff]   ;;  %v366_v17 = vld [vmem:[%s479_s4 + $0x8] sm:$0xff]   ;;  %v367_v18 = vld [vmem:[%s479_s4 + $0x10] sm:$0xff]  }
   0x5   :  { %336 = vmatpush3.bf16.msra.mxu1 %v365_v16  ;;  %v368_v19 = vld [vmem:[%s479_s4 + $0x18] sm:$0xff]   ;;  %v369_v20 = vld [vmem:[%s479_s4 + $0x20] sm:$0xff]   ;;  %v370_v21 = vld [vmem:[%s479_s4 + $0x28] sm:$0xff]  }
   0x6   :  { %337 = vmatprep.subr.bf16.mxu1 %v375_v2  ;;  %v371_v22 = vld [vmem:[%s479_s4 + $0x30] sm:$0xff]   ;;  %v278_v27 = vld [vmem:[%s480_s1] ss:$0 sm:$0xff]  ;;  %v372_v33 = vld [vmem:[%s479_s4 + $0x38] sm:$0xff]  }
   0x7   :  { %318 = vmatpush3.bf16.msra.mxu0 %v358_v4  ;;  %v279_v29 = vld [vmem:[%s481_s2] ss:$0 sm:$0xff] }
   0x8   :  { %319 = vmatprep.subr.bf16.mxu0 %v375_v2  ;;  %v288_v39 = vld [vmem:[%s482_s5] ss:$0 sm:$0xff] }
   0x9   :  { %338 = vmatpush3.bf16.msra.mxu1 %v366_v17 }
   0xa   :  { %339 = vmatprep.subr.bf16.mxu1 %v375_v2 }
   0xb   :  { %320 = vmatpush3.bf16.msra.mxu0 %v359_v10 }
   0xc   :  { %321 = vmatprep.subr.bf16.mxu0 %v375_v2 }
   0xd   :  { %340 = vmatpush3.bf16.msra.mxu1 %v367_v18 }
   0xe   :  { %341 = vmatprep.subr.bf16.mxu1 %v375_v2 }
   0xf   :  { %322 = vmatpush3.bf16.msra.mxu0 %v360_v11 }
  0x10   :  { %323 = vmatprep.subr.bf16.mxu0 %v375_v2 }
  0x11   :  { %342 = vmatpush3.bf16.msra.mxu1 %v368_v19 }
  0x12   :  { %343 = vmatprep.subr.bf16.mxu1 %v375_v2 }
  0x13   :  { %324 = vmatpush3.bf16.msra.mxu0 %v361_v12 }
  0x14   :  { %325 = vmatprep.subr.bf16.mxu0 %v375_v2 }
  0x15   :  { %344 = vmatpush3.bf16.msra.mxu1 %v369_v20 }
  0x16   :  { %345 = vmatprep.subr.bf16.mxu1 %v375_v2 }
  0x17   :  { %326 = vmatpush3.bf16.msra.mxu0 %v362_v13 }
  0x18   :  { %327 = vmatprep.subr.bf16.mxu0 %v375_v2 }
  0x19   :  { %346 = vmatpush3.bf16.msra.mxu1 %v370_v21 }
  0x1a   :  { %347 = vmatprep.subr.bf16.mxu1 %v375_v2 }
  0x1b   :  { %328 = vmatpush3.bf16.msra.mxu0 %v363_v14 }
  0x1c   :  { %329 = vmatprep.subr.bf16.mxu0 %v375_v2 }
  0x1d   :  { %348 = vmatpush3.bf16.msra.mxu1 %v371_v22 }
  0x1e   :  { %349 = vmatprep.subr.bf16.mxu1 %v375_v2 }
  0x1f   :  { %330 = vmatpush3.bf16.msra.mxu0 %v364_v15 }
  0x21   :  { %350 = vmatpush3.bf16.msra.mxu1 %v372_v33 }
  0x90   :  { %v30_v5 = vpop.xlane.xlu0 %29 }
  0x91   :  { %v32_v6 = vmul.f32 0.0078125, %v30_v5 }
  0x93   :  { %v33_v7 = vsub.f32 %v24_v0, %v32_v6 }
  0x95   :  { %v34_v8 = vmul.f32 %v33_v7, %v33_v7 }
  0x97   :  { %v35_v9 = vsel %vm27_vm0, %v34_v8, 0.0 }
  0x98   :  { %36 = vadd.xlane.f32.xlu0 %v35_v9 }
 0x125   :  { %v37_v23 = vpop.xlane.xlu0 %36 }
 0x126   :  { %v38_v24 = vmul.f32 0.0078125, %v37_v23 }
 0x128   :  { %v39_v25 = vadd.f32 1e-05, %v38_v24 }
 0x12a   :  { %373 = vrsqrt.f32 %v39_v25 }
 0x134   :  { %v374_v26 = vpop.eup %373 }
 0x135   :  { %v41_v28 = vmul.f32 %v374_v26, %v33_v7 }
 0x137   :  { %v48_v30 = vmul.f32 %v278_v27, %v41_v28 }
 0x139   :  { %v55_v31 = vadd.f32 %v279_v29, %v48_v30 }
 0x13b   :  { %v56_v32 = vpack.c.bf16 %v55_v31, %v55_v31 }
 0x13d   :  { %332 = vmatmul.mubr.bf16.vlgmr.msra.gmra.mrb[0].mxu0 %v56_v32 }
 0x210   :  { %v155_v34 = vpop.f32.mrb[0].mxu0 }
 0x211   :  { %v161_v35 = vpack.c.bf16 %v155_v34, %v155_v34  ;;  %v333_v36 = vpop.f32.mrb[1].mxu0 }
 0x212   :  { %v158_v37 = vpop.f32.mrb[2].mxu0 }
 0x213   :  { %v334_v38 = vpop.f32.mrb[3].mxu0  ;;  %352 = vmatmul.mubr.bf16.vlgmr.msra.gmra.mrb[0].mxu1 %v161_v35 }
 0x2e6   :  { %v267_v40 = vpop.f32.mrb[0].mxu1 }
 0x2e7   :  { %v268_v41 = vadd.f32 %v288_v39, %v267_v40  ;;  %v353_v42 = vpop.f32.mrb[1].mxu1 }
 0x2e8   :  { %v270_v43 = vpop.f32.mrb[2].mxu1 }
 0x2e9   :  { %273 = vst [vmem:[%s483_s6] sm:$0x3] %v268_v41  ;;  %v354_v44 = vpop.f32.mrb[3].mxu1 }

// kernel: forward.30
= control target key start
LH: loop header
LB: loop body
LE: loop exit
PB: predicated region body
PF: predicated region fallthrough
CT: control target
= control target key end

     0   :  { %v2252_v3 = vmov 0.0   ;;  %v2253_v30 = vmov 0   ;;  %vm2254_vm0 = vmmov 0   ;;  %v128_v53 = vlaneseq  ;;  %s2256_s20 = smov 64   ;;  %s2257_s21 = smov 32   ;;  %s2850_s0 = inlined_call_operand.vmem [shape: f32[16,128], index: 0, kind: input, shape index: {}]   ;;  %s2851_s4 = inlined_call_operand.vmem [shape: bf16[128,384], index: 4, kind: input, shape index: {}]   ;;  %s2852_s2 = inlined_call_operand.vmem [shape: f32[1,128], index: 2, kind: input, shape index: {}]   ;;  %s2853_s3 = inlined_call_operand.vmem [shape: f32[1,128], index: 3, kind: input, shape index: {}]   ;;  %s2854_s5 = inlined_call_operand.vmem [shape: f32[1,384], index: 5, kind: input, shape index: {}]   ;;  %s2855_s1 = inlined_call_operand.vmem [shape: f32[16,16], index: 1, kind: input, shape index: {}]   ;;  %s2856_s6 = inlined_call_operand.vmem [shape: bf16[128,128], index: 6, kind: input, shape index: {}]   ;;  %s2857_s7 = inlined_call_operand.vmem [shape: f32[1,128], index: 7, kind: input, shape index: {}]   ;;  %s2858_s10 = inlined_call_operand.vmem [shape: bf16[128,512], index: 10, kind: input, shape index: {}]   ;;  %s2859_s8 = inlined_call_operand.vmem [shape: f32[1,128], index: 8, kind: input, shape index: {}]   ;;  %s2860_s9 = inlined_call_operand.vmem [shape: f32[1,128], index: 9, kind: input, shape index: {}]   ;;  %s2861_s12 = inlined_call_operand.vmem [shape: bf16[512,128], index: 12, kind: input, shape index: {}]   ;;  %s2862_s11 = inlined_call_operand.vmem [shape: f32[1,512], index: 11, kind: input, shape index: {}]   ;;  %s2863_s13 = inlined_call_operand.vmem [shape: f32[1,128], index: 13, kind: input, shape index: {}]   ;;  %s2864_s14 = inlined_call_operand.vmem [shape: f32[16,128], index: 14, kind: output, shape index: {}]  }
   0x1   :  { %v2336_v0 = vld [vmem:[%s2850_s0] sm:$0xff]  ;;  %v2342_v1 = vld [vmem:[%s2850_s0 + $0x8] sm:$0xff]  ;;  %1951 = vmatprep.subr.bf16.mxu1 %v2252_v3  ;;  %v2070_v18 = vld [vmem:[%s2851_s4 + $0x30] ss:$12 sps:$4 sm:$0xff]   ;;  %303 = vmatprep.mubr.bf16.mxu0 %v2253_v30  ;;  %vm360_vm1 = vcmask 261120   ;;  %vm408_vm2 = vcmask 130048  }
   0x2   :  { %54 = vadd.xlane.f32.xlu0 %v2336_v0  ;;  %v2060_v2 = vld [vmem:[%s2851_s4 + $0x4] ss:$12 sps:$4 sm:$0xff]   ;;  %v2062_v4 = vld [vmem:[%s2851_s4] ss:$12 sps:$4 sm:$0xff]   ;;  %v2063_v5 = vld [vmem:[%s2851_s4 + $0x8] ss:$12 sps:$4 sm:$0xff]   ;;  %1967 = vmatprep.mubr.msk.bf16.mxu1 %vm2254_vm0, %v2252_v3 }
   0x3   :  { %271 = vmatprep.subr.bf16.mxu0 %v2060_v2  ;;  %v2064_v6 = vld [vmem:[%s2851_s4 + $0x1c] ss:$12 sps:$4 sm:$0xff]   ;;  %1952 = vmatpush3.bf16.msra.mxu1 %v2063_v5  ;;  %v2066_v15 = vld [vmem:[%s2851_s4 + $0x18] ss:$12 sps:$4 sm:$0xff]   ;;  %v2067_v16 = vld [vmem:[%s2851_s4 + $0x20] ss:$12 sps:$4 sm:$0xff]  }
   0x4   :  { %272 = vmatpush1.bf16.msra.mxu0 %v2062_v4  ;;  %1953 = vmatprep.subr.bf16.mxu1 %v2252_v3  ;;  %v2068_v17 = vld [vmem:[%s2851_s4 + $0x34] ss:$12 sps:$4 sm:$0xff]   ;;  %v2071_v19 = vld [vmem:[%s2851_s4 + $0x38] ss:$12 sps:$4 sm:$0xff]   ;;  %v2075_v22 = vld [vmem:[%s2851_s4 + $0x50] ss:$12 sps:$4 sm:$0xff]  }
   0x5   :  { %273 = vmatprep.subr.bf16.mxu0 %v2064_v6  ;;  %v2072_v20 = vld [vmem:[%s2851_s4 + $0x4c] ss:$12 sps:$4 sm:$0xff]   ;;  %v2074_v21 = vld [vmem:[%s2851_s4 + $0x48] ss:$12 sps:$4 sm:$0xff]   ;;  %v2076_v23 = vld [vmem:[%s2851_s4 + $0x64] ss:$12 sps:$4 sm:$0xff]  }
   0x6   :  { %56 = vadd.xlane.f32.xlu0 %v2342_v1  ;;  %v2078_v24 = vld [vmem:[%s2851_s4 + $0x60] ss:$12 sps:$4 sm:$0xff]   ;;  %v2079_v25 = vld [vmem:[%s2851_s4 + $0x68] ss:$12 sps:$4 sm:$0xff]   ;;  %v2082_v27 = vld [vmem:[%s2851_s4 + $0x78] ss:$12 sps:$4 sm:$0xff]  }
   0x7   :  { %1954 = vmatpush3.bf16.msra.mxu1 %v2067_v16  ;;  %v2080_v26 = vld [vmem:[%s2851_s4 + $0x7c] ss:$12 sps:$4 sm:$0xff]   ;;  %v2083_v28 = vld [vmem:[%s2851_s4 + $0x80] ss:$12 sps:$4 sm:$0xff]   ;;  %v2087_v32 = vld [vmem:[%s2851_s4 + $0x98] ss:$12 sps:$4 sm:$0xff]  }
   0x8   :  { %274 = vmatpush1.bf16.msra.mxu0 %v2066_v15  ;;  %1955 = vmatprep.subr.bf16.mxu1 %v2252_v3  ;;  %v2084_v29 = vld [vmem:[%s2851_s4 + $0x94] ss:$12 sps:$4 sm:$0xff]   ;;  %v2086_v31 = vld [vmem:[%s2851_s4 + $0x90] ss:$12 sps:$4 sm:$0xff]   ;;  %v2088_v33 = vld [vmem:[%s2851_s4 + $0xac] ss:$12 sps:$4 sm:$0xff]  }
   0x9   :  { %275 = vmatprep.subr.bf16.mxu0 %v2068_v17  ;;  %v2090_v34 = vld [vmem:[%s2851_s4 + $0xa8] ss:$12 sps:$4 sm:$0xff]   ;;  %v2091_v35 = vld [vmem:[%s2851_s4 + $0xb0] ss:$12 sps:$4 sm:$0xff]   ;;  %v1755_v44 = vld [vmem:[%s2852_s2] ss:$0 sm:$0xff] }
   0xa   :  { %v1756_v48 = vld [vmem:[%s2853_s3] ss:$0 sm:$0xff]  ;;  %v2452_v54 = vshrl.u32 %v128_v53, 7  ;;  %vm868_vm3 = vcmask 523264   ;;  %vm871_vm4 = vcmask 785408  }
   0xb   :  { %1956 = vmatpush3.bf16.msra.mxu1 %v2071_v19  ;;  %v126_v56 = vld [vmem:[%s2854_s5] sm:$0x7] }
   0xc   :  { %276 = vmatpush1.bf16.msra.mxu0 %v2070_v18  ;;  %1957 = vmatprep.subr.bf16.mxu1 %v2252_v3  ;;  %v130_v55 = vsub.s32 0, %v2452_v54  ;;  %v138_v57 = vsub.s32 2, %v2452_v54  ;;  %v134_v58 = vsub.s32 1, %v2452_v54 }
   0xd   :  { %277 = vmatprep.subr.bf16.mxu0 %v2072_v20 }
   0xe   :  { %v131_v59 = vrot.slane %v126_v56, %v130_v55  ;;  %v139_v60 = vrot.slane %v126_v56, %v138_v57  ;;  %v135_v63 = vrot.slane %v126_v56, %v134_v58 }
   0xf   :  { %1958 = vmatpush3.bf16.msra.mxu1 %v2075_v22 }
  0x10   :  { %278 = vmatpush1.bf16.msra.mxu0 %v2074_v21  ;;  %1959 = vmatprep.subr.bf16.mxu1 %v2252_v3  ;;  %v2478_v21 = vld [vmem:[%s2855_s1] sm:$0xff] }
  0x11   :  { %279 = vmatprep.subr.bf16.mxu0 %v2076_v23  ;;  %v2483_v23 = vld [vmem:[%s2855_s1 + $0x8] sm:$0xff]  ;;  %s2255_s1 = smov 96  }
  0x13   :  { %1960 = vmatpush3.bf16.msra.mxu1 %v2079_v25 }
  0x14   :  { %280 = vmatpush1.bf16.msra.mxu0 %v2078_v24  ;;  %1961 = vmatprep.subr.bf16.mxu1 %v2252_v3 }
  0x15   :  { %281 = vmatprep.subr.bf16.mxu0 %v2080_v26 }
  0x17   :  { %1962 = vmatpush3.bf16.msra.mxu1 %v2083_v28 }
  0x18   :  { %282 = vmatpush1.bf16.msra.mxu0 %v2082_v27  ;;  %1963 = vmatprep.subr.bf16.mxu1 %v2252_v3 }
  0x19   :  { %283 = vmatprep.subr.bf16.mxu0 %v2084_v29 }
  0x1b   :  { %1964 = vmatpush3.bf16.msra.mxu1 %v2087_v32 }
  0x1c   :  { %284 = vmatpush1.bf16.msra.mxu0 %v2086_v31  ;;  %1965 = vmatprep.subr.bf16.mxu1 %v2252_v3 }
  0x1d   :  { %285 = vmatprep.subr.bf16.mxu0 %v2088_v33 }
  0x1f   :  { %1966 = vmatpush3.bf16.msra.mxu1 %v2091_v35 }
  0x20   :  { %286 = vmatpush1.bf16.msra.mxu0 %v2090_v34  ;;  %1971 = vmatprep.subr.bf16.mxu1 %v2252_v3 }
  0x21   :  { %1995 = vmatprep.subr.bf16.mxu0 %v2252_v3 }
  0x8f   :  { %v55_v7 = vpop.xlane.xlu0 %54 }
  0x90   :  { %v59_v8 = vmul.f32 0.0078125, %v55_v7 }
  0x92   :  { %v2360_v9 = vsub.f32 %v2336_v0, %v59_v8 }
  0x93   :  { %v57_v10 = vpop.xlane.xlu0 %56 }
  0x94   :  { %v60_v11 = vmul.f32 0.0078125, %v57_v10  ;;  %v63_v12 = vmul.f32 %v2360_v9, %v2360_v9 }
  0x96   :  { %v2365_v13 = vsub.f32 %v2342_v1, %v60_v11  ;;  %65 = vadd.xlane.f32.xlu1 %v63_v12 }
  0x98   :  { %v64_v14 = vmul.f32 %v2365_v13, %v2365_v13 }
  0x9a   :  { %67 = vadd.xlane.f32.xlu1 %v64_v14 }
 0x123   :  { %v66_v36 = vpop.xlane.xlu1 %65 }
 0x124   :  { %v69_v37 = vmul.f32 0.0078125, %v66_v36 }
 0x126   :  { %v71_v38 = vadd.f32 1e-05, %v69_v37 }
 0x127   :  { %v68_v39 = vpop.xlane.xlu1 %67 }
 0x128   :  { %2180 = vrsqrt.f32 %v71_v38  ;;  %v70_v40 = vmul.f32 0.0078125, %v68_v39 }
 0x12a   :  { %v72_v41 = vadd.f32 1e-05, %v70_v40 }
 0x12c   :  { %2182 = vrsqrt.f32 %v72_v41 }
 0x132   :  { %v2181_v42 = vpop.eup %2180 }
 0x133   :  { %v75_v43 = vmul.f32 %v2181_v42, %v2360_v9 }
 0x135   :  { %v83_v47 = vmul.f32 %v1755_v44, %v75_v43 }
 0x136   :  { %v2183_v45 = vpop.eup %2182 }
 0x137   :  { %v76_v46 = vmul.f32 %v2183_v45, %v2365_v13  ;;  %v91_v50 = vadd.f32 %v1756_v48, %v83_v47 }
 0x139   :  { %v84_v49 = vmul.f32 %v1755_v44, %v76_v46 }
 0x13b   :  { %v92_v51 = vadd.f32 %v1756_v48, %v84_v49 }
 0x13d   :  { %v93_v52 = vpack.c.bf16 %v92_v51, %v91_v50 }
 0x13f   :  { %304 = vmatmul.mubr.bf16.vlgmr.msra.gmra.mrb[0].mxu0 %v93_v52  ;;  %1968 = vmatmul.mubr.bf16.vlgmr.msra.gmra.mrb[0].mxu1 %v93_v52 }
 0x140   :  { %1973 = vmatprep.mubr.msk.bf16.mxu1 %vm2254_vm0, %v2252_v3  ;;  %1997 = vmatprep.mubr.msk.bf16.mxu0 %vm2254_vm0, %v2252_v3 }
 0x212   :  { %v305_v61 = vpop.f32.mrb[0].mxu0  ;;  %v348_v62 = vpop.f32.mrb[0].mxu1 }
 0x213   :  { %v306_v2 = vadd.f32 %v305_v61, %v131_v59  ;;  %v307_v4 = vpop.f32.mrb[1].mxu0  ;;  %v1969_v5 = vpop.f32.mrb[1].mxu1  ;;  %v349_v8 = vadd.f32 %v348_v62, %v139_v60 }
 0x214   :  { %v309_v6 = vpop.f32.mrb[2].mxu0  ;;  %v351_v7 = vpop.f32.mrb[2].mxu1  ;;  %v308_v13 = vadd.f32 %v307_v4, %v135_v63 }
 0x215   :  { %v310_v9 = vadd.f32 %v309_v6, %v131_v59  ;;  %v352_v10 = vadd.f32 %v351_v7, %v139_v60  ;;  %v311_v11 = vpop.f32.mrb[3].mxu0  ;;  %v1970_v12 = vpop.f32.mrb[3].mxu1  ;;  %v355_v15 = vmul.f32 0.17677669, %v306_v2 }
 0x216   :  { %v312_v14 = vadd.f32 %v311_v11, %v135_v63 }
 0x217   :  { %v356_v16 = vmul.f32 0.17677669, %v310_v9  ;;  %v2466_v17 = vpack.c.bf16 %v352_v10, %v349_v8 }
 0x218   :  { %v358_v18 = vpack.c.bf16 %v312_v14, %v308_v13 }
 0x219   :  { %v357_v19 = vpack.c.bf16 %v356_v16, %v355_v15 }
 0x21a   :  { %v365_v20 = vsel %vm360_vm1, %v358_v18, 0 }
 0x21b   :  { %1972 = vmatpush3.bf16.xpose.msra.mxu1 %v365_v20 }
 0x21c   :  { %1977 = vmatprep.subr.bf16.mxu1 %v2252_v3 }
 0x222   :  { %1974 = vmatmul.mubr.msk.bf16.vlgmr.msra.gmra.mrb[4].mxu1 %vm360_vm1, %v357_v19 }
 0x223   :  { %1978 = vmatpush3.bf16.msra.mxu1 %v2466_v17  ;;  %1979 = vmatprep.mubr.msk.bf16.mxu1 %vm2254_vm0, %v2252_v3 }
 0x224   :  { %1983 = vmatprep.subr.bf16.mxu1 %v2252_v3 }
 0x2f5   :  { %v401_v22 = vpop.f32.mrb[4].mxu1 }
 0x2f6   :  { %v402_v24 = vadd.f32 %v401_v22, %v2478_v21  ;;  %v1975_v25 = vpop.f32.mrb[5].mxu1 }
 0x2f7   :  { %v404_v26 = vpop.f32.mrb[6].mxu1 }
 0x2f8   :  { %v405_v27 = vadd.f32 %v404_v26, %v2483_v23  ;;  %v1976_v28 = vpop.f32.mrb[7].mxu1  ;;  %v409_v29 = vsel %vm408_vm2, %v402_v24, -inf }
 0x2f9   :  { %410 = vmax.xlane.f32.xlu0 %v409_v29 }
 0x2fa   :  { %v412_v31 = vsel %vm408_vm2, %v405_v27, -inf }
 0x2fb   :  { %413 = vmax.xlane.f32.xlu1 %v412_v31 }
 0x386   :  { %v411_v32 = vpop.xlane.xlu0 %410 }
 0x387   :  { %v415_v33 = vsub.f32 %v402_v24, %v411_v32 }
 0x388   :  { %v414_v34 = vpop.xlane.xlu1 %413 }
 0x389   :  { %v417_v35 = vmul.f32 1.442695, %v415_v33  ;;  %v416_v36 = vsub.f32 %v405_v27, %v414_v34 }
 0x38b   :  { %2184 = vpow2.f32 %v417_v35  ;;  %v419_v37 = vmul.f32 1.442695, %v416_v36 }
 0x38d   :  { %2186 = vpow2.f32 %v419_v37 }
 0x395   :  { %v2185_v38 = vpop.eup %2184 }
 0x396   :  { %v421_v39 = vsel %vm408_vm2, %v2185_v38, 0.0 }
 0x397   :  { %v2187_v40 = vpop.eup %2186  ;;  %422 = vadd.xlane.f32.xlu0 %v421_v39 }
 0x398   :  { %v424_v41 = vsel %vm408_vm2, %v2187_v40, 0.0 }
 0x399   :  { %425 = vadd.xlane.f32.xlu1 %v424_v41 }
 0x3aa   :  { %477 = vrot.lane.b32.xlu1 %v357_v19, %s2255_s1 }
 0x3ad   :  { %480 = vrot.lane.b32.xlu0 %v358_v18, %s2255_s1 }
 0x3ae   :  { %602 = vrot.lane.b32.xlu1 %v358_v18, %s2256_s20 }
 0x3b1   :  { %723 = vrot.lane.b32.xlu0 %v358_v18, %s2257_s21 }
 0x3b2   :  { %600 = vrot.lane.b32.xlu1 %v357_v19, %s2256_s20 }
 0x3b6   :  { %721 = vrot.lane.b32.xlu1 %v357_v19, %s2257_s21 }
 0x424   :  { %v423_v42 = vpop.xlane.xlu0 %422 }
 0x425   :  { %2188 = vrcp.f32 %v423_v42 }
 0x426   :  { %v426_v43 = vpop.xlane.xlu1 %425 }
 0x427   :  { %2190 = vrcp.f32 %v426_v43 }
 0x428   :  { %v481_v45 = vpop.permute.xlu0 %480 }
 0x429   :  { %v486_v56 = vsel %vm360_vm1, %v481_v45, 0 }
 0x42a   :  { %v478_v44 = vpop.permute.xlu1 %477 }
 0x42c   :  { %v724_v52 = vpop.permute.xlu0 %723 }
 0x42d   :  { %v729_v60 = vsel %vm360_vm1, %v724_v52, 0 }
 0x42e   :  { %v603_v46 = vpop.permute.xlu1 %602 }
 0x42f   :  { %v2189_v47 = vpop.eup %2188  ;;  %v608_v48 = vsel %vm360_vm1, %v603_v46, 0 }
 0x430   :  { %1996 = vmatpush3.bf16.xpose.msra.mxu0 %v608_v48  ;;  %v429_v50 = vmul.f32 %v2189_v47, %v2185_v38 }
 0x431   :  { %v2191_v49 = vpop.eup %2190  ;;  %2007 = vmatprep.subr.bf16.mxu0 %v2252_v3 }
 0x432   :  { %v430_v51 = vmul.f32 %v2191_v49, %v2187_v40  ;;  %v601_v59 = vpop.permute.xlu1 %600 }
 0x434   :  { %v431_v53 = vpack.c.bf16 %v430_v51, %v429_v50 }
 0x436   :  { %1980 = vmatmul.mubr.msk.bf16.vlgmr.msra.gmra.mrb[8].mxu1 %vm408_vm2, %v431_v53  ;;  %v722_v61 = vpop.permute.xlu1 %721 }
 0x437   :  { %1984 = vmatpush3.bf16.xpose.msra.mxu1 %v486_v56  ;;  %1998 = vmatmul.mubr.msk.bf16.vlgmr.msra.gmra.mrb[4].mxu0 %vm360_vm1, %v601_v59 }
 0x438   :  { %2008 = vmatpush3.bf16.xpose.msra.mxu0 %v729_v60  ;;  %1985 = vmatprep.mubr.msk.bf16.mxu1 %vm2254_vm0, %v2252_v3 }
 0x439   :  { %2009 = vmatprep.mubr.msk.bf16.mxu0 %vm2254_vm0, %v2252_v3  ;;  %1989 = vmatprep.subr.bf16.mxu1 %v2252_v3 }
 0x43a   :  { %2019 = vmatprep.subr.bf16.mxu0 %v2252_v3 }
 0x43e   :  { %1986 = vmatmul.mubr.msk.bf16.vlgmr.msra.gmra.mrb[12].mxu1 %vm360_vm1, %v478_v44 }
 0x43f   :  { %2010 = vmatmul.mubr.msk.bf16.vlgmr.msra.gmra.mrb[8].mxu0 %vm360_vm1, %v722_v61  ;;  %1991 = vmatprep.mubr.msk.bf16.mxu1 %vm2254_vm0, %v2252_v3 }
 0x440   :  { %2035 = vmatprep.mubr.msk.bf16.mxu0 %vm2254_vm0, %v2252_v3 }
 0x509   :  { %v2515_v62 = vpop.f32.mrb[8].mxu1 }
 0x50a   :  { %v1981_v63 = vpop.f32.mrb[9].mxu1  ;;  %v644_v2 = vpop.f32.mrb[4].mxu0 }
 0x50b   :  { %v2517_v4 = vpop.f32.mrb[10].mxu1  ;;  %v1999_v5 = vpop.f32.mrb[5].mxu0  ;;  %v645_v15 = vadd.f32 %v644_v2, %v2478_v21 }
 0x50c   :  { %v1982_v6 = vpop.f32.mrb[11].mxu1  ;;  %v647_v7 = vpop.f32.mrb[6].mxu0 }
 0x50d   :  { %v2000_v8 = vpop.f32.mrb[7].mxu0  ;;  %v648_v26 = vadd.f32 %v647_v7, %v2483_v23  ;;  %v651_v27 = vsel %vm408_vm2, %v645_v15, -inf }
 0x50f   :  { %v654_v31 = vsel %vm408_vm2, %v648_v26, -inf }
 0x511   :  { %v522_v9 = vpop.f32.mrb[12].mxu1 }
 0x512   :  { %v523_v10 = vadd.f32 %v522_v9, %v2478_v21  ;;  %v1987_v11 = vpop.f32.mrb[13].mxu1  ;;  %v765_v12 = vpop.f32.mrb[8].mxu0 }
 0x513   :  { %v525_v13 = vpop.f32.mrb[14].mxu1  ;;  %v2011_v14 = vpop.f32.mrb[9].mxu0  ;;  %v766_v29 = vadd.f32 %v765_v12, %v2478_v21 }
 0x514   :  { %v526_v16 = vadd.f32 %v525_v13, %v2483_v23  ;;  %v1988_v18 = vpop.f32.mrb[15].mxu1  ;;  %v768_v19 = vpop.f32.mrb[10].mxu0  ;;  %v529_v20 = vsel %vm408_vm2, %v523_v10, -inf }
 0x515   :  { %v2012_v22 = vpop.f32.mrb[11].mxu0  ;;  %530 = vmax.xlane.f32.xlu0 %v529_v20  ;;  %v769_v24 = vadd.f32 %v768_v19, %v2483_v23  ;;  %v772_v32 = vsel %vm408_vm2, %v766_v29, -inf }
 0x516   :  { %v532_v25 = vsel %vm408_vm2, %v526_v16, -inf }
 0x517   :  { %533 = vmax.xlane.f32.xlu1 %v532_v25  ;;  %v775_v28 = vsel %vm408_vm2, %v769_v24, -inf }
 0x519   :  { %652 = vmax.xlane.f32.xlu0 %v651_v27 }
 0x51b   :  { %776 = vmax.xlane.f32.xlu1 %v775_v28 }
 0x51d   :  { %655 = vmax.xlane.f32.xlu0 %v654_v31 }
 0x521   :  { %773 = vmax.xlane.f32.xlu0 %v772_v32 }
 0x5a2   :  { %v531_v33 = vpop.xlane.xlu0 %530 }
 0x5a3   :  { %v535_v41 = vsub.f32 %v523_v10, %v531_v33  ;;  %v2092_v33 = vld [vmem:[%s2856_s6] sm:$0xff]  }
 0x5a4   :  { %v534_v34 = vpop.xlane.xlu1 %533  ;;  %2020 = vmatpush3.bf16.msra.mxu0 %v2092_v33 }
 0x5a5   :  { %v536_v42 = vsub.f32 %v526_v16, %v534_v34  ;;  %v537_v46 = vmul.f32 1.442695, %v535_v41  ;;  %v2093_v34 = vld [vmem:[%s2856_s6 + $0x8] sm:$0xff]   ;;  %2021 = vmatprep.subr.bf16.mxu0 %v2252_v3 }
 0x5a6   :  { %v653_v35 = vpop.xlane.xlu0 %652 }
 0x5a7   :  { %v657_v36 = vsub.f32 %v645_v15, %v653_v35  ;;  %v539_v47 = vmul.f32 1.442695, %v536_v42  ;;  %v2094_v35 = vld [vmem:[%s2856_s6 + $0x10] sm:$0xff]  }
 0x5a8   :  { %v777_v37 = vpop.xlane.xlu1 %776  ;;  %2022 = vmatpush3.bf16.msra.mxu0 %v2093_v34 }
 0x5a9   :  { %v659_v23 = vmul.f32 1.442695, %v657_v36  ;;  %v779_v38 = vsub.f32 %v769_v24, %v777_v37  ;;  %2023 = vmatprep.subr.bf16.mxu0 %v2252_v3  ;;  %v2095_v36 = vld [vmem:[%s2856_s6 + $0x18] sm:$0xff]   ;;  %v2096_v37 = vld [vmem:[%s2856_s6 + $0x20] sm:$0xff]  }
 0x5aa   :  { %v656_v39 = vpop.xlane.xlu0 %655 }
 0x5ab   :  { %2192 = vpow2.f32 %v659_v23  ;;  %v658_v40 = vsub.f32 %v648_v26, %v656_v39  ;;  %v782_v43 = vmul.f32 1.442695, %v779_v38  ;;  %v2097_v39 = vld [vmem:[%s2856_s6 + $0x28] sm:$0xff]  }
 0x5ac   :  { %2024 = vmatpush3.bf16.msra.mxu0 %v2094_v35 }
 0x5ad   :  { %v661_v21 = vmul.f32 1.442695, %v658_v40  ;;  %2025 = vmatprep.subr.bf16.mxu0 %v2252_v3 }
 0x5ae   :  { %v774_v44 = vpop.xlane.xlu0 %773 }
 0x5af   :  { %2194 = vpow2.f32 %v661_v21  ;;  %v778_v45 = vsub.f32 %v766_v29, %v774_v44 }
 0x5b0   :  { %2196 = vpow2.f32 %v782_v43  ;;  %2026 = vmatpush3.bf16.msra.mxu0 %v2095_v36  ;;  %v2098_v43 = vld [vmem:[%s2856_s6 + $0x30] sm:$0xff]  }
 0x5b1   :  { %v780_v48 = vmul.f32 1.442695, %v778_v45  ;;  %2027 = vmatprep.subr.bf16.mxu0 %v2252_v3  ;;  %v2099_v45 = vld [vmem:[%s2856_s6 + $0x38] sm:$0xff]  }
 0x5b3   :  { %2198 = vpow2.f32 %v780_v48 }
 0x5b4   :  { %2200 = vpow2.f32 %v537_v46  ;;  %2028 = vmatpush3.bf16.msra.mxu0 %v2096_v37  ;;  %v2114_v37 = vld [vmem:[%s2858_s10 + $0x44] ss:$16 sps:$4 sm:$0xff]  }
 0x5b5   :  { %v2193_v49 = vpop.eup %2192  ;;  %2202 = vpow2.f32 %v539_v47  ;;  %2029 = vmatprep.subr.bf16.mxu0 %v2252_v3 }
 0x5b6   :  { %v663_v50 = vsel %vm408_vm2, %v2193_v49, 0.0 }
 0x5b7   :  { %664 = vadd.xlane.f32.xlu0 %v663_v50 }
 0x5b8   :  { %2030 = vmatpush3.bf16.msra.mxu0 %v2097_v39  ;;  %v2115_v39 = vld [vmem:[%s2858_s10 + $0x48] ss:$16 sps:$4 sm:$0xff]  }
 0x5b9   :  { %v2195_v51 = vpop.eup %2194  ;;  %2031 = vmatprep.subr.bf16.mxu0 %v2252_v3 }
 0x5ba   :  { %v666_v52 = vsel %vm408_vm2, %v2195_v51, 0.0  ;;  %v2197_v53 = vpop.eup %2196 }
 0x5bb   :  { %667 = vadd.xlane.f32.xlu1 %v666_v52  ;;  %v787_v61 = vsel %vm408_vm2, %v2197_v53, 0.0 }
 0x5bc   :  { %2032 = vmatpush3.bf16.msra.mxu0 %v2098_v43  ;;  %v2121_v43 = vld [vmem:[%s2858_s10 + $0x68] ss:$16 sps:$4 sm:$0xff]  }
 0x5bd   :  { %v2199_v56 = vpop.eup %2198  ;;  %2033 = vmatprep.subr.bf16.mxu0 %v2252_v3 }
 0x5be   :  { %v2201_v59 = vpop.eup %2200  ;;  %v784_v60 = vsel %vm408_vm2, %v2199_v56, 0.0 }
 0x5bf   :  { %v2203_v63 = vpop.eup %2202  ;;  %785 = vadd.xlane.f32.xlu0 %v784_v60  ;;  %788 = vadd.xlane.f32.xlu1 %v787_v61  ;;  %v541_v2 = vsel %vm408_vm2, %v2201_v59, 0.0 }
 0x5c0   :  { %v544_v5 = vsel %vm408_vm2, %v2203_v63, 0.0  ;;  %2034 = vmatpush3.bf16.msra.mxu0 %v2099_v45  ;;  %v2124_v45 = vld [vmem:[%s2858_s10 + $0x80] ss:$16 sps:$4 sm:$0xff]  }
 0x5c3   :  { %542 = vadd.xlane.f32.xlu0 %v541_v2  ;;  %545 = vadd.xlane.f32.xlu1 %v544_v5 }
 0x5d4   :  { %674 = vrot.lane.b32.xlu1 %v2466_v17, %s2256_s20 }
 0x5d8   :  { %795 = vrot.lane.b32.xlu1 %v2466_v17, %s2257_s21 }
 0x5d9   :  { %553 = vrot.lane.b32.xlu0 %v2466_v17, %s2255_s1 }
 0x644   :  { %v665_v6 = vpop.xlane.xlu0 %664 }
 0x648   :  { %v668_v7 = vpop.xlane.xlu1 %667 }
 0x64c   :  { %v786_v8 = vpop.xlane.xlu0 %785  ;;  %v789_v9 = vpop.xlane.xlu1 %788 }
 0x650   :  { %v543_v10 = vpop.xlane.xlu0 %542  ;;  %v546_v11 = vpop.xlane.xlu1 %545 }
 0x651   :  { %2204 = vrcp.f32 %v543_v10 }
 0x652   :  { %2206 = vrcp.f32 %v546_v11 }
 0x653   :  { %2208 = vrcp.f32 %v668_v7 }
 0x654   :  { %v554_v12 = vpop.permute.xlu0 %553  ;;  %2210 = vrcp.f32 %v665_v6  ;;  %v675_v19 = vpop.permute.xlu1 %674 }
 0x655   :  { %1990 = vmatpush3.bf16.msra.mxu1 %v554_v12  ;;  %2212 = vrcp.f32 %v786_v8 }
 0x656   :  { %2001 = vmatprep.subr.bf16.mxu1 %v2252_v3  ;;  %2214 = vrcp.f32 %v789_v9 }
 0x658   :  { %v796_v28 = vpop.permute.xlu1 %795 }
 0x65b   :  { %v2205_v13 = vpop.eup %2204 }
 0x65c   :  { %v2207_v14 = vpop.eup %2206  ;;  %v549_v15 = vmul.f32 %v2205_v13, %v2201_v59 }
 0x65d   :  { %v550_v16 = vmul.f32 %v2207_v14, %v2203_v63  ;;  %v2209_v18 = vpop.eup %2208 }
 0x65e   :  { %v2211_v20 = vpop.eup %2210  ;;  %v672_v22 = vmul.f32 %v2209_v18, %v2195_v51 }
 0x65f   :  { %v551_v17 = vpack.c.bf16 %v550_v16, %v549_v15  ;;  %v671_v24 = vmul.f32 %v2211_v20, %v2193_v49  ;;  %v2213_v25 = vpop.eup %2212  ;;  %v1797_v15 = vld [vmem:[%s2857_s7] ss:$0 sm:$0xff] }
 0x660   :  { %v2215_v27 = vpop.eup %2214  ;;  %v792_v29 = vmul.f32 %v2213_v25, %v2199_v56  ;;  %v2108_v25 = vld [vmem:[%s2858_s10 + $0x24] ss:$16 sps:$4 sm:$0xff]  }
 0x661   :  { %1992 = vmatmul.mubr.msk.bf16.vlgmr.msra.gmra.mrb[16].mxu1 %vm408_vm2, %v551_v17  ;;  %v673_v26 = vpack.c.bf16 %v672_v22, %v671_v24  ;;  %v793_v31 = vmul.f32 %v2215_v27, %v2197_v53  ;;  %v2103_v22 = vld [vmem:[%s2858_s10 + $0x8] ss:$16 sps:$4 sm:$0xff]   ;;  %v2106_v24 = vld [vmem:[%s2858_s10 + $0x20] ss:$16 sps:$4 sm:$0xff]   ;;  %v2111_v27 = vld [vmem:[%s2858_s10 + $0x2c] ss:$16 sps:$4 sm:$0xff]  }
 0x662   :  { %2002 = vmatpush3.bf16.msra.mxu1 %v675_v19  ;;  %2003 = vmatprep.mubr.msk.bf16.mxu1 %vm2254_vm0, %v2252_v3 }
 0x663   :  { %2013 = vmatprep.subr.bf16.mxu1 %v2252_v3  ;;  %v794_v32 = vpack.c.bf16 %v793_v31, %v792_v29 }
 0x669   :  { %2004 = vmatmul.mubr.msk.bf16.vlgmr.msra.gmra.mrb[20].mxu1 %vm408_vm2, %v673_v26  ;;  %v2109_v26 = vld [vmem:[%s2858_s10 + $0x28] ss:$16 sps:$4 sm:$0xff]  }
 0x66a   :  { %2014 = vmatpush3.bf16.msra.mxu1 %v796_v28  ;;  %2015 = vmatprep.mubr.msk.bf16.mxu1 %vm2254_vm0, %v2252_v3 }
 0x671   :  { %2016 = vmatmul.mubr.msk.bf16.vlgmr.msra.gmra.mrb[24].mxu1 %vm408_vm2, %v794_v32 }
 0x672   :  { %1278 = vmatprep.mubr.bf16.mxu1 %v2253_v30 }
 0x734   :  { %v593_v23 = vpop.f32.mrb[16].mxu1 }
 0x735   :  { %v1993_v38 = vpop.f32.mrb[17].mxu1 }
 0x736   :  { %v596_v40 = vpop.f32.mrb[18].mxu1  ;;  %v2112_v38 = vld [vmem:[%s2858_s10 + $0x40] ss:$16 sps:$4 sm:$0xff]  }
 0x737   :  { %v2045_v41 = vpack.i.bf16 %v596_v40, %v593_v23  ;;  %v1994_v42 = vpop.f32.mrb[19].mxu1  ;;  %v2117_v23 = vld [vmem:[%s2858_s10 + $0x4c] ss:$16 sps:$4 sm:$0xff]   ;;  %v2120_v40 = vld [vmem:[%s2858_s10 + $0x64] ss:$16 sps:$4 sm:$0xff]  }
 0x738   :  { %v2118_v42 = vld [vmem:[%s2858_s10 + $0x60] ss:$16 sps:$4 sm:$0xff]  }
 0x739   :  { %2046 = vrot.lane.b32.xlu1 %v2045_v41, %s2257_s21  ;;  %v2123_v41 = vld [vmem:[%s2858_s10 + $0x6c] ss:$16 sps:$4 sm:$0xff]  }
 0x73c   :  { %v714_v21 = vpop.f32.mrb[20].mxu1 }
 0x73d   :  { %v2005_v44 = vpop.f32.mrb[21].mxu1 }
 0x73e   :  { %v717_v46 = vpop.f32.mrb[22].mxu1  ;;  %v2129_v44 = vld [vmem:[%s2858_s10 + $0x8c] ss:$16 sps:$4 sm:$0xff]  }
 0x73f   :  { %v2050_v47 = vpack.i.bf16 %v717_v46, %v714_v21  ;;  %v2006_v48 = vpop.f32.mrb[23].mxu1  ;;  %v2126_v21 = vld [vmem:[%s2858_s10 + $0x84] ss:$16 sps:$4 sm:$0xff]   ;;  %v2127_v46 = vld [vmem:[%s2858_s10 + $0x88] ss:$16 sps:$4 sm:$0xff]  }
 0x740   :  { %v2135_v48 = vld [vmem:[%s2858_s10 + $0xac] ss:$16 sps:$4 sm:$0xff]  }
 0x741   :  { %2051 = vrot.lane.b32.xlu0 %v2050_v47, %s2256_s20  ;;  %v2132_v47 = vld [vmem:[%s2858_s10 + $0xa4] ss:$16 sps:$4 sm:$0xff]  }
 0x744   :  { %v835_v49 = vpop.f32.mrb[24].mxu1 }
 0x745   :  { %v2017_v50 = vpop.f32.mrb[25].mxu1 }
 0x746   :  { %v838_v51 = vpop.f32.mrb[26].mxu1  ;;  %v2133_v50 = vld [vmem:[%s2858_s10 + $0xa8] ss:$16 sps:$4 sm:$0xff]  }
 0x747   :  { %v2055_v52 = vpack.i.bf16 %v838_v51, %v835_v49  ;;  %v2018_v53 = vpop.f32.mrb[27].mxu1  ;;  %v2130_v49 = vld [vmem:[%s2858_s10 + $0xa0] ss:$16 sps:$4 sm:$0xff]   ;;  %v2138_v51 = vld [vmem:[%s2858_s10 + $0xc4] ss:$16 sps:$4 sm:$0xff]  }
 0x748   :  { %v2136_v53 = vld [vmem:[%s2858_s10 + $0xc0] ss:$16 sps:$4 sm:$0xff]  }
 0x749   :  { %2056 = vrot.lane.b32.xlu1 %v2055_v52, %s2255_s1  ;;  %v2141_v52 = vld [vmem:[%s2858_s10 + $0xcc] ss:$16 sps:$4 sm:$0xff]  }
 0x7ab   :  { %v2047_v56 = vpop.permute.xlu1 %2046 }
 0x7ac   :  { %v2049_v59 = vunpack.i.h.bf16 %v2047_v56  ;;  %v2048_v60 = vunpack.i.l.bf16 %v2047_v56  ;;  %v2139_v56 = vld [vmem:[%s2858_s10 + $0xc8] ss:$16 sps:$4 sm:$0xff]  }
 0x7ae   :  { %v867_v5 = vsel %vm360_vm1, %v2517_v4, %v2049_v59  ;;  %v866_v6 = vsel %vm360_vm1, %v2515_v62, %v2048_v60  ;;  %v2147_v59 = vld [vmem:[%s2858_s10 + $0xec] ss:$16 sps:$4 sm:$0xff]   ;;  %v2142_v60 = vld [vmem:[%s2858_s10 + $0xe0] ss:$16 sps:$4 sm:$0xff]  }
 0x7b3   :  { %v2052_v3 = vpop.permute.xlu0 %2051 }
 0x7b4   :  { %v2054_v61 = vunpack.i.h.bf16 %v2052_v3  ;;  %v2053_v63 = vunpack.i.l.bf16 %v2052_v3  ;;  %v2144_v3 = vld [vmem:[%s2858_s10 + $0xe4] ss:$16 sps:$4 sm:$0xff]  }
 0x7b6   :  { %v870_v9 = vsel %vm868_vm3, %v867_v5, %v2054_v61  ;;  %v869_v10 = vsel %vm868_vm3, %v866_v6, %v2053_v63  ;;  %v2145_v61 = vld [vmem:[%s2858_s10 + $0xe8] ss:$16 sps:$4 sm:$0xff]  }
 0x7bb   :  { %v2057_v2 = vpop.permute.xlu1 %2056 }
 0x7bc   :  { %v2059_v7 = vunpack.i.h.bf16 %v2057_v2  ;;  %v2058_v8 = vunpack.i.l.bf16 %v2057_v2 }
 0x7be   :  { %v873_v11 = vsel %vm871_vm4, %v870_v9, %v2059_v7  ;;  %v872_v12 = vsel %vm871_vm4, %v869_v10, %v2058_v8 }
 0x7bf   :  { %v874_v13 = vpack.c.bf16 %v873_v11, %v872_v12  ;;  %v1798_v11 = vld [vmem:[%s2859_s8] ss:$0 sm:$0xff] }
 0x7c1   :  { %2036 = vmatmul.mubr.bf16.vlgmr.msra.gmra.mrb[12].mxu0 %v874_v13 }
 0x7c2   :  { %1321 = vmatprep.mubr.bf16.mxu0 %v2253_v30  ;;  %v2100_v30 = vld [vmem:[%s2858_s10] ss:$16 sps:$4 sm:$0xff]  }
 0x894   :  { %v973_v14 = vpop.f32.mrb[12].mxu0 }
 0x895   :  { %v980_v4 = vadd.f32 %v973_v14, %v2336_v0  ;;  %v2037_v16 = vpop.f32.mrb[13].mxu0  ;;  %v2102_v0 = vld [vmem:[%s2858_s10 + $0x4] ss:$16 sps:$4 sm:$0xff]  }
 0x896   :  { %v976_v17 = vpop.f32.mrb[14].mxu0  ;;  %1246 = vmatprep.subr.bf16.mxu1 %v2102_v0  ;;  %v2150_v0 = vld [vmem:[%s2861_s12] sm:$0xff]  }
 0x897   :  { %v2596_v62 = vadd.f32 %v1797_v15, %v980_v4  ;;  %v981_v18 = vadd.f32 %v976_v17, %v2342_v1  ;;  %v2038_v19 = vpop.f32.mrb[15].mxu0  ;;  %v2105_v1 = vld [vmem:[%s2858_s10 + $0xc] ss:$16 sps:$4 sm:$0xff]   ;;  %1247 = vmatpush1.bf16.msra.mxu1 %v2100_v30  ;;  %v2149_v30 = vld [vmem:[%s2861_s12 + $0xc0] sm:$0xff]  }
 0x898   :  { %1289 = vmatprep.subr.bf16.mxu0 %v2105_v1  ;;  %1248 = vmatprep.subr.bf16.mxu1 %v2108_v25  ;;  %v2148_v19 = vld [vmem:[%s2861_s12 + $0x40] sm:$0xff]   ;;  %v2152_v1 = vld [vmem:[%s2861_s12 + $0x48] sm:$0xff]  }
 0x899   :  { %v2599_v20 = vadd.f32 %v1797_v15, %v981_v18  ;;  %993 = vadd.xlane.f32.xlu0 %v2596_v62  ;;  %1290 = vmatpush1.bf16.msra.mxu0 %v2103_v22  ;;  %v1799_v15 = vld [vmem:[%s2860_s9] ss:$0 sm:$0xff]  ;;  %v2154_v25 = vld [vmem:[%s2861_s12 + $0x8] sm:$0xff]  }
 0x89a   :  { %1291 = vmatprep.subr.bf16.mxu0 %v2111_v27  ;;  %v2151_v22 = vld [vmem:[%s2861_s12 + $0x80] sm:$0xff]   ;;  %v2156_v27 = vld [vmem:[%s2861_s12 + $0x50] sm:$0xff]  }
 0x89b   :  { %995 = vadd.xlane.f32.xlu1 %v2599_v20  ;;  %1249 = vmatpush1.bf16.msra.mxu1 %v2106_v24  ;;  %v2153_v24 = vld [vmem:[%s2861_s12 + $0xc8] sm:$0xff]  }
 0x89c   :  { %1250 = vmatprep.subr.bf16.mxu1 %v2114_v37  ;;  %v2165_v37 = vld [vmem:[%s2861_s12 + $0xe0] sm:$0xff]  }
 0x89d   :  { %1292 = vmatpush1.bf16.msra.mxu0 %v2109_v26  ;;  %v2155_v26 = vld [vmem:[%s2861_s12 + $0x88] sm:$0xff]  }
 0x89e   :  { %1293 = vmatprep.subr.bf16.mxu0 %v2117_v23  ;;  %v2166_v23 = vld [vmem:[%s2861_s12 + $0x20] sm:$0xff]  }
 0x89f   :  { %1251 = vmatpush1.bf16.msra.mxu1 %v2112_v38  ;;  %v2167_v38 = vld [vmem:[%s2861_s12 + $0xa0] sm:$0xff]  }
 0x8a0   :  { %1252 = vmatprep.subr.bf16.mxu1 %v2120_v40  ;;  %v2169_v40 = vld [vmem:[%s2861_s12 + $0xe8] sm:$0xff]  }
 0x8a1   :  { %1294 = vmatpush1.bf16.msra.mxu0 %v2115_v39  ;;  %v2168_v39 = vld [vmem:[%s2861_s12 + $0x68] sm:$0xff]  }
 0x8a2   :  { %1295 = vmatprep.subr.bf16.mxu0 %v2123_v41  ;;  %v2170_v41 = vld [vmem:[%s2861_s12 + $0x28] sm:$0xff]  }
 0x8a3   :  { %1253 = vmatpush1.bf16.msra.mxu1 %v2118_v42  ;;  %v2171_v42 = vld [vmem:[%s2861_s12 + $0xa8] sm:$0xff]  }
 0x8a4   :  { %1254 = vmatprep.subr.bf16.mxu1 %v2126_v21  ;;  %v2173_v21 = vld [vmem:[%s2861_s12 + $0xf0] sm:$0xff]  }
 0x8a5   :  { %1296 = vmatpush1.bf16.msra.mxu0 %v2121_v43  ;;  %v2172_v43 = vld [vmem:[%s2861_s12 + $0x70] sm:$0xff]  }
 0x8a6   :  { %1297 = vmatprep.subr.bf16.mxu0 %v2129_v44  ;;  %v2174_v44 = vld [vmem:[%s2861_s12 + $0x30] sm:$0xff]  }
 0x8a7   :  { %1255 = vmatpush1.bf16.msra.mxu1 %v2124_v45  ;;  %v2175_v45 = vld [vmem:[%s2861_s12 + $0xb0] sm:$0xff]  }
 0x8a8   :  { %1256 = vmatprep.subr.bf16.mxu1 %v2132_v47  ;;  %v2177_v47 = vld [vmem:[%s2861_s12 + $0xf8] sm:$0xff]  }
 0x8a9   :  { %1298 = vmatpush1.bf16.msra.mxu0 %v2127_v46  ;;  %v2176_v46 = vld [vmem:[%s2861_s12 + $0x78] sm:$0xff]  }
 0x8aa   :  { %1299 = vmatprep.subr.bf16.mxu0 %v2135_v48  ;;  %v2178_v48 = vld [vmem:[%s2861_s12 + $0x38] sm:$0xff]  }
 0x8ab   :  { %1257 = vmatpush1.bf16.msra.mxu1 %v2130_v49  ;;  %v2179_v49 = vld [vmem:[%s2861_s12 + $0xb8] sm:$0xff]  }
 0x8ac   :  { %1258 = vmatprep.subr.bf16.mxu1 %v2138_v51  ;;  %v1080_v51 = vsub.s32 3, %v2452_v54 }
 0x8ad   :  { %1300 = vmatpush1.bf16.msra.mxu0 %v2133_v50  ;;  %v1064_v50 = vld [vmem:[%s2862_s11] sm:$0xf] }
 0x8ae   :  { %1301 = vmatprep.subr.bf16.mxu0 %v2141_v52  ;;  %v1069_v52 = vrot.slane %v1064_v50, %v130_v55 }
 0x8af   :  { %1259 = vmatpush1.bf16.msra.mxu1 %v2136_v53  ;;  %v1077_v53 = vrot.slane %v1064_v50, %v138_v57 }
 0x8b0   :  { %1260 = vmatprep.subr.bf16.mxu1 %v2144_v3  ;;  %v1081_v3 = vrot.slane %v1064_v50, %v1080_v51 }
 0x8b1   :  { %1302 = vmatpush1.bf16.msra.mxu0 %v2139_v56  ;;  %v1073_v56 = vrot.slane %v1064_v50, %v134_v58 }
 0x8b2   :  { %1303 = vmatprep.subr.bf16.mxu0 %v2147_v59 }
 0x8b3   :  { %1261 = vmatpush1.bf16.msra.mxu1 %v2142_v60 }
 0x8b4   :  { %1907 = vmatprep.subr.bf16.mxu1 %v2148_v19 }
 0x8b5   :  { %1304 = vmatpush1.bf16.msra.mxu0 %v2145_v61 }
 0x8b6   :  { %1929 = vmatprep.subr.bf16.mxu0 %v2149_v30 }
 0x926   :  { %v994_v28 = vpop.xlane.xlu0 %993 }
 0x927   :  { %v997_v29 = vmul.f32 0.0078125, %v994_v28  ;;  %v2157_v28 = vld [vmem:[%s2861_s12 + $0xd0] sm:$0xff]  }
 0x928   :  { %v996_v31 = vpop.xlane.xlu1 %995 }
 0x929   :  { %v2628_v32 = vsub.f32 %v2596_v62, %v997_v29  ;;  %v998_v33 = vmul.f32 0.0078125, %v996_v31  ;;  %v2158_v29 = vld [vmem:[%s2861_s12 + $0x10] sm:$0xff]  }
 0x92a   :  { %v2159_v31 = vld [vmem:[%s2861_s12 + $0x90] sm:$0xff]  }
 0x92b   :  { %v2631_v34 = vsub.f32 %v2599_v20, %v998_v33  ;;  %v1001_v35 = vmul.f32 %v2628_v32, %v2628_v32  ;;  %v2161_v33 = vld [vmem:[%s2861_s12 + $0xd8] sm:$0xff]  }
 0x92d   :  { %1003 = vadd.xlane.f32.xlu0 %v1001_v35  ;;  %v1002_v36 = vmul.f32 %v2631_v34, %v2631_v34  ;;  %v2163_v35 = vld [vmem:[%s2861_s12 + $0x98] sm:$0xff]  }
 0x931   :  { %1005 = vadd.xlane.f32.xlu0 %v1002_v36  ;;  %v2164_v36 = vld [vmem:[%s2861_s12 + $0x60] sm:$0xff]  }
 0x9ba   :  { %v1004_v63 = vpop.xlane.xlu0 %1003 }
 0x9bb   :  { %v1007_v2 = vmul.f32 0.0078125, %v1004_v63 }
 0x9bd   :  { %v1009_v5 = vadd.f32 1e-05, %v1007_v2 }
 0x9be   :  { %v1006_v6 = vpop.xlane.xlu0 %1005 }
 0x9bf   :  { %2216 = vrsqrt.f32 %v1009_v5  ;;  %v1008_v7 = vmul.f32 0.0078125, %v1006_v6 }
 0x9c1   :  { %v1010_v8 = vadd.f32 1e-05, %v1008_v7 }
 0x9c3   :  { %2218 = vrsqrt.f32 %v1010_v8 }
 0x9c9   :  { %v2217_v9 = vpop.eup %2216 }
 0x9ca   :  { %v1013_v10 = vmul.f32 %v2217_v9, %v2628_v32  ;;  %v2160_v32 = vld [vmem:[%s2861_s12 + $0x58] sm:$0xff]  }
 0x9cc   :  { %v1021_v14 = vmul.f32 %v1798_v11, %v1013_v10 }
 0x9cd   :  { %v2219_v12 = vpop.eup %2218 }
 0x9ce   :  { %v1014_v13 = vmul.f32 %v2219_v12, %v2631_v34  ;;  %v1029_v16 = vadd.f32 %v1799_v15, %v1021_v14  ;;  %v2162_v34 = vld [vmem:[%s2861_s12 + $0x18] sm:$0xff]  }
 0x9d0   :  { %v1022_v4 = vmul.f32 %v1798_v11, %v1014_v13 }
 0x9d2   :  { %v1030_v17 = vadd.f32 %v1799_v15, %v1022_v4 }
 0x9d4   :  { %v1031_v18 = vpack.c.bf16 %v1030_v17, %v1029_v16 }
 0x9d6   :  { %1279 = vmatmul.mubr.bf16.vlgmr.msra.gmra.mrb[28].mxu1 %v1031_v18  ;;  %1322 = vmatmul.mubr.bf16.vlgmr.msra.gmra.mrb[16].mxu0 %v1031_v18 }
 0x9d7   :  { %1908 = vmatpush3.bf16.msra.mxu1 %v2150_v0  ;;  %1930 = vmatpush3.bf16.msra.mxu0 %v2151_v22 }
 0x9d8   :  { %1909 = vmatprep.subr.bf16.mxu1 %v2152_v1  ;;  %1931 = vmatprep.subr.bf16.mxu0 %v2153_v24 }
 0x9db   :  { %1910 = vmatpush3.bf16.msra.mxu1 %v2154_v25  ;;  %1932 = vmatpush3.bf16.msra.mxu0 %v2155_v26 }
 0x9dc   :  { %1911 = vmatprep.subr.bf16.mxu1 %v2156_v27  ;;  %1933 = vmatprep.subr.bf16.mxu0 %v2157_v28 }
 0x9df   :  { %1912 = vmatpush3.bf16.msra.mxu1 %v2158_v29  ;;  %1934 = vmatpush3.bf16.msra.mxu0 %v2159_v31 }
 0x9e0   :  { %1913 = vmatprep.subr.bf16.mxu1 %v2160_v32  ;;  %1935 = vmatprep.subr.bf16.mxu0 %v2161_v33 }
 0x9e3   :  { %1914 = vmatpush3.bf16.msra.mxu1 %v2162_v34  ;;  %1936 = vmatpush3.bf16.msra.mxu0 %v2163_v35 }
 0x9e4   :  { %1915 = vmatprep.subr.bf16.mxu1 %v2164_v36  ;;  %1937 = vmatprep.subr.bf16.mxu0 %v2165_v37 }
 0x9e7   :  { %1916 = vmatpush3.bf16.msra.mxu1 %v2166_v23  ;;  %1938 = vmatpush3.bf16.msra.mxu0 %v2167_v38 }
 0x9e8   :  { %1917 = vmatprep.subr.bf16.mxu1 %v2168_v39  ;;  %1939 = vmatprep.subr.bf16.mxu0 %v2169_v40 }
 0x9eb   :  { %1918 = vmatpush3.bf16.msra.mxu1 %v2170_v41  ;;  %1940 = vmatpush3.bf16.msra.mxu0 %v2171_v42 }
 0x9ec   :  { %1919 = vmatprep.subr.bf16.mxu1 %v2172_v43  ;;  %1941 = vmatprep.subr.bf16.mxu0 %v2173_v21 }
 0x9ef   :  { %1920 = vmatpush3.bf16.msra.mxu1 %v2174_v44  ;;  %1942 = vmatpush3.bf16.msra.mxu0 %v2175_v45 }
 0x9f0   :  { %1921 = vmatprep.subr.bf16.mxu1 %v2176_v46  ;;  %1943 = vmatprep.subr.bf16.mxu0 %v2177_v47 }
 0x9f3   :  { %1922 = vmatpush3.bf16.msra.mxu1 %v2178_v48  ;;  %1944 = vmatpush3.bf16.msra.mxu0 %v2179_v49 }
 0xaa9   :  { %v1280_v59 = vpop.f32.mrb[28].mxu1  ;;  %v1323_v60 = vpop.f32.mrb[16].mxu0 }
 0xaaa   :  { %v2823_v61 = vadd.f32 %v1280_v59, %v1069_v52  ;;  %v2825_v63 = vadd.f32 %v1323_v60, %v1077_v53  ;;  %v1282_v2 = vpop.f32.mrb[29].mxu1  ;;  %v1325_v5 = vpop.f32.mrb[17].mxu0 }
 0xaab   :  { %v2827_v6 = vadd.f32 %v1282_v2, %v1073_v56  ;;  %v2829_v7 = vadd.f32 %v1325_v5, %v1081_v3  ;;  %v1284_v55 = vpop.f32.mrb[30].mxu1  ;;  %v1327_v8 = vpop.f32.mrb[18].mxu0 }
 0xaac   :  { %v1832_v57 = vmul.f32 -1.702, %v2823_v61  ;;  %v1834_v54 = vmul.f32 -1.702, %v2825_v63  ;;  %v1285_v58 = vadd.f32 %v1284_v55, %v1069_v52  ;;  %v1328_v9 = vadd.f32 %v1327_v8, %v1077_v53  ;;  %v1286_v10 = vpop.f32.mrb[31].mxu1  ;;  %v1329_v11 = vpop.f32.mrb[19].mxu0 }
 0xaad   :  { %v1833_v12 = vmul.f32 -1.702, %v2827_v6  ;;  %v1835_v13 = vmul.f32 -1.702, %v2829_v7  ;;  %v1287_v14 = vadd.f32 %v1286_v10, %v1073_v56  ;;  %v1330_v15 = vadd.f32 %v1329_v11, %v1081_v3 }
 0xaae   :  { %v1348_v4 = vmul.f32 1.442695, %v1832_v57  ;;  %v1352_v16 = vmul.f32 1.442695, %v1834_v54  ;;  %v1836_v17 = vmul.f32 -1.702, %v1285_v58 }
 0xaaf   :  { %v1350_v18 = vmul.f32 1.442695, %v1833_v12  ;;  %v1354_v19 = vmul.f32 1.442695, %v1835_v13  ;;  %v1838_v30 = vmul.f32 -1.702, %v1328_v9 }
 0xab0   :  { %2220 = vpow2.f32 %v1348_v4  ;;  %v1356_v0 = vmul.f32 1.442695, %v1836_v17  ;;  %v1837_v22 = vmul.f32 -1.702, %v1287_v14  ;;  %v1839_v1 = vmul.f32 -1.702, %v1330_v15 }
 0xab1   :  { %2222 = vpow2.f32 %v1352_v16  ;;  %v1360_v24 = vmul.f32 1.442695, %v1838_v30 }
 0xab2   :  { %2224 = vpow2.f32 %v1350_v18  ;;  %v1358_v25 = vmul.f32 1.442695, %v1837_v22  ;;  %v1362_v26 = vmul.f32 1.442695, %v1839_v1 }
 0xab3   :  { %2226 = vpow2.f32 %v1354_v19 }
 0xab4   :  { %2228 = vpow2.f32 %v1356_v0 }
 0xab5   :  { %2230 = vpow2.f32 %v1360_v24 }
 0xab6   :  { %2232 = vpow2.f32 %v1358_v25 }
 0xab7   :  { %2234 = vpow2.f32 %v1362_v26 }
 0xaba   :  { %v2221_v27 = vpop.eup %2220 }
 0xabb   :  { %v2223_v28 = vpop.eup %2222  ;;  %v1364_v29 = vadd.f32 1.0, %v2221_v27 }
 0xabc   :  { %v2225_v31 = vpop.eup %2224  ;;  %v1366_v32 = vadd.f32 1.0, %v2223_v28 }
 0xabd   :  { %v2227_v33 = vpop.eup %2226  ;;  %2236 = vrcp.f32 %v1364_v29  ;;  %v1365_v34 = vadd.f32 1.0, %v2225_v31 }
 0xabe   :  { %v2229_v35 = vpop.eup %2228  ;;  %2238 = vrcp.f32 %v1366_v32  ;;  %v1367_v36 = vadd.f32 1.0, %v2227_v33 }
 0xabf   :  { %v2231_v37 = vpop.eup %2230  ;;  %2240 = vrcp.f32 %v1365_v34  ;;  %v1368_v23 = vadd.f32 1.0, %v2229_v35 }
 0xac0   :  { %v2233_v38 = vpop.eup %2232  ;;  %2242 = vrcp.f32 %v1367_v36  ;;  %v1370_v39 = vadd.f32 1.0, %v2231_v37 }
 0xac1   :  { %v2235_v40 = vpop.eup %2234  ;;  %2244 = vrcp.f32 %v1368_v23  ;;  %v1369_v41 = vadd.f32 1.0, %v2233_v38 }
 0xac2   :  { %2246 = vrcp.f32 %v1370_v39  ;;  %v1371_v42 = vadd.f32 1.0, %v2235_v40 }
 0xac3   :  { %2248 = vrcp.f32 %v1369_v41 }
 0xac4   :  { %2250 = vrcp.f32 %v1371_v42 }
 0xac7   :  { %v2237_v43 = vpop.eup %2236 }
 0xac8   :  { %v2239_v21 = vpop.eup %2238  ;;  %v1388_v48 = vmul.f32 %v2237_v43, %v2823_v61 }
 0xac9   :  { %v2241_v44 = vpop.eup %2240  ;;  %v1390_v51 = vmul.f32 %v2239_v21, %v2825_v63 }
 0xaca   :  { %v2243_v45 = vpop.eup %2242  ;;  %v1389_v56 = vmul.f32 %v2241_v44, %v2827_v6 }
 0xacb   :  { %v2245_v46 = vpop.eup %2244  ;;  %v1391_v60 = vmul.f32 %v2243_v45, %v2829_v7 }
 0xacc   :  { %v2247_v47 = vpop.eup %2246  ;;  %v1392_v49 = vmul.f32 %v2245_v46, %v1285_v58 }
 0xacd   :  { %v2249_v50 = vpop.eup %2248  ;;  %v1394_v52 = vmul.f32 %v2247_v47, %v1328_v9 }
 0xace   :  { %v2251_v53 = vpop.eup %2250  ;;  %v1396_v3 = vpack.c.bf16 %v1392_v49, %v1388_v48  ;;  %v1393_v59 = vmul.f32 %v2249_v50, %v1287_v14 }
 0xacf   :  { %v1398_v2 = vpack.c.bf16 %v1394_v52, %v1390_v51  ;;  %v1395_v5 = vmul.f32 %v2251_v53, %v1330_v15  ;;  %v1872_v15 = vld [vmem:[%s2863_s13] ss:$0 sm:$0xff] }
 0xad0   :  { %v1397_v55 = vpack.c.bf16 %v1393_v59, %v1389_v56 }
 0xad1   :  { %v1399_v8 = vpack.c.bf16 %v1395_v5, %v1391_v60 }
 0xad2   :  { %1688 = vmatprep.mubr.bf16.mxu1 %v1397_v55 }
 0xad3   :  { %1729 = vmatprep.mubr.bf16.mxu0 %v1399_v8  ;;  %1689 = vmatmul.mubr.bf16.vlgmr.msra.gmra.mrb[32].mxu1 %v1396_v3 }
 0xad4   :  { %1730 = vmatmul.mubr.bf16.vlgmr.msra.gmra.mrb[20].mxu0 %v1398_v2 }
 0xba6   :  { %v1923_v61 = vpop.f32.mrb[32].mxu1 }
 0xba7   :  { %v1945_v57 = vpop.f32.mrb[20].mxu0  ;;  %v1924_v54 = vpop.f32.mrb[33].mxu1 }
 0xba8   :  { %v1925_v63 = vadd.f32 %v1924_v54, %v1923_v61  ;;  %v1946_v58 = vpop.f32.mrb[21].mxu0  ;;  %v1926_v9 = vpop.f32.mrb[34].mxu1 }
 0xba9   :  { %v1947_v10 = vadd.f32 %v1946_v58, %v1945_v57  ;;  %v1948_v6 = vpop.f32.mrb[22].mxu0  ;;  %v1927_v11 = vpop.f32.mrb[35].mxu1 }
 0xbaa   :  { %v1928_v12 = vadd.f32 %v1927_v11, %v1926_v9  ;;  %v1949_v13 = vpop.f32.mrb[23].mxu0 }
 0xbab   :  { %v1732_v7 = vadd.f32 %v1947_v10, %v1925_v63  ;;  %v1950_v14 = vadd.f32 %v1949_v13, %v1948_v6 }
 0xbad   :  { %v1738_v4 = vadd.f32 %v1732_v7, %v2596_v62  ;;  %v1735_v16 = vadd.f32 %v1950_v14, %v1928_v12 }
 0xbaf   :  { %v1747_v17 = vadd.f32 %v1872_v15, %v1738_v4  ;;  %v1739_v18 = vadd.f32 %v1735_v16, %v2599_v20 }
 0xbb1   :  { %1749 = vst [vmem:[%s2864_s14] sm:$0xff] %v1747_v17  ;;  %v1748_v19 = vadd.f32 %v1872_v15, %v1739_v18 }
 0xbb3   :  { %1750 = vst [vmem:[%s2864_s14 + $0x8] sm:$0xff] %v1748_v19 }

</bundles_post_ra>
